<compile_context>
chip_gen: v6e
topology: v6e:2x2x1
jax: 0.10.0
libtpu: 0.0.40
codegen_flags: <defaults>
</compile_context>

<pallas_src>
import jax
import jax.numpy as jnp
from jax.experimental import pallas as pl
from jax.experimental.pallas import tpu as pltpu

BN_EPS = 1e-5


def _conv_tile(halo_ref, w_ref):
    """3x3 conv on one halo tile (in-kernel im2col): 9 accumulated MXU matmuls.

    halo_ref: (1, TR+2, Wo+2, Cin) bf16 VMEM tile (one output-row tile + halo)
    w_ref:    (9, Cin, Cout) bf16
    returns:  (TR*Wo, Cout) f32 conv output for this tile (no bias).
    """
    trp2, wop2, cin = halo_ref.shape[1], halo_ref.shape[2], halo_ref.shape[3]
    tr, wo = trp2 - 2, wop2 - 2
    cout = w_ref.shape[2]
    acc = jnp.zeros((tr * wo, cout), jnp.float32)
    for kh in range(3):
        for kw in range(3):
            a = halo_ref[0, kh:kh + tr, kw:kw + wo, :].reshape(tr * wo, cin)
            acc = acc + jnp.dot(a, w_ref[3 * kh + kw],
                                preferred_element_type=jnp.float32)
    return acc


def stats_kernel(halo_ref, w_ref, stats_ref):
    """Pass 1: per-tile per-channel sum (row 0) and sum-of-squares (row 1)."""
    acc = _conv_tile(halo_ref, w_ref)                       # (TM, Cout) f32
    s = jnp.sum(acc, axis=0, keepdims=True)                 # (1, Cout)
    ss = jnp.sum(acc * acc, axis=0, keepdims=True)          # (1, Cout)
    rows = jax.lax.broadcasted_iota(jnp.int32, stats_ref.shape, 0)
    stats_ref[...] = jnp.where(rows == 0, s, jnp.where(rows == 1, ss, 0.0))


def apply_kernel(halo_ref, w_ref, scale_ref, shift_ref, o_ref):
    """Pass 2: recompute conv tile, fused BN scale/shift, ReLU."""
    acc = _conv_tile(halo_ref, w_ref)                       # (TM, Cout) f32
    y = acc * scale_ref[...] + shift_ref[...]               # (1, Cout) broadcast
    o_ref[...] = jnp.maximum(y, 0.0).astype(o_ref.dtype)


def upconv_forward(x_nchw, w_oihw, bias, gamma, beta):
    """UpConv forward: Upsample(x2 nearest) -> Conv2d(3x3, pad=1) -> BN -> ReLU.

    NOTE: `bias` is accepted for interface parity but not used in compute — a
    per-channel conv bias is cancelled exactly by the train-mode BatchNorm mean
    subtraction, so dropping it removes a full (M, Cout) VPU pass.
    """
    del bias
    N, Cin, H, W = x_nchw.shape
    Cout = w_oihw.shape[0]
    Ho, Wo = 2 * H, 2 * W
    M = N * Ho * Wo

    # ---- choose output-row tile size (target ~512 output rows per grid step) ----
    tr_target = max(1, 512 // Wo)
    TR = 1
    for cand in range(min(tr_target, Ho), 0, -1):
        if Ho % cand == 0:
            TR = cand
            break
    num_rt = Ho // TR
    NT = N * num_rt                 # number of grid tiles
    TM = TR * Wo                    # output rows of the 2-D slab per tile
    assert TM % 8 == 0, "tile rows must be sublane-aligned (Wo*TR % 8 == 0)"

    # ---- glue (plain JAX): NHWC, nearest x2, zero-pad, halo row-tiles, bf16 ----
    xh = jnp.transpose(x_nchw, (0, 2, 3, 1)).astype(jnp.bfloat16)      # NHWC
    xu = jnp.repeat(jnp.repeat(xh, 2, axis=1), 2, axis=2)              # nearest x2
    xp = jnp.pad(xu, ((0, 0), (1, 1), (1, 1), (0, 0)))                 # padding=1
    # Row tiles with a 2-row halo (~(TR+2)/TR duplication, vs 9x for full im2col).
    halo = jnp.stack([xp[:, t * TR: t * TR + TR + 2] for t in range(num_rt)],
                     axis=1)                                           # (N,num_rt,TR+2,Wo+2,Cin)
    halo = halo.reshape(NT, TR + 2, Wo + 2, Cin)

    w = jnp.transpose(w_oihw, (2, 3, 1, 0)).reshape(9, Cin, Cout)      # (kh*3+kw, Cin, Cout)
    w = w.astype(jnp.bfloat16)

    halo_spec = pl.BlockSpec((1, TR + 2, Wo + 2, Cin), lambda i: (i, 0, 0, 0))
    w_spec = pl.BlockSpec((9, Cin, Cout), lambda i: (0, 0, 0))

    # ---- pass 1: per-tile partial sums / sums-of-squares (fully parallel) ----
    stats = pl.pallas_call(
        stats_kernel,
        out_shape=jax.ShapeDtypeStruct((NT * 8, Cout), jnp.float32),
        grid=(NT,),
        in_specs=[halo_spec, w_spec],
        out_specs=pl.BlockSpec((8, Cout), lambda i: (i, 0)),
        compiler_params=pltpu.CompilerParams(
            dimension_semantics=("parallel",)),
    )(halo, w)
    stats = stats.reshape(NT, 8, Cout)

    # Tiny (Cout,) reductions + BN folding in plain JAX.
    mean = jnp.sum(stats[:, 0, :], axis=0) / M
    var = jnp.maximum(jnp.sum(stats[:, 1, :], axis=0) / M - mean * mean, 0.0)
    scale = gamma.astype(jnp.float32) * jax.lax.rsqrt(var + BN_EPS)
    shift = beta.astype(jnp.float32) - mean * scale
    scale2 = scale.reshape(1, Cout)
    shift2 = shift.reshape(1, Cout)

    # ---- pass 2: conv (recomputed) + fused scale/shift + ReLU (fully parallel) ----
    out2d = pl.pallas_call(
        apply_kernel,
        out_shape=jax.ShapeDtypeStruct((M, Cout), jnp.float32),
        grid=(NT,),
        in_specs=[halo_spec, w_spec,
                  pl.BlockSpec((1, Cout), lambda i: (0, 0)),
                  pl.BlockSpec((1, Cout), lambda i: (0, 0))],
        out_specs=pl.BlockSpec((TM, Cout), lambda i: (i, 0)),
        compiler_params=pltpu.CompilerParams(
            dimension_semantics=("parallel",)),
    )(halo, w, scale2, shift2)

    # [M, Cout] -> NHWC -> NCHW (PyTorch output convention)
    return out2d.reshape(N, Ho, Wo, Cout).transpose(0, 3, 1, 2)


def upconv_reference(x_nchw, w_oihw, bias, gamma, beta):
    """Pure-JAX f32 reference mirroring the PyTorch module (train-mode BN)."""
    xu = jnp.repeat(jnp.repeat(x_nchw, 2, axis=2), 2, axis=3)
    y = jax.lax.conv_general_dilated(
        xu, w_oihw, window_strides=(1, 1), padding=((1, 1), (1, 1)),
        dimension_numbers=("NCHW", "OIHW", "NCHW"))
    y = y + bias.reshape(1, -1, 1, 1)
    mean = jnp.mean(y, axis=(0, 2, 3), keepdims=True)
    var = jnp.mean((y - mean) ** 2, axis=(0, 2, 3), keepdims=True)
    y = (y - mean) * jax.lax.rsqrt(var + BN_EPS)
    y = y * gamma.reshape(1, -1, 1, 1) + beta.reshape(1, -1, 1, 1)
    return jnp.maximum(y, 0.0)


if __name__ == "__main__":
    key = jax.random.PRNGKey(0)
    k_x, k_w, k_b = jax.random.split(key, 3)

    N, Cin, H, W = 2, 4, 16, 16
    Cout = 8

    x = jax.random.normal(k_x, (N, Cin, H, W), jnp.float32)

    # Deterministic parameter init (shapes from UpConv.__init__):
    #   Conv2d(Cin, Cout, 3, padding=1, bias=True) + BatchNorm2d(Cout) defaults.
    fan_in = Cin * 3 * 3
    conv_w = jax.random.normal(k_w, (Cout, Cin, 3, 3), jnp.float32) / jnp.sqrt(fan_in)
    conv_b = jax.random.normal(k_b, (Cout,), jnp.float32) * 0.05
    bn_gamma = jnp.ones((Cout,), jnp.float32)   # BatchNorm2d.weight default
    bn_beta = jnp.zeros((Cout,), jnp.float32)   # BatchNorm2d.bias default

    out = upconv_forward(x, conv_w, conv_b, bn_gamma, bn_beta)
    out = jax.block_until_ready(out)

    ref = upconv_reference(x, conv_w, conv_b, bn_gamma, bn_beta)
    assert out.shape == (N, Cout, 2 * H, 2 * W), out.shape
    # Kernel streams activations/weights as bf16 (f32 accumulation / BN math),
    # so compare to the f32 reference with a bf16-appropriate tolerance.
    err = float(jnp.max(jnp.abs(out - ref)))
    assert jnp.allclose(out, ref, rtol=2e-2, atol=2e-2), err

    print("KERNEL_OK")
</pallas_src>

<mosaic_0001>
module attributes {stable_mosaic.version = 11 : i64} {
  func.func @stats_kernel(%arg0: i32, %arg1: memref<1x18x34x4xbf16, #tpu.memory_space<vmem>>, %arg2: memref<9x4x8xbf16, #tpu.memory_space<vmem>>, %arg3: memref<8x8xf32, #tpu.memory_space<vmem>>) attributes {dimension_semantics = [#tpu.dimension_semantics<parallel>], iteration_bounds = array<i64: 4>, scalar_prefetch = 0 : i64, scratch_operands = 0 : i64, tpu.core_type = #tpu.core_type<tc>, window_params = [{transform_indices = @transform_0, window_bounds = array<i64: 1, 18, 34, 4>}, {pipeline_mode = #tpu.pipeline_mode<synchronous>, transform_indices = @transform_1, window_bounds = array<i64: 9, 4, 8>}, {transform_indices = @transform_2, window_bounds = array<i64: 8, 8>}]} {
    %cst = arith.constant 0.000000e+00 : f32
    %0 = vector.broadcast %cst : f32 to vector<512x8xf32>
    %c0 = arith.constant 0 : index
    %c0_0 = arith.constant 0 : index
    %c0_1 = arith.constant 0 : index
    %c0_2 = arith.constant 0 : index
    %1 = vector.load %arg1[%c0, %c0_0, %c0_1, %c0_2] : memref<1x18x34x4xbf16, #tpu.memory_space<vmem>>, vector<1x16x32x4xbf16>
    %2 = vector.shape_cast %1 : vector<1x16x32x4xbf16> to vector<16x32x4xbf16>
    %3 = vector.shape_cast %2 : vector<16x32x4xbf16> to vector<512x4xbf16>
    %c0_3 = arith.constant 0 : index
    %c0_4 = arith.constant 0 : index
    %c0_5 = arith.constant 0 : index
    %4 = vector.load %arg2[%c0_3, %c0_4, %c0_5] : memref<9x4x8xbf16, #tpu.memory_space<vmem>>, vector<1x4x8xbf16>
    %5 = vector.shape_cast %4 : vector<1x4x8xbf16> to vector<4x8xbf16>
    %cst_6 = arith.constant dense<0.000000e+00> : vector<512x8xf32>
    %6 = tpu.matmul %3, %5, %cst_6 {dimension_numbers = #tpu.dot_dimension_numbers<[1], [0], [0], [1], [0, 0, 1, 1], [], []>} : vector<512x4xbf16>, vector<4x8xbf16>, vector<512x8xf32> -> vector<512x8xf32>
    %7 = arith.addf %0, %6 : vector<512x8xf32>
    %c0_7 = arith.constant 0 : index
    %c0_8 = arith.constant 0 : index
    %c1 = arith.constant 1 : index
    %c0_9 = arith.constant 0 : index
    %8 = vector.load %arg1[%c0_7, %c0_8, %c1, %c0_9] : memref<1x18x34x4xbf16, #tpu.memory_space<vmem>>, vector<1x16x32x4xbf16>
    %9 = vector.shape_cast %8 : vector<1x16x32x4xbf16> to vector<16x32x4xbf16>
    %10 = vector.shape_cast %9 : vector<16x32x4xbf16> to vector<512x4xbf16>
    %c1_10 = arith.constant 1 : index
    %c0_11 = arith.constant 0 : index
    %c0_12 = arith.constant 0 : index
    %11 = vector.load %arg2[%c1_10, %c0_11, %c0_12] : memref<9x4x8xbf16, #tpu.memory_space<vmem>>, vector<1x4x8xbf16>
    %12 = vector.shape_cast %11 : vector<1x4x8xbf16> to vector<4x8xbf16>
    %cst_13 = arith.constant dense<0.000000e+00> : vector<512x8xf32>
    %13 = tpu.matmul %10, %12, %cst_13 {dimension_numbers = #tpu.dot_dimension_numbers<[1], [0], [0], [1], [0, 0, 1, 1], [], []>} : vector<512x4xbf16>, vector<4x8xbf16>, vector<512x8xf32> -> vector<512x8xf32>
    %14 = arith.addf %7, %13 : vector<512x8xf32>
    %c0_14 = arith.constant 0 : index
    %c0_15 = arith.constant 0 : index
    %c2 = arith.constant 2 : index
    %c0_16 = arith.constant 0 : index
    %15 = vector.load %arg1[%c0_14, %c0_15, %c2, %c0_16] : memref<1x18x34x4xbf16, #tpu.memory_space<vmem>>, vector<1x16x32x4xbf16>
    %16 = vector.shape_cast %15 : vector<1x16x32x4xbf16> to vector<16x32x4xbf16>
    %17 = vector.shape_cast %16 : vector<16x32x4xbf16> to vector<512x4xbf16>
    %c2_17 = arith.constant 2 : index
    %c0_18 = arith.constant 0 : index
    %c0_19 = arith.constant 0 : index
    %18 = vector.load %arg2[%c2_17, %c0_18, %c0_19] : memref<9x4x8xbf16, #tpu.memory_space<vmem>>, vector<1x4x8xbf16>
    %19 = vector.shape_cast %18 : vector<1x4x8xbf16> to vector<4x8xbf16>
    %cst_20 = arith.constant dense<0.000000e+00> : vector<512x8xf32>
    %20 = tpu.matmul %17, %19, %cst_20 {dimension_numbers = #tpu.dot_dimension_numbers<[1], [0], [0], [1], [0, 0, 1, 1], [], []>} : vector<512x4xbf16>, vector<4x8xbf16>, vector<512x8xf32> -> vector<512x8xf32>
    %21 = arith.addf %14, %20 : vector<512x8xf32>
    %c0_21 = arith.constant 0 : index
    %c1_22 = arith.constant 1 : index
    %c0_23 = arith.constant 0 : index
    %c0_24 = arith.constant 0 : index
    %22 = vector.load %arg1[%c0_21, %c1_22, %c0_23, %c0_24] : memref<1x18x34x4xbf16, #tpu.memory_space<vmem>>, vector<1x16x32x4xbf16>
    %23 = vector.shape_cast %22 : vector<1x16x32x4xbf16> to vector<16x32x4xbf16>
    %24 = vector.shape_cast %23 : vector<16x32x4xbf16> to vector<512x4xbf16>
    %c3 = arith.constant 3 : index
    %c0_25 = arith.constant 0 : index
    %c0_26 = arith.constant 0 : index
    %25 = vector.load %arg2[%c3, %c0_25, %c0_26] : memref<9x4x8xbf16, #tpu.memory_space<vmem>>, vector<1x4x8xbf16>
    %26 = vector.shape_cast %25 : vector<1x4x8xbf16> to vector<4x8xbf16>
    %cst_27 = arith.constant dense<0.000000e+00> : vector<512x8xf32>
    %27 = tpu.matmul %24, %26, %cst_27 {dimension_numbers = #tpu.dot_dimension_numbers<[1], [0], [0], [1], [0, 0, 1, 1], [], []>} : vector<512x4xbf16>, vector<4x8xbf16>, vector<512x8xf32> -> vector<512x8xf32>
    %28 = arith.addf %21, %27 : vector<512x8xf32>
    %c0_28 = arith.constant 0 : index
    %c1_29 = arith.constant 1 : index
    %c1_30 = arith.constant 1 : index
    %c0_31 = arith.constant 0 : index
    %29 = vector.load %arg1[%c0_28, %c1_29, %c1_30, %c0_31] : memref<1x18x34x4xbf16, #tpu.memory_space<vmem>>, vector<1x16x32x4xbf16>
    %30 = vector.shape_cast %29 : vector<1x16x32x4xbf16> to vector<16x32x4xbf16>
    %31 = vector.shape_cast %30 : vector<16x32x4xbf16> to vector<512x4xbf16>
    %c4 = arith.constant 4 : index
    %c0_32 = arith.constant 0 : index
    %c0_33 = arith.constant 0 : index
    %32 = vector.load %arg2[%c4, %c0_32, %c0_33] : memref<9x4x8xbf16, #tpu.memory_space<vmem>>, vector<1x4x8xbf16>
    %33 = vector.shape_cast %32 : vector<1x4x8xbf16> to vector<4x8xbf16>
    %cst_34 = arith.constant dense<0.000000e+00> : vector<512x8xf32>
    %34 = tpu.matmul %31, %33, %cst_34 {dimension_numbers = #tpu.dot_dimension_numbers<[1], [0], [0], [1], [0, 0, 1, 1], [], []>} : vector<512x4xbf16>, vector<4x8xbf16>, vector<512x8xf32> -> vector<512x8xf32>
    %35 = arith.addf %28, %34 : vector<512x8xf32>
    %c0_35 = arith.constant 0 : index
    %c1_36 = arith.constant 1 : index
    %c2_37 = arith.constant 2 : index
    %c0_38 = arith.constant 0 : index
    %36 = vector.load %arg1[%c0_35, %c1_36, %c2_37, %c0_38] : memref<1x18x34x4xbf16, #tpu.memory_space<vmem>>, vector<1x16x32x4xbf16>
    %37 = vector.shape_cast %36 : vector<1x16x32x4xbf16> to vector<16x32x4xbf16>
    %38 = vector.shape_cast %37 : vector<16x32x4xbf16> to vector<512x4xbf16>
    %c5 = arith.constant 5 : index
    %c0_39 = arith.constant 0 : index
    %c0_40 = arith.constant 0 : index
    %39 = vector.load %arg2[%c5, %c0_39, %c0_40] : memref<9x4x8xbf16, #tpu.memory_space<vmem>>, vector<1x4x8xbf16>
    %40 = vector.shape_cast %39 : vector<1x4x8xbf16> to vector<4x8xbf16>
    %cst_41 = arith.constant dense<0.000000e+00> : vector<512x8xf32>
    %41 = tpu.matmul %38, %40, %cst_41 {dimension_numbers = #tpu.dot_dimension_numbers<[1], [0], [0], [1], [0, 0, 1, 1], [], []>} : vector<512x4xbf16>, vector<4x8xbf16>, vector<512x8xf32> -> vector<512x8xf32>
    %42 = arith.addf %35, %41 : vector<512x8xf32>
    %c0_42 = arith.constant 0 : index
    %c2_43 = arith.constant 2 : index
    %c0_44 = arith.constant 0 : index
    %c0_45 = arith.constant 0 : index
    %43 = vector.load %arg1[%c0_42, %c2_43, %c0_44, %c0_45] : memref<1x18x34x4xbf16, #tpu.memory_space<vmem>>, vector<1x16x32x4xbf16>
    %44 = vector.shape_cast %43 : vector<1x16x32x4xbf16> to vector<16x32x4xbf16>
    %45 = vector.shape_cast %44 : vector<16x32x4xbf16> to vector<512x4xbf16>
    %c6 = arith.constant 6 : index
    %c0_46 = arith.constant 0 : index
    %c0_47 = arith.constant 0 : index
    %46 = vector.load %arg2[%c6, %c0_46, %c0_47] : memref<9x4x8xbf16, #tpu.memory_space<vmem>>, vector<1x4x8xbf16>
    %47 = vector.shape_cast %46 : vector<1x4x8xbf16> to vector<4x8xbf16>
    %cst_48 = arith.constant dense<0.000000e+00> : vector<512x8xf32>
    %48 = tpu.matmul %45, %47, %cst_48 {dimension_numbers = #tpu.dot_dimension_numbers<[1], [0], [0], [1], [0, 0, 1, 1], [], []>} : vector<512x4xbf16>, vector<4x8xbf16>, vector<512x8xf32> -> vector<512x8xf32>
    %49 = arith.addf %42, %48 : vector<512x8xf32>
    %c0_49 = arith.constant 0 : index
    %c2_50 = arith.constant 2 : index
    %c1_51 = arith.constant 1 : index
    %c0_52 = arith.constant 0 : index
    %50 = vector.load %arg1[%c0_49, %c2_50, %c1_51, %c0_52] : memref<1x18x34x4xbf16, #tpu.memory_space<vmem>>, vector<1x16x32x4xbf16>
    %51 = vector.shape_cast %50 : vector<1x16x32x4xbf16> to vector<16x32x4xbf16>
    %52 = vector.shape_cast %51 : vector<16x32x4xbf16> to vector<512x4xbf16>
    %c7 = arith.constant 7 : index
    %c0_53 = arith.constant 0 : index
    %c0_54 = arith.constant 0 : index
    %53 = vector.load %arg2[%c7, %c0_53, %c0_54] : memref<9x4x8xbf16, #tpu.memory_space<vmem>>, vector<1x4x8xbf16>
    %54 = vector.shape_cast %53 : vector<1x4x8xbf16> to vector<4x8xbf16>
    %cst_55 = arith.constant dense<0.000000e+00> : vector<512x8xf32>
    %55 = tpu.matmul %52, %54, %cst_55 {dimension_numbers = #tpu.dot_dimension_numbers<[1], [0], [0], [1], [0, 0, 1, 1], [], []>} : vector<512x4xbf16>, vector<4x8xbf16>, vector<512x8xf32> -> vector<512x8xf32>
    %56 = arith.addf %49, %55 : vector<512x8xf32>
    %c0_56 = arith.constant 0 : index
    %c2_57 = arith.constant 2 : index
    %c2_58 = arith.constant 2 : index
    %c0_59 = arith.constant 0 : index
    %57 = vector.load %arg1[%c0_56, %c2_57, %c2_58, %c0_59] : memref<1x18x34x4xbf16, #tpu.memory_space<vmem>>, vector<1x16x32x4xbf16>
    %58 = vector.shape_cast %57 : vector<1x16x32x4xbf16> to vector<16x32x4xbf16>
    %59 = vector.shape_cast %58 : vector<16x32x4xbf16> to vector<512x4xbf16>
    %c8 = arith.constant 8 : index
    %c0_60 = arith.constant 0 : index
    %c0_61 = arith.constant 0 : index
    %60 = vector.load %arg2[%c8, %c0_60, %c0_61] : memref<9x4x8xbf16, #tpu.memory_space<vmem>>, vector<1x4x8xbf16>
    %61 = vector.shape_cast %60 : vector<1x4x8xbf16> to vector<4x8xbf16>
    %cst_62 = arith.constant dense<0.000000e+00> : vector<512x8xf32>
    %62 = tpu.matmul %59, %61, %cst_62 {dimension_numbers = #tpu.dot_dimension_numbers<[1], [0], [0], [1], [0, 0, 1, 1], [], []>} : vector<512x4xbf16>, vector<4x8xbf16>, vector<512x8xf32> -> vector<512x8xf32>
    %63 = arith.addf %56, %62 : vector<512x8xf32>
    %cst_63 = arith.constant dense<0.000000e+00> : vector<8xf32>
    %64 = vector.multi_reduction <add>, %63, %cst_63 [0] : vector<512x8xf32> to vector<8xf32>
    %65 = vector.shape_cast %64 : vector<8xf32> to vector<1x8xf32>
    %66 = arith.mulf %63, %63 : vector<512x8xf32>
    %cst_64 = arith.constant dense<0.000000e+00> : vector<8xf32>
    %67 = vector.multi_reduction <add>, %66, %cst_64 [0] : vector<512x8xf32> to vector<8xf32>
    %68 = vector.shape_cast %67 : vector<8xf32> to vector<1x8xf32>
    %69 = tpu.iota {dimensions = array<i32: 0>} : vector<8x8xi32>
    %c0_i32 = arith.constant 0 : i32
    %70 = vector.broadcast %c0_i32 : i32 to vector<8x8xi32>
    %71 = arith.cmpi eq, %69, %70 : vector<8x8xi32>
    %c1_i32 = arith.constant 1 : i32
    %72 = vector.broadcast %c1_i32 : i32 to vector<8x8xi32>
    %73 = arith.cmpi eq, %69, %72 : vector<8x8xi32>
    %cst_65 = arith.constant 0.000000e+00 : f32
    %74 = vector.shape_cast %68 : vector<1x8xf32> to vector<1x8xf32>
    %75 = vector.broadcast %74 : vector<1x8xf32> to vector<8x8xf32>
    %76 = vector.broadcast %cst_65 : f32 to vector<8x8xf32>
    %77 = arith.select %73, %75, %76 : vector<8x8xi1>, vector<8x8xf32>
    %78 = vector.shape_cast %65 : vector<1x8xf32> to vector<1x8xf32>
    %79 = vector.broadcast %78 : vector<1x8xf32> to vector<8x8xf32>
    %80 = arith.select %71, %79, %77 : vector<8x8xi1>, vector<8x8xf32>
    %c0_66 = arith.constant 0 : index
    %c0_67 = arith.constant 0 : index
    %81 = vector.load %arg3[%c0_66, %c0_67] : memref<8x8xf32, #tpu.memory_space<vmem>>, vector<8x8xf32>
    tpu.vector_store %arg3[%c0_66, %c0_67], %80 {strides = array<i32>} : memref<8x8xf32, #tpu.memory_space<vmem>>, vector<8x8xf32>,
    return
  }
  func.func @transform_0(%arg0: i32) -> (i32, i32, i32, i32) {
    %c0_i32 = arith.constant 0 : i32
    %c0_i32_0 = arith.constant 0 : i32
    %c0_i32_1 = arith.constant 0 : i32
    %c0_i32_2 = arith.constant 0 : i32
    return %arg0, %c0_i32, %c0_i32_0, %c0_i32_1 : i32, i32, i32, i32
  }
  func.func @transform_1(%arg0: i32) -> (i32, i32, i32) {
    %c0_i32 = arith.constant 0 : i32
    %c0_i32_0 = arith.constant 0 : i32
    %c0_i32_1 = arith.constant 0 : i32
    %c0_i32_2 = arith.constant 0 : i32
    return %c0_i32, %c0_i32_0, %c0_i32_1 : i32, i32, i32
  }
  func.func @transform_2(%arg0: i32) -> (i32, i32) {
    %c0_i32 = arith.constant 0 : i32
    %c0_i32_0 = arith.constant 0 : i32
    return %arg0, %c0_i32 : i32, i32
  }
}

</mosaic_0001>

<bundles_post_ra>
// kernel: tpu_custom_call.1
= control target key start
LH: loop header
LB: loop body
LE: loop exit
PB: predicated region body
PF: predicated region fallthrough
CT: control target
= control target key end

     0   :  { %s10991_s9 = smov 0   ;;  %s15569_s0 = inlined_call_operand.vmem [shape: bf16[4,18,34,4], index: 0, kind: input, shape index: {}]   ;;  %s15570_s1 = inlined_call_operand.vmem [shape: bf16[9,4,8], index: 1, kind: input, shape index: {}]   ;;  %s15571_s2 = inlined_call_operand.vmem [shape: f32[32,8], index: 2, kind: output, shape index: {}]  }
   0x1 LB: > { %s8901_s10 = sadd.s32 4294967295, %s10974_s9   ;;  %p8905_p0 = scmp.ge.s32.totalorder %s10974_s9, 1  ;;  %s10974_s9 = sphi %s10991_s9, %s12_s9  }
   0x2   : > { %p112_p1 = scmp.lt.s32.totalorder %s10974_s9, 5 }
   0x4   : > { %p113_p2 = pnand %p8905_p0, %p112_p1 }
   0x6   : > { %116 = sbr.rel (%p113_p2) target bundleno = 903 (0x387), region = 28 }
   0xb   : > { %v8908_v0 = vld [vmem:[%s15570_s1 + $0x2] sm:$0x3]  ;;  %vm1126_vm0 = vcmask 1041408   ;;  %p133_p3 = scmp.lt.s32.totalorder %s8901_s10, 3  ;;  %v207_v2 = vld [vmem:[%s15570_s1] sm:$0x3] }
   0xc   : > { %10756 = vmatprep.subr.msk.bf16.mxu1 %vm1126_vm0, %v8908_v0  ;;  %10755 = vmatprep.subr.msk.bf16.mxu0 %vm1126_vm0, %v8908_v0  ;;  %v1128_v1 = vsel %vm1126_vm0, %v8908_v0, 0  ;;  %v9053_v3 = vld [vmem:[%s15570_s1 + $0x4] sm:$0x3]  ;;  %vm224_vm1 = vsmask.f32 3328  ;;  %v11022_v4 = vsel %vm1126_vm0, %v207_v2, 0 }
   0xd   : > { %10754 = vmatpush3.bf16.msra.mxu1 %v1128_v1  ;;  %10160 = vmatpush3.bf16.msra.mxu0 %v1128_v1  ;;  %s16372_s10 = smov (!%p133_p3, %s8901_s10), 3  ;;  %vm225_vm2 = vsmask.f32 7440  ;;  %vm1029_vm3 = vcmask 31744   ;;  %v15662_v30 = vmov 0  ;;  %v2421_v56 = vsel %vm1126_vm0, %v9053_v3, 0 }
   0xe   : > { %10757 = vmatprep.subr.msk.bf16.mxu1 %vm1126_vm0, %v207_v2  ;;  %10758 = vmatprep.subr.msk.bf16.mxu0 %vm1126_vm0, %v9053_v3  ;;  %s10765_s17 = smul.u32 360, %s16372_s10  ;;  %vm11033_vm4 = vmor %vm224_vm1, %vm225_vm2  ;;  %vm2015_vm5 = vcmask 1042432   ;;  %vm2016_vm6 = vcmask 1046532   ;;  %vm8510_vm8 = vcmask 64512   ;;  %s8907_s5 = sshll.u32 %s16372_s10, 3 }
   0xf   : > { %v15663_v30 = vsel %vm11033_vm4, 4294967295, %v15662_v30  ;;  %vm11383_vm7 = vmor %vm2015_vm5, %vm2016_vm6  ;;  %s141_s8 = scalar_lea.vmem %s15571_s2, %s8907_s5 }
  0x10   : > { %s11019_s20 = scalar_lea.vmem %s15569_s0, %s10765_s17  ;;  %15664 = vst [vmem:[#allocation2_spill] sm:$0xff] %v15663_v30 }
  0x11   : > { %v143_v5 = vld [vmem:[%s11019_s20] sm:$0xf]  ;;  %v144_v6 = vld [vmem:[%s11019_s20 + $0x4] sm:$0xf]  ;;  %v145_v7 = vld [vmem:[%s11019_s20 + $0x8] sm:$0xf] }
  0x12   : > { %v228_v8 = vshrl.u32 %v143_v5, 16  ;;  %v231_v9 = vshll.u32 %v143_v5, 16  ;;  %v237_v10 = vshll.u32 %v144_v6, 16  ;;  %v241_v11 = vshrl.u32 %v144_v6, 16  ;;  %v175_v14 = vld [vmem:[%s11019_s20 + $0xa0] sm:$0xf] }
  0x13   : > { %v247_v12 = vshll.u32 %v145_v7, 16  ;;  %v251_v13 = vshrl.u32 %v145_v7, 16  ;;  %v176_v15 = vld [vmem:[%s11019_s20 + $0xa4] sm:$0xf]  ;;  %v177_v20 = vld [vmem:[%s11019_s20 + $0xa8] sm:$0xf] }
  0x14   : > { %v230_v16 = vrot.slane %v228_v8, 4  ;;  %v233_v17 = vrot.slane %v231_v9, 5  ;;  %v239_v18 = vrot.slane %v237_v10, 5  ;;  %v243_v19 = vrot.slane %v241_v11, 4  ;;  %v146_v29 = vld [vmem:[%s11019_s20 + $0xc] sm:$0xf] }
  0x15   : > { %v249_v21 = vrot.slane %v247_v12, 5  ;;  %v253_v22 = vrot.slane %v251_v13, 4  ;;  %v580_v23 = vshrl.u32 %v175_v14, 16  ;;  %v583_v24 = vshll.u32 %v175_v14, 16  ;;  %v208_v43 = vld [vmem:[%s11019_s20 + $0x10] sm:$0x1] }
  0x16   : > { %v234_v25 = vor.u32 %v233_v17, %v230_v16  ;;  %v244_v26 = vor.u32 %v243_v19, %v239_v18  ;;  %v589_v27 = vshll.u32 %v176_v15, 16  ;;  %v593_v28 = vshrl.u32 %v176_v15, 16  ;;  %v178_v48 = vld [vmem:[%s11019_s20 + $0xac] sm:$0xf]  ;;  %v216_v60 = vld [vmem:[%s11019_s20 + $0xb0] sm:$0x1] }
  0x17   : > { %v254_v31 = vor.u32 %v253_v22, %v249_v21  ;;  %v582_v32 = vrot.slane %v580_v23, 4  ;;  %v585_v33 = vrot.slane %v583_v24, 5  ;;  %v599_v34 = vshll.u32 %v177_v20, 16  ;;  %v147_v62 = vld [vmem:[%s11019_s20 + $0x14] sm:$0xf] }
  0x18   : > { %v235_v35 = vrot.slane %v234_v25, 4  ;;  %v245_v36 = vrot.slane %v244_v26, 4  ;;  %v591_v37 = vrot.slane %v589_v27, 5  ;;  %v595_v38 = vrot.slane %v593_v28, 4  ;;  %v148_v3 = vld [vmem:[%s11019_s20 + $0x18] sm:$0xf] }
  0x19   : > { %v255_v39 = vrot.slane %v254_v31, 4  ;;  %v586_v40 = vor.u32 %v585_v33, %v582_v32  ;;  %v601_v41 = vrot.slane %v599_v34, 5  ;;  %v603_v42 = vshrl.u32 %v177_v20, 16  ;;  %v149_v11 = vld [vmem:[%s11019_s20 + $0x1c] sm:$0xf] }
  0x1a   : > { %v240_v44 = vsel %vm11033_vm4, %v235_v35, %v239_v18  ;;  %v250_v45 = vsel %vm11033_vm4, %v245_v36, %v249_v21  ;;  %v596_v46 = vor.u32 %v595_v38, %v591_v37  ;;  %v257_v47 = vshll.u32 %v146_v29, 16  ;;  %v179_v18 = vld [vmem:[%s11019_s20 + $0xb4] sm:$0xf]  ;;  %v180_v23 = vld [vmem:[%s11019_s20 + $0xb8] sm:$0xf] }
  0x1b   : > { %v8909_v49 = vcombine.low %v240_v44, %v250_v45  ;;  %v587_v50 = vrot.slane %v586_v40, 4  ;;  %v605_v51 = vrot.slane %v603_v42, 4  ;;  %v261_v52 = vshrl.u32 %v146_v29, 16  ;;  %v181_v35 = vld [vmem:[%s11019_s20 + $0xbc] sm:$0xf] }
  0x1c   : > { %v597_v53 = vrot.slane %v596_v46, 4  ;;  %v259_v54 = vrot.slane %v257_v47, 5  ;;  %v267_v55 = vshll.u32 %v208_v43, 16  ;;  %v609_v61 = vshll.u32 %v178_v48, 16  ;;  %v150_v42 = vld [vmem:[%s11019_s20 + $0x20] sm:$0xf] }
  0x1d   : > { %10161 = vmatprep.mubr.msk.bf16.mxu0 %vm1029_vm3, %v8909_v49  ;;  %v592_v57 = vsel %vm11033_vm4, %v587_v50, %v591_v37  ;;  %v606_v58 = vor.u32 %v605_v51, %v601_v41  ;;  %v263_v59 = vrot.slane %v261_v52, 4  ;;  %v613_v2 = vshrl.u32 %v178_v48, 16  ;;  %v209_v50 = vld [vmem:[%s11019_s20 + $0x24] sm:$0x1]  ;;  %v11773_v30 = vld [vmem:[%s11019_s20 + $0xc8] sm:$0xf] }
  0x1e   : > { %v602_v63 = vsel %vm11033_vm4, %v597_v53, %v601_v41  ;;  %v260_v0 = vsel %vm11033_vm4, %v255_v39, %v259_v54  ;;  %v269_v1 = vrot.slane %v267_v55, 5  ;;  %v611_v8 = vrot.slane %v609_v61, 5  ;;  %15686 = vst [vmem:[#allocation16_spill] sm:$0xff] %v11773_v30 }
  0x1f   : > { %v607_v5 = vrot.slane %v606_v58, 4  ;;  %v8925_v6 = vcombine.low %v592_v57, %v602_v63  ;;  %v264_v7 = vor.u32 %v263_v59, %v259_v54  ;;  %v615_v9 = vrot.slane %v613_v2, 4 }
  0x20   : > { %v619_v10 = vshll.u32 %v216_v60, 16  ;;  %v272_v12 = vshrl.u32 %v147_v62, 16  ;;  %v275_v13 = vshll.u32 %v147_v62, 16  ;;  %v281_v16 = vshll.u32 %v148_v3, 16 }
  0x21   : > { %10193 = vmatprep.mubr.msk.bf16.mxu1 %vm1029_vm3, %v8925_v6  ;;  %v265_v14 = vrot.slane %v264_v7, 4  ;;  %v612_v15 = vsel %vm11033_vm4, %v607_v5, %v611_v8  ;;  %v285_v17 = vshrl.u32 %v148_v3, 16  ;;  %v616_v19 = vor.u32 %v615_v9, %v611_v8  ;;  %v217_v3 = vld [vmem:[%s11019_s20 + $0xc4] sm:$0x1] }
  0x22   : > { %v621_v20 = vrot.slane %v619_v10, 5  ;;  %v274_v21 = vrot.slane %v272_v12, 4  ;;  %v277_v22 = vrot.slane %v275_v13, 5  ;;  %v283_v25 = vrot.slane %v281_v16, 5  ;;  %v151_v10 = vld [vmem:[%s11019_s20 + $0x28] sm:$0xf] }
  0x23   : > { %v270_v24 = vsel %vm11033_vm4, %v265_v14, %v269_v1  ;;  %v287_v26 = vrot.slane %v285_v17, 4  ;;  %v291_v27 = vshll.u32 %v149_v11, 16  ;;  %v617_v29 = vrot.slane %v616_v19, 4 }
  0x24   : > { %v8910_v28 = vcombine.low %v260_v0, %v270_v24  ;;  %v278_v31 = vor.u32 %v277_v22, %v274_v21  ;;  %v624_v32 = vshrl.u32 %v179_v18, 16  ;;  %v627_v36 = vshll.u32 %v179_v18, 16  ;;  %v153_v22 = vld [vmem:[%s11019_s20 + $0x30] sm:$0xf] }
  0x25   : > { %v288_v33 = vor.u32 %v287_v26, %v283_v25  ;;  %v293_v34 = vrot.slane %v291_v27, 5  ;;  %v633_v37 = vshll.u32 %v180_v23, 16  ;;  %v622_v38 = vsel %vm11033_vm4, %v617_v29, %v621_v20  ;;  %v183_v29 = vld [vmem:[%s11019_s20 + $0xc8] sm:$0xf] }
  0x26   : > { %10162 = vmatmul.mubr.msk.bf16.vlgmr.msra.gmra.mxu0 %vm1029_vm3, %v8910_v28  ;;  %v279_v39 = vrot.slane %v278_v31, 4  ;;  %v626_v40 = vrot.slane %v624_v32, 4  ;;  %v637_v41 = vshrl.u32 %v180_v23, 16  ;;  %v8926_v43 = vcombine.low %v612_v15, %v622_v38  ;;  %v152_v15 = vld [vmem:[%s11019_s20 + $0x2c] sm:$0xf] }
  0x27   : > { %10292 = vmatpush3.bf16.msra.mxu0 %v2421_v56  ;;  %v289_v44 = vrot.slane %v288_v33, 4  ;;  %v629_v45 = vrot.slane %v627_v36, 5  ;;  %v635_v46 = vrot.slane %v633_v37, 5  ;;  %v643_v49 = vshll.u32 %v181_v35, 16  ;;  %v182_v56 = vld [vmem:[%s11019_s20 + $0xc0] sm:$0xf] }
  0x28   : > { %v284_v47 = vsel %vm11033_vm4, %v279_v39, %v283_v25  ;;  %v639_v48 = vrot.slane %v637_v41, 4  ;;  %v295_v51 = vshrl.u32 %v149_v11, 16  ;;  %10194 = vmatmul.mubr.msk.bf16.vlgmr.msra.gmra.mxu1 %vm1029_vm3, %v8926_v43  ;;  %v301_v54 = vshll.u32 %v150_v42, 16 }
  0x29   : > { %v294_v52 = vsel %vm11033_vm4, %v289_v44, %v293_v34  ;;  %v630_v53 = vor.u32 %v629_v45, %v626_v40  ;;  %v305_v55 = vshrl.u32 %v150_v42, 16  ;;  %10226 = vmatpush3.bf16.msra.mxu1 %v11022_v4  ;;  %v645_v59 = vrot.slane %v643_v49, 5  ;;  %v185_v42 = vld [vmem:[%s11019_s20 + $0xd0] sm:$0xf]  ;;  %v154_v49 = vld [vmem:[%s11019_s20 + $0x34] sm:$0xf] }
  0x2a   : > { %v8911_v57 = vcombine.low %v284_v47, %v294_v52  ;;  %v640_v58 = vor.u32 %v639_v48, %v635_v46  ;;  %v297_v60 = vrot.slane %v295_v51, 4  ;;  %v303_v62 = vrot.slane %v301_v54, 5 }
  0x2b   : > { %v631_v61 = vrot.slane %v630_v53, 4  ;;  %v307_v63 = vrot.slane %v305_v55, 4  ;;  %v311_v0 = vshll.u32 %v209_v50, 16  ;;  %v647_v5 = vshrl.u32 %v181_v35, 16  ;;  %v184_v35 = vld [vmem:[%s11019_s20 + $0xcc] sm:$0xf] }
  0x2c   : > { %10165 = vmatprep.mubr.msk.bf16.mxu0 %vm1029_vm3, %v8911_v57  ;;  %v641_v1 = vrot.slane %v640_v58, 4  ;;  %v298_v2 = vor.u32 %v297_v60, %v293_v34  ;;  %v653_v6 = vshll.u32 %v182_v56, 16  ;;  %v657_v9 = vshrl.u32 %v182_v56, 16  ;;  %v210_v58 = vld [vmem:[%s11019_s20 + $0x38] sm:$0x1] }
  0x2d   : > { %v636_v4 = vsel %vm11033_vm4, %v631_v61, %v635_v46  ;;  %v308_v7 = vor.u32 %v307_v63, %v303_v62  ;;  %v313_v8 = vrot.slane %v311_v0, 5  ;;  %v649_v13 = vrot.slane %v647_v5, 4 }
  0x2e   : > { %v646_v11 = vsel %vm11033_vm4, %v641_v1, %v645_v59  ;;  %v299_v12 = vrot.slane %v298_v2, 4  ;;  %v655_v14 = vrot.slane %v653_v6, 5  ;;  %v659_v18 = vrot.slane %v657_v9, 4 }
  0x2f   : > { %v8927_v16 = vcombine.low %v636_v4, %v646_v11  ;;  %v309_v17 = vrot.slane %v308_v7, 4  ;;  %v663_v19 = vshll.u32 %v217_v3, 16  ;;  %v650_v21 = vor.u32 %v649_v13, %v645_v59  ;;  %v186_v7 = vld [vmem:[%s11019_s20 + $0xd4] sm:$0xf]  ;;  %v218_v11 = vld [vmem:[%s11019_s20 + $0xd8] sm:$0x1] }
  0x30   : > { %v304_v20 = vsel %vm11033_vm4, %v299_v12, %v303_v62  ;;  %v316_v23 = vshrl.u32 %v151_v10, 16  ;;  %v319_v24 = vshll.u32 %v151_v10, 16  ;;  %v660_v26 = vor.u32 %v659_v18, %v655_v14  ;;  %v155_v13 = vld [vmem:[%s11019_s20 + $0x3c] sm:$0xf] }
  0x31   : > { %10197 = vmatprep.mubr.msk.bf16.mxu1 %vm1029_vm3, %v8927_v16  ;;  %v314_v25 = vsel %vm11033_vm4, %v309_v17, %v313_v8  ;;  %v665_v27 = vrot.slane %v663_v19, 5  ;;  %v325_v28 = vshll.u32 %v152_v15, 16  ;;  %v651_v32 = vrot.slane %v650_v21, 4 }
  0x32   : > { %v8912_v31 = vcombine.low %v304_v20, %v314_v25  ;;  %v318_v33 = vrot.slane %v316_v23, 4  ;;  %v321_v34 = vrot.slane %v319_v24, 5  ;;  %v661_v36 = vrot.slane %v660_v26, 4 }
  0x33   : > { %v327_v37 = vrot.slane %v325_v28, 5  ;;  %v329_v38 = vshrl.u32 %v152_v15, 16  ;;  %v335_v39 = vshll.u32 %v153_v22, 16  ;;  %v656_v40 = vsel %vm11033_vm4, %v651_v32, %v655_v14 }
  0x34   : > { %10166 = vmatmul.mubr.msk.bf16.gmra.mxu0 %vm1029_vm3, %v8912_v31  ;;  %v322_v41 = vor.u32 %v321_v34, %v318_v33  ;;  %v668_v43 = vshrl.u32 %v183_v29, 16  ;;  %v671_v44 = vshll.u32 %v183_v29, 16  ;;  %v666_v45 = vsel %vm11033_vm4, %v661_v36, %v665_v27  ;;  %v156_v31 = vld [vmem:[%s11019_s20 + $0x40] sm:$0xf]  ;;  %v157_v36 = vld [vmem:[%s11019_s20 + $0x44] sm:$0xf] }
  0x35   : > { %v331_v46 = vrot.slane %v329_v38, 4  ;;  %v337_v47 = vrot.slane %v335_v39, 5  ;;  %v677_v48 = vshll.u32 %v184_v35, 16  ;;  %v8928_v50 = vcombine.low %v656_v40, %v666_v45 }
  0x36   : > { %v323_v51 = vrot.slane %v322_v41, 4  ;;  %v670_v52 = vrot.slane %v668_v43, 4  ;;  %v673_v53 = vrot.slane %v671_v44, 5  ;;  %v681_v56 = vshrl.u32 %v184_v35, 16 }
  0x37   : > { %v332_v54 = vor.u32 %v331_v46, %v327_v37  ;;  %v679_v55 = vrot.slane %v677_v48, 5  ;;  %v687_v57 = vshll.u32 %v185_v42, 16  ;;  %10198 = vmatmul.mubr.msk.bf16.gmra.mxu1 %vm1029_vm3, %v8928_v50  ;;  %v339_v61 = vshrl.u32 %v153_v22, 16  ;;  %v188_v46 = vld [vmem:[%s11019_s20 + $0xe0] sm:$0xf] }
  0x38   : > { %v328_v59 = vsel %vm11033_vm4, %v323_v51, %v327_v37  ;;  %v674_v60 = vor.u32 %v673_v53, %v670_v52  ;;  %v345_v62 = vshll.u32 %v154_v49, 16  ;;  %v683_v0 = vrot.slane %v681_v56, 4  ;;  %v187_v37 = vld [vmem:[%s11019_s20 + $0xdc] sm:$0xf] }
  0x39   : > { %v333_v63 = vrot.slane %v332_v54, 4  ;;  %v689_v1 = vrot.slane %v687_v57, 5  ;;  %v349_v2 = vshrl.u32 %v154_v49, 16  ;;  %v341_v5 = vrot.slane %v339_v61, 4  ;;  %v189_v54 = vld [vmem:[%s11019_s20 + $0xe4] sm:$0xf] }
  0x3a   : > { %v675_v3 = vrot.slane %v674_v60, 4  ;;  %v347_v6 = vrot.slane %v345_v62, 5  ;;  %v355_v4 = vshll.u32 %v210_v58, 16  ;;  %v684_v9 = vor.u32 %v683_v0, %v679_v55  ;;  %v158_v0 = vld [vmem:[%s11019_s20 + $0x48] sm:$0xf] }
  0x3b   : > { %v338_v8 = vsel %vm11033_vm4, %v333_v63, %v337_v47  ;;  %v351_v10 = vrot.slane %v349_v2, 4  ;;  %v691_v12 = vshrl.u32 %v185_v42, 16  ;;  %v342_v16 = vor.u32 %v341_v5, %v337_v47 }
  0x3c   : > { %v8913_v14 = vcombine.low %v328_v59, %v338_v8  ;;  %v680_v15 = vsel %vm11033_vm4, %v675_v3, %v679_v55  ;;  %v357_v17 = vrot.slane %v355_v4, 5  ;;  %v685_v18 = vrot.slane %v684_v9, 4  ;;  %v211_v8 = vld [vmem:[%s11019_s20 + $0x4c] sm:$0x1] }
  0x3d   : > { %v352_v19 = vor.u32 %v351_v10, %v347_v6  ;;  %v693_v20 = vrot.slane %v691_v12, 4  ;;  %v697_v21 = vshll.u32 %v186_v7, 16  ;;  %v343_v22 = vrot.slane %v342_v16, 4 }
  0x3e   : > { %10169 = vmatprep.mubr.msk.bf16.mxu0 %vm1029_vm3, %v8913_v14  ;;  %v701_v23 = vshrl.u32 %v186_v7, 16  ;;  %v707_v24 = vshll.u32 %v218_v11, 16  ;;  %v360_v25 = vshrl.u32 %v155_v13, 16  ;;  %v690_v26 = vsel %vm11033_vm4, %v685_v18, %v689_v1  ;;  %v190_v18 = vld [vmem:[%s11019_s20 + $0xe8] sm:$0xf] }
  0x3f   : > { %v353_v27 = vrot.slane %v352_v19, 4  ;;  %v694_v28 = vor.u32 %v693_v20, %v689_v1  ;;  %v699_v29 = vrot.slane %v697_v21, 5  ;;  %v8929_v32 = vcombine.low %v680_v15, %v690_v26  ;;  %v219_v19 = vld [vmem:[%s11019_s20 + $0xec] sm:$0x1] }
  0x40   : > { %v348_v33 = vsel %vm11033_vm4, %v343_v22, %v347_v6  ;;  %v703_v34 = vrot.slane %v701_v23, 4  ;;  %v709_v35 = vrot.slane %v707_v24, 5  ;;  %v362_v40 = vrot.slane %v360_v25, 4  ;;  %v11139_v24 = vld [vmem:[%s15570_s1 + $0x6] sm:$0x3] }
  0x41   : > { %v358_v38 = vsel %vm11033_vm4, %v353_v27, %v357_v17  ;;  %v695_v39 = vrot.slane %v694_v28, 4  ;;  %v363_v41 = vshll.u32 %v155_v13, 16  ;;  %10201 = vmatprep.mubr.msk.bf16.mxu1 %vm1029_vm3, %v8929_v32  ;;  %v369_v44 = vshll.u32 %v156_v31, 16  ;;  %10759 = vmatprep.subr.msk.bf16.mxu1 %vm1126_vm0, %v11139_v24 }
  0x42   : > { %v8914_v42 = vcombine.low %v348_v33, %v358_v38  ;;  %v704_v43 = vor.u32 %v703_v34, %v699_v29  ;;  %v373_v45 = vshrl.u32 %v156_v31, 16  ;;  %v379_v49 = vshll.u32 %v157_v36, 16 }
  0x43   : > { %v700_v47 = vsel %vm11033_vm4, %v695_v39, %v699_v29  ;;  %v365_v48 = vrot.slane %v363_v41, 5  ;;  %v712_v50 = vshrl.u32 %v187_v37, 16  ;;  %v371_v52 = vrot.slane %v369_v44, 5  ;;  %v11148_v29 = vld [vmem:[%s15570_s1 + $0x8] sm:$0x3] }
  0x44   : > { %10170 = vmatmul.mubr.msk.bf16.gmra.mxu0 %vm1029_vm3, %v8914_v42  ;;  %v705_v51 = vrot.slane %v704_v43, 4  ;;  %v375_v53 = vrot.slane %v373_v45, 4  ;;  %v715_v55 = vshll.u32 %v187_v37, 16  ;;  %v381_v57 = vrot.slane %v379_v49, 5  ;;  %10760 = vmatprep.subr.msk.bf16.mxu0 %vm1126_vm0, %v11148_v29  ;;  %v11160_v45 = vld [vmem:[%s11019_s20 + $0x58] sm:$0xf] }
  0x45   : > { %v366_v56 = vor.u32 %v365_v48, %v362_v40  ;;  %v714_v58 = vrot.slane %v712_v50, 4  ;;  %v721_v59 = vshll.u32 %v188_v46, 16  ;;  %v725_v63 = vshrl.u32 %v188_v46, 16  ;;  %v11157_v40 = vld [vmem:[%s11019_s20 + $0x54] sm:$0xf] }
  0x46   : > { %v710_v60 = vsel %vm11033_vm4, %v705_v51, %v709_v35  ;;  %v376_v61 = vor.u32 %v375_v53, %v371_v52  ;;  %v717_v62 = vrot.slane %v715_v55, 5  ;;  %v731_v5 = vshll.u32 %v189_v54, 16  ;;  %v159_v35 = vld [vmem:[%s11019_s20 + $0x50] sm:$0xf]  ;;  %v192_v51 = vld [vmem:[%s11019_s20 + $0xf4] sm:$0xf] }
  0x47   : > { %v8930_v1 = vcombine.low %v700_v47, %v710_v60  ;;  %v367_v2 = vrot.slane %v366_v56, 4  ;;  %v723_v3 = vrot.slane %v721_v59, 5  ;;  %v727_v7 = vrot.slane %v725_v63, 4  ;;  %v191_v50 = vld [vmem:[%s11019_s20 + $0xf0] sm:$0xf] }
  0x48   : > { %v377_v6 = vrot.slane %v376_v61, 4  ;;  %v718_v4 = vor.u32 %v717_v62, %v714_v58  ;;  %v383_v9 = vshrl.u32 %v157_v36, 16  ;;  %v733_v11 = vrot.slane %v731_v5, 5  ;;  %v193_v60 = vld [vmem:[%s11019_s20 + $0xf8] sm:$0xf] }
  0x49   : > { %10202 = vmatmul.mubr.msk.bf16.gmra.mxu1 %vm1029_vm3, %v8930_v1  ;;  %v372_v10 = vsel %vm11033_vm4, %v367_v2, %v371_v52  ;;  %v389_v12 = vshll.u32 %v158_v0, 16  ;;  %v393_v13 = vshrl.u32 %v158_v0, 16  ;;  %v728_v16 = vor.u32 %v727_v7, %v723_v3  ;;  %v11174_v1 = vld [vmem:[%s11019_s20 + $0x5c] sm:$0xf] }
  0x4a   : > { %v382_v14 = vsel %vm11033_vm4, %v377_v6, %v381_v57  ;;  %v719_v15 = vrot.slane %v718_v4, 4  ;;  %v385_v17 = vrot.slane %v383_v9, 4  ;;  %v399_v23 = vshll.u32 %v211_v8, 16 }
  0x4b   : > { %v8915_v20 = vcombine.low %v372_v10, %v382_v14  ;;  %v391_v21 = vrot.slane %v389_v12, 5  ;;  %v395_v22 = vrot.slane %v393_v13, 4  ;;  %v729_v26 = vrot.slane %v728_v16, 4  ;;  %v11182_v14 = vld [vmem:[%s11019_s20 + $0x60] sm:$0x1] }
  0x4c   : > { %v724_v25 = vsel %vm11033_vm4, %v719_v15, %v723_v3  ;;  %v386_v27 = vor.u32 %v385_v17, %v381_v57  ;;  %v735_v28 = vshrl.u32 %v189_v54, 16  ;;  %v401_v32 = vrot.slane %v399_v23, 5 }
  0x4d   : > { %10173 = vmatprep.mubr.msk.bf16.mxu0 %vm1029_vm3, %v8915_v20  ;;  %v396_v31 = vor.u32 %v395_v22, %v391_v21  ;;  %v741_v33 = vshll.u32 %v190_v18, 16  ;;  %v745_v34 = vshrl.u32 %v190_v18, 16  ;;  %v734_v36 = vsel %vm11033_vm4, %v729_v26, %v733_v11 }
  0x4e   : > { %v387_v37 = vrot.slane %v386_v27, 4  ;;  %v737_v38 = vrot.slane %v735_v28, 4  ;;  %v751_v39 = vshll.u32 %v219_v19, 16  ;;  %v8931_v41 = vcombine.low %v724_v25, %v734_v36  ;;  %v194_v19 = vld [vmem:[%s11019_s20 + $0xfc] sm:$0xf] }
  0x4f   : > { %v397_v42 = vrot.slane %v396_v31, 4  ;;  %v743_v43 = vrot.slane %v741_v33, 5  ;;  %v747_v44 = vrot.slane %v745_v34, 4  ;;  %v404_v49 = vshrl.u32 %v159_v35, 16  ;;  %v220_v31 = vld [vmem:[%s11019_s20 + $0x100] sm:$0x1] }
  0x50   : > { %v392_v46 = vsel %vm11033_vm4, %v387_v37, %v391_v21  ;;  %v738_v47 = vor.u32 %v737_v38, %v733_v11  ;;  %v753_v48 = vrot.slane %v751_v39, 5  ;;  %10205 = vmatprep.mubr.msk.bf16.mxu1 %vm1029_vm3, %v8931_v41  ;;  %v407_v54 = vshll.u32 %v159_v35, 16  ;;  %v11195_v36 = vld [vmem:[%s11019_s20 + $0x64] sm:$0xf] }
  0x51   : > { %v402_v52 = vsel %vm11033_vm4, %v397_v42, %v401_v32  ;;  %v748_v53 = vor.u32 %v747_v44, %v743_v43  ;;  %v413_v55 = vshll.u32 %v11157_v40, 16  ;;  %v406_v58 = vrot.slane %v404_v49, 4 }
  0x52   : > { %v8916_v56 = vcombine.low %v392_v46, %v402_v52  ;;  %v739_v57 = vrot.slane %v738_v47, 4  ;;  %v417_v59 = vshrl.u32 %v11157_v40, 16  ;;  %v409_v62 = vrot.slane %v407_v54, 5 }
  0x53   : > { %v749_v61 = vrot.slane %v748_v53, 4  ;;  %v415_v63 = vrot.slane %v413_v55, 5  ;;  %v423_v0 = vshll.u32 %v11160_v45, 16  ;;  %v756_v5 = vshrl.u32 %v191_v50, 16 }
  0x54   : > { %10174 = vmatmul.mubr.msk.bf16.gmra.mxu0 %vm1029_vm3, %v8916_v56  ;;  %v744_v2 = vsel %vm11033_vm4, %v739_v57, %v743_v43  ;;  %v419_v3 = vrot.slane %v417_v59, 4  ;;  %v759_v6 = vshll.u32 %v191_v50, 16  ;;  %v410_v7 = vor.u32 %v409_v62, %v406_v58  ;;  %v11205_v56 = vld [vmem:[%s11019_s20 + $0x6c] sm:$0xf]  ;;  %v195_v57 = vld [vmem:[%s11019_s20 + $0x104] sm:$0xf] }
  0x55   : > { %v754_v4 = vsel %vm11033_vm4, %v749_v61, %v753_v48  ;;  %v425_v8 = vrot.slane %v423_v0, 5  ;;  %v765_v9 = vshll.u32 %v192_v51, 16  ;;  %v758_v12 = vrot.slane %v756_v5, 4 }
  0x56   : > { %v8932_v10 = vcombine.low %v744_v2, %v754_v4  ;;  %v420_v11 = vor.u32 %v419_v3, %v415_v63  ;;  %v761_v13 = vrot.slane %v759_v6, 5  ;;  %v411_v15 = vrot.slane %v410_v7, 4  ;;  %v196_v7 = vld [vmem:[%s11019_s20 + $0x108] sm:$0xf] }
  0x57   : > { %v767_v16 = vrot.slane %v765_v9, 5  ;;  %v769_v17 = vshrl.u32 %v192_v51, 16  ;;  %v775_v18 = vshll.u32 %v193_v60, 16  ;;  %v427_v22 = vshrl.u32 %v11160_v45, 16  ;;  %v11202_v51 = vld [vmem:[%s11019_s20 + $0x68] sm:$0xf] }
  0x58   : > { %10206 = vmatmul.mubr.msk.bf16.gmra.mxu1 %vm1029_vm3, %v8932_v10  ;;  %v421_v20 = vrot.slane %v420_v11, 4  ;;  %v762_v21 = vor.u32 %v761_v13, %v758_v12  ;;  %v433_v23 = vshll.u32 %v11174_v1, 16  ;;  %v416_v25 = vsel %vm11033_vm4, %v411_v15, %v415_v63  ;;  %v197_v12 = vld [vmem:[%s11019_s20 + $0x10c] sm:$0xf] }
  0x59   : > { %v771_v26 = vrot.slane %v769_v17, 4  ;;  %v777_v27 = vrot.slane %v775_v18, 5  ;;  %v437_v28 = vshrl.u32 %v11174_v1, 16  ;;  %v429_v34 = vrot.slane %v427_v22, 4  ;;  %v11223_v18 = vld [vmem:[%s11019_s20 + $0x70] sm:$0xf] }
  0x5a   : > { %v426_v32 = vsel %vm11033_vm4, %v421_v20, %v425_v8  ;;  %v763_v33 = vrot.slane %v762_v21, 4  ;;  %v435_v35 = vrot.slane %v433_v23, 5  ;;  %v443_v41 = vshll.u32 %v11182_v14, 16 }
  0x5b   : > { %v8917_v37 = vcombine.low %v416_v25, %v426_v32  ;;  %v772_v38 = vor.u32 %v771_v26, %v767_v16  ;;  %v439_v39 = vrot.slane %v437_v28, 4  ;;  %v430_v43 = vor.u32 %v429_v34, %v425_v8  ;;  %v11231_v34 = vld [vmem:[%s11019_s20 + $0x74] sm:$0x1] }
  0x5c   : > { %v768_v42 = vsel %vm11033_vm4, %v763_v33, %v767_v16  ;;  %v779_v44 = vshrl.u32 %v193_v60, 16  ;;  %v785_v46 = vshll.u32 %v194_v19, 16  ;;  %v445_v49 = vrot.slane %v443_v41, 5  ;;  %v198_v41 = vld [vmem:[%s11019_s20 + $0x110] sm:$0xf] }
  0x5d   : > { %10177 = vmatprep.mubr.msk.bf16.mxu0 %vm1029_vm3, %v8917_v37  ;;  %v773_v47 = vrot.slane %v772_v38, 4  ;;  %v440_v48 = vor.u32 %v439_v39, %v435_v35  ;;  %v789_v50 = vshrl.u32 %v194_v19, 16  ;;  %v431_v52 = vrot.slane %v430_v43, 4 }
  0x5e   : > { %v781_v53 = vrot.slane %v779_v44, 4  ;;  %v787_v54 = vrot.slane %v785_v46, 5  ;;  %v795_v55 = vshll.u32 %v220_v31, 16  ;;  %v448_v61 = vshrl.u32 %v11195_v36, 16 }
  0x5f   : > { %v778_v58 = vsel %vm11033_vm4, %v773_v47, %v777_v27  ;;  %v441_v59 = vrot.slane %v440_v48, 4  ;;  %v791_v60 = vrot.slane %v789_v50, 4  ;;  %v436_v63 = vsel %vm11033_vm4, %v431_v52, %v435_v35  ;;  %v221_v52 = vld [vmem:[%s11019_s20 + $0x114] sm:$0x1] }
  0x60   : > { %v8933_v62 = vcombine.low %v768_v42, %v778_v58  ;;  %v782_v0 = vor.u32 %v781_v53, %v777_v27  ;;  %v797_v2 = vrot.slane %v795_v55, 5  ;;  %v450_v6 = vrot.slane %v448_v61, 4  ;;  %v11244_v58 = vld [vmem:[%s11019_s20 + $0x78] sm:$0xf] }
  0x61   : > { %v446_v3 = vsel %vm11033_vm4, %v441_v59, %v445_v49  ;;  %v792_v5 = vor.u32 %v791_v60, %v787_v54  ;;  %v451_v4 = vshll.u32 %v11195_v36, 16  ;;  %v457_v10 = vshll.u32 %v11202_v51, 16 }
  0x62   : > { %10209 = vmatprep.mubr.msk.bf16.mxu1 %vm1029_vm3, %v8933_v62  ;;  %v8918_v8 = vcombine.low %v436_v63, %v446_v3  ;;  %v783_v9 = vrot.slane %v782_v0, 4  ;;  %v461_v11 = vshrl.u32 %v11202_v51, 16  ;;  %v467_v16 = vshll.u32 %v11205_v56, 16 }
  0x63   : > { %v793_v13 = vrot.slane %v792_v5, 4  ;;  %v453_v15 = vrot.slane %v451_v4, 5  ;;  %v800_v17 = vshrl.u32 %v195_v57, 16  ;;  %v459_v20 = vrot.slane %v457_v10, 5  ;;  %v11250_v5 = vld [vmem:[%s11019_s20 + $0x7c] sm:$0xf] }
  0x64   : > { %10178 = vmatmul.mubr.msk.bf16.gmra.mxu0 %vm1029_vm3, %v8918_v8  ;;  %v788_v19 = vsel %vm11033_vm4, %v783_v9, %v787_v54  ;;  %v463_v21 = vrot.slane %v461_v11, 4  ;;  %v803_v22 = vshll.u32 %v195_v57, 16  ;;  %v469_v26 = vrot.slane %v467_v16, 5  ;;  %v11254_v9 = vld [vmem:[%s11019_s20 + $0x80] sm:$0xf] }
  0x65   : > { %v798_v23 = vsel %vm11033_vm4, %v793_v13, %v797_v2  ;;  %v454_v25 = vor.u32 %v453_v15, %v450_v6  ;;  %v802_v27 = vrot.slane %v800_v17, 4  ;;  %v809_v33 = vshll.u32 %v196_v7, 16 }
  0x66   : > { %v8934_v28 = vcombine.low %v788_v19, %v798_v23  ;;  %v464_v31 = vor.u32 %v463_v21, %v459_v20  ;;  %v805_v32 = vrot.slane %v803_v22, 5  ;;  %v813_v37 = vshrl.u32 %v196_v7, 16 }
  0x67   : > { %v455_v35 = vrot.slane %v454_v25, 4  ;;  %v819_v38 = vshll.u32 %v197_v12, 16  ;;  %v471_v39 = vshrl.u32 %v11205_v56, 16  ;;  %v811_v44 = vrot.slane %v809_v33, 5 }
  0x68   : > { %10210 = vmatmul.mubr.msk.bf16.gmra.mxu1 %vm1029_vm3, %v8934_v28  ;;  %v465_v42 = vrot.slane %v464_v31, 4  ;;  %v806_v43 = vor.u32 %v805_v32, %v802_v27  ;;  %v477_v46 = vshll.u32 %v11223_v18, 16  ;;  %v815_v48 = vrot.slane %v813_v37, 4 }
  0x69   : > { %v460_v47 = vsel %vm11033_vm4, %v455_v35, %v459_v20  ;;  %v821_v49 = vrot.slane %v819_v38, 5  ;;  %v473_v50 = vrot.slane %v471_v39, 4  ;;  %v481_v57 = vshrl.u32 %v11223_v18, 16  ;;  %v199_v20 = vld [vmem:[%s11019_s20 + $0x118] sm:$0xf] }
  0x6a   : > { %v470_v53 = vsel %vm11033_vm4, %v465_v42, %v469_v26  ;;  %v807_v54 = vrot.slane %v806_v43, 4  ;;  %v479_v55 = vrot.slane %v477_v46, 5  ;;  %v816_v60 = vor.u32 %v815_v48, %v811_v44  ;;  %v11271_v39 = vld [vmem:[%s11019_s20 + $0x120] sm:$0xf]  ;;  %v11274_v46 = vld [vmem:[%s11019_s20 + $0x84] sm:$0xf] }
  0x6b   : > { %v8919_v59 = vcombine.low %v460_v47, %v470_v53  ;;  %v474_v61 = vor.u32 %v473_v50, %v469_v26  ;;  %v487_v62 = vshll.u32 %v11231_v34, 16  ;;  %v483_v0 = vrot.slane %v481_v57, 4  ;;  %v200_v26 = vld [vmem:[%s11019_s20 + $0x11c] sm:$0xf] }
  0x6c   : > { %v812_v63 = vsel %vm11033_vm4, %v807_v54, %v811_v44  ;;  %v823_v2 = vshrl.u32 %v197_v12, 16  ;;  %v829_v3 = vshll.u32 %v198_v41, 16  ;;  %v817_v6 = vrot.slane %v816_v60, 4 }
  0x6d   : > { %10181 = vmatprep.mubr.msk.bf16.mxu0 %vm1029_vm3, %v8919_v59  ;;  %v475_v4 = vrot.slane %v474_v61, 4  ;;  %v489_v7 = vrot.slane %v487_v62, 5  ;;  %v833_v8 = vshrl.u32 %v198_v41, 16  ;;  %v484_v10 = vor.u32 %v483_v0, %v479_v55  ;;  %v11282_v62 = vld [vmem:[%s11019_s20 + $0x88] sm:$0x1] }
  0x6e   : > { %v825_v11 = vrot.slane %v823_v2, 4  ;;  %v831_v13 = vrot.slane %v829_v3, 5  ;;  %v839_v15 = vshll.u32 %v221_v52, 16  ;;  %v822_v12 = vsel %vm11033_vm4, %v817_v6, %v821_v49  ;;  %v11286_v6 = vld [vmem:[%s11019_s20 + $0x124] sm:$0xf] }
  0x6f   : > { %v480_v16 = vsel %vm11033_vm4, %v475_v4, %v479_v55  ;;  %v835_v17 = vrot.slane %v833_v8, 4  ;;  %v492_v19 = vshrl.u32 %v11244_v58, 16  ;;  %v8935_v21 = vcombine.low %v812_v63, %v822_v12  ;;  %15665 = vst [vmem:[#allocation3_spill] sm:$0xff] %v11286_v6 }
  0x70   : > { %v485_v22 = vrot.slane %v484_v10, 4  ;;  %v826_v23 = vor.u32 %v825_v11, %v821_v49  ;;  %v841_v25 = vrot.slane %v839_v15, 5  ;;  %v495_v31 = vshll.u32 %v11244_v58, 16 }
  0x71   : > { %v836_v27 = vor.u32 %v835_v17, %v831_v13  ;;  %v494_v28 = vrot.slane %v492_v19, 4  ;;  %v501_v32 = vshll.u32 %v11250_v5, 16  ;;  %10213 = vmatprep.mubr.msk.bf16.mxu1 %vm1029_vm3, %v8935_v21  ;;  %v505_v37 = vshrl.u32 %v11250_v5, 16  ;;  %v11297_v21 = vld [vmem:[%s11019_s20 + $0x128] sm:$0x1] }
  0x72   : > { %v490_v33 = vsel %vm11033_vm4, %v485_v22, %v489_v7  ;;  %v827_v35 = vrot.slane %v826_v23, 4  ;;  %v511_v38 = vshll.u32 %v11254_v9, 16  ;;  %v497_v43 = vrot.slane %v495_v31, 5 }
  0x73   : > { %v8920_v41 = vcombine.low %v480_v16, %v490_v33  ;;  %v837_v42 = vrot.slane %v836_v27, 4  ;;  %v503_v44 = vrot.slane %v501_v32, 5  ;;  %v507_v48 = vrot.slane %v505_v37, 4  ;;  %v11301_v27 = vld [vmem:[%s11019_s20 + $0x8c] sm:$0xf] }
  0x74   : > { %v832_v47 = vsel %vm11033_vm4, %v827_v35, %v831_v13  ;;  %v513_v49 = vrot.slane %v511_v38, 5  ;;  %v844_v50 = vshrl.u32 %v199_v20, 16  ;;  %v498_v53 = vor.u32 %v497_v43, %v494_v28  ;;  %v11306_v35 = vld [vmem:[%s11019_s20 + $0x90] sm:$0xf] }
  0x75   : > { %10182 = vmatmul.mubr.msk.bf16.gmra.mxu0 %vm1029_vm3, %v8920_v41  ;;  %v842_v52 = vsel %vm11033_vm4, %v837_v42, %v841_v25  ;;  %v847_v54 = vshll.u32 %v199_v20, 16  ;;  %v853_v55 = vshll.u32 %v200_v26, 16  ;;  %v508_v59 = vor.u32 %v507_v48, %v503_v44 }
  0x76   : > { %v8936_v57 = vcombine.low %v832_v47, %v842_v52  ;;  %v846_v60 = vrot.slane %v844_v50, 4  ;;  %v857_v61 = vshrl.u32 %v200_v26, 16  ;;  %v499_v63 = vrot.slane %v498_v53, 4 }
  0x77   : > { %v849_v0 = vrot.slane %v847_v54, 5  ;;  %v855_v2 = vrot.slane %v853_v55, 5  ;;  %v863_v3 = vshll.u32 %v11271_v39, 16  ;;  %v509_v4 = vrot.slane %v508_v59, 4  ;;  %v11319_v55 = vld [vmem:[%s11019_s20 + $0x12c] sm:$0xf] }
  0x78   : > { %10214 = vmatmul.mubr.msk.bf16.gmra.mxu1 %vm1029_vm3, %v8936_v57  ;;  %v859_v7 = vrot.slane %v857_v61, 4  ;;  %v515_v8 = vshrl.u32 %v11254_v9, 16  ;;  %v521_v10 = vshll.u32 %v11274_v46, 16  ;;  %v504_v11 = vsel %vm11033_vm4, %v499_v63, %v503_v44  ;;  %15666 = vst [vmem:[#allocation4_spill] sm:$0xff] %v11319_v55  ;;  %v11326_v63 = vld [vmem:[%s11019_s20 + $0x130] sm:$0xf] }
  0x79   : > { %v850_v13 = vor.u32 %v849_v0, %v846_v60  ;;  %v865_v15 = vrot.slane %v863_v3, 5  ;;  %v525_v12 = vshrl.u32 %v11274_v46, 16  ;;  %v514_v16 = vsel %vm11033_vm4, %v509_v4, %v513_v49  ;;  %15667 = vst [vmem:[#allocation5_spill] sm:$0xff] %v11326_v63 }
  0x7a   : > { %v860_v17 = vor.u32 %v859_v7, %v855_v2  ;;  %v517_v19 = vrot.slane %v515_v8, 4  ;;  %v523_v20 = vrot.slane %v521_v10, 5  ;;  %v8921_v22 = vcombine.low %v504_v11, %v514_v16 }
  0x7b   : > { %v851_v23 = vrot.slane %v850_v13, 4  ;;  %v527_v25 = vrot.slane %v525_v12, 4  ;;  %v531_v26 = vshll.u32 %v11282_v62, 16  ;;  %v867_v32 = vshrl.u32 %v11271_v39, 16  ;;  %v11333_v13 = vld [vmem:[%s11019_s20 + $0x134] sm:$0xf] }
  0x7c   : > { %v861_v28 = vrot.slane %v860_v17, 4  ;;  %v518_v31 = vor.u32 %v517_v19, %v513_v49  ;;  %v873_v33 = vshll.u32 %v11286_v6, 16  ;;  %10185 = vmatprep.mubr.msk.bf16.mxu0 %vm1029_vm3, %v8921_v22  ;;  %v877_v42 = vshrl.u32 %v11286_v6, 16  ;;  %v11315_v49 = vld [vmem:[%s11019_s20 + $0x94] sm:$0xf] }
  0x7d   : > { %v856_v37 = vsel %vm11033_vm4, %v851_v23, %v855_v2  ;;  %v528_v38 = vor.u32 %v527_v25, %v523_v20  ;;  %v533_v41 = vrot.slane %v531_v26, 5  ;;  %v869_v47 = vrot.slane %v867_v32, 4  ;;  %v11338_v19 = vld [vmem:[%s11019_s20 + $0x98] sm:$0xf] }
  0x7e   : > { %v866_v43 = vsel %vm11033_vm4, %v861_v28, %v865_v15  ;;  %v519_v44 = vrot.slane %v518_v31, 4  ;;  %v875_v48 = vrot.slane %v873_v33, 5  ;;  %v879_v53 = vrot.slane %v877_v42, 4  ;;  %v11349_v33 = vld [vmem:[%s11019_s20 + $0x9c] sm:$0x1] }
  0x7f   : > { %v8937_v50 = vcombine.low %v856_v37, %v866_v43  ;;  %v529_v52 = vrot.slane %v528_v38, 4  ;;  %v883_v54 = vshll.u32 %v11297_v21, 16  ;;  %v870_v59 = vor.u32 %v869_v47, %v865_v15 }
  0x80   : > { %v524_v57 = vsel %vm11033_vm4, %v519_v44, %v523_v20  ;;  %v536_v60 = vshrl.u32 %v11301_v27, 16  ;;  %v539_v61 = vshll.u32 %v11301_v27, 16  ;;  %v880_v2 = vor.u32 %v879_v53, %v875_v48 }
  0x81   : > { %10217 = vmatprep.mubr.msk.bf16.mxu1 %vm1029_vm3, %v8937_v50  ;;  %v534_v0 = vsel %vm11033_vm4, %v529_v52, %v533_v41  ;;  %v885_v3 = vrot.slane %v883_v54, 5  ;;  %v545_v4 = vshll.u32 %v11306_v35, 16  ;;  %v871_v8 = vrot.slane %v870_v59, 4 }
  0x82   : > { %v8922_v7 = vcombine.low %v524_v57, %v534_v0  ;;  %v538_v10 = vrot.slane %v536_v60, 4  ;;  %v541_v11 = vrot.slane %v539_v61, 5  ;;  %v881_v15 = vrot.slane %v880_v2, 4  ;;  %v11359_v57 = vld [vmem:[%s11019_s20 + $0x138] sm:$0xf] }
  0x83   : > { %v547_v12 = vrot.slane %v545_v4, 5  ;;  %v549_v16 = vshrl.u32 %v11306_v35, 16  ;;  %v555_v17 = vshll.u32 %v11315_v49, 16  ;;  %v876_v20 = vsel %vm11033_vm4, %v871_v8, %v875_v48  ;;  %v11364_v8 = vld [vmem:[%s11019_s20 + $0x13c] sm:$0x1] }
  0x84   : > { %10186 = vmatmul.mubr.msk.bf16.gmra.mxu0 %vm1029_vm3, %v8922_v7  ;;  %v542_v22 = vor.u32 %v541_v11, %v538_v10  ;;  %v888_v23 = vshrl.u32 %v11319_v55, 16  ;;  %v891_v25 = vshll.u32 %v11319_v55, 16  ;;  %v886_v26 = vsel %vm11033_vm4, %v881_v15, %v885_v3 }
  0x85   : > { %v551_v28 = vrot.slane %v549_v16, 4  ;;  %v557_v31 = vrot.slane %v555_v17, 5  ;;  %v897_v32 = vshll.u32 %v11326_v63, 16  ;;  %v8938_v37 = vcombine.low %v876_v20, %v886_v26 }
  0x86   : > { %v543_v38 = vrot.slane %v542_v22, 4  ;;  %v890_v41 = vrot.slane %v888_v23, 4  ;;  %v893_v42 = vrot.slane %v891_v25, 5  ;;  %v901_v47 = vshrl.u32 %v11326_v63, 16 }
  0x87   : > { %v552_v43 = vor.u32 %v551_v28, %v547_v12  ;;  %v899_v44 = vrot.slane %v897_v32, 5  ;;  %v907_v48 = vshll.u32 %v11333_v13, 16  ;;  %10218 = vmatmul.mubr.msk.bf16.gmra.mxu1 %vm1029_vm3, %v8938_v37  ;;  %v559_v53 = vshrl.u32 %v11315_v49, 16  ;;  %v1967_v32 = vld [vmem:[%s11019_s20] sm:$0xe] }
  0x88   : > { %v548_v50 = vsel %vm11033_vm4, %v543_v38, %v547_v12  ;;  %v894_v52 = vor.u32 %v893_v42, %v890_v41  ;;  %v565_v54 = vshll.u32 %v11338_v19, 16  ;;  %v903_v60 = vrot.slane %v901_v47, 4 }
  0x89   : > { %v553_v59 = vrot.slane %v552_v43, 4  ;;  %v909_v61 = vrot.slane %v907_v48, 5  ;;  %v569_v0 = vshrl.u32 %v11338_v19, 16  ;;  %v561_v3 = vrot.slane %v559_v53, 4 }
  0x8a   : > { %v895_v2 = vrot.slane %v894_v52, 4  ;;  %v567_v4 = vrot.slane %v565_v54, 5  ;;  %v575_v7 = vshll.u32 %v11349_v33, 16  ;;  %v904_v11 = vor.u32 %v903_v60, %v899_v44 }
  0x8b   : > { %v558_v10 = vsel %vm11033_vm4, %v553_v59, %v557_v31  ;;  %v571_v15 = vrot.slane %v569_v0, 4  ;;  %v911_v12 = vshrl.u32 %v11333_v13, 16  ;;  %v562_v20 = vor.u32 %v561_v3, %v557_v31 }
  0x8c   : > { %v8923_v16 = vcombine.low %v548_v50, %v558_v10  ;;  %v900_v17 = vsel %vm11033_vm4, %v895_v2, %v899_v44  ;;  %v577_v22 = vrot.slane %v575_v7, 5  ;;  %v905_v23 = vrot.slane %v904_v11, 4  ;;  %v10870_v2 = vld [vmem:[%s11019_s20 + $0x4] sm:$0xf]  ;;  %v11390_v7 = vld [vmem:[%s11019_s20 + $0x8] sm:$0xf] }
  0x8d   : > { %v572_v25 = vor.u32 %v571_v15, %v567_v4  ;;  %v913_v26 = vrot.slane %v911_v12, 4  ;;  %v917_v28 = vshll.u32 %v11359_v57, 16  ;;  %v563_v37 = vrot.slane %v562_v20, 4  ;;  %v11393_v10 = vld [vmem:[%s11019_s20 + $0xc] sm:$0xf] }
  0x8e   : > { %10189 = vmatprep.mubr.msk.bf16.mxu0 %vm1029_vm3, %v8923_v16  ;;  %v921_v38 = vshrl.u32 %v11359_v57, 16  ;;  %v927_v41 = vshll.u32 %v11364_v8, 16  ;;  %v910_v42 = vsel %vm11033_vm4, %v905_v23, %v909_v61  ;;  %v9037_v0 = vrot.slane %v1967_v32, 9  ;;  %v10873_v15 = vld [vmem:[%s11019_s20 + $0x10] sm:$0x1] }
  0x8f   : > { %v573_v43 = vrot.slane %v572_v25, 4  ;;  %v914_v31 = vor.u32 %v913_v26, %v909_v61  ;;  %v919_v44 = vrot.slane %v917_v28, 5  ;;  %v8939_v47 = vcombine.low %v900_v17, %v910_v42  ;;  %v10874_v26 = vld [vmem:[%s11019_s20] sm:$0xf] }
  0x90   : > { %v568_v48 = vsel %vm11033_vm4, %v563_v37, %v567_v4  ;;  %v923_v50 = vrot.slane %v921_v38, 4  ;;  %v929_v52 = vrot.slane %v927_v41, 5  ;;  %v2020_v3 = vrot.slane %v10870_v2, 5  ;;  %v1968_v4 = vld [vmem:[%s11019_s20 + $0x14] sm:$0xe] }
  0x91   : > { %v578_v53 = vsel %vm11033_vm4, %v573_v43, %v577_v22  ;;  %v915_v54 = vrot.slane %v914_v31, 4  ;;  %10221 = vmatprep.mubr.msk.bf16.mxu1 %vm1029_vm3, %v8939_v47  ;;  %v8974_v11 = vcombine.low %v11390_v7, %v11393_v10  ;;  %v2029_v12 = vrot.slane %v10873_v15, 5  ;;  %v11411_v43 = vld [vmem:[%s11019_s20 + $0x18] sm:$0xf]  ;;  %v11432_v15 = vld [vmem:[%s11019_s20 + $0x20] sm:$0xf] }
  0x92   : > { %v8924_v59 = vcombine.low %v568_v48, %v578_v53  ;;  %v924_v60 = vor.u32 %v923_v50, %v919_v44  ;;  %v2023_v16 = vrot.slane %v11390_v7, 5  ;;  %v2026_v17 = vrot.slane %v11393_v10, 5  ;;  %v1969_v48 = vld [vmem:[%s11019_s20 + $0x28] sm:$0xe]  ;;  %v11518_v7 = vld [vmem:[%s15570_s1 + $0xc] sm:$0x3] }
  0x93   : > { %v920_v20 = vsel %vm11033_vm4, %v915_v54, %v919_v44  ;;  %v2021_v23 = vsel %vm11383_vm7, %v9037_v0, %v2020_v3  ;;  %v2022_v25 = vrot.slane %v2020_v3, 4  ;;  %v8973_v28 = vcombine.low %v10874_v26, %v10870_v2  ;;  %v11415_v44 = vld [vmem:[%s11019_s20 + $0x1c] sm:$0xf]  ;;  %15670 = vst [vmem:[#allocation6_spill] sm:$0xff] %v11518_v7 }
  0x94   : > { %10190 = vmatmul.mubr.msk.bf16.gmra.mxu0 %vm1029_vm3, %v8924_v59  ;;  %v925_v22 = vrot.slane %v924_v60, 4  ;;  %v2025_v32 = vrot.slane %v2023_v16, 4  ;;  %v2028_v37 = vrot.slane %v2026_v17, 4  ;;  %v9038_v38 = vrot.slane %v1968_v4, 9  ;;  %v1970_v26 = vld [vmem:[%s11019_s20 + $0x3c] sm:$0xe] }
  0x95   : > { %v2024_v42 = vsel %vm11383_vm7, %v2022_v25, %v2023_v16  ;;  %v2033_v31 = vrot.slane %v11411_v43, 5  ;;  %v2036_v47 = vrot.slane %v11415_v44, 5  ;;  %v3100_v60 = vsel %vm1126_vm0, %v11139_v24, 0  ;;  %v10878_v24 = vld [vmem:[%s11019_s20 + $0x24] sm:$0x1] }
  0x96   : > { %v930_v41 = vsel %vm11033_vm4, %v925_v22, %v929_v52  ;;  %v9054_v53 = vcombine.low %v2021_v23, %v2024_v42  ;;  %v2027_v54 = vsel %vm11383_vm7, %v2025_v32, %v2026_v17  ;;  %v2030_v52 = vsel %vm11383_vm7, %v2028_v37, %v2029_v12  ;;  %v11440_v22 = vld [vmem:[%s11019_s20 + $0x2c] sm:$0xf]  ;;  %v11444_v25 = vld [vmem:[%s11019_s20 + $0x30] sm:$0xf]  ;;  %v10881_v32 = vld [vmem:[%s11019_s20 + $0x14] sm:$0xf] }
  0x97   : > { %v8940_v50 = vcombine.low %v920_v20, %v930_v41  ;;  %v9055_v59 = vcombine.low %v2027_v54, %v2030_v52  ;;  %v2034_v0 = vsel %vm11383_vm7, %v9038_v38, %v2033_v31  ;;  %v2035_v2 = vrot.slane %v2033_v31, 4 }
  0x98   : > { %10293 = vmatprep.mubr.msk.bf16.mxu0 %vm1029_vm3, %v9054_v53  ;;  %v4434_v3 = vsel %vm1126_vm0, %v11148_v29, 0  ;;  %v2038_v4 = vrot.slane %v2036_v47, 4  ;;  %v2039_v12 = vrot.slane %v11432_v15, 5  ;;  %v2042_v16 = vrot.slane %v10878_v24, 5  ;;  %v11463_v53 = vld [vmem:[%s11019_s20 + $0x28] sm:$0xf] }
  0x99   : > { %10222 = vmatmul.mubr.msk.bf16.gmra.mxu1 %vm1029_vm3, %v8940_v50  ;;  %v2037_v17 = vsel %vm11383_vm7, %v2035_v2, %v2036_v47  ;;  %v9039_v20 = vrot.slane %v1969_v48, 9  ;;  %v2046_v23 = vrot.slane %v11440_v22, 5  ;;  %v2049_v29 = vrot.slane %v11444_v25, 5  ;;  %v11456_v48 = vld [vmem:[%s11019_s20 + $0x34] sm:$0xf] }
  0x9a   : > { %10227 = vmatprep.mubr.msk.bf16.mxu1 %vm1029_vm3, %v8973_v28  ;;  %v8975_v37 = vcombine.low %v10881_v32, %v11411_v43  ;;  %v9056_v28 = vcombine.low %v2034_v0, %v2037_v17  ;;  %v2041_v41 = vrot.slane %v2039_v12, 4  ;;  %v2040_v42 = vsel %vm11383_vm7, %v2038_v4, %v2039_v12  ;;  %v1971_v2 = vld [vmem:[%s11019_s20 + $0x50] sm:$0xe]  ;;  %v11481_v32 = vld [vmem:[%s11019_s20 + $0x3c] sm:$0xf] }
  0x9b   : > { %v2048_v31 = vrot.slane %v2046_v23, 4  ;;  %v2051_v47 = vrot.slane %v2049_v29, 4  ;;  %v2052_v50 = vrot.slane %v11456_v48, 5  ;;  %v9040_v24 = vrot.slane %v1970_v26, 9 }
  0x9c   : > { %10294 = vmatmul.mubr.msk.bf16.vlgmr.msra.gmra.mxu0 %vm1029_vm3, %v9055_v59  ;;  %v2043_v43 = vsel %vm11383_vm7, %v2041_v41, %v2042_v16  ;;  %v10884_v59 = vld [vmem:[%s11019_s20 + $0x38] sm:$0x1]  ;;  %v11478_v16 = vld [vmem:[%s15570_s1 + $0xa] sm:$0x3]  ;;  %v9041_v54 = vrot.slane %v1971_v2, 9  ;;  %v2072_v38 = vrot.slane %v11157_v40, 5 }
  0x9d   : > { %10424 = vmatpush3.bf16.msra.mxu0 %v4434_v3  ;;  %10297 = vmatprep.mubr.msk.bf16.mxu0 %vm1029_vm3, %v9056_v28  ;;  %v2055_v0 = vrot.slane %v10884_v59, 5  ;;  %v2047_v3 = vsel %vm11383_vm7, %v9039_v20, %v2046_v23  ;;  %v2050_v4 = vsel %vm11383_vm7, %v2048_v31, %v2049_v29  ;;  %v2054_v12 = vrot.slane %v2052_v50, 4  ;;  %v11484_v28 = vld [vmem:[%s11019_s20 + $0x40] sm:$0xf]  ;;  %v11490_v23 = vld [vmem:[%s11019_s20 + $0x44] sm:$0xf] }
  0x9e   : > { %v9057_v17 = vcombine.low %v2040_v42, %v2043_v43  ;;  %v2059_v20 = vrot.slane %v11484_v28, 5  ;;  %v2062_v29 = vrot.slane %v11490_v23, 5  ;;  %v11495_v26 = vsel %vm11383_vm7, %v2051_v47, %v2052_v50  ;;  %v11502_v31 = vld [vmem:[%s11019_s20 + $0x48] sm:$0xf]  ;;  %v10889_v59 = vld [vmem:[%s11019_s20 + $0x4c] sm:$0x1]  ;;  %10762 = vmatprep.subr.msk.bf16.mxu0 %vm1126_vm0, %v11518_v7 }
  0x9f   : > { %v11499_v42 = vsel %vm11383_vm7, %v2054_v12, %v2055_v0  ;;  %v2065_v43 = vrot.slane %v11502_v31, 5  ;;  %v2068_v41 = vrot.slane %v10889_v59, 5  ;;  %v9058_v52 = vcombine.low %v2047_v3, %v2050_v4  ;;  %v11720_v50 = vld [vmem:[%s11019_s20 + $0xb4] sm:$0xf] }
  0xa0   : > { %v2061_v47 = vrot.slane %v2059_v20, 4  ;;  %v2064_v0 = vrot.slane %v2062_v29, 4  ;;  %v2075_v59 = vrot.slane %v11160_v45, 5  ;;  %v9059_v10 = vcombine.low %v11495_v26, %v11499_v42  ;;  %v1972_v45 = vld [vmem:[%s11019_s20 + $0x64] sm:$0xe]  ;;  %15678 = vst [vmem:[#allocation10_spill] sm:$0xff] %v11720_v50 }
  0xa1   : > { %10228 = vmatmul.mubr.msk.bf16.vlgmr.msra.gmra.mxu1 %vm1029_vm3, %v8974_v11  ;;  %v2067_v12 = vrot.slane %v2065_v43, 4  ;;  %v2060_v11 = vsel %vm11383_vm7, %v9040_v24, %v2059_v20  ;;  %v2078_v2 = vrot.slane %v11174_v1, 5  ;;  %v2074_v20 = vrot.slane %v2072_v38, 4  ;;  %v11747_v50 = vld [vmem:[%s11019_s20 + $0xc0] sm:$0xf] }
  0xa2   : > { %10358 = vmatpush3.bf16.msra.mxu1 %v3100_v60  ;;  %10231 = vmatprep.mubr.msk.bf16.mxu1 %vm1029_vm3, %v8975_v37  ;;  %v11525_v60 = vld [vmem:[%s11019_s20 + $0x50] sm:$0xf]  ;;  %v2063_v3 = vsel %vm11383_vm7, %v2061_v47, %v2062_v29  ;;  %v11540_v4 = vsel %vm11383_vm7, %v2064_v0, %v2065_v43  ;;  %v11549_v26 = vsel %vm11383_vm7, %v9041_v54, %v2072_v38  ;;  %v2077_v42 = vrot.slane %v2075_v59, 4  ;;  %v11557_v43 = vld [vmem:[%s11019_s20 + $0x58] sm:$0xf] }
  0xa3   : > { %10761 = vmatprep.subr.msk.bf16.mxu1 %vm1126_vm0, %v11478_v16  ;;  %v11544_v24 = vsel %vm11383_vm7, %v2067_v12, %v2068_v41  ;;  %v2081_v37 = vrot.slane %v11182_v14, 5  ;;  %v11554_v29 = vsel %vm11383_vm7, %v2074_v20, %v2075_v59  ;;  %v9042_v47 = vrot.slane %v1972_v45, 9  ;;  %v1973_v0 = vld [vmem:[%s11019_s20 + $0x78] sm:$0xe]  ;;  %15682 = vst [vmem:[#allocation13_spill] sm:$0xff] %v11747_v50 }
  0xa4   : > { %10298 = vmatmul.mubr.msk.bf16.gmra.mxu0 %vm1029_vm3, %v9057_v17  ;;  %v2080_v17 = vrot.slane %v2078_v2, 4  ;;  %v9060_v38 = vcombine.low %v2060_v11, %v2063_v3  ;;  %v11565_v54 = vsel %vm11383_vm7, %v2077_v42, %v2078_v2  ;;  %v2088_v12 = vrot.slane %v11205_v56, 5  ;;  %v1974_v42 = vld [vmem:[%s11019_s20 + $0x8c] sm:$0xe] }
  0xa5   : > { %10301 = vmatprep.mubr.msk.bf16.mxu0 %vm1029_vm3, %v9058_v52  ;;  %v2085_v52 = vrot.slane %v11202_v51, 5  ;;  %v9061_v59 = vcombine.low %v11540_v4, %v11544_v24  ;;  %v9062_v45 = vcombine.low %v11549_v26, %v11554_v29  ;;  %v15671_v2 = vcombine.low %v11415_v44, %v11432_v15  ;;  %v11708_v26 = vld [vmem:[%s11019_s20 + $0xb8] sm:$0xf] }
  0xa6   : > { %v11569_v14 = vsel %vm11383_vm7, %v2080_v17, %v2081_v37  ;;  %v2091_v4 = vrot.slane %v11223_v18, 5  ;;  %v15672_v17 = vcombine.low %v11463_v53, %v11440_v22  ;;  %v9043_v15 = vrot.slane %v1973_v0, 9  ;;  %15677 = vst [vmem:[#allocation9_spill] sm:$0xff] %v11708_v26 }
  0xa7   : > { %v2087_v11 = vrot.slane %v2085_v52, 4  ;;  %v11586_v3 = vsel %vm11383_vm7, %v9042_v47, %v2085_v52  ;;  %v2101_v47 = vrot.slane %v11254_v9, 5  ;;  %v2090_v20 = vrot.slane %v2088_v12, 4 }
  0xa8   : > { %v2094_v24 = vrot.slane %v11231_v34, 5  ;;  %v2107_v34 = vrot.slane %v11282_v62, 5  ;;  %v9044_v52 = vrot.slane %v1974_v42, 9  ;;  %v2111_v62 = vrot.slane %v11306_v35, 5 }
  0xa9   : > { %10232 = vmatmul.mubr.msk.bf16.gmra.mxu1 %vm1029_vm3, %v15671_v2  ;;  %v11598_v44 = vsel %vm11383_vm7, %v2087_v11, %v2088_v12  ;;  %v2098_v2 = vrot.slane %v11250_v5, 5  ;;  %v2103_v11 = vrot.slane %v2101_v47, 4  ;;  %v2114_v22 = vrot.slane %v11315_v49, 5 }
  0xaa   : > { %10235 = vmatprep.mubr.msk.bf16.mxu1 %vm1029_vm3, %v15672_v17  ;;  %v2104_v17 = vrot.slane %v11274_v46, 5  ;;  %v15673_v12 = vcombine.low %v11444_v25, %v11456_v48  ;;  %v11659_v25 = vld [vmem:[%s11019_s20 + $0xa4] sm:$0xf]  ;;  %v2137_v29 = vrot.slane %v11708_v26, 5 }
  0xab   : > { %v11610_v53 = vsel %vm11383_vm7, %v9043_v15, %v2098_v2  ;;  %v2100_v0 = vrot.slane %v2098_v2, 4  ;;  %v2124_v48 = vrot.slane %v11659_v25, 5 }
  0xac   : > { %10302 = vmatmul.mubr.msk.bf16.gmra.mxu0 %vm1029_vm3, %v9059_v10  ;;  %v2093_v10 = vrot.slane %v2091_v4, 4  ;;  %v11625_v2 = vsel %vm11383_vm7, %v2103_v11, %v2104_v17  ;;  %v2106_v41 = vrot.slane %v2104_v17, 4  ;;  %v2117_v11 = vrot.slane %v11338_v19, 5 }
  0xad   : > { %10305 = vmatprep.mubr.msk.bf16.mxu0 %vm1029_vm3, %v9060_v38  ;;  %v11621_v15 = vsel %vm11383_vm7, %v2100_v0, %v2101_v47  ;;  %v1975_v38 = vld [vmem:[%s11019_s20 + $0xa0] sm:$0xe]  ;;  %v11636_v47 = vsel %vm11383_vm7, %v2090_v20, %v2091_v4  ;;  %v2120_v17 = vrot.slane %v11349_v33, 5  ;;  %v11652_v20 = vsel %vm11383_vm7, %v9044_v52, %v2111_v62  ;;  %v1976_v52 = vld [vmem:[%s11019_s20 + $0xb4] sm:$0xe] }
  0xae   : > { %v11640_v0 = vsel %vm11383_vm7, %v2106_v41, %v2107_v34  ;;  %v2113_v4 = vrot.slane %v2111_v62, 4  ;;  %v2116_v41 = vrot.slane %v2114_v22, 4  ;;  %v15674_v34 = vcombine.low %v11481_v32, %v11484_v28 }
  0xaf   : > { %v2119_v33 = vrot.slane %v2117_v11, 4  ;;  %v9045_v37 = vrot.slane %v1975_v38, 9  ;;  %v11669_v62 = vsel %vm11383_vm7, %v2093_v10, %v2094_v24  ;;  %v11680_v38 = vld [vmem:[%s11019_s20 + $0xac] sm:$0xf]  ;;  %v10895_v24 = vld [vmem:[%s11019_s20 + $0xb0] sm:$0x1] }
  0xb0   : > { %v11673_v32 = vsel %vm11383_vm7, %v2113_v4, %v2114_v22  ;;  %v11677_v28 = vsel %vm11383_vm7, %v2116_v41, %v2117_v11  ;;  %15676 = vst [vmem:[#allocation8_spill] sm:$0xff] %v11680_v38  ;;  %v2126_v11 = vrot.slane %v2124_v48, 4 }
  0xb1   : > { %10236 = vmatmul.mubr.msk.bf16.gmra.mxu1 %vm1029_vm3, %v15673_v12  ;;  %v11663_v12 = vld [vmem:[%s11019_s20 + $0xa8] sm:$0xf]  ;;  %v11688_v22 = vsel %vm11383_vm7, %v2119_v33, %v2120_v17  ;;  %v11692_v10 = vsel %vm11383_vm7, %v9045_v37, %v2124_v48  ;;  %v2133_v17 = vrot.slane %v10895_v24, 5  ;;  %v9046_v48 = vrot.slane %v1976_v52, 9  ;;  %v11725_v52 = vld [vmem:[%s11019_s20 + $0xbc] sm:$0xf] }
  0xb2   : > { %10239 = vmatprep.mubr.msk.bf16.mxu1 %vm1029_vm3, %v15674_v34  ;;  %15675 = vst [vmem:[#allocation7_spill] sm:$0xff] %v11663_v12  ;;  %v2127_v42 = vrot.slane %v11663_v12, 5  ;;  %v2130_v34 = vrot.slane %v11680_v38, 5  ;;  %15679 = vst [vmem:[#allocation11_spill] sm:$0xff] %v11725_v52  ;;  %v2139_v38 = vrot.slane %v2137_v29, 4 }
  0xb3   : > { %v11744_v26 = vsel %vm11383_vm7, %v9046_v48, %v2137_v29  ;;  %v11761_v48 = vld [vmem:[%s11019_s20 + $0xcc] sm:$0xf] }
  0xb4   : > { %10306 = vmatmul.mubr.msk.bf16.gmra.mxu0 %vm1029_vm3, %v9061_v59  ;;  %v2129_v4 = vrot.slane %v2127_v42, 4  ;;  %v2132_v41 = vrot.slane %v2130_v34, 4  ;;  %v11705_v37 = vsel %vm11383_vm7, %v2126_v11, %v2127_v42  ;;  %v11713_v59 = vld [vmem:[%s11019_s20 + $0xa0] sm:$0xf]  ;;  %v2140_v11 = vrot.slane %v11725_v52, 5  ;;  %15684 = vst [vmem:[#allocation14_spill] sm:$0xff] %v11761_v48 }
  0xb5   : > { %10309 = vmatprep.mubr.msk.bf16.mxu0 %vm1029_vm3, %v9062_v45  ;;  %v1977_v45 = vld [vmem:[%s11019_s20 + $0xc8] sm:$0xe]  ;;  %v15681_v42 = vcombine.low %v11490_v23, %v11502_v31  ;;  %v2150_v29 = vrot.slane %v11761_v48, 5  ;;  %v1980_v52 = vld [vmem:[%s11019_s20 + $0x104] sm:$0xe] }
  0xb6   : > { %v11732_v24 = vsel %vm11383_vm7, %v2129_v4, %v2130_v34  ;;  %v11736_v33 = vsel %vm11383_vm7, %v2132_v41, %v2133_v17  ;;  %v2142_v7 = vrot.slane %v2140_v11, 4  ;;  %v2143_v34 = vrot.slane %v11747_v50, 5  ;;  %v10901_v4 = vld [vmem:[%s11019_s20 + $0xc4] sm:$0x1]  ;;  %v1978_v41 = vld [vmem:[%s11019_s20 + $0xdc] sm:$0xe] }
  0xb7   : > { %15680 = vst [vmem:[#allocation12_spill] sm:$0xff] %v11736_v33  ;;  %v2146_v12 = vrot.slane %v10901_v4, 5  ;;  %v15683_v17 = vcombine.low %v11525_v60, %v11157_v40  ;;  %v11758_v23 = vsel %vm11383_vm7, %v2139_v38, %v2140_v11  ;;  %v9047_v31 = vrot.slane %v1977_v45, 9  ;;  %v11786_v60 = vld [vmem:[%s11019_s20 + $0xd4] sm:$0xf] }
  0xb8   : > { %v15687_v45 = vcombine.low %v11565_v54, %v11569_v14  ;;  %v11783_v11 = vsel %vm11383_vm7, %v2142_v7, %v2143_v34  ;;  %v2152_v40 = vrot.slane %v2150_v29, 4  ;;  %15688 = vst [vmem:[#allocation17_spill] sm:$0xff] %v11786_v60  ;;  %v2156_v50 = vrot.slane %v11786_v60, 5  ;;  %v1979_v54 = vld [vmem:[%s11019_s20 + $0xf0] sm:$0xe] }
  0xb9   : > { %10240 = vmatmul.mubr.msk.bf16.gmra.mxu1 %vm1029_vm3, %v15681_v42  ;;  %v11765_v42 = vld [vmem:[%s11019_s20 + $0xd0] sm:$0xf]  ;;  %v15689_v38 = vcombine.low %v11586_v3, %v11598_v44  ;;  %v11804_v48 = vsel %vm11383_vm7, %v9047_v31, %v2150_v29  ;;  %v11817_v14 = vld [vmem:[%s11019_s20 + $0xe0] sm:$0xf]  ;;  %v11823_v29 = vld [vmem:[%s11019_s20 + $0xe4] sm:$0xf]  ;;  %v15694_v60 = vcombine.low %v11557_v43, %v11174_v1 }
  0xba   : > { %10243 = vmatprep.mubr.msk.bf16.mxu1 %vm1029_vm3, %v15683_v17  ;;  %15685 = vst [vmem:[#allocation15_spill] sm:$0xff] %v11765_v42  ;;  %v2153_v4 = vrot.slane %v11765_v42, 5  ;;  %v2145_v17 = vrot.slane %v2143_v34, 4  ;;  %v10906_v34 = vld [vmem:[%s11019_s20 + $0xd8] sm:$0x1]  ;;  %v2158_v44 = vrot.slane %v2156_v50, 4  ;;  %v15695_v42 = vcombine.low %v11195_v36, %v11202_v51 }
  0xbb   : > { %15691 = vst [vmem:[#allocation19_spill] sm:$0xff] %v11817_v14  ;;  %v2163_v31 = vrot.slane %v11817_v14, 5  ;;  %15692 = vst [vmem:[#allocation20_spill] sm:$0xff] %v11823_v29  ;;  %v10911_v14 = vld [vmem:[%s11019_s20 + $0xec] sm:$0x1]  ;;  %v9049_v30 = vrot.slane %v1979_v54, 9 }
  0xbc   : > { %10310 = vmatmul.mubr.msk.bf16.gmra.mxu0 %vm1029_vm3, %v15687_v45  ;;  %v2155_v33 = vrot.slane %v2153_v4, 4  ;;  %v11797_v7 = vsel %vm11383_vm7, %v2145_v17, %v2146_v12  ;;  %v2159_v45 = vrot.slane %v10906_v34, 5  ;;  %v11808_v3 = vsel %vm11383_vm7, %v2152_v40, %v2153_v4  ;;  %v11814_v17 = vld [vmem:[%s11019_s20 + $0xdc] sm:$0xf]  ;;  %v11835_v12 = vld [vmem:[%s11019_s20 + $0xe8] sm:$0xf] }
  0xbd   : > { %10313 = vmatprep.mubr.msk.bf16.mxu0 %vm1029_vm3, %v15689_v38  ;;  %v9048_v38 = vrot.slane %v1978_v41, 9  ;;  %15690 = vst [vmem:[#allocation18_spill] sm:$0xff] %v11814_v17  ;;  %v2166_v4 = vrot.slane %v11823_v29, 5  ;;  %15693 = vst [vmem:[#allocation21_spill] sm:$0xff] %v11835_v12  ;;  %v2169_v34 = vrot.slane %v11835_v12, 5  ;;  %v2172_v17 = vrot.slane %v10911_v14, 5 }
  0xbe   : > { %v11828_v41 = vsel %vm11383_vm7, %v2155_v33, %v2156_v50  ;;  %v11832_v40 = vsel %vm11383_vm7, %v2158_v44, %v2159_v45  ;;  %v2165_v33 = vrot.slane %v2163_v31, 4  ;;  %v11852_v1 = vld [vmem:[%s11019_s20 + $0xf4] sm:$0xf]  ;;  %v11867_v51 = vld [vmem:[%s11019_s20 + $0xf0] sm:$0xf]  ;;  %v15698_v29 = vcombine.low %v11636_v47, %v11669_v62 }
  0xbf   : > { %v2168_v44 = vrot.slane %v2166_v4, 4  ;;  %v2171_v14 = vrot.slane %v2169_v34, 4  ;;  %15696 = vst [vmem:[#allocation22_spill] sm:$0xff] %v11852_v1  ;;  %v2176_v43 = vrot.slane %v11852_v1, 5  ;;  %v11864_v36 = vsel %vm11383_vm7, %v9048_v38, %v2163_v31  ;;  %v11872_v54 = vld [vmem:[%s11019_s20 + $0xfc] sm:$0xf] }
  0xc0   : > { %15697 = vst [vmem:[#allocation23_spill] sm:$0xff] %v11872_v54  ;;  %v2182_v12 = vrot.slane %v11872_v54, 5  ;;  %v11881_v45 = vsel %vm11383_vm7, %v2165_v33, %v2166_v4  ;;  %v15699_v1 = vcombine.low %v11610_v53, %v11621_v15  ;;  %v9050_v53 = vrot.slane %v1980_v52, 9  ;;  %v11907_v15 = vld [vmem:[%s11019_s20 + $0x108] sm:$0xf] }
  0xc1   : > { %10244 = vmatmul.mubr.msk.bf16.gmra.mxu1 %vm1029_vm3, %v15694_v60  ;;  %v11856_v60 = vld [vmem:[%s11019_s20 + $0xf8] sm:$0xf]  ;;  %v11885_v38 = vsel %vm11383_vm7, %v2168_v44, %v2169_v34  ;;  %v11889_v31 = vsel %vm11383_vm7, %v2171_v14, %v2172_v17  ;;  %v11897_v47 = vsel %vm11383_vm7, %v9049_v30, %v2176_v43  ;;  %15700 = vst [vmem:[#allocation24_spill] sm:$0xff] %v11907_v15  ;;  %v2189_v44 = vrot.slane %v11907_v15, 5 }
  0xc2   : > { %10247 = vmatprep.mubr.msk.bf16.mxu1 %vm1029_vm3, %v15695_v42  ;;  %v2179_v50 = vrot.slane %v11856_v60, 5  ;;  %v2178_v42 = vrot.slane %v2176_v43, 4  ;;  %v2184_v34 = vrot.slane %v2182_v12, 4  ;;  %v11920_v43 = vld [vmem:[%s11019_s20 + $0x10c] sm:$0xf] }
  0xc3   : > { %v2192_v52 = vrot.slane %v11920_v43, 5  ;;  %v2191_v30 = vrot.slane %v2189_v44, 4  ;;  %v11940_v15 = vsel %vm11383_vm7, %v9050_v53, %v2189_v44  ;;  %v11956_v53 = vld [vmem:[%s11019_s20 + $0x11c] sm:$0xf] }
  0xc4   : > { %10314 = vmatmul.mubr.msk.bf16.gmra.mxu0 %vm1029_vm3, %v15698_v29  ;;  %v2181_v62 = vrot.slane %v2179_v50, 4  ;;  %v10916_v29 = vld [vmem:[%s11019_s20 + $0x100] sm:$0x1]  ;;  %v11902_v17 = vsel %vm11383_vm7, %v2178_v42, %v2179_v50  ;;  %v1981_v42 = vld [vmem:[%s11019_s20 + $0x118] sm:$0xe]  ;;  %v15702_v50 = vcombine.low %v11205_v56, %v11223_v18  ;;  %15705 = vst [vmem:[#allocation27_spill] sm:$0xff] %v11956_v53 }
  0xc5   : > { %10317 = vmatprep.mubr.msk.bf16.mxu0 %vm1029_vm3, %v15699_v1  ;;  %v2185_v4 = vrot.slane %v10916_v29, 5  ;;  %v11915_v1 = vld [vmem:[%s11019_s20 + $0x104] sm:$0xf]  ;;  %v2194_v29 = vrot.slane %v2192_v52, 4  ;;  %v11953_v56 = vsel %vm11383_vm7, %v2191_v30, %v2192_v52  ;;  %v9051_v18 = vrot.slane %v1981_v42, 9 }
  0xc6   : > { %15701 = vst [vmem:[#allocation25_spill] sm:$0xff] %v11915_v1  ;;  %v11928_v33 = vsel %vm11383_vm7, %v2181_v62, %v2182_v12  ;;  %v11943_v1 = vld [vmem:[%s11019_s20 + $0x110] sm:$0xf]  ;;  %v10921_v62 = vld [vmem:[%s11019_s20 + $0x114] sm:$0x1]  ;;  %v2202_v44 = vrot.slane %v11956_v53, 5  ;;  %v15707_v42 = vcombine.low %v11625_v2, %v11640_v0 }
  0xc7   : > { %v11932_v14 = vsel %vm11383_vm7, %v2184_v34, %v2185_v4  ;;  %15703 = vst [vmem:[#allocation26_spill] sm:$0xff] %v11943_v1  ;;  %v2195_v12 = vrot.slane %v11943_v1, 5  ;;  %v2198_v34 = vrot.slane %v10921_v62, 5  ;;  %v15704_v4 = vcombine.low %v11244_v58, %v11250_v5  ;;  %v1982_v52 = vld [vmem:[%s11019_s20 + $0x12c] sm:$0xe] }
  0xc8   : > { %v2204_v62 = vrot.slane %v2202_v44, 4  ;;  %v2208_v58 = vrot.slane %v11286_v6, 5  ;;  %v15708_v1 = vcombine.low %v11652_v20, %v11673_v32  ;;  %v11991_v0 = vsel %vm11383_vm7, %v9051_v18, %v2202_v44  ;;  %v9247_v32 = vld [vmem:[%s11019_s20 + $0x14] sm:$0xf]  ;;  %v9248_v20 = vld [vmem:[%s11019_s20 + $0x18] sm:$0xf] }
  0xc9   : > { %10248 = vmatmul.mubr.msk.bf16.gmra.mxu1 %vm1029_vm3, %v15702_v50  ;;  %v2205_v50 = vrot.slane %v11271_v39, 5  ;;  %v2197_v5 = vrot.slane %v2195_v12, 4  ;;  %v11976_v39 = vsel %vm11383_vm7, %v2194_v29, %v2195_v12  ;;  %v11994_v29 = vld [vmem:[%s11019_s20 + $0x120] sm:$0xf]  ;;  %v2211_v12 = vrot.slane %v11297_v21, 5 }
  0xca   : > { %10251 = vmatprep.mubr.msk.bf16.mxu1 %vm1029_vm3, %v15704_v4  ;;  %v11965_v4 = vld [vmem:[%s11019_s20 + $0x118] sm:$0xf]  ;;  %15709 = vst [vmem:[#allocation29_spill] sm:$0xff] %v11994_v29  ;;  %v2210_v44 = vrot.slane %v2208_v58, 4  ;;  %v2218_v30 = vrot.slane %v11333_v13, 5  ;;  %v2221_v21 = vrot.slane %v11359_v57, 5 }
  0xcb   : > { %15706 = vst [vmem:[#allocation28_spill] sm:$0xff] %v11965_v4  ;;  %v2207_v54 = vrot.slane %v2205_v50, 4  ;;  %v11987_v2 = vsel %vm11383_vm7, %v2197_v5, %v2198_v34  ;;  %v9052_v5 = vrot.slane %v1982_v52, 9  ;;  %v3536_v52 = vshrl.u32 %v9247_v32, 16 }
  0xcc   : > { %10318 = vmatmul.mubr.msk.bf16.gmra.mxu0 %vm1029_vm3, %v15707_v42  ;;  %v2215_v42 = vrot.slane %v11326_v63, 5  ;;  %v15710_v34 = vcombine.low %v11254_v9, %v11274_v46  ;;  %v2220_v55 = vrot.slane %v2218_v30, 4  ;;  %v2224_v6 = vrot.slane %v11364_v8, 5  ;;  %v9250_v63 = vld [vmem:[%s11019_s20 + $0x20] sm:$0xf] }
  0xcd   : > { %10321 = vmatprep.mubr.msk.bf16.mxu0 %vm1029_vm3, %v15708_v1  ;;  %v12001_v1 = vsel %vm11383_vm7, %v2204_v62, %v2205_v50  ;;  %v12015_v50 = vsel %vm11383_vm7, %v2207_v54, %v2208_v58  ;;  %v9249_v62 = vld [vmem:[%s11019_s20 + $0x1c] sm:$0xf]  ;;  %v15711_v54 = vcombine.low %v11301_v27, %v11306_v35  ;;  %v2223_v58 = vrot.slane %v2221_v21, 4 }
  0xce   : > { %v2217_v18 = vrot.slane %v2215_v42, 4  ;;  %v3538_v29 = vrot.slane %v3536_v52, 4  ;;  %v3539_v53 = vshll.u32 %v9247_v32, 16  ;;  %v3545_v4 = vshll.u32 %v9248_v20, 16 }
  0xcf   : > { %v12032_v9 = vsel %vm11383_vm7, %v2210_v44, %v2211_v12  ;;  %v12036_v46 = vsel %vm11383_vm7, %v9052_v5, %v2215_v42  ;;  %v3555_v8 = vshll.u32 %v9249_v62, 16  ;;  %v15712_v27 = vcombine.low %v11677_v28, %v11688_v22 }
  0xd0   : > { %v12045_v35 = vsel %vm11383_vm7, %v2217_v18, %v2218_v30  ;;  %v12049_v32 = vsel %vm11383_vm7, %v2220_v55, %v2221_v21  ;;  %v3541_v12 = vrot.slane %v3539_v53, 5  ;;  %v12051_v5 = vrot.slane %v3545_v4, 5  ;;  %v9252_v21 = vld [vmem:[%s11019_s20 + $0x28] sm:$0xf] }
  0xd1   : > { %10252 = vmatmul.mubr.msk.bf16.gmra.mxu1 %vm1029_vm3, %v15710_v34  ;;  %v3549_v34 = vshrl.u32 %v9248_v20, 16  ;;  %v12054_v20 = vld [vmem:[%s11019_s20 + $0x24] sm:$0x1]  ;;  %v15714_v28 = vcombine.low %v11692_v10, %v11705_v37  ;;  %v12062_v22 = vsel %vm11383_vm7, %v2223_v58, %v2224_v6  ;;  %v3557_v18 = vrot.slane %v3555_v8, 5 }
  0xd2   : > { %10255 = vmatprep.mubr.msk.bf16.mxu1 %vm1029_vm3, %v15711_v54  ;;  %15713 = vst [vmem:[#allocation30_spill] sm:$0xff] %v12054_v20  ;;  %v3559_v44 = vshrl.u32 %v9249_v62, 16  ;;  %v3542_v53 = vor.u32 %v3541_v12, %v3538_v29  ;;  %v3565_v4 = vshll.u32 %v9250_v63, 16  ;;  %v3569_v42 = vshrl.u32 %v9250_v63, 16  ;;  %v9253_v54 = vld [vmem:[%s11019_s20 + $0x2c] sm:$0xf] }
  0xd3   : > { %v3551_v30 = vrot.slane %v3549_v34, 4  ;;  %v3575_v6 = vshll.u32 %v12054_v20, 16  ;;  %v15715_v63 = vcombine.low %v11315_v49, %v11338_v19  ;;  %v3583_v49 = vshll.u32 %v9252_v21, 16  ;;  %v9255_v12 = vld [vmem:[%s11019_s20 + $0x34] sm:$0xf] }
  0xd4   : > { %10322 = vmatmul.mubr.msk.bf16.gmra.mxu0 %vm1029_vm3, %v15712_v27  ;;  %v3561_v37 = vrot.slane %v3559_v44, 4  ;;  %v3543_v58 = vrot.slane %v3542_v53, 4  ;;  %v3567_v34 = vrot.slane %v3565_v4, 5  ;;  %v3571_v8 = vrot.slane %v3569_v42, 4  ;;  %v9254_v4 = vld [vmem:[%s11019_s20 + $0x30] sm:$0xf] }
  0xd5   : > { %10325 = vmatprep.mubr.msk.bf16.mxu0 %vm1029_vm3, %v15714_v28  ;;  %v3552_v10 = vor.u32 %v3551_v30, %v12051_v5  ;;  %v3580_v28 = vshrl.u32 %v9252_v21, 16  ;;  %v15716_v30 = vcombine.low %v11713_v59, %v11659_v25  ;;  %v12085_v53 = vsel %vm1126_vm0, %v11478_v16, 0  ;;  %v15717_v62 = vld [vmem:[#allocation12_spill] sm:$0xff]  ;;  %v9259_v20 = vld [vmem:[%s11019_s20 + $0x44] sm:$0xf] }
  0xd6   : > { %v3562_v27 = vor.u32 %v3561_v37, %v3557_v18  ;;  %v3572_v44 = vor.u32 %v3571_v8, %v3567_v34  ;;  %v3589_v19 = vshll.u32 %v9253_v54, 16  ;;  %v15718_v52 = vcombine.low %v11732_v24, %v15717_v62 }
  0xd7   : > { %v3553_v29 = vrot.slane %v3552_v10, 4  ;;  %v3577_v10 = vrot.slane %v3575_v6, 5  ;;  %v3582_v37 = vrot.slane %v3580_v28, 4  ;;  %v3548_v16 = vsel %vm11033_vm4, %v3543_v58, %v12051_v5 }
  0xd8   : > { %v3563_v42 = vrot.slane %v3562_v27, 4  ;;  %v3573_v59 = vrot.slane %v3572_v44, 4  ;;  %v3585_v8 = vrot.slane %v3583_v49, 5  ;;  %v12096_v21 = vrot.slane %v3589_v19, 5  ;;  %v9257_v44 = vld [vmem:[%s11019_s20 + $0x3c] sm:$0xf] }
  0xd9   : > { %10256 = vmatmul.mubr.msk.bf16.gmra.mxu1 %vm1029_vm3, %v15715_v63  ;;  %v3593_v63 = vshrl.u32 %v9253_v54, 16  ;;  %v15720_v6 = vcombine.low %v11744_v26, %v11758_v23  ;;  %v3558_v54 = vsel %vm11033_vm4, %v3553_v29, %v3557_v18  ;;  %v3599_v62 = vshll.u32 %v9254_v4, 16  ;;  %v15721_v29 = vld [vmem:[#allocation6_spill] sm:$0xff] }
  0xda   : > { %10259 = vmatprep.mubr.msk.bf16.mxu1 %vm1029_vm3, %v15716_v30  ;;  %v3603_v27 = vshrl.u32 %v9254_v4, 16  ;;  %v3568_v5 = vsel %vm11033_vm4, %v3563_v42, %v3567_v34  ;;  %v3586_v58 = vor.u32 %v3585_v8, %v3582_v37  ;;  %v3609_v28 = vshll.u32 %v9255_v12, 16  ;;  %v9258_v42 = vld [vmem:[%s11019_s20 + $0x40] sm:$0xf]  ;;  %v15723_v37 = vld [vmem:[#allocation8_spill] sm:$0xff] }
  0xdb   : > { %v3595_v24 = vrot.slane %v3593_v63, 4  ;;  %v3613_v30 = vshrl.u32 %v9255_v12, 16  ;;  %v3578_v26 = vsel %vm11033_vm4, %v3573_v59, %v3577_v10  ;;  %v3601_v49 = vrot.slane %v3599_v62, 5  ;;  %v15722_v12 = vld [vmem:[#allocation7_spill] sm:$0xff]  ;;  %v15725_v62 = vld [vmem:[#allocation10_spill] sm:$0xff] }
  0xdc   : > { %10326 = vmatmul.mubr.msk.bf16.gmra.mxu0 %vm1029_vm3, %v15718_v52  ;;  %v12105_v52 = vld [vmem:[%s11019_s20 + $0x38] sm:$0x1]  ;;  %v3605_v18 = vrot.slane %v3603_v27, 4  ;;  %v12115_v19 = vsel %vm1126_vm0, %v15721_v29, 0  ;;  %v12117_v4 = vrot.slane %v3609_v28, 5  ;;  %v15724_v8 = vcombine.low %v15722_v12, %v15723_v37 }
  0xdd   : > { %10329 = vmatprep.mubr.msk.bf16.mxu0 %vm1029_vm3, %v15720_v6  ;;  %v3596_v23 = vor.u32 %v3595_v24, %v12096_v21  ;;  %v3615_v63 = vrot.slane %v3613_v30, 4  ;;  %v3619_v34 = vshll.u32 %v12105_v52, 16  ;;  %v12125_v10 = vcombine.low %v3548_v16, %v3558_v54  ;;  %v15726_v27 = vld [vmem:[#allocation9_spill] sm:$0xff] }
  0xde   : > { %v3587_v59 = vrot.slane %v3586_v58, 4  ;;  %v3606_v6 = vor.u32 %v3605_v18, %v3601_v49  ;;  %v3624_v24 = vshrl.u32 %v9257_v44, 16  ;;  %v15727_v29 = vcombine.low %v15725_v62, %v15726_v27  ;;  %v9260_v18 = vld [vmem:[%s11019_s20 + $0x48] sm:$0xf]  ;;  %v9262_v27 = vld [vmem:[%s11019_s20 + $0x50] sm:$0xf] }
  0xdf   : > { %v12131_v28 = vcombine.low %v3568_v5, %v3578_v26  ;;  %v3597_v30 = vrot.slane %v3596_v23, 4  ;;  %v3616_v55 = vor.u32 %v3615_v63, %v12117_v4  ;;  %v3627_v12 = vshll.u32 %v9257_v44, 16 }
  0xe0   : > { %v3607_v37 = vrot.slane %v3606_v6, 4  ;;  %v3626_v54 = vrot.slane %v3624_v24, 4  ;;  %v3633_v58 = vshll.u32 %v9258_v42, 16  ;;  %v3621_v26 = vrot.slane %v3619_v34, 5 }
  0xe1   : > { %10260 = vmatmul.mubr.msk.bf16.gmra.mxu1 %vm1029_vm3, %v15724_v8  ;;  %v15728_v8 = vcombine.low %v11783_v11, %v11797_v7  ;;  %v3617_v5 = vrot.slane %v3616_v55, 4  ;;  %v3629_v23 = vrot.slane %v3627_v12, 5  ;;  %v3637_v62 = vshrl.u32 %v9258_v42, 16  ;;  %v12151_v11 = vld [vmem:[%s11019_s20 + $0x4c] sm:$0x1] }
  0xe2   : > { %10263 = vmatprep.mubr.msk.bf16.mxu1 %vm1029_vm3, %v15727_v29  ;;  %v15729_v63 = vcombine.low %v11804_v48, %v11808_v3  ;;  %v3592_v44 = vsel %vm11033_vm4, %v3587_v59, %v12096_v21  ;;  %v12148_v6 = vrot.slane %v3633_v58, 5  ;;  %v3643_v24 = vshll.u32 %v9259_v20, 16 }
  0xe3   : > { %v3647_v7 = vshrl.u32 %v9259_v20, 16  ;;  %v3602_v34 = vsel %vm11033_vm4, %v3597_v30, %v3601_v49  ;;  %v3630_v42 = vor.u32 %v3629_v23, %v3626_v54  ;;  %v3639_v48 = vrot.slane %v3637_v62, 4  ;;  %v9263_v30 = vld [vmem:[%s11019_s20 + $0x54] sm:$0xf]  ;;  %v15731_v54 = vld [vmem:[#allocation11_spill] sm:$0xff]  ;;  %v15732_v23 = vld [vmem:[#allocation13_spill] sm:$0xff] }
  0xe4   : > { %10330 = vmatmul.mubr.msk.bf16.gmra.mxu0 %vm1029_vm3, %v15728_v8  ;;  %v3653_v3 = vshll.u32 %v9260_v18, 16  ;;  %v3612_v21 = vsel %vm11033_vm4, %v3607_v37, %v12117_v4  ;;  %v3645_v59 = vrot.slane %v3643_v24, 5  ;;  %v3657_v12 = vshrl.u32 %v9260_v18, 16 }
  0xe5   : > { %10333 = vmatprep.mubr.msk.bf16.mxu0 %vm1029_vm3, %v15729_v63  ;;  %v3649_v29 = vrot.slane %v3647_v7, 4  ;;  %v3622_v20 = vsel %vm11033_vm4, %v3617_v5, %v3621_v26  ;;  %v3640_v58 = vor.u32 %v3639_v48, %v12148_v6  ;;  %v3663_v49 = vshll.u32 %v12151_v11, 16  ;;  %v9264_v7 = vld [vmem:[%s11019_s20 + $0x58] sm:$0xf]  ;;  %v15736_v26 = vld [vmem:[#allocation16_spill] sm:$0xff]  ;;  %v15737_v48 = vld [vmem:[#allocation14_spill] sm:$0xff] }
  0xe6   : > { %v12153_v55 = vpop.f32.mrf.mxu0  ;;  %v3655_v8 = vrot.slane %v3653_v3, 5  ;;  %v15733_v62 = vcombine.low %v15731_v54, %v15732_v23  ;;  %v3631_v37 = vrot.slane %v3630_v42, 4  ;;  %v3659_v24 = vrot.slane %v3657_v12, 4 }
  0xe7   : > { %15730 = vst [vmem:[#allocation12_spill] sm:$0xff] %v12153_v55  ;;  %v3650_v18 = vor.u32 %v3649_v29, %v3645_v59  ;;  %v3668_v5 = vshrl.u32 %v9262_v27, 16  ;;  %v15738_v3 = vcombine.low %v15736_v26, %v15737_v48  ;;  %v12179_v16 = vcombine.low %v3592_v44, %v3602_v34  ;;  %v9265_v44 = vld [vmem:[%s11019_s20 + $0x5c] sm:$0xf] }
  0xe8   : > { %v12170_v63 = vpop.f32.mrf.mxu1  ;;  %v12172_v4 = vpop.f32.mrf.mxu0  ;;  %v3641_v54 = vrot.slane %v3640_v58, 4  ;;  %v3665_v23 = vrot.slane %v3663_v49, 5  ;;  %v3677_v42 = vshll.u32 %v9263_v30, 16  ;;  %v15739_v29 = vcombine.low %v11828_v41, %v11832_v40  ;;  %v12202_v49 = vld [vmem:[%s11019_s20 + $0x60] sm:$0x1] }
  0xe9   : > { %10264 = vmatmul.mubr.msk.bf16.gmra.mxu1 %vm1029_vm3, %v15733_v62  ;;  %15734 = vst [vmem:[#allocation6_spill] sm:$0xff] %v12170_v63  ;;  %15735 = vst [vmem:[#allocation7_spill] sm:$0xff] %v12172_v4  ;;  %v3671_v62 = vshll.u32 %v9262_v27, 16  ;;  %v3651_v55 = vrot.slane %v3650_v18, 4  ;;  %v3660_v63 = vor.u32 %v3659_v24, %v3655_v8  ;;  %v3670_v4 = vrot.slane %v3668_v5, 4 }
  0xea   : > { %10267 = vmatprep.mubr.msk.bf16.mxu1 %vm1029_vm3, %v15738_v3  ;;  %v12185_v12 = vcombine.low %v3612_v21, %v3622_v20  ;;  %v3681_v48 = vshrl.u32 %v9263_v30, 16  ;;  %v3687_v3 = vshll.u32 %v9264_v7, 16  ;;  %v15740_v34 = vcombine.low %v11864_v36, %v11881_v45  ;;  %v12192_v27 = vpop.f32.mrf.mxu1  ;;  %v12194_v58 = vpop.f32.mrf.mxu0 }
  0xeb   : > { %v3673_v26 = vrot.slane %v3671_v62, 5  ;;  %15741 = vst [vmem:[#allocation8_spill] sm:$0xff] %v12192_v27  ;;  %v3636_v41 = vsel %vm11033_vm4, %v3631_v37, %v12148_v6  ;;  %v3646_v40 = vsel %vm11033_vm4, %v3641_v54, %v3645_v59  ;;  %v3661_v21 = vrot.slane %v3660_v63, 4  ;;  %v9267_v62 = vld [vmem:[%s11019_s20 + $0x64] sm:$0xf]  ;;  %v15753_v27 = vld [vmem:[#allocation21_spill] sm:$0xff] }
  0xec   : > { %10334 = vmatmul.mubr.msk.bf16.gmra.mxu0 %vm1029_vm3, %v15739_v29  ;;  %v3679_v20 = vrot.slane %v3677_v42, 5  ;;  %v3683_v36 = vrot.slane %v3681_v48, 4  ;;  %v3689_v30 = vrot.slane %v3687_v3, 5  ;;  %v3691_v18 = vshrl.u32 %v9264_v7, 16  ;;  %v15742_v29 = vld [vmem:[#allocation15_spill] sm:$0xff] }
  0xed   : > { %10337 = vmatprep.mubr.msk.bf16.mxu0 %vm1029_vm3, %v15740_v34  ;;  %v3674_v45 = vor.u32 %v3673_v26, %v3670_v4  ;;  %v3656_v24 = vsel %vm11033_vm4, %v3651_v55, %v3655_v8  ;;  %v3666_v5 = vsel %vm11033_vm4, %v3661_v21, %v3665_v23  ;;  %v3697_v6 = vshll.u32 %v9265_v44, 16  ;;  %v9268_v4 = vld [vmem:[%s11019_s20 + $0x68] sm:$0xf]  ;;  %v15743_v26 = vld [vmem:[#allocation17_spill] sm:$0xff]  ;;  %v12216_v55 = vpop.f32.mrf.mxu1  ;;  %v12218_v8 = vpop.f32.mrf.mxu0  ;;  %v9269_v34 = vld [vmem:[%s11019_s20 + $0x6c] sm:$0xf] }
  0xee   : > { %v3701_v37 = vshrl.u32 %v9265_v44, 16  ;;  %v3684_v63 = vor.u32 %v3683_v36, %v3679_v20  ;;  %v3693_v54 = vrot.slane %v3691_v18, 4  ;;  %v3707_v42 = vshll.u32 %v12202_v49, 16  ;;  %15745 = vst [vmem:[#allocation10_spill] sm:$0xff] %v12216_v55  ;;  %v15746_v21 = vld [vmem:[#allocation18_spill] sm:$0xff]  ;;  %v15747_v36 = vld [vmem:[#allocation19_spill] sm:$0xff] }
  0xef   : > { %v15744_v7 = vcombine.low %v15742_v29, %v15743_v26  ;;  %v12220_v23 = vcombine.low %v3636_v41, %v3646_v40  ;;  %v3675_v48 = vrot.slane %v3674_v45, 4  ;;  %v12222_v3 = vrot.slane %v3697_v6, 5 }
  0xf0   : > { %v3703_v44 = vrot.slane %v3701_v37, 4  ;;  %v15748_v18 = vcombine.low %v15746_v21, %v15747_v36  ;;  %v12229_v29 = vcombine.low %v3656_v24, %v3666_v5  ;;  %v3685_v26 = vrot.slane %v3684_v63, 4  ;;  %v9270_v63 = vld [vmem:[%s11019_s20 + $0x70] sm:$0xf] }
  0xf1   : > { %10268 = vmatmul.mubr.msk.bf16.gmra.mxu1 %vm1029_vm3, %v15744_v7  ;;  %v3694_v7 = vor.u32 %v3693_v54, %v3689_v30  ;;  %v3712_v59 = vshrl.u32 %v9267_v62, 16  ;;  %v3715_v41 = vshll.u32 %v9267_v62, 16  ;;  %v3721_v40 = vshll.u32 %v9268_v4, 16  ;;  %v12244_v62 = vpop.f32.mrf.mxu1 }
  0xf2   : > { %10271 = vmatprep.mubr.msk.bf16.mxu1 %vm1029_vm3, %v15748_v18  ;;  %v3704_v55 = vor.u32 %v3703_v44, %v12222_v3  ;;  %v3725_v45 = vshrl.u32 %v9268_v4, 16  ;;  %v15749_v6 = vcombine.low %v11885_v38, %v11889_v31  ;;  %v12236_v37 = vrot.slane %v3707_v42, 5  ;;  %15751 = vst [vmem:[#allocation9_spill] sm:$0xff] %v12244_v62  ;;  %v9271_v44 = vld [vmem:[%s11019_s20 + $0x74] sm:$0x1] }
  0xf3   : > { %v3714_v24 = vrot.slane %v3712_v59, 4  ;;  %v3731_v5 = vshll.u32 %v9269_v34, 16  ;;  %v15750_v54 = vcombine.low %v11897_v47, %v11902_v17  ;;  %v3680_v38 = vsel %vm11033_vm4, %v3675_v48, %v3679_v20 }
  0xf4   : > { %10338 = vmatmul.mubr.msk.bf16.gmra.mxu0 %vm1029_vm3, %v15749_v6  ;;  %v12246_v4 = vpop.f32.mrf.mxu0  ;;  %v3690_v31 = vsel %vm11033_vm4, %v3685_v26, %v3689_v30  ;;  %v3717_v42 = vrot.slane %v3715_v41, 5  ;;  %v12252_v59 = vrot.slane %v3721_v40, 5  ;;  %v12255_v36 = vrot.slane %v3694_v7, 4  ;;  %v9272_v6 = vld [vmem:[%s11019_s20 + $0x78] sm:$0xf]  ;;  %v15752_v7 = vld [vmem:[#allocation20_spill] sm:$0xff] }
  0xf5   : > { %10341 = vmatprep.mubr.msk.bf16.mxu0 %vm1029_vm3, %v15750_v54  ;;  %v3727_v47 = vrot.slane %v3725_v45, 4  ;;  %v12257_v17 = vrot.slane %v3731_v5, 5  ;;  %v3735_v18 = vshrl.u32 %v9269_v34, 16  ;;  %v12260_v54 = vrot.slane %v3704_v55, 4  ;;  %v9273_v40 = vld [vmem:[%s11019_s20 + $0x7c] sm:$0xf] }
  0xf6   : > { %v3718_v21 = vor.u32 %v3717_v42, %v3714_v24  ;;  %v3741_v62 = vshll.u32 %v9270_v63, 16  ;;  %v3745_v20 = vshrl.u32 %v9270_v63, 16  ;;  %v12262_v48 = vcombine.low %v3680_v38, %v3690_v31  ;;  %v12272_v55 = vpop.f32.mrf.mxu0  ;;  %v15756_v31 = vld [vmem:[#allocation22_spill] sm:$0xff] }
  0xf7   : > { %v3728_v30 = vor.u32 %v3727_v47, %v12252_v59  ;;  %v3737_v26 = vrot.slane %v3735_v18, 4  ;;  %v3751_v41 = vshll.u32 %v9271_v44, 16  ;;  %v15754_v45 = vcombine.low %v15752_v7, %v15753_v27  ;;  %v12270_v34 = vpop.f32.mrf.mxu1  ;;  %v9274_v18 = vld [vmem:[%s11019_s20 + $0x80] sm:$0xf] }
  0xf8   : > { %15755 = vst [vmem:[#allocation11_spill] sm:$0xff] %v12270_v34  ;;  %v3719_v24 = vrot.slane %v3718_v21, 4  ;;  %v3743_v5 = vrot.slane %v3741_v62, 5  ;;  %v3747_v63 = vrot.slane %v3745_v20, 4  ;;  %v3756_v38 = vshrl.u32 %v9272_v6, 16 }
  0xf9   : > { %10272 = vmatmul.mubr.msk.bf16.gmra.mxu1 %vm1029_vm3, %v15754_v45  ;;  %v15757_v42 = vcombine.low %v11867_v51, %v15756_v31  ;;  %v3700_v27 = vsel %vm11033_vm4, %v12255_v36, %v12222_v3  ;;  %v3729_v44 = vrot.slane %v3728_v30, 4  ;;  %v3738_v47 = vor.u32 %v3737_v26, %v12257_v17  ;;  %v9278_v34 = vld [vmem:[%s11019_s20 + $0x90] sm:$0xf] }
  0xfa   : > { %v3759_v7 = vshll.u32 %v9272_v6, 16  ;;  %v3710_v21 = vsel %vm11033_vm4, %v12260_v54, %v12236_v37  ;;  %v3748_v62 = vor.u32 %v3747_v63, %v3743_v5  ;;  %v3758_v51 = vrot.slane %v3756_v38, 4  ;;  %v9275_v6 = vld [vmem:[%s11019_s20 + $0x84] sm:$0xf]  ;;  %v12297_v37 = vpop.f32.mrf.mxu1  ;;  %v12299_v54 = vpop.f32.mrf.mxu0 }
  0xfb   : > { %10275 = vmatprep.mubr.msk.bf16.mxu1 %vm1029_vm3, %v15757_v42  ;;  %v3765_v20 = vshll.u32 %v9273_v40, 16  ;;  %v15758_v45 = vcombine.low %v11928_v33, %v11932_v14  ;;  %v3739_v31 = vrot.slane %v3738_v47, 4  ;;  %v3753_v3 = vrot.slane %v3751_v41, 5  ;;  %15760 = vst [vmem:[#allocation13_spill] sm:$0xff] %v12297_v37  ;;  %v9276_v42 = vld [vmem:[%s11019_s20 + $0x88] sm:$0x1] }
  0xfc   : > { %v3761_v36 = vrot.slane %v3759_v7, 5  ;;  %v3769_v30 = vshrl.u32 %v9273_v40, 16  ;;  %v15759_v26 = vcombine.low %v11940_v15, %v11953_v56  ;;  %v3724_v33 = vsel %vm11033_vm4, %v3719_v24, %v12252_v59  ;;  %v9277_v47 = vld [vmem:[%s11019_s20 + $0x8c] sm:$0xf] }
  0xfd   : > { %10342 = vmatmul.mubr.msk.bf16.gmra.mxu0 %vm1029_vm3, %v15758_v45  ;;  %v3749_v14 = vrot.slane %v3748_v62, 4  ;;  %v3767_v63 = vrot.slane %v3765_v20, 5  ;;  %v3775_v41 = vshll.u32 %v9274_v18, 16  ;;  %v3734_v40 = vsel %vm11033_vm4, %v3729_v44, %v12257_v17  ;;  %v15761_v17 = vld [vmem:[#allocation23_spill] sm:$0xff] }
  0xfe   : > { %10345 = vmatprep.mubr.msk.bf16.mxu0 %vm1029_vm3, %v15759_v26  ;;  %v3762_v38 = vor.u32 %v3761_v36, %v3758_v51  ;;  %v3771_v15 = vrot.slane %v3769_v30, 4  ;;  %v3779_v56 = vshrl.u32 %v9274_v18, 16  ;;  %v3744_v7 = vsel %vm11033_vm4, %v3739_v31, %v3743_v5  ;;  %v12318_v18 = vpop.f32.mrf.mxu1  ;;  %v12320_v51 = vpop.f32.mrf.mxu0 }
  0xff   : > { %v3777_v45 = vrot.slane %v3775_v41, 5  ;;  %v3785_v26 = vshll.u32 %v9275_v6, 16  ;;  %v3789_v37 = vshrl.u32 %v9275_v6, 16  ;;  %v3754_v59 = vsel %vm11033_vm4, %v3749_v14, %v3753_v3  ;;  %15763 = vst [vmem:[#allocation16_spill] sm:$0xff] %v12318_v18  ;;  %v15764_v3 = vld [vmem:[#allocation25_spill] sm:$0xff]  ;;  %v15765_v6 = vld [vmem:[#allocation24_spill] sm:$0xff] }
 0x100   : > { %v3763_v24 = vrot.slane %v3762_v38, 4  ;;  %v3772_v62 = vor.u32 %v3771_v15, %v3767_v63  ;;  %v3781_v20 = vrot.slane %v3779_v56, 4  ;;  %v15762_v44 = vcombine.low %v11856_v60, %v15761_v17  ;;  %v9279_v15 = vld [vmem:[%s11019_s20 + $0x94] sm:$0xf] }
 0x101   : > { %v12322_v5 = vrot.slane %v3785_v26, 5  ;;  %v3791_v31 = vrot.slane %v3789_v37, 4  ;;  %v3795_v36 = vshll.u32 %v9276_v42, 16  ;;  %v3800_v30 = vshrl.u32 %v9277_v47, 16 }
 0x102   : > { %10276 = vmatmul.mubr.msk.bf16.gmra.mxu1 %vm1029_vm3, %v15762_v44  ;;  %v15766_v14 = vcombine.low %v15764_v3, %v15765_v6  ;;  %v12328_v41 = vcombine.low %v3700_v27, %v3710_v21  ;;  %v3773_v60 = vrot.slane %v3772_v62, 4  ;;  %v3782_v38 = vor.u32 %v3781_v20, %v3777_v45  ;;  %v12347_v62 = vpop.f32.mrf.mxu1 }
 0x103   : > { %v3803_v56 = vshll.u32 %v9277_v47, 16  ;;  %v12331_v17 = vcombine.low %v3724_v33, %v3734_v40  ;;  %v3792_v26 = vor.u32 %v3791_v31, %v12322_v5  ;;  %v3802_v37 = vrot.slane %v3800_v30, 4  ;;  %v9280_v33 = vld [vmem:[%s11019_s20 + $0x98] sm:$0xf]  ;;  %15769 = vst [vmem:[#allocation14_spill] sm:$0xff] %v12347_v62 }
 0x104   : > { %10279 = vmatprep.mubr.msk.bf16.mxu1 %vm1029_vm3, %v15766_v14  ;;  %v3809_v42 = vshll.u32 %v9278_v34, 16  ;;  %v15767_v44 = vcombine.low %v11976_v39, %v11987_v2  ;;  %v12338_v3 = vcombine.low %v3744_v7, %v3754_v59  ;;  %v3768_v27 = vsel %vm11033_vm4, %v3763_v24, %v3767_v63  ;;  %v12349_v20 = vpop.f32.mrf.mxu0  ;;  %v9282_v31 = vld [vmem:[%s11019_s20 + $0xa0] sm:$0xf] }
 0x105   : > { %v3805_v21 = vrot.slane %v3803_v56, 5  ;;  %v3813_v47 = vshrl.u32 %v9278_v34, 16  ;;  %v15768_v40 = vcombine.low %v11991_v0, %v12001_v1  ;;  %v3778_v39 = vsel %vm11033_vm4, %v3773_v60, %v3777_v45  ;;  %v9281_v34 = vld [vmem:[%s11019_s20 + $0x9c] sm:$0x1] }
 0x106   : > { %10346 = vmatmul.mubr.msk.bf16.gmra.mxu0 %vm1029_vm3, %v15767_v44  ;;  %v12353_v2 = vrot.slane %v3795_v36, 5  ;;  %v12355_v7 = vrot.slane %v3809_v42, 5  ;;  %v3819_v63 = vshll.u32 %v9279_v15, 16  ;;  %v12358_v59 = vrot.slane %v3782_v38, 4  ;;  %v9283_v38 = vld [vmem:[%s11019_s20 + $0xa4] sm:$0xf] }
 0x107   : > { %10349 = vmatprep.mubr.msk.bf16.mxu0 %vm1029_vm3, %v15768_v40  ;;  %v3806_v24 = vor.u32 %v3805_v21, %v3802_v37  ;;  %v3815_v0 = vrot.slane %v3813_v47, 4  ;;  %v3823_v1 = vshrl.u32 %v9279_v15, 16  ;;  %v12361_v30 = vrot.slane %v3792_v26, 4  ;;  %v15770_v37 = vld [vmem:[#allocation26_spill] sm:$0xff]  ;;  %v12377_v26 = vpop.f32.mrf.mxu0  ;;  %v15773_v40 = vld [vmem:[#allocation28_spill] sm:$0xff] }
 0x108   : > { %v12363_v6 = vrot.slane %v3819_v63, 5  ;;  %v3829_v14 = vshll.u32 %v9280_v33, 16  ;;  %v3833_v56 = vshrl.u32 %v9280_v33, 16  ;;  %v12365_v45 = vcombine.low %v3768_v27, %v3778_v39  ;;  %v15774_v39 = vld [vmem:[#allocation27_spill] sm:$0xff] }
 0x109   : > { %v12367_v36 = vrot.slane %v3806_v24, 4  ;;  %v3816_v60 = vor.u32 %v3815_v0, %v12355_v7  ;;  %v3825_v42 = vrot.slane %v3823_v1, 4  ;;  %v15771_v44 = vcombine.low %v11920_v43, %v15770_v37  ;;  %v12375_v15 = vpop.f32.mrf.mxu1  ;;  %v9284_v1 = vld [vmem:[%s11019_s20 + $0xa8] sm:$0xf] }
 0x10a   : > { %15772 = vst [vmem:[#allocation15_spill] sm:$0xff] %v12375_v15  ;;  %v3831_v21 = vrot.slane %v3829_v14, 5  ;;  %v3835_v47 = vrot.slane %v3833_v56, 4  ;;  %v3839_v27 = vshll.u32 %v9281_v34, 16  ;;  %v3844_v33 = vshrl.u32 %v9282_v31, 16 }
 0x10b   : > { %10280 = vmatmul.mubr.msk.bf16.gmra.mxu1 %vm1029_vm3, %v15771_v44  ;;  %v15775_v63 = vcombine.low %v15773_v40, %v15774_v39  ;;  %v3788_v43 = vsel %vm11033_vm4, %v12358_v59, %v12322_v5  ;;  %v3817_v24 = vrot.slane %v3816_v60, 4  ;;  %v3826_v0 = vor.u32 %v3825_v42, %v12363_v6  ;;  %v9288_v15 = vld [vmem:[%s11019_s20 + $0xb8] sm:$0xf] }
 0x10c   : > { %v3847_v37 = vshll.u32 %v9282_v31, 16  ;;  %v3798_v34 = vsel %vm11033_vm4, %v12361_v30, %v12353_v2  ;;  %v3836_v14 = vor.u32 %v3835_v47, %v3831_v21  ;;  %v3846_v56 = vrot.slane %v3844_v33, 4  ;;  %v9285_v31 = vld [vmem:[%s11019_s20 + $0xac] sm:$0xf]  ;;  %v12402_v2 = vpop.f32.mrf.mxu1  ;;  %v12404_v30 = vpop.f32.mrf.mxu0 }
 0x10d   : > { %10283 = vmatprep.mubr.msk.bf16.mxu1 %vm1029_vm3, %v15775_v63  ;;  %v3853_v44 = vshll.u32 %v9283_v38, 16  ;;  %v15776_v40 = vcombine.low %v12015_v50, %v12032_v9  ;;  %v3827_v39 = vrot.slane %v3826_v0, 4  ;;  %v3841_v5 = vrot.slane %v3839_v27, 5  ;;  %15778 = vst [vmem:[#allocation17_spill] sm:$0xff] %v12402_v2  ;;  %v9286_v63 = vld [vmem:[%s11019_s20 + $0xb0] sm:$0x1] }
 0x10e   : > { %v3849_v59 = vrot.slane %v3847_v37, 5  ;;  %v3857_v60 = vshrl.u32 %v9283_v38, 16  ;;  %v15777_v42 = vcombine.low %v12036_v46, %v12045_v35  ;;  %v3812_v50 = vsel %vm11033_vm4, %v12367_v36, %v12355_v7  ;;  %v9287_v0 = vld [vmem:[%s11019_s20 + $0xb4] sm:$0xf] }
 0x10f   : > { %10350 = vmatmul.mubr.msk.bf16.gmra.mxu0 %vm1029_vm3, %v15776_v40  ;;  %v3837_v9 = vrot.slane %v3836_v14, 4  ;;  %v3855_v47 = vrot.slane %v3853_v44, 5  ;;  %v3863_v27 = vshll.u32 %v9284_v1, 16  ;;  %v3822_v38 = vsel %vm11033_vm4, %v3817_v24, %v12363_v6  ;;  %v15779_v6 = vld [vmem:[#allocation29_spill] sm:$0xff]  ;;  %v15780_v24 = vld [vmem:[#allocation3_spill] sm:$0xff] }
 0x110   : > { %10353 = vmatprep.mubr.msk.bf16.mxu0 %vm1029_vm3, %v15777_v42  ;;  %v3850_v46 = vor.u32 %v3849_v59, %v3846_v56  ;;  %v3859_v35 = vrot.slane %v3857_v60, 4  ;;  %v3867_v33 = vshrl.u32 %v9284_v1, 16  ;;  %v3832_v37 = vsel %vm11033_vm4, %v3827_v39, %v3831_v21  ;;  %v12424_v1 = vpop.f32.mrf.mxu1  ;;  %v12426_v59 = vpop.f32.mrf.mxu0 }
 0x111   : > { %v3865_v40 = vrot.slane %v3863_v27, 5  ;;  %v3873_v42 = vshll.u32 %v9285_v31, 16  ;;  %v3877_v2 = vshrl.u32 %v9285_v31, 16  ;;  %v3842_v7 = vsel %vm11033_vm4, %v3837_v9, %v3841_v5  ;;  %15782 = vst [vmem:[#allocation18_spill] sm:$0xff] %v12424_v1  ;;  %v15783_v5 = vld [vmem:[#allocation4_spill] sm:$0xff]  ;;  %v15784_v9 = vld [vmem:[#allocation5_spill] sm:$0xff] }
 0x112   : > { %v3851_v36 = vrot.slane %v3850_v46, 4  ;;  %v3860_v14 = vor.u32 %v3859_v35, %v3855_v47  ;;  %v3869_v44 = vrot.slane %v3867_v33, 4  ;;  %v15781_v56 = vcombine.low %v15779_v6, %v15780_v24  ;;  %v9289_v6 = vld [vmem:[%s11019_s20 + $0xbc] sm:$0xf] }
 0x113   : > { %v12428_v21 = vrot.slane %v3873_v42, 5  ;;  %v3879_v39 = vrot.slane %v3877_v2, 4  ;;  %v3883_v60 = vshll.u32 %v9286_v63, 16  ;;  %v3888_v31 = vshrl.u32 %v9287_v0, 16 }
 0x114   : > { %10284 = vmatmul.mubr.msk.bf16.gmra.mxu1 %vm1029_vm3, %v15781_v56  ;;  %v15785_v27 = vcombine.low %v15783_v5, %v15784_v9  ;;  %v12434_v46 = vcombine.low %v3788_v43, %v3798_v34  ;;  %v3861_v35 = vrot.slane %v3860_v14, 4  ;;  %v3870_v33 = vor.u32 %v3869_v44, %v3865_v40  ;;  %v12453_v14 = vpop.f32.mrf.mxu0 }
 0x115   : > { %v3891_v24 = vshll.u32 %v9287_v0, 16  ;;  %v12437_v56 = vcombine.low %v3812_v50, %v3822_v38  ;;  %v3880_v42 = vor.u32 %v3879_v39, %v12428_v21  ;;  %v3890_v2 = vrot.slane %v3888_v31, 4  ;;  %v9290_v38 = vld [vmem:[%s11019_s20 + $0xc0] sm:$0xf]  ;;  %v12451_v0 = vpop.f32.mrf.mxu1  ;;  %v9292_v31 = vld [vmem:[%s11019_s20 + $0xc8] sm:$0xf] }
 0x116   : > { %10287 = vmatprep.mubr.msk.bf16.mxu1 %vm1029_vm3, %v15785_v27  ;;  %v3897_v63 = vshll.u32 %v9288_v15, 16  ;;  %v15786_v5 = vcombine.low %v12049_v32, %v12062_v22  ;;  %v12444_v9 = vcombine.low %v3832_v37, %v3842_v7  ;;  %v3856_v43 = vsel %vm11033_vm4, %v3851_v36, %v3855_v47  ;;  %15787 = vst [vmem:[#allocation19_spill] sm:$0xff] %v12451_v0  ;;  %v9291_v47 = vld [vmem:[%s11019_s20 + $0xc4] sm:$0x1]  ;;  %v10806_v36 = vld [vmem:[%s11019_s20 + $0x14] sm:$0xff]  }
 0x117   : > { %v3893_v34 = vrot.slane %v3891_v24, 5  ;;  %v3901_v50 = vshrl.u32 %v9288_v15, 16  ;;  %v3866_v32 = vsel %vm11033_vm4, %v3861_v35, %v3865_v40  ;;  %v12457_v22 = vrot.slane %v3883_v60, 5 }
 0x118   : > { %10354 = vmatmul.mubr.msk.bf16.gmra.mxu0 %vm1029_vm3, %v15786_v5  ;;  %v12459_v37 = vrot.slane %v3897_v63, 5  ;;  %v3907_v7 = vshll.u32 %v9289_v6, 16  ;;  %v12463_v15 = vrot.slane %v3870_v33, 4  ;;  %v12466_v27 = vrot.slane %v3880_v42, 4  ;;  %v9293_v33 = vld [vmem:[%s11019_s20 + $0xcc] sm:$0xf]  ;;  %v12482_v42 = vpop.f32.mrf.mxu0 }
 0x119   : > { %10425 = vmatprep.mubr.msk.bf16.mxu0 %vm1029_vm3, %v12125_v10  ;;  %v3894_v44 = vor.u32 %v3893_v34, %v3890_v2  ;;  %v3903_v39 = vrot.slane %v3901_v50, 4  ;;  %v3911_v10 = vshrl.u32 %v9289_v6, 16  ;;  %v3917_v5 = vshll.u32 %v9290_v38, 16  ;;  %v12480_v6 = vpop.f32.mrf.mxu1 }
 0x11a   : > { %v12468_v24 = vrot.slane %v3907_v7, 5  ;;  %v3921_v40 = vshrl.u32 %v9290_v38, 16  ;;  %v12470_v60 = vcombine.low %v3856_v43, %v3866_v32  ;;  %v15788_v2 = vcombine.low %v11333_v13, %v11359_v57  ;;  %15789 = vst [vmem:[#allocation20_spill] sm:$0xff] %v12480_v6  ;;  %v9294_v7 = vld [vmem:[%s11019_s20 + $0xd0] sm:$0xf] }
 0x11b   : > { %v12472_v35 = vrot.slane %v3894_v44, 4  ;;  %v3904_v63 = vor.u32 %v3903_v39, %v12459_v37  ;;  %v3913_v0 = vrot.slane %v3911_v10, 4  ;;  %v12484_v34 = vrot.slane %v3917_v5, 5 }
 0x11c   : > { %10288 = vmatmul.mubr.msk.bf16.gmra.mxu1 %vm1029_vm3, %v15788_v2  ;;  %v3923_v43 = vrot.slane %v3921_v40, 4  ;;  %v3927_v50 = vshll.u32 %v9291_v47, 16  ;;  %v3932_v38 = vshrl.u32 %v9292_v31, 16  ;;  %v3876_v13 = vsel %vm11033_vm4, %v12463_v15, %v12428_v21 }
 0x11d   : > { %10359 = vmatprep.mubr.msk.bf16.mxu1 %vm1029_vm3, %v10806_v36  ;;  %v3905_v57 = vrot.slane %v3904_v63, 4  ;;  %v3914_v32 = vor.u32 %v3913_v0, %v12468_v24  ;;  %v3935_v44 = vshll.u32 %v9292_v31, 16  ;;  %v3886_v47 = vsel %vm11033_vm4, %v12466_v27, %v12457_v22  ;;  %v9295_v0 = vld [vmem:[%s11019_s20 + $0xd4] sm:$0xf]  ;;  %v10807_v31 = vld [vmem:[%s11019_s20 + $0x1c] sm:$0xff]   ;;  %v10808_v63 = vld [vmem:[%s11019_s20 + $0x28] sm:$0xff]   ;;  %v12506_v22 = vpop.f32.mrf.mxu1  ;;  %v12508_v27 = vpop.f32.mrf.mxu0 }
 0x11e   : > { %v3924_v39 = vor.u32 %v3923_v43, %v12484_v34  ;;  %v3934_v36 = vrot.slane %v3932_v38, 4  ;;  %v3941_v10 = vshll.u32 %v9293_v33, 16  ;;  %v3929_v21 = vrot.slane %v3927_v50, 5  ;;  %15790 = vst [vmem:[#allocation21_spill] sm:$0xff] %v12506_v22 }
 0x11f   : > { %v3915_v5 = vrot.slane %v3914_v32, 4  ;;  %v3937_v15 = vrot.slane %v3935_v44, 5  ;;  %v3945_v40 = vshrl.u32 %v9293_v33, 16  ;;  %v3951_v43 = vshll.u32 %v9294_v7, 16  ;;  %v9296_v32 = vld [vmem:[%s11019_s20 + $0xd8] sm:$0x1] }
 0x120   : > { %10426 = vmatmul.mubr.msk.bf16.vlgmr.msra.gmra.mxu0 %vm1029_vm3, %v12131_v28  ;;  %v3900_v28 = vsel %vm11033_vm4, %v12472_v35, %v12459_v37  ;;  %v3925_v33 = vrot.slane %v3924_v39, 4  ;;  %v12514_v2 = vrot.slane %v3941_v10, 5  ;;  %v3955_v38 = vshrl.u32 %v9294_v7, 16  ;;  %v9297_v44 = vld [vmem:[%s11019_s20 + $0xdc] sm:$0xf]  ;;  %v12529_v7 = vpop.f32.mrf.mxu1 }
 0x121   : > { %10556 = vmatpush3.bf16.msra.mxu0 %v12115_v19  ;;  %10429 = vmatprep.mubr.msk.bf16.mxu0 %vm1029_vm3, %v12179_v16  ;;  %v3910_v19 = vsel %vm11033_vm4, %v3905_v57, %v12468_v24  ;;  %v3938_v50 = vor.u32 %v3937_v15, %v3934_v36  ;;  %v3947_v16 = vrot.slane %v3945_v40, 4  ;;  %v3920_v22 = vsel %vm11033_vm4, %v3915_v5, %v12484_v34  ;;  %v9298_v57 = vld [vmem:[%s11019_s20 + $0xe0] sm:$0xf]  ;;  %v12531_v36 = vpop.f32.mrf.mxu0 }
 0x122   : > { %v3953_v6 = vrot.slane %v3951_v43, 5  ;;  %v3961_v37 = vshll.u32 %v9295_v0, 16  ;;  %v3965_v35 = vshrl.u32 %v9295_v0, 16  ;;  %v3930_v39 = vsel %vm11033_vm4, %v3925_v33, %v3929_v21  ;;  %15791 = vst [vmem:[#allocation22_spill] sm:$0xff] %v12529_v7 }
 0x123   : > { %v3939_v10 = vrot.slane %v3938_v50, 4  ;;  %v3948_v1 = vor.u32 %v3947_v16, %v12514_v2  ;;  %v3957_v24 = vrot.slane %v3955_v38, 4  ;;  %v3971_v5 = vshll.u32 %v9296_v32, 16  ;;  %v12543_v50 = vld [vmem:[%s15570_s1 + $0xe] sm:$0x3] }
 0x124   : > { %10360 = vmatmul.mubr.msk.bf16.vlgmr.msra.gmra.mxu1 %vm1029_vm3, %v10807_v31  ;;  %v12533_v15 = vrot.slane %v3961_v37, 5  ;;  %v3967_v34 = vrot.slane %v3965_v35, 4  ;;  %v3976_v40 = vshrl.u32 %v9297_v44, 16  ;;  %v12537_v21 = vcombine.low %v3876_v13, %v3886_v47  ;;  %v9299_v31 = vld [vmem:[%s11019_s20 + $0xe4] sm:$0xf] }
 0x125   : > { %10490 = vmatpush3.bf16.msra.mxu1 %v12085_v53  ;;  %10363 = vmatprep.mubr.msk.bf16.mxu1 %vm1029_vm3, %v10808_v63  ;;  %v3949_v0 = vrot.slane %v3948_v1, 4  ;;  %v3958_v33 = vor.u32 %v3957_v24, %v3953_v6  ;;  %v3979_v43 = vshll.u32 %v9297_v44, 16  ;;  %v12545_v16 = vcombine.low %v3900_v28, %v3910_v19  ;;  %v9300_v28 = vld [vmem:[%s11019_s20 + $0xe8] sm:$0xf]  ;;  %v12561_v19 = vld [vmem:[%s15570_s1 + $0x10] sm:$0x3] }
 0x126   : > { %v3968_v38 = vor.u32 %v3967_v34, %v12533_v15  ;;  %v3978_v53 = vrot.slane %v3976_v40, 4  ;;  %v3985_v32 = vshll.u32 %v9298_v57, 16  ;;  %10763 = vmatprep.subr.msk.bf16.mxu1 %vm1126_vm0, %v12543_v50  ;;  %v12552_v1 = vcombine.low %v3920_v22, %v3930_v39  ;;  %v10809_v44 = vld [vmem:[%s11019_s20 + $0x30] sm:$0xff]   ;;  %v12568_v22 = vpop.f32.mrf.mxu0  ;;  %10764 = vmatprep.subr.msk.bf16.mxu0 %vm1126_vm0, %v12561_v19  ;;  %v10810_v24 = vld [vmem:[%s11019_s20 + $0x3c] sm:$0xff]  }
 0x127   : > { %v3944_v13 = vsel %vm11033_vm4, %v3939_v10, %v12514_v2  ;;  %v3981_v47 = vrot.slane %v3979_v43, 5  ;;  %v3989_v63 = vshrl.u32 %v9298_v57, 16  ;;  %15793 = vst [vmem:[#allocation25_spill] sm:$0xff] %v12568_v22  ;;  %v3954_v2 = vsel %vm11033_vm4, %v3949_v0, %v3953_v6  ;;  %v9301_v10 = vld [vmem:[%s11019_s20 + $0xec] sm:$0x1] }
 0x128   : > { %10430 = vmatmul.mubr.msk.bf16.gmra.mxu0 %vm1029_vm3, %v12185_v12  ;;  %v12566_v12 = vpop.f32.mrf.mxu1  ;;  %v12572_v37 = vrot.slane %v3971_v5, 5  ;;  %v12574_v35 = vrot.slane %v3985_v32, 5  ;;  %v3995_v39 = vshll.u32 %v9299_v31, 16  ;;  %v12580_v57 = vrot.slane %v3958_v33, 4  ;;  %v9302_v43 = vld [vmem:[%s11019_s20 + $0xf0] sm:$0xf] }
 0x129   : > { %10433 = vmatprep.mubr.msk.bf16.mxu0 %vm1029_vm3, %v12220_v23  ;;  %15792 = vst [vmem:[#allocation23_spill] sm:$0xff] %v12566_v12  ;;  %v3982_v23 = vor.u32 %v3981_v47, %v3978_v53  ;;  %v3991_v34 = vrot.slane %v3989_v63, 4  ;;  %v3999_v40 = vshrl.u32 %v9299_v31, 16  ;;  %v12583_v12 = vrot.slane %v3968_v38, 4  ;;  %v9303_v33 = vld [vmem:[%s11019_s20 + $0xf4] sm:$0xf]  ;;  %v12596_v31 = vpop.f32.mrf.mxu0 }
 0x12a   : > { %v12585_v6 = vrot.slane %v3995_v39, 5  ;;  %v4005_v5 = vshll.u32 %v9300_v28, 16  ;;  %v4009_v0 = vshrl.u32 %v9300_v28, 16  ;;  %v12587_v32 = vcombine.low %v3944_v13, %v3954_v2  ;;  %v12594_v53 = vpop.f32.mrf.mxu1  ;;  %15795 = vst [vmem:[#allocation26_spill] sm:$0xff] %v12596_v31  ;;  %v9304_v39 = vld [vmem:[%s11019_s20 + $0xf8] sm:$0xf] }
 0x12b   : > { %v12589_v7 = vrot.slane %v3982_v23, 4  ;;  %v3992_v62 = vor.u32 %v3991_v34, %v12574_v35  ;;  %v4001_v18 = vrot.slane %v3999_v40, 4  ;;  %15794 = vst [vmem:[#allocation24_spill] sm:$0xff] %v12594_v53  ;;  %v4015_v63 = vshll.u32 %v9301_v10, 16  ;;  %v12631_v53 = vld [vmem:[%s11019_s20 + $0x100] sm:$0x1] }
 0x12c   : > { %10364 = vmatmul.mubr.msk.bf16.gmra.mxu1 %vm1029_vm3, %v10809_v44  ;;  %v12598_v38 = vrot.slane %v4005_v5, 5  ;;  %v4011_v47 = vrot.slane %v4009_v0, 4  ;;  %v4020_v28 = vshrl.u32 %v9302_v43, 16  ;;  %v3964_v13 = vsel %vm11033_vm4, %v12580_v57, %v12533_v15  ;;  %v10812_v0 = vld [vmem:[%s11019_s20 + $0x50] sm:$0xff]  }
 0x12d   : > { %10367 = vmatprep.mubr.msk.bf16.mxu1 %vm1029_vm3, %v10810_v24  ;;  %v3993_v44 = vrot.slane %v3992_v62, 4  ;;  %v4002_v2 = vor.u32 %v4001_v18, %v12585_v6  ;;  %v4023_v23 = vshll.u32 %v9302_v43, 16  ;;  %v3974_v10 = vsel %vm11033_vm4, %v12583_v12, %v12572_v37  ;;  %v9305_v18 = vld [vmem:[%s11019_s20 + $0xfc] sm:$0xf]  ;;  %v10811_v43 = vld [vmem:[%s11019_s20 + $0x44] sm:$0xff]   ;;  %v12619_v12 = vpop.f32.mrf.mxu1  ;;  %v12621_v37 = vpop.f32.mrf.mxu0 }
 0x12e   : > { %v4012_v34 = vor.u32 %v4011_v47, %v12598_v38  ;;  %v4022_v24 = vrot.slane %v4020_v28, 4  ;;  %v4029_v40 = vshll.u32 %v9303_v33, 16  ;;  %v4017_v15 = vrot.slane %v4015_v63, 5  ;;  %15796 = vst [vmem:[#allocation28_spill] sm:$0xff] %v12619_v12  ;;  %15797 = vst [vmem:[#allocation27_spill] sm:$0xff] %v12621_v37 }
 0x12f   : > { %v4003_v5 = vrot.slane %v4002_v2, 4  ;;  %v4025_v57 = vrot.slane %v4023_v23, 5  ;;  %v4033_v62 = vshrl.u32 %v9303_v33, 16  ;;  %v4039_v33 = vshll.u32 %v9304_v39, 16  ;;  %v9307_v12 = vld [vmem:[%s11019_s20 + $0x104] sm:$0xf] }
 0x130   : > { %10434 = vmatmul.mubr.msk.bf16.gmra.mxu0 %vm1029_vm3, %v12229_v29  ;;  %v3988_v29 = vsel %vm11033_vm4, %v12589_v7, %v12574_v35  ;;  %v4013_v47 = vrot.slane %v4012_v34, 4  ;;  %v4031_v63 = vrot.slane %v4029_v40, 5  ;;  %v3998_v28 = vsel %vm11033_vm4, %v3993_v44, %v12585_v6  ;;  %v12640_v44 = vld [vmem:[%s11019_s20 + $0x108] sm:$0xf] }
 0x131   : > { %10437 = vmatprep.mubr.msk.bf16.mxu0 %vm1029_vm3, %v12262_v48  ;;  %v4026_v2 = vor.u32 %v4025_v57, %v4022_v24  ;;  %v4035_v23 = vrot.slane %v4033_v62, 4  ;;  %v4043_v48 = vshrl.u32 %v9304_v39, 16  ;;  %v4008_v37 = vsel %vm11033_vm4, %v4003_v5, %v12598_v38  ;;  %v12643_v39 = vpop.f32.mrf.mxu1  ;;  %v12645_v24 = vpop.f32.mrf.mxu0 }
 0x132   : > { %v4041_v31 = vrot.slane %v4039_v33, 5  ;;  %v4049_v7 = vshll.u32 %v9305_v18, 16  ;;  %v4053_v35 = vshrl.u32 %v9305_v18, 16  ;;  %v4018_v34 = vsel %vm11033_vm4, %v4013_v47, %v4017_v15  ;;  %15798 = vst [vmem:[#allocation29_spill] sm:$0xff] %v12643_v39  ;;  %15799 = vst [vmem:[#allocation3_spill] sm:$0xff] %v12645_v24 }
 0x133   : > { %v4027_v40 = vrot.slane %v4026_v2, 4  ;;  %v4036_v22 = vor.u32 %v4035_v23, %v4031_v63  ;;  %v4045_v6 = vrot.slane %v4043_v48, 4  ;;  %v4059_v5 = vshll.u32 %v12631_v53, 16  ;;  %v12654_v33 = vld [vmem:[%s11019_s20 + $0x10c] sm:$0xf] }
 0x134   : > { %10368 = vmatmul.mubr.msk.bf16.gmra.mxu1 %vm1029_vm3, %v10811_v43  ;;  %v12647_v57 = vrot.slane %v4049_v7, 5  ;;  %v4055_v38 = vrot.slane %v4053_v35, 4  ;;  %v4064_v62 = vshrl.u32 %v9307_v12, 16  ;;  %v12651_v15 = vcombine.low %v3964_v13, %v3974_v10  ;;  %15800 = vst [vmem:[#allocation4_spill] sm:$0xff] %v12654_v33 }
 0x135   : > { %10371 = vmatprep.mubr.msk.bf16.mxu1 %vm1029_vm3, %v10812_v0  ;;  %v4037_v18 = vrot.slane %v4036_v22, 4  ;;  %v4046_v47 = vor.u32 %v4045_v6, %v4041_v31  ;;  %v4067_v43 = vshll.u32 %v9307_v12, 16  ;;  %v12656_v2 = vcombine.low %v3988_v29, %v3998_v28  ;;  %v12668_v12 = vld [vmem:[%s11019_s20 + $0x110] sm:$0xf]  ;;  %v10813_v29 = vld [vmem:[%s11019_s20 + $0x58] sm:$0xff]   ;;  %v12673_v28 = vpop.f32.mrf.mxu1  ;;  %v12675_v35 = vpop.f32.mrf.mxu0  ;;  %v10814_v6 = vld [vmem:[%s11019_s20 + $0x64] sm:$0xff]  }
 0x136   : > { %v4056_v23 = vor.u32 %v4055_v38, %v12647_v57  ;;  %v4066_v48 = vrot.slane %v4064_v62, 4  ;;  %v4073_v7 = vshll.u32 %v12640_v44, 16  ;;  %v12662_v0 = vcombine.low %v4008_v37, %v4018_v34  ;;  %15801 = vst [vmem:[#allocation5_spill] sm:$0xff] %v12668_v12  ;;  %15802 = vst [vmem:[#allocation31_spill] sm:$0xff] %v12673_v28  ;;  %v9312_v28 = vld [vmem:[%s11019_s20 + $0x118] sm:$0xf] }
 0x137   : > { %v4032_v22 = vsel %vm11033_vm4, %v4027_v40, %v4031_v63  ;;  %v4069_v13 = vrot.slane %v4067_v43, 5  ;;  %v4077_v10 = vshrl.u32 %v12640_v44, 16  ;;  %15803 = vst [vmem:[#allocation32_spill] sm:$0xff] %v12675_v35  ;;  %v12679_v37 = vrot.slane %v4059_v5, 5  ;;  %v12685_v40 = vld [vmem:[%s11019_s20 + $0x114] sm:$0x1] }
 0x138   : > { %10438 = vmatmul.mubr.msk.bf16.gmra.mxu0 %vm1029_vm3, %v12328_v41  ;;  %v4042_v41 = vsel %vm11033_vm4, %v4037_v18, %v4041_v31  ;;  %v12681_v63 = vrot.slane %v4073_v7, 5  ;;  %v4083_v34 = vshll.u32 %v12654_v33, 16  ;;  %15804 = vst [vmem:[#allocation33_spill] sm:$0xff] %v12685_v40  ;;  %v12688_v38 = vrot.slane %v4046_v47, 4  ;;  %v12698_v7 = vpop.f32.mrf.mxu0 }
 0x139   : > { %10441 = vmatprep.mubr.msk.bf16.mxu0 %vm1029_vm3, %v12331_v17  ;;  %v4070_v17 = vor.u32 %v4069_v13, %v4066_v48  ;;  %v4079_v62 = vrot.slane %v4077_v10, 4  ;;  %v4087_v43 = vshrl.u32 %v12654_v33, 16  ;;  %v12692_v39 = vrot.slane %v4056_v23, 4  ;;  %15805 = vst [vmem:[#allocation34_spill] sm:$0xff] %v12698_v7  ;;  %v12706_v10 = vld [vmem:[%s11019_s20 + $0x11c] sm:$0xf]  ;;  %v12709_v23 = vpop.f32.mrf.mxu1 }
 0x13a   : > { %v12694_v31 = vrot.slane %v4083_v34, 5  ;;  %v4093_v5 = vshll.u32 %v12668_v12, 16  ;;  %v4097_v18 = vshrl.u32 %v12668_v12, 16  ;;  %v12700_v35 = vcombine.low %v4032_v22, %v4042_v41  ;;  %15806 = vst [vmem:[#allocation35_spill] sm:$0xff] %v12706_v10  ;;  %15807 = vst [vmem:[#allocation36_spill] sm:$0xff] %v12709_v23 }
 0x13b   : > { %v12702_v47 = vrot.slane %v4070_v17, 4  ;;  %v4080_v48 = vor.u32 %v4079_v62, %v12681_v63  ;;  %v4089_v13 = vrot.slane %v4087_v43, 4  ;;  %v4103_v12 = vshll.u32 %v12685_v40, 16  ;;  %v12721_v17 = vld [vmem:[%s11019_s20 + $0x120] sm:$0xf] }
 0x13c   : > { %10372 = vmatmul.mubr.msk.bf16.gmra.mxu1 %vm1029_vm3, %v10813_v29  ;;  %v12711_v34 = vrot.slane %v4093_v5, 5  ;;  %v4099_v24 = vrot.slane %v4097_v18, 4  ;;  %v4108_v7 = vshrl.u32 %v9312_v28, 16  ;;  %v4052_v22 = vsel %vm11033_vm4, %v12688_v38, %v12647_v57  ;;  %15808 = vst [vmem:[#allocation37_spill] sm:$0xff] %v12721_v17  ;;  %v12731_v57 = vpop.f32.mrf.mxu0  ;;  %v12735_v23 = vld [vmem:[%s11019_s20 + $0x124] sm:$0xf] }
 0x13d   : > { %10375 = vmatprep.mubr.msk.bf16.mxu1 %vm1029_vm3, %v10814_v6  ;;  %v4081_v41 = vrot.slane %v4080_v48, 4  ;;  %v4090_v29 = vor.u32 %v4089_v13, %v12694_v31  ;;  %v4111_v62 = vshll.u32 %v9312_v28, 16  ;;  %v4062_v43 = vsel %vm11033_vm4, %v12692_v39, %v12679_v37  ;;  %15809 = vst [vmem:[#allocation38_spill] sm:$0xff] %v12731_v57  ;;  %15810 = vst [vmem:[#allocation39_spill] sm:$0xff] %v12735_v23  ;;  %v10815_v39 = vld [vmem:[%s11019_s20 + $0x6c] sm:$0xff]   ;;  %v10816_v37 = vld [vmem:[%s11019_s20 + $0x78] sm:$0xff]  }
 0x13e   : > { %v4100_v6 = vor.u32 %v4099_v24, %v12711_v34  ;;  %v4110_v5 = vrot.slane %v4108_v7, 4  ;;  %v4117_v18 = vshll.u32 %v12706_v10, 16  ;;  %v4105_v48 = vrot.slane %v4103_v12, 5  ;;  %v12741_v24 = vpop.f32.mrf.mxu1  ;;  %v12753_v40 = vld [vmem:[%s11019_s20 + $0x128] sm:$0x1]  ;;  %v12761_v33 = vpop.f32.mrf.mxu0 }
 0x13f   : > { %v4091_v38 = vrot.slane %v4090_v29, 4  ;;  %v4113_v13 = vrot.slane %v4111_v62, 5  ;;  %v4121_v28 = vshrl.u32 %v12706_v10, 16  ;;  %15811 = vst [vmem:[#allocation40_spill] sm:$0xff] %v12741_v24  ;;  %v4127_v29 = vshll.u32 %v12721_v17, 16  ;;  %15812 = vst [vmem:[#allocation41_spill] sm:$0xff] %v12753_v40 }
 0x140   : > { %10442 = vmatmul.mubr.msk.bf16.gmra.mxu0 %vm1029_vm3, %v12338_v3  ;;  %v4076_v3 = vsel %vm11033_vm4, %v12702_v47, %v12681_v63  ;;  %v4101_v12 = vrot.slane %v4100_v6, 4  ;;  %v4119_v7 = vrot.slane %v4117_v18, 5  ;;  %v4086_v62 = vsel %vm11033_vm4, %v4081_v41, %v12694_v31  ;;  %v9317_v24 = vld [vmem:[%s11019_s20 + $0x12c] sm:$0xf]  ;;  %15813 = vst [vmem:[#allocation42_spill] sm:$0xff] %v12761_v33 }
 0x141   : > { %10445 = vmatprep.mubr.msk.bf16.mxu0 %vm1029_vm3, %v12365_v45  ;;  %v4114_v57 = vor.u32 %v4113_v13, %v4110_v5  ;;  %v4123_v10 = vrot.slane %v4121_v28, 4  ;;  %v4131_v45 = vshrl.u32 %v12721_v17, 16  ;;  %v4096_v63 = vsel %vm11033_vm4, %v4091_v38, %v12711_v34  ;;  %v12766_v28 = vld [vmem:[%s11019_s20 + $0x130] sm:$0xf]  ;;  %v12769_v17 = vpop.f32.mrf.mxu1 }
 0x142   : > { %v4129_v47 = vrot.slane %v4127_v29, 5  ;;  %v4137_v6 = vshll.u32 %v12735_v23, 16  ;;  %v4141_v18 = vshrl.u32 %v12735_v23, 16  ;;  %v4106_v31 = vsel %vm11033_vm4, %v4101_v12, %v4105_v48  ;;  %15814 = vst [vmem:[#allocation43_spill] sm:$0xff] %v12766_v28  ;;  %15815 = vst [vmem:[#allocation44_spill] sm:$0xff] %v12769_v17 }
 0x143   : > { %v4115_v41 = vrot.slane %v4114_v57, 4  ;;  %v4124_v5 = vor.u32 %v4123_v10, %v4119_v7  ;;  %v4133_v13 = vrot.slane %v4131_v45, 4  ;;  %v4147_v29 = vshll.u32 %v12753_v40, 16  ;;  %v12778_v48 = vld [vmem:[%s11019_s20 + $0x134] sm:$0xf] }
 0x144   : > { %10376 = vmatmul.mubr.msk.bf16.gmra.mxu1 %vm1029_vm3, %v10815_v39  ;;  %v12771_v34 = vrot.slane %v4137_v6, 5  ;;  %v4143_v38 = vrot.slane %v4141_v18, 4  ;;  %v4152_v23 = vshrl.u32 %v9317_v24, 16  ;;  %v12775_v33 = vcombine.low %v4052_v22, %v4062_v43  ;;  %15816 = vst [vmem:[#allocation45_spill] sm:$0xff] %v12778_v48  ;;  %v12786_v22 = vpop.f32.mrf.mxu0 }
 0x145   : > { %10379 = vmatprep.mubr.msk.bf16.mxu1 %vm1029_vm3, %v10816_v37  ;;  %v4125_v10 = vrot.slane %v4124_v5, 4  ;;  %v4134_v57 = vor.u32 %v4133_v13, %v4129_v47  ;;  %v4155_v12 = vshll.u32 %v9317_v24, 16  ;;  %v12780_v39 = vcombine.low %v4076_v3, %v4086_v62  ;;  %15817 = vst [vmem:[#allocation46_spill] sm:$0xff] %v12786_v22  ;;  %v12794_v62 = vld [vmem:[%s11019_s20 + $0x138] sm:$0xf]  ;;  %v12797_v5 = vpop.f32.mrf.mxu1  ;;  %v10818_v13 = vld [vmem:[%s11019_s20 + $0x8c] sm:$0xff]  }
 0x146   : > { %v4144_v45 = vor.u32 %v4143_v38, %v12771_v34  ;;  %v4154_v6 = vrot.slane %v4152_v23, 4  ;;  %v4161_v18 = vshll.u32 %v12766_v28, 16  ;;  %v12788_v43 = vcombine.low %v4096_v63, %v4106_v31  ;;  %15818 = vst [vmem:[#allocation47_spill] sm:$0xff] %v12794_v62  ;;  %v10817_v23 = vld [vmem:[%s11019_s20 + $0x80] sm:$0xff]   ;;  %15819 = vst [vmem:[#allocation48_spill] sm:$0xff] %v12797_v5 }
 0x147   : > { %v4120_v37 = vsel %vm11033_vm4, %v4115_v41, %v4119_v7  ;;  %v4157_v24 = vrot.slane %v4155_v12, 5  ;;  %v4165_v3 = vshrl.u32 %v12766_v28, 16  ;;  %v12803_v63 = vrot.slane %v4147_v29, 5  ;;  %v12809_v41 = vld [vmem:[%s11019_s20 + $0x13c] sm:$0x1] }
 0x148   : > { %10446 = vmatmul.mubr.msk.bf16.gmra.mxu0 %vm1029_vm3, %v12434_v46  ;;  %v4130_v46 = vsel %vm11033_vm4, %v4125_v10, %v4129_v47  ;;  %v12805_v31 = vrot.slane %v4161_v18, 5  ;;  %v4171_v7 = vshll.u32 %v12778_v48, 16  ;;  %15820 = vst [vmem:[#allocation49_spill] sm:$0xff] %v12809_v41  ;;  %v12812_v38 = vrot.slane %v4134_v57, 4  ;;  %v12822_v18 = vpop.f32.mrf.mxu0 }
 0x149   : > { %10449 = vmatprep.mubr.msk.bf16.mxu0 %vm1029_vm3, %v12437_v56  ;;  %v4158_v12 = vor.u32 %v4157_v24, %v4154_v6  ;;  %v4167_v5 = vrot.slane %v4165_v3, 4  ;;  %v4175_v17 = vshrl.u32 %v12778_v48, 16  ;;  %v9322_v56 = vld [vmem:[%s11019_s20 + $0x140] sm:$0xf]  ;;  %v12816_v22 = vrot.slane %v4144_v45, 4  ;;  %15821 = vst [vmem:[#allocation50_spill] sm:$0xff] %v12822_v18  ;;  %v12833_v45 = vpop.f32.mrf.mxu1 }
 0x14a   : > { %v12818_v47 = vrot.slane %v4171_v7, 5  ;;  %v4181_v29 = vshll.u32 %v12794_v62, 16  ;;  %v4185_v10 = vshrl.u32 %v12794_v62, 16  ;;  %v12824_v28 = vcombine.low %v4120_v37, %v4130_v46  ;;  %v12830_v3 = vld [vmem:[%s11019_s20 + $0x144] sm:$0xf]  ;;  %15823 = vst [vmem:[#allocation52_spill] sm:$0xff] %v12833_v45 }
 0x14b   : > { %v12826_v57 = vrot.slane %v4158_v12, 4  ;;  %v4168_v6 = vor.u32 %v4167_v5, %v12805_v31  ;;  %v4177_v24 = vrot.slane %v4175_v17, 4  ;;  %15822 = vst [vmem:[#allocation51_spill] sm:$0xff] %v12830_v3  ;;  %v4191_v62 = vshll.u32 %v12809_v41, 16  ;;  %v12847_v5 = vld [vmem:[%s11019_s20 + $0x148] sm:$0xf] }
 0x14c   : > { %10380 = vmatmul.mubr.msk.bf16.gmra.mxu1 %vm1029_vm3, %v10817_v23  ;;  %v12835_v7 = vrot.slane %v4181_v29, 5  ;;  %v4187_v48 = vrot.slane %v4185_v10, 4  ;;  %v4196_v18 = vshrl.u32 %v9322_v56, 16  ;;  %v4140_v17 = vsel %vm11033_vm4, %v12812_v38, %v12771_v34  ;;  %15824 = vst [vmem:[#allocation53_spill] sm:$0xff] %v12847_v5  ;;  %v12857_v34 = vpop.f32.mrf.mxu0  ;;  %v12863_v45 = vld [vmem:[%s11019_s20 + $0x14c] sm:$0xf] }
 0x14d   : > { %10383 = vmatprep.mubr.msk.bf16.mxu1 %vm1029_vm3, %v10818_v13  ;;  %v12843_v37 = vrot.slane %v4168_v6, 4  ;;  %v4178_v23 = vor.u32 %v4177_v24, %v12818_v47  ;;  %v4199_v46 = vshll.u32 %v9322_v56, 16  ;;  %v4150_v13 = vsel %vm11033_vm4, %v12816_v22, %v12803_v63  ;;  %15825 = vst [vmem:[#allocation54_spill] sm:$0xff] %v12857_v34  ;;  %15826 = vst [vmem:[#allocation55_spill] sm:$0xff] %v12863_v45  ;;  %v10819_v22 = vld [vmem:[%s11019_s20 + $0x94] sm:$0xff]   ;;  %v10820_v63 = vld [vmem:[%s11019_s20 + $0xa0] sm:$0xff]  }
 0x14e   : > { %v4188_v12 = vor.u32 %v4187_v48, %v12835_v7  ;;  %v4198_v29 = vrot.slane %v4196_v18, 4  ;;  %v4205_v10 = vshll.u32 %v12830_v3, 16  ;;  %v4193_v6 = vrot.slane %v4191_v62, 5  ;;  %v12866_v48 = vpop.f32.mrf.mxu1  ;;  %v12882_v41 = vld [vmem:[%s11019_s20 + $0x150] sm:$0x1]  ;;  %v12891_v40 = vpop.f32.mrf.mxu0 }
 0x14f   : > { %v12859_v38 = vrot.slane %v4178_v23, 4  ;;  %v4201_v56 = vrot.slane %v4199_v46, 5  ;;  %v4209_v24 = vshrl.u32 %v12830_v3, 16  ;;  %15827 = vst [vmem:[#allocation56_spill] sm:$0xff] %v12866_v48  ;;  %v4215_v23 = vshll.u32 %v12847_v5, 16  ;;  %15828 = vst [vmem:[#allocation57_spill] sm:$0xff] %v12891_v40 }
 0x150   : > { %10450 = vmatmul.mubr.msk.bf16.gmra.mxu0 %vm1029_vm3, %v12444_v9  ;;  %v4164_v9 = vsel %vm11033_vm4, %v12826_v57, %v12805_v31  ;;  %v4189_v62 = vrot.slane %v4188_v12, 4  ;;  %v4207_v18 = vrot.slane %v4205_v10, 5  ;;  %v4174_v46 = vsel %vm11033_vm4, %v12843_v37, %v12818_v47 }
 0x151   : > { %10453 = vmatprep.mubr.msk.bf16.mxu0 %vm1029_vm3, %v12470_v60  ;;  %v4202_v34 = vor.u32 %v4201_v56, %v4198_v29  ;;  %v4211_v48 = vrot.slane %v4209_v24, 4  ;;  %v4219_v3 = vshrl.u32 %v12847_v5, 16  ;;  %v9392_v60 = vld [vmem:[%s11019_s20 + $0x14] sm:$0xe]  ;;  %v4184_v31 = vsel %vm11033_vm4, %v12859_v38, %v12835_v7  ;;  %v12896_v24 = vpop.f32.mrf.mxu1 }
 0x152   : > { %v4217_v57 = vrot.slane %v4215_v23, 5  ;;  %v4225_v12 = vshll.u32 %v12863_v45, 16  ;;  %v4229_v10 = vshrl.u32 %v12863_v45, 16  ;;  %v4194_v47 = vsel %vm11033_vm4, %v4189_v62, %v4193_v6  ;;  %15829 = vst [vmem:[#allocation58_spill] sm:$0xff] %v12896_v24  ;;  %v10926_v24 = vld [vmem:[%s11019_s20 + $0x1c] sm:$0xf] }
 0x153   : > { %v4203_v37 = vrot.slane %v4202_v34, 4  ;;  %v4212_v29 = vor.u32 %v4211_v48, %v4207_v18  ;;  %v4221_v56 = vrot.slane %v4219_v3, 4  ;;  %v4235_v23 = vshll.u32 %v12882_v41, 16  ;;  %v10925_v3 = vld [vmem:[%s11019_s20 + $0x18] sm:$0xf] }
 0x154   : > { %10384 = vmatmul.mubr.msk.bf16.gmra.mxu1 %vm1029_vm3, %v10819_v22  ;;  %v12898_v7 = vrot.slane %v4225_v12, 5  ;;  %v4231_v38 = vrot.slane %v4229_v10, 4  ;;  %v9408_v45 = vrot.slane %v9392_v60, 9  ;;  %v4887_v62 = vrot.slane %v10925_v3, 5  ;;  %v10927_v10 = vld [vmem:[%s11019_s20 + $0x20] sm:$0xf]  ;;  %v12908_v60 = vpop.f32.mrf.mxu0 }
 0x155   : > { %10387 = vmatprep.mubr.msk.bf16.mxu1 %vm1029_vm3, %v10820_v63  ;;  %v4208_v6 = vsel %vm11033_vm4, %v4203_v37, %v4207_v18  ;;  %v4213_v34 = vrot.slane %v4212_v29, 4  ;;  %v4222_v48 = vor.u32 %v4221_v56, %v4217_v57  ;;  %v4237_v40 = vrot.slane %v4235_v23, 5  ;;  %v12916_v56 = vpop.f32.mrf.mxu1 }
 0x156   : > { %v4232_v22 = vor.u32 %v4231_v38, %v12898_v7  ;;  %v4890_v12 = vrot.slane %v10926_v24, 5  ;;  %v4893_v5 = vrot.slane %v10927_v10, 5  ;;  %v12912_v63 = vcombine.low %v4140_v17, %v4150_v13  ;;  %15830 = vst [vmem:[#allocation59_spill] sm:$0xff] %v12916_v56  ;;  %v10821_v24 = vld [vmem:[%s11019_s20 + $0xa8] sm:$0xff]   ;;  %v12924_v17 = vpop.f32.mrf.mxu0  ;;  %v10822_v13 = vld [vmem:[%s11019_s20 + $0xb4] sm:$0xff]  }
 0x157   : > { %v4218_v18 = vsel %vm11033_vm4, %v4213_v34, %v4217_v57  ;;  %v4223_v37 = vrot.slane %v4222_v48, 4  ;;  %v4889_v29 = vrot.slane %v4887_v62, 4  ;;  %v12921_v38 = vcombine.low %v4164_v9, %v4174_v46  ;;  %15831 = vst [vmem:[#allocation60_spill] sm:$0xff] %v12924_v17  ;;  %v9394_v9 = vld [vmem:[%s11019_s20 + $0x3c] sm:$0xe]  ;;  %v15851_v17 = vld [vmem:[#allocation12_spill] sm:$0xff] }
 0x158   : > { %10454 = vmatmul.mubr.msk.bf16.gmra.mxu0 %vm1029_vm3, %v12537_v21  ;;  %v4233_v23 = vrot.slane %v4232_v22, 4  ;;  %v4892_v3 = vrot.slane %v4890_v12, 4  ;;  %v4895_v10 = vrot.slane %v4893_v5, 4  ;;  %v9393_v21 = vld [vmem:[%s11019_s20 + $0x28] sm:$0xe]  ;;  %v12927_v57 = vcombine.low %v4184_v31, %v4194_v47 }
 0x159   : > { %10457 = vmatprep.mubr.msk.bf16.mxu0 %vm1029_vm3, %v12545_v16  ;;  %v12929_v34 = vcombine.low %v4208_v6, %v4218_v18  ;;  %v4228_v48 = vsel %vm11033_vm4, %v4223_v37, %v12898_v7  ;;  %v12936_v16 = vsel %vm11383_vm7, %v9408_v45, %v4887_v62  ;;  %v12943_v31 = vsel %vm11383_vm7, %v4889_v29, %v4890_v12  ;;  %v12953_v45 = vpop.f32.mrf.mxu0  ;;  %v12966_v37 = vpop.f32.mrf.mxu1 }
 0x15a   : > { %v4238_v46 = vsel %vm11033_vm4, %v4233_v23, %v4237_v40  ;;  %15832 = vst [vmem:[#allocation61_spill] sm:$0xff] %v12943_v31  ;;  %v12947_v47 = vsel %vm1126_vm0, %v12543_v50, 0  ;;  %v12951_v7 = vsel %vm1126_vm0, %v12561_v19, 0  ;;  %15835 = vst [vmem:[#allocation64_spill] sm:$0xff] %v12953_v45  ;;  %v12957_v6 = vsel %vm11383_vm7, %v4892_v3, %v4893_v5  ;;  %v15837_v40 = vld [vmem:[#allocation30_spill] sm:$0xff] }
 0x15b   : > { %15833 = vst [vmem:[#allocation62_spill] sm:$0xff] %v12947_v47  ;;  %15834 = vst [vmem:[#allocation63_spill] sm:$0xff] %v12951_v7  ;;  %v15838_v62 = vrot.slane %v15837_v40, 5  ;;  %v9409_v12 = vrot.slane %v9393_v21, 9  ;;  %v10928_v50 = vld [vmem:[%s11019_s20 + $0x2c] sm:$0xf]  ;;  %v12972_v47 = vpop.f32.mrf.mxu0 }
 0x15c   : > { %15836 = vst [vmem:[#allocation65_spill] sm:$0xff] %v12957_v6  ;;  %v4900_v18 = vrot.slane %v10928_v50, 5  ;;  %15840 = vst [vmem:[#allocation66_spill] sm:$0xff] %v12966_v37  ;;  %10388 = vmatmul.mubr.msk.bf16.gmra.mxu1 %vm1029_vm3, %v10821_v24  ;;  %v10929_v19 = vld [vmem:[%s11019_s20 + $0x30] sm:$0xf]  ;;  %v9410_v3 = vrot.slane %v9394_v9, 9 }
 0x15d   : > { %v12963_v22 = vsel %vm11383_vm7, %v4895_v10, %v15838_v62  ;;  %v4903_v29 = vrot.slane %v10929_v19, 5  ;;  %v10930_v23 = vld [vmem:[%s11019_s20 + $0x34] sm:$0xf]  ;;  %v10931_v40 = vld [vmem:[%s11019_s20 + $0x40] sm:$0xf]  ;;  %15841 = vst [vmem:[#allocation67_spill] sm:$0xff] %v12972_v47  ;;  %10391 = vmatprep.mubr.msk.bf16.mxu1 %vm1029_vm3, %v10822_v13  ;;  %v12979_v19 = vpop.f32.mrf.mxu1  ;;  %v10295_v47 = vpop.f32.mrf.mxu0 }
 0x15e   : > { %15839 = vst [vmem:[#allocation30_spill] sm:$0xff] %v12963_v22  ;;  %v4906_v5 = vrot.slane %v10930_v23, 5  ;;  %v4913_v56 = vrot.slane %v10931_v40, 5  ;;  %v4902_v21 = vrot.slane %v4900_v18, 4  ;;  %v10932_v62 = vld [vmem:[%s11019_s20 + $0x44] sm:$0xf]  ;;  %v12983_v9 = vsel %vm11383_vm7, %v9409_v12, %v4900_v18 }
 0x15f   : > { %v4916_v50 = vrot.slane %v10932_v62, 5  ;;  %v10933_v24 = vld [vmem:[%s11019_s20 + $0x48] sm:$0xf]  ;;  %15842 = vst [vmem:[#allocation68_spill] sm:$0xff] %v12979_v19  ;;  %15843 = vst [vmem:[#allocation69_spill] sm:$0xff] %v12983_v9  ;;  %v4905_v23 = vrot.slane %v4903_v29, 4  ;;  %v12988_v62 = vcombine.low %v4228_v48, %v4238_v46  ;;  %v12994_v12 = vpop.f32.mrf.mxu1 }
 0x160   : > { %v4919_v37 = vrot.slane %v10933_v24, 5  ;;  %v4908_v40 = vrot.slane %v4906_v5, 4  ;;  %v4915_v25 = vrot.slane %v4913_v56, 4  ;;  %v9395_v13 = vld [vmem:[%s11019_s20 + $0x50] sm:$0xe]  ;;  %10458 = vmatmul.mubr.msk.bf16.gmra.mxu0 %vm1029_vm3, %v12552_v1  ;;  %v12992_v24 = vsel %vm11383_vm7, %v4902_v21, %v4903_v29  ;;  %15845 = vst [vmem:[#allocation71_spill] sm:$0xff] %v12994_v12  ;;  %v2457_v21 = vpop.f32.mrf.mxu0 }
 0x161   : > { %15844 = vst [vmem:[#allocation70_spill] sm:$0xff] %v12992_v24  ;;  %v4918_v10 = vrot.slane %v4916_v50, 4  ;;  %v10823_v18 = vld [vmem:[%s11019_s20 + $0xbc] sm:$0xff]   ;;  %10461 = vmatprep.mubr.msk.bf16.mxu0 %vm1029_vm3, %v12587_v32  ;;  %v13003_v1 = vsel %vm11383_vm7, %v4905_v23, %v4906_v5  ;;  %v15847_v48 = vrot.slane %v12105_v52, 5  ;;  %v13013_v29 = vsel %vm11383_vm7, %v9410_v3, %v4913_v56  ;;  %v9396_v32 = vld [vmem:[%s11019_s20 + $0x64] sm:$0xe] }
 0x162   : > { %v4921_v19 = vrot.slane %v4919_v37, 4  ;;  %15846 = vst [vmem:[#allocation72_spill] sm:$0xff] %v13003_v1  ;;  %v10824_v12 = vld [vmem:[%s11019_s20 + $0xc8] sm:$0xff]   ;;  %v13023_v52 = vsel %vm11383_vm7, %v4915_v25, %v4916_v50  ;;  %v9411_v23 = vrot.slane %v9395_v13, 9  ;;  %v10934_v3 = vld [vmem:[%s11019_s20 + $0x54] sm:$0xf]  ;;  %v10296_v5 = vpop.f32.mrf.mxu0 }
 0x163   : > { %v13009_v46 = vsel %vm11383_vm7, %v4908_v40, %v15847_v48  ;;  %v13025_v40 = vpop.f32.mrf.mxu1  ;;  %v13029_v56 = vsel %vm11383_vm7, %v4918_v10, %v4919_v37  ;;  %v4926_v48 = vrot.slane %v10934_v3, 5  ;;  %v10935_v22 = vld [vmem:[%s11019_s20 + $0x58] sm:$0xf]  ;;  %v10936_v24 = vld [vmem:[%s11019_s20 + $0x5c] sm:$0xf]  ;;  %v9412_v50 = vrot.slane %v9396_v32, 9 }
 0x164   : > { %15848 = vst [vmem:[#allocation73_spill] sm:$0xff] %v13009_v46  ;;  %15849 = vst [vmem:[#allocation74_spill] sm:$0xff] %v13025_v40  ;;  %v4929_v45 = vrot.slane %v10935_v22, 5  ;;  %v4932_v9 = vrot.slane %v10936_v24, 5  ;;  %v15850_v46 = vrot.slane %v12151_v11, 5  ;;  %10392 = vmatmul.mubr.msk.bf16.gmra.mxu1 %vm1029_vm3, %v10823_v18  ;;  %v2460_v11 = vpop.f32.mrf.mxu0 }
 0x165   : > { %v10937_v13 = vld [vmem:[%s11019_s20 + $0x68] sm:$0xf]  ;;  %v10938_v1 = vld [vmem:[%s11019_s20 + $0x6c] sm:$0xf]  ;;  %v10229_v10 = vpop.f32.mrf.mxu1  ;;  %v4928_v3 = vrot.slane %v4926_v48, 4  ;;  %10395 = vmatprep.mubr.msk.bf16.mxu1 %vm1029_vm3, %v10824_v12 }
 0x166   : > { %v13038_v25 = vsel %vm11383_vm7, %v4921_v19, %v15850_v46  ;;  %v4939_v40 = vrot.slane %v10937_v13, 5  ;;  %v4942_v37 = vrot.slane %v10938_v1, 5  ;;  %v4931_v6 = vrot.slane %v4929_v45, 4  ;;  %v10939_v7 = vld [vmem:[%s11019_s20 + $0x70] sm:$0xf]  ;;  %v10299_v19 = vpop.f32.mrf.mxu0 }
 0x167   : > { %v4934_v22 = vrot.slane %v4932_v9, 4  ;;  %v4945_v24 = vrot.slane %v10939_v7, 5  ;;  %v1721_v31 = vadd.f32 %v10229_v10, %v15851_v17  ;;  %v13050_v1 = vsel %vm11383_vm7, %v9411_v23, %v4926_v48  ;;  %v1712_v46 = vpop.f32.mrf.mxu1  ;;  %v15857_v48 = vld [vmem:[#allocation7_spill] sm:$0xff] }
 0x168   : > { %v4941_v18 = vrot.slane %v4939_v40, 4  ;;  %v13054_v32 = vsel %vm11383_vm7, %v4928_v3, %v4929_v45  ;;  %v13058_v17 = vsel %vm11383_vm7, %v4931_v6, %v4932_v9  ;;  %v15854_v7 = vrot.slane %v12202_v49, 5  ;;  %10462 = vmatmul.mubr.msk.bf16.gmra.mxu0 %vm1029_vm3, %v12651_v15  ;;  %v9397_v6 = vld [vmem:[%s11019_s20 + $0x78] sm:$0xe]  ;;  %v10825_v3 = vld [vmem:[%s11019_s20 + $0xd0] sm:$0xff]  }
 0x169   : > { %15852 = vst [vmem:[#allocation12_spill] sm:$0xff] %v13054_v32  ;;  %15853 = vst [vmem:[#allocation75_spill] sm:$0xff] %v13058_v17  ;;  %v4944_v13 = vrot.slane %v4942_v37, 4  ;;  %v13066_v23 = vadd.f32 %v10295_v47, %v1721_v31  ;;  %v1713_v10 = vadd.f32 %v1712_v46, %v15857_v48  ;;  %v13075_v49 = vsel %vm11383_vm7, %v9412_v50, %v4939_v40  ;;  %v10230_v9 = vpop.f32.mrf.mxu1  ;;  %v10826_v48 = vld [vmem:[%s11019_s20 + $0xdc] sm:$0xff]   ;;  %v9398_v17 = vld [vmem:[%s11019_s20 + $0x8c] sm:$0xe] }
 0x16a   : > { %v13064_v12 = vsel %vm11383_vm7, %v4934_v22, %v15854_v7  ;;  %10465 = vmatprep.mubr.msk.bf16.mxu0 %vm1029_vm3, %v12656_v2  ;;  %v13085_v15 = vsel %vm11383_vm7, %v4941_v18, %v4942_v37  ;;  %v4947_v47 = vrot.slane %v4945_v24, 4  ;;  %v10940_v22 = vld [vmem:[%s11019_s20 + $0x74] sm:$0x1]  ;;  %v1724_v50 = vadd.f32 %v10230_v9, %v12194_v58  ;;  %v2473_v7 = vpop.f32.mrf.mxu0  ;;  %v10941_v31 = vld [vmem:[%s11019_s20 + $0x7c] sm:$0xf] }
 0x16b   : > { %15855 = vst [vmem:[#allocation76_spill] sm:$0xff] %v13064_v12  ;;  %15856 = vst [vmem:[#allocation77_spill] sm:$0xff] %v13066_v23  ;;  %v4948_v46 = vrot.slane %v10940_v22, 5  ;;  %v13088_v40 = vadd.f32 %v2457_v21, %v1713_v10  ;;  %v4952_v45 = vrot.slane %v10941_v31, 5  ;;  %v1715_v23 = vpop.f32.mrf.mxu1  ;;  %v13097_v37 = vsel %vm11383_vm7, %v4944_v13, %v4945_v24  ;;  %v10942_v22 = vld [vmem:[%s11019_s20 + $0x80] sm:$0xf] }
 0x16c   : > { %15859 = vst [vmem:[#allocation78_spill] sm:$0xff] %v13097_v37  ;;  %v9413_v18 = vrot.slane %v9397_v6, 9  ;;  %v4955_v21 = vrot.slane %v10942_v22, 5  ;;  %v10943_v10 = vld [vmem:[%s11019_s20 + $0x84] sm:$0xf]  ;;  %v13101_v58 = vadd.f32 %v10296_v5, %v1724_v50  ;;  %v1716_v9 = vadd.f32 %v1715_v23, %v12218_v8  ;;  %v10300_v32 = vpop.f32.mrf.mxu0  ;;  %10396 = vmatmul.mubr.msk.bf16.gmra.mxu1 %vm1029_vm3, %v10825_v3 }
 0x16d   : > { %15858 = vst [vmem:[#allocation7_spill] sm:$0xff] %v13088_v40  ;;  %v4958_v40 = vrot.slane %v10943_v10, 5  ;;  %v10944_v31 = vld [vmem:[%s11019_s20 + $0x88] sm:$0x1]  ;;  %v10233_v24 = vpop.f32.mrf.mxu1  ;;  %v13111_v13 = vsel %vm11383_vm7, %v4947_v47, %v4948_v46  ;;  %v4954_v5 = vrot.slane %v4952_v45, 4  ;;  %10399 = vmatprep.mubr.msk.bf16.mxu1 %vm1029_vm3, %v10826_v48 }
 0x16e   : > { %15860 = vst [vmem:[#allocation79_spill] sm:$0xff] %v13101_v58  ;;  %v4961_v12 = vrot.slane %v10944_v31, 5  ;;  %15861 = vst [vmem:[#allocation80_spill] sm:$0xff] %v13111_v13  ;;  %v4957_v6 = vrot.slane %v4955_v21, 4  ;;  %v13113_v23 = vadd.f32 %v2460_v11, %v1716_v9  ;;  %v1737_v50 = vadd.f32 %v10233_v24, %v12246_v4  ;;  %v2476_v22 = vpop.f32.mrf.mxu0  ;;  %v10945_v10 = vld [vmem:[%s11019_s20 + $0x90] sm:$0xf] }
 0x16f   : > { %v4960_v8 = vrot.slane %v4958_v40, 4  ;;  %v4965_v31 = vrot.slane %v10945_v10, 5  ;;  %v10946_v2 = vld [vmem:[%s11019_s20 + $0x94] sm:$0xf]  ;;  %v1728_v58 = vpop.f32.mrf.mxu1  ;;  %v13121_v47 = vsel %vm11383_vm7, %v9413_v18, %v4952_v45  ;;  %v13125_v46 = vsel %vm11383_vm7, %v4954_v5, %v4955_v21  ;;  %v10947_v9 = vld [vmem:[%s11019_s20 + $0x98] sm:$0xf] }
 0x170   : > { %15862 = vst [vmem:[#allocation81_spill] sm:$0xff] %v13113_v23  ;;  %v4968_v3 = vrot.slane %v10946_v2, 5  ;;  %v9414_v11 = vrot.slane %v9398_v17, 9  ;;  %v4971_v4 = vrot.slane %v10947_v9, 5  ;;  %v9399_v24 = vld [vmem:[%s11019_s20 + $0xa0] sm:$0xe]  ;;  %v13129_v23 = vadd.f32 %v10299_v19, %v1737_v50  ;;  %v10303_v2 = vpop.f32.mrf.mxu0  ;;  %10466 = vmatmul.mubr.msk.bf16.gmra.mxu0 %vm1029_vm3, %v12662_v0 }
 0x171   : > { %v1729_v48 = vadd.f32 %v1728_v58, %v12272_v55  ;;  %v13136_v45 = vsel %vm11383_vm7, %v4957_v6, %v4958_v40  ;;  %v13140_v17 = vsel %vm11383_vm7, %v4960_v8, %v4961_v12  ;;  %v10234_v18 = vpop.f32.mrf.mxu1  ;;  %v10827_v21 = vld [vmem:[%s11019_s20 + $0xe4] sm:$0xff]   ;;  %10469 = vmatprep.mubr.msk.bf16.mxu0 %vm1029_vm3, %v12700_v35  ;;  %v4967_v19 = vrot.slane %v4965_v31, 4  ;;  %v10828_v12 = vld [vmem:[%s11019_s20 + $0xf0] sm:$0xff]   ;;  %v10948_v8 = vld [vmem:[%s11019_s20 + $0x9c] sm:$0x1] }
 0x172   : > { %15863 = vst [vmem:[#allocation82_spill] sm:$0xff] %v13129_v23  ;;  %v4970_v0 = vrot.slane %v4968_v3, 4  ;;  %v4973_v58 = vrot.slane %v4971_v4, 4  ;;  %v1740_v40 = vadd.f32 %v10234_v18, %v12299_v54  ;;  %v2489_v6 = vpop.f32.mrf.mxu0  ;;  %v4974_v50 = vrot.slane %v10948_v8, 5  ;;  %v10949_v23 = vld [vmem:[%s11019_s20 + $0xa4] sm:$0xf] }
 0x173   : > { %v13147_v5 = vadd.f32 %v2473_v7, %v1729_v48  ;;  %v9415_v10 = vrot.slane %v9399_v24, 9  ;;  %v1731_v9 = vpop.f32.mrf.mxu1  ;;  %v4978_v13 = vrot.slane %v10949_v23, 5  ;;  %v10950_v37 = vld [vmem:[%s11019_s20 + $0xa8] sm:$0xf]  ;;  %v13163_v24 = vsel %vm11383_vm7, %v9414_v11, %v4965_v31  ;;  %v9400_v31 = vld [vmem:[%s11019_s20 + $0xb4] sm:$0xe] }
 0x174   : > { %v4981_v7 = vrot.slane %v10950_v37, 5  ;;  %v13158_v48 = vadd.f32 %v10300_v32, %v1740_v40  ;;  %v1732_v54 = vadd.f32 %v1731_v9, %v12320_v51  ;;  %v10304_v18 = vpop.f32.mrf.mxu0  ;;  %v13167_v8 = vsel %vm11383_vm7, %v4967_v19, %v4968_v3  ;;  %10400 = vmatmul.mubr.msk.bf16.gmra.mxu1 %vm1029_vm3, %v10827_v21  ;;  %v10951_v19 = vld [vmem:[%s11019_s20 + $0xac] sm:$0xf]  ;;  %v10955_v35 = vld [vmem:[%s11019_s20 + $0xc0] sm:$0xf] }
 0x175   : > { %15864 = vst [vmem:[#allocation83_spill] sm:$0xff] %v13147_v5  ;;  %v10237_v55 = vpop.f32.mrf.mxu1  ;;  %v13172_v32 = vsel %vm11383_vm7, %v4970_v0, %v4971_v4  ;;  %v13176_v51 = vsel %vm11383_vm7, %v4973_v58, %v4974_v50  ;;  %v13180_v37 = vsel %vm11383_vm7, %v9415_v10, %v4978_v13  ;;  %v4980_v23 = vrot.slane %v4978_v13, 4  ;;  %10403 = vmatprep.mubr.msk.bf16.mxu1 %vm1029_vm3, %v10828_v12  ;;  %v10952_v50 = vld [vmem:[%s11019_s20 + $0xb0] sm:$0x1]  ;;  %v10953_v13 = vld [vmem:[%s11019_s20 + $0xb8] sm:$0xf] }
 0x176   : > { %15865 = vst [vmem:[#allocation84_spill] sm:$0xff] %v13158_v48  ;;  %v13183_v3 = vadd.f32 %v2476_v22, %v1732_v54  ;;  %v1753_v11 = vadd.f32 %v10237_v55, %v12349_v20  ;;  %v2492_v21 = vpop.f32.mrf.mxu0  ;;  %v4983_v4 = vrot.slane %v4981_v7, 4  ;;  %v4984_v0 = vrot.slane %v10951_v19, 5  ;;  %v10954_v22 = vld [vmem:[%s11019_s20 + $0xbc] sm:$0xf] }
 0x177   : > { %v1744_v58 = vpop.f32.mrf.mxu1  ;;  %v13190_v40 = vsel %vm11383_vm7, %v4980_v23, %v4981_v7  ;;  %v4987_v10 = vrot.slane %v10952_v50, 5  ;;  %v4991_v9 = vrot.slane %v10953_v13, 5  ;;  %v4994_v54 = vrot.slane %v10954_v22, 5  ;;  %v10829_v50 = vld [vmem:[%s11019_s20 + $0xf8] sm:$0xff]   ;;  %v10830_v7 = vld [vmem:[%s11019_s20 + $0x104] sm:$0xff]  }
 0x178   : > { %15866 = vst [vmem:[#allocation85_spill] sm:$0xff] %v13183_v3  ;;  %v13195_v20 = vadd.f32 %v10303_v2, %v1753_v11  ;;  %v1745_v55 = vadd.f32 %v1744_v58, %v12377_v26  ;;  %v10307_v12 = vpop.f32.mrf.mxu0  ;;  %10470 = vmatmul.mubr.msk.bf16.gmra.mxu0 %vm1029_vm3, %v12775_v33  ;;  %v9416_v23 = vrot.slane %v9400_v31, 9  ;;  %v4986_v11 = vrot.slane %v4984_v0, 4  ;;  %v9401_v58 = vld [vmem:[%s11019_s20 + $0xc8] sm:$0xe] }
 0x179   : > { %v10238_v19 = vpop.f32.mrf.mxu1  ;;  %10473 = vmatprep.mubr.msk.bf16.mxu0 %vm1029_vm3, %v12780_v39  ;;  %v4993_v33 = vrot.slane %v4991_v9, 4  ;;  %v13216_v39 = vsel %vm11383_vm7, %v4983_v4, %v4984_v0  ;;  %v4996_v3 = vrot.slane %v4994_v54, 4  ;;  %v10956_v48 = vld [vmem:[%s11019_s20 + $0xc4] sm:$0x1]  ;;  %v9417_v0 = vrot.slane %v9401_v58, 9 }
 0x17a   : > { %15867 = vst [vmem:[#allocation86_spill] sm:$0xff] %v13195_v20  ;;  %v13210_v13 = vadd.f32 %v2489_v6, %v1745_v55  ;;  %v1756_v31 = vadd.f32 %v10238_v19, %v12404_v30  ;;  %v2505_v22 = vpop.f32.mrf.mxu0  ;;  %v4997_v20 = vrot.slane %v10955_v35, 5  ;;  %v13221_v26 = vsel %vm11383_vm7, %v4986_v11, %v4987_v10  ;;  %v10957_v6 = vld [vmem:[%s11019_s20 + $0xcc] sm:$0xf]  ;;  %v10958_v58 = vld [vmem:[%s11019_s20 + $0xd0] sm:$0xf] }
 0x17b   : > { %v1747_v2 = vpop.f32.mrf.mxu1  ;;  %v5000_v5 = vrot.slane %v10956_v48, 5  ;;  %v5004_v55 = vrot.slane %v10957_v6, 5  ;;  %v13230_v35 = vsel %vm11383_vm7, %v9416_v23, %v4991_v9  ;;  %v9402_v48 = vld [vmem:[%s11019_s20 + $0xdc] sm:$0xe] }
 0x17c   : > { %15868 = vst [vmem:[#allocation87_spill] sm:$0xff] %v13210_v13  ;;  %v13225_v30 = vadd.f32 %v10304_v18, %v1756_v31  ;;  %v1748_v19 = vadd.f32 %v1747_v2, %v12426_v59  ;;  %v10308_v4 = vpop.f32.mrf.mxu0  ;;  %10404 = vmatmul.mubr.msk.bf16.gmra.mxu1 %vm1029_vm3, %v10829_v50  ;;  %v13237_v18 = vsel %vm11383_vm7, %v4993_v33, %v4994_v54  ;;  %v4999_v59 = vrot.slane %v4997_v20, 4  ;;  %v10959_v31 = vld [vmem:[%s11019_s20 + $0xd4] sm:$0xf]  ;;  %v10960_v33 = vld [vmem:[%s11019_s20 + $0xd8] sm:$0x1] }
 0x17d   : > { %v10241_v10 = vpop.f32.mrf.mxu1  ;;  %v5006_v2 = vrot.slane %v5004_v55, 4  ;;  %10407 = vmatprep.mubr.msk.bf16.mxu1 %vm1029_vm3, %v10830_v7  ;;  %v5007_v50 = vrot.slane %v10958_v58, 5  ;;  %v5010_v6 = vrot.slane %v10959_v31, 5  ;;  %v13248_v54 = vsel %vm11383_vm7, %v4996_v3, %v4997_v20 }
 0x17e   : > { %15869 = vst [vmem:[#allocation88_spill] sm:$0xff] %v13225_v30  ;;  %v13239_v11 = vadd.f32 %v2492_v21, %v1748_v19  ;;  %v1769_v9 = vadd.f32 %v10241_v10, %v12453_v14  ;;  %v2508_v23 = vpop.f32.mrf.mxu0  ;;  %v13252_v21 = vsel %vm11383_vm7, %v4999_v59, %v5000_v5  ;;  %v5013_v14 = vrot.slane %v10960_v33, 5  ;;  %v10961_v19 = vld [vmem:[%s11019_s20 + $0xe0] sm:$0xf]  ;;  %v10831_v59 = vld [vmem:[%s11019_s20 + $0x10c] sm:$0xff]  }
 0x17f   : > { %v1760_v30 = vpop.f32.mrf.mxu1  ;;  %v5017_v10 = vrot.slane %v10961_v19, 5  ;;  %v13265_v5 = vsel %vm11383_vm7, %v9417_v0, %v5004_v55  ;;  %v10832_v0 = vld [vmem:[%s11019_s20 + $0x118] sm:$0xff]  }
 0x180   : > { %15870 = vst [vmem:[#allocation89_spill] sm:$0xff] %v13239_v11  ;;  %v13256_v7 = vadd.f32 %v10307_v12, %v1769_v9  ;;  %v1761_v58 = vadd.f32 %v1760_v30, %v12482_v42  ;;  %v10311_v31 = vpop.f32.mrf.mxu0  ;;  %10474 = vmatmul.mubr.msk.bf16.gmra.mxu0 %vm1029_vm3, %v12788_v43  ;;  %15872 = vst [vmem:[#allocation91_spill] sm:$0xff] %v13265_v5  ;;  %v13272_v42 = vsel %vm11383_vm7, %v5006_v2, %v5007_v50  ;;  %v15954_v5 = vld [vmem:[#allocation70_spill] sm:$0xff] }
 0x181   : > { %v10242_v20 = vpop.f32.mrf.mxu1  ;;  %10477 = vmatprep.mubr.msk.bf16.mxu0 %vm1029_vm3, %v12824_v28  ;;  %15873 = vst [vmem:[#allocation92_spill] sm:$0xff] %v13272_v42  ;;  %v5009_v12 = vrot.slane %v5007_v50, 4  ;;  %v5012_v30 = vrot.slane %v5010_v6, 4  ;;  %v9418_v43 = vrot.slane %v9402_v48, 9  ;;  %v10962_v28 = vld [vmem:[%s11019_s20 + $0xe4] sm:$0xf] }
 0x182   : > { %15871 = vst [vmem:[#allocation90_spill] sm:$0xff] %v13256_v7  ;;  %v13274_v9 = vadd.f32 %v2505_v22, %v1761_v58  ;;  %v1772_v33 = vadd.f32 %v10242_v20, %v12508_v27  ;;  %v2521_v55 = vpop.f32.mrf.mxu0  ;;  %v5020_v3 = vrot.slane %v10962_v28, 5  ;;  %v5019_v48 = vrot.slane %v5017_v10, 4  ;;  %v10963_v27 = vld [vmem:[%s11019_s20 + $0xe8] sm:$0xf] }
 0x183   : > { %v1763_v7 = vpop.f32.mrf.mxu1  ;;  %v13283_v2 = vsel %vm11383_vm7, %v5009_v12, %v5010_v6  ;;  %v13287_v22 = vsel %vm11383_vm7, %v5012_v30, %v5013_v14  ;;  %v5023_v50 = vrot.slane %v10963_v27, 5  ;;  %v9403_v12 = vld [vmem:[%s11019_s20 + $0xf0] sm:$0xe]  ;;  %v10965_v28 = vld [vmem:[%s11019_s20 + $0xf4] sm:$0xf] }
 0x184   : > { %15874 = vst [vmem:[#allocation93_spill] sm:$0xff] %v13274_v9  ;;  %15875 = vst [vmem:[#allocation94_spill] sm:$0xff] %v13283_v2  ;;  %v13290_v58 = vadd.f32 %v10308_v4, %v1772_v33  ;;  %v1764_v20 = vadd.f32 %v1763_v7, %v12531_v36  ;;  %v10312_v19 = vpop.f32.mrf.mxu0  ;;  %v10964_v9 = vld [vmem:[%s11019_s20 + $0xec] sm:$0x1]  ;;  %10408 = vmatmul.mubr.msk.bf16.gmra.mxu1 %vm1029_vm3, %v10831_v59  ;;  %v13302_v4 = vsel %vm11383_vm7, %v9418_v43, %v5017_v10  ;;  %v15880_v33 = vld [vmem:[#allocation25_spill] sm:$0xff] }
 0x185   : > { %15876 = vst [vmem:[#allocation95_spill] sm:$0xff] %v13287_v22  ;;  %v5026_v6 = vrot.slane %v10964_v9, 5  ;;  %v10245_v11 = vpop.f32.mrf.mxu1  ;;  %15878 = vst [vmem:[#allocation97_spill] sm:$0xff] %v13302_v4  ;;  %v5022_v36 = vrot.slane %v5020_v3, 4  ;;  %v5025_v7 = vrot.slane %v5023_v50, 4  ;;  %10411 = vmatprep.mubr.msk.bf16.mxu1 %vm1029_vm3, %v10832_v0  ;;  %v13313_v10 = vsel %vm11383_vm7, %v5019_v48, %v5020_v3  ;;  %v15884_v0 = vld [vmem:[#allocation26_spill] sm:$0xff] }
 0x186   : > { %15877 = vst [vmem:[#allocation96_spill] sm:$0xff] %v13290_v58  ;;  %v13304_v30 = vadd.f32 %v2508_v23, %v1764_v20  ;;  %v1785_v27 = vadd.f32 %v10245_v11, %v15880_v33  ;;  %v2524_v9 = vpop.f32.mrf.mxu0  ;;  %v5030_v58 = vrot.slane %v10965_v28, 5  ;;  %v10966_v59 = vld [vmem:[%s11019_s20 + $0xf8] sm:$0xf]  ;;  %v9404_v14 = vld [vmem:[%s11019_s20 + $0x104] sm:$0xe] }
 0x187   : > { %v5033_v13 = vrot.slane %v10966_v59, 5  ;;  %v1776_v22 = vpop.f32.mrf.mxu1  ;;  %15881 = vst [vmem:[#allocation25_spill] sm:$0xff] %v13313_v10  ;;  %v13317_v23 = vsel %vm11383_vm7, %v5022_v36, %v5023_v50  ;;  %v9419_v43 = vrot.slane %v9403_v12, 9  ;;  %v10967_v11 = vld [vmem:[%s11019_s20 + $0xfc] sm:$0xf]  ;;  %v13327_v3 = vsel %vm11383_vm7, %v5025_v7, %v5026_v6  ;;  %v10833_v36 = vld [vmem:[%s11019_s20 + $0x120] sm:$0xff]  }
 0x188   : > { %15879 = vst [vmem:[#allocation98_spill] sm:$0xff] %v13304_v30  ;;  %15882 = vst [vmem:[#allocation99_spill] sm:$0xff] %v13317_v23  ;;  %v5036_v20 = vrot.slane %v10967_v11, 5  ;;  %v13320_v33 = vadd.f32 %v10311_v31, %v1785_v27  ;;  %v1777_v28 = vadd.f32 %v1776_v22, %v15884_v0  ;;  %v10315_v30 = vpop.f32.mrf.mxu0  ;;  %10478 = vmatmul.mubr.msk.bf16.gmra.mxu0 %vm1029_vm3, %v12912_v63  ;;  %v5039_v48 = vrot.slane %v12631_v53, 5  ;;  %v15887_v11 = vld [vmem:[#allocation27_spill] sm:$0xff]  ;;  %v15888_v7 = vld [vmem:[#allocation4_spill] sm:$0xff] }
 0x189   : > { %15885 = vst [vmem:[#allocation26_spill] sm:$0xff] %v13327_v3  ;;  %v10246_v50 = vpop.f32.mrf.mxu1  ;;  %10481 = vmatprep.mubr.msk.bf16.mxu0 %vm1029_vm3, %v12921_v38  ;;  %v5032_v31 = vrot.slane %v5030_v58, 4  ;;  %v5035_v12 = vrot.slane %v5033_v13, 4  ;;  %v9420_v59 = vrot.slane %v9404_v14, 9  ;;  %v5043_v6 = vrot.slane %v12640_v44, 5  ;;  %v15890_v14 = vld [vmem:[#allocation5_spill] sm:$0xff] }
 0x18a   : > { %15883 = vst [vmem:[#allocation100_spill] sm:$0xff] %v13320_v33  ;;  %v5038_v27 = vrot.slane %v5036_v20, 4  ;;  %v13333_v22 = vadd.f32 %v2521_v55, %v1777_v28  ;;  %v1788_v63 = vadd.f32 %v10246_v50, %v15887_v11  ;;  %v2537_v0 = vpop.f32.mrf.mxu0  ;;  %v10834_v33 = vld [vmem:[%s11019_s20 + $0x12c] sm:$0xff]   ;;  %v5046_v53 = vrot.slane %v15888_v7, 5  ;;  %v9405_v38 = vld [vmem:[%s11019_s20 + $0x118] sm:$0xe] }
 0x18b   : > { %v1779_v2 = vpop.f32.mrf.mxu1  ;;  %v13345_v55 = vsel %vm11383_vm7, %v9419_v43, %v5030_v58  ;;  %v5049_v28 = vrot.slane %v15890_v14, 5  ;;  %v15892_v11 = vld [vmem:[#allocation3_spill] sm:$0xff]  ;;  %v13353_v7 = vsel %vm11383_vm7, %v5032_v31, %v5033_v13  ;;  %v13357_v42 = vsel %vm11383_vm7, %v5035_v12, %v5036_v20  ;;  %v15897_v14 = vld [vmem:[#allocation32_spill] sm:$0xff]  ;;  %v15952_v23 = vld [vmem:[#allocation62_spill] sm:$0xff] }
 0x18c   : > { %15886 = vst [vmem:[#allocation101_spill] sm:$0xff] %v13333_v22  ;;  %15889 = vst [vmem:[#allocation27_spill] sm:$0xff] %v13345_v55  ;;  %v13348_v50 = vadd.f32 %v10312_v19, %v1788_v63  ;;  %v1780_v22 = vadd.f32 %v1779_v2, %v15892_v11  ;;  %v10316_v44 = vpop.f32.mrf.mxu0  ;;  %10412 = vmatmul.mubr.msk.bf16.gmra.mxu1 %vm1029_vm3, %v10833_v36  ;;  %v13363_v58 = vsel %vm11383_vm7, %v5038_v27, %v5039_v48  ;;  %v15899_v36 = vld [vmem:[#allocation33_spill] sm:$0xff]  ;;  %v15947_v55 = vld [vmem:[#allocation30_spill] sm:$0xff] }
 0x18d   : > { %15893 = vst [vmem:[#allocation5_spill] sm:$0xff] %v13353_v7  ;;  %15894 = vst [vmem:[#allocation3_spill] sm:$0xff] %v13357_v42  ;;  %v10249_v3 = vpop.f32.mrf.mxu1  ;;  %v5045_v19 = vrot.slane %v5043_v6, 4  ;;  %v5048_v43 = vrot.slane %v5046_v53, 4  ;;  %v5051_v2 = vrot.slane %v5049_v28, 4  ;;  %10415 = vmatprep.mubr.msk.bf16.mxu1 %vm1029_vm3, %v10834_v33  ;;  %v13371_v20 = vsel %vm11383_vm7, %v9420_v59, %v5043_v6  ;;  %v15904_v33 = vld [vmem:[#allocation34_spill] sm:$0xff] }
 0x18e   : > { %15891 = vst [vmem:[#allocation4_spill] sm:$0xff] %v13348_v50  ;;  %15895 = vst [vmem:[#allocation102_spill] sm:$0xff] %v13363_v58  ;;  %v13365_v63 = vadd.f32 %v2524_v9, %v1780_v22  ;;  %v1801_v13 = vadd.f32 %v10249_v3, %v15897_v14  ;;  %v2540_v31 = vpop.f32.mrf.mxu0  ;;  %v5052_v12 = vrot.slane %v15899_v36, 5  ;;  %v9421_v27 = vrot.slane %v9405_v38, 9  ;;  %v15901_v9 = vld [vmem:[#allocation35_spill] sm:$0xff]  ;;  %v15902_v3 = vld [vmem:[#allocation37_spill] sm:$0xff] }
 0x18f   : > { %15898 = vst [vmem:[#allocation32_spill] sm:$0xff] %v13371_v20  ;;  %v1792_v11 = vpop.f32.mrf.mxu1  ;;  %v13376_v48 = vsel %vm11383_vm7, %v5045_v19, %v5046_v53  ;;  %v5056_v22 = vrot.slane %v15901_v9, 5  ;;  %v5059_v14 = vrot.slane %v15902_v3, 5  ;;  %v10835_v19 = vld [vmem:[%s11019_s20 + $0x134] sm:$0xff]   ;;  %v15908_v3 = vld [vmem:[#allocation38_spill] sm:$0xff] }
 0x190   : > { %15896 = vst [vmem:[#allocation103_spill] sm:$0xff] %v13365_v63  ;;  %15900 = vst [vmem:[#allocation33_spill] sm:$0xff] %v13376_v48  ;;  %v13380_v63 = vadd.f32 %v10315_v30, %v1801_v13  ;;  %v1793_v50 = vadd.f32 %v1792_v11, %v15904_v33  ;;  %v10319_v59 = vpop.f32.mrf.mxu0  ;;  %10482 = vmatmul.mubr.msk.bf16.gmra.mxu0 %vm1029_vm3, %v12927_v57  ;;  %v13396_v13 = vsel %vm11383_vm7, %v5048_v43, %v5049_v28  ;;  %v9406_v11 = vld [vmem:[%s11019_s20 + $0x12c] sm:$0xe]  ;;  %v15911_v43 = vld [vmem:[#allocation41_spill] sm:$0xff] }
 0x191   : > { %v10250_v38 = vpop.f32.mrf.mxu1  ;;  %10485 = vmatprep.mubr.msk.bf16.mxu0 %vm1029_vm3, %v12929_v34  ;;  %15905 = vst [vmem:[#allocation37_spill] sm:$0xff] %v13396_v13  ;;  %v13400_v57 = vsel %vm11383_vm7, %v5051_v2, %v5052_v12  ;;  %v5058_v36 = vrot.slane %v5056_v22, 4  ;;  %v10836_v34 = vld [vmem:[%s11019_s20 + $0x140] sm:$0xff]   ;;  %v5061_v6 = vrot.slane %v5059_v14, 4  ;;  %v13410_v28 = vsel %vm11383_vm7, %v9421_v27, %v5056_v22  ;;  %v15912_v12 = vld [vmem:[#allocation43_spill] sm:$0xff]  ;;  %v15913_v58 = vld [vmem:[#allocation45_spill] sm:$0xff] }
 0x192   : > { %15903 = vst [vmem:[#allocation35_spill] sm:$0xff] %v13380_v63  ;;  %15906 = vst [vmem:[#allocation34_spill] sm:$0xff] %v13400_v57  ;;  %v13403_v9 = vadd.f32 %v2537_v0, %v1793_v50  ;;  %v1804_v33 = vadd.f32 %v10250_v38, %v15908_v3  ;;  %v2553_v53 = vpop.f32.mrf.mxu0  ;;  %v15909_v63 = vld [vmem:[#allocation39_spill] sm:$0xff]  ;;  %v5065_v2 = vrot.slane %v15911_v43, 5  ;;  %v5069_v20 = vrot.slane %v15912_v12, 5  ;;  %v15915_v38 = vld [vmem:[#allocation42_spill] sm:$0xff] }
 0x193   : > { %v5062_v30 = vrot.slane %v15909_v63, 5  ;;  %v1795_v48 = vpop.f32.mrf.mxu1  ;;  %15910 = vst [vmem:[#allocation38_spill] sm:$0xff] %v13410_v28  ;;  %v5072_v0 = vrot.slane %v15913_v58, 5  ;;  %v13420_v63 = vsel %vm11383_vm7, %v5058_v36, %v5059_v14  ;;  %v9422_v42 = vrot.slane %v9406_v11, 9  ;;  %v10838_v27 = vld [vmem:[%s11019_s20 + $0x28] sm:$0xff]   ;;  %v15946_v13 = vld [vmem:[#allocation65_spill] sm:$0xff] }
 0x194   : > { %15907 = vst [vmem:[#allocation104_spill] sm:$0xff] %v13403_v9  ;;  %v13415_v50 = vadd.f32 %v10316_v44, %v1804_v33  ;;  %v1796_v3 = vadd.f32 %v1795_v48, %v15915_v38  ;;  %v10320_v9 = vpop.f32.mrf.mxu0  ;;  %15916 = vst [vmem:[#allocation41_spill] sm:$0xff] %v13420_v63  ;;  %10416 = vmatmul.mubr.msk.bf16.gmra.mxu1 %vm1029_vm3, %v10835_v19  ;;  %v5071_v58 = vrot.slane %v5069_v20, 4  ;;  %v15918_v48 = vld [vmem:[#allocation46_spill] sm:$0xff]  ;;  %v15920_v19 = vld [vmem:[#allocation47_spill] sm:$0xff] }
 0x195   : > { %v10253_v7 = vpop.f32.mrf.mxu1  ;;  %v5064_v43 = vrot.slane %v5062_v30, 4  ;;  %v5074_v44 = vrot.slane %v5072_v0, 4  ;;  %10419 = vmatprep.mubr.msk.bf16.mxu1 %vm1029_vm3, %v10836_v34  ;;  %v13432_v14 = vsel %vm11383_vm7, %v5061_v6, %v5062_v30  ;;  %v5075_v36 = vrot.slane %v15920_v19, 5  ;;  %v9407_v11 = vld [vmem:[%s11019_s20 + $0x140] sm:$0xe]  ;;  %v15953_v4 = vld [vmem:[#allocation69_spill] sm:$0xff] }
 0x196   : > { %15914 = vst [vmem:[#allocation39_spill] sm:$0xff] %v13415_v50  ;;  %v13426_v33 = vadd.f32 %v2540_v31, %v1796_v3  ;;  %v1817_v12 = vadd.f32 %v10253_v7, %v15918_v48  ;;  %v2556_v38 = vpop.f32.mrf.mxu0  ;;  %15919 = vst [vmem:[#allocation45_spill] sm:$0xff] %v13432_v14  ;;  %v15922_v7 = vld [vmem:[#allocation49_spill] sm:$0xff]  ;;  %v15923_v48 = vld [vmem:[#allocation51_spill] sm:$0xff]  ;;  %v13451_v19 = vsel %vm11383_vm7, %v9422_v42, %v5069_v20  ;;  %v9423_v50 = vrot.slane %v9407_v11, 9 }
 0x197   : > { %v1808_v22 = vpop.f32.mrf.mxu1  ;;  %v13440_v31 = vsel %vm11383_vm7, %v5064_v43, %v5065_v2  ;;  %v5078_v3 = vrot.slane %v15922_v7, 5  ;;  %v5082_v34 = vrot.slane %v15923_v48, 5  ;;  %v15925_v6 = vld [vmem:[#allocation50_spill] sm:$0xff]  ;;  %15926 = vst [vmem:[#allocation47_spill] sm:$0xff] %v13451_v19  ;;  %v9618_v63 = vld [vmem:[%s11019_s20 + $0x28] sm:$0xf] }
 0x198   : > { %15917 = vst [vmem:[#allocation43_spill] sm:$0xff] %v13426_v33  ;;  %15921 = vst [vmem:[#allocation42_spill] sm:$0xff] %v13440_v31  ;;  %v13444_v33 = vadd.f32 %v10319_v59, %v1817_v12  ;;  %v1809_v30 = vadd.f32 %v1808_v22, %v15925_v6  ;;  %v10323_v57 = vpop.f32.mrf.mxu0  ;;  %10486 = vmatmul.mubr.msk.bf16.gmra.mxu0 %vm1029_vm3, %v12988_v62  ;;  %v10837_v43 = vld [vmem:[%s11019_s20 + $0x148] sm:$0xff]   ;;  %v13460_v22 = vsel %vm11383_vm7, %v5071_v58, %v5072_v0  ;;  %v15930_v12 = vld [vmem:[#allocation54_spill] sm:$0xff] }
 0x199   : > { %v10254_v2 = vpop.f32.mrf.mxu1  ;;  %10557 = vmatprep.mubr.msk.bf16.mxu0 %vm1029_vm3, %v10838_v27  ;;  %15927 = vst [vmem:[#allocation49_spill] sm:$0xff] %v13460_v22  ;;  %v13464_v62 = vsel %vm11383_vm7, %v5074_v44, %v5075_v36  ;;  %v5077_v42 = vrot.slane %v5075_v36, 4  ;;  %v5084_v27 = vrot.slane %v5082_v34, 4  ;;  %v15931_v48 = vld [vmem:[#allocation53_spill] sm:$0xff]  ;;  %v15933_v58 = vld [vmem:[#allocation55_spill] sm:$0xff]  ;;  %v6403_v36 = vshrl.u32 %v9618_v63, 16 }
 0x19a   : > { %15924 = vst [vmem:[#allocation46_spill] sm:$0xff] %v13444_v33  ;;  %15928 = vst [vmem:[#allocation51_spill] sm:$0xff] %v13464_v62  ;;  %v13466_v20 = vadd.f32 %v2553_v53, %v1809_v30  ;;  %v1820_v11 = vadd.f32 %v10254_v2, %v15930_v12  ;;  %v2569_v7 = vpop.f32.mrf.mxu0  ;;  %v5085_v6 = vrot.slane %v15931_v48, 5  ;;  %v5088_v44 = vrot.slane %v15933_v58, 5  ;;  %v13476_v33 = vld [vmem:[%s11019_s20 + $0x2c] sm:$0xf] }
 0x19b   : > { %v1811_v59 = vpop.f32.mrf.mxu1  ;;  %v13472_v0 = vsel %vm11383_vm7, %v5077_v42, %v5078_v3  ;;  %v6406_v53 = vshll.u32 %v9618_v63, 16  ;;  %v15935_v2 = vld [vmem:[#allocation57_spill] sm:$0xff]  ;;  %v10839_v31 = vld [vmem:[%s11019_s20 + $0x30] sm:$0xff]   ;;  %v13486_v14 = vsel %vm11383_vm7, %v9423_v50, %v5082_v34  ;;  %v6405_v58 = vrot.slane %v6403_v36, 4 }
 0x19c   : > { %15929 = vst [vmem:[#allocation50_spill] sm:$0xff] %v13466_v20  ;;  %15932 = vst [vmem:[#allocation54_spill] sm:$0xff] %v13472_v0  ;;  %v13478_v30 = vadd.f32 %v10320_v9, %v1820_v11  ;;  %v1812_v12 = vadd.f32 %v1811_v59, %v15935_v2  ;;  %v10324_v20 = vpop.f32.mrf.mxu0  ;;  %v13489_v3 = vld [vmem:[%s11019_s20 + $0x30] sm:$0xf]  ;;  %10420 = vmatmul.mubr.msk.bf16.gmra.mxu1 %vm1029_vm3, %v10837_v43  ;;  %v10840_v63 = vld [vmem:[%s11019_s20 + $0x3c] sm:$0xff]   ;;  %v5087_v59 = vrot.slane %v5085_v6, 4 }
 0x19d   : > { %v10257_v42 = vpop.f32.mrf.mxu1  ;;  %v5091_v11 = vrot.slane %v12882_v41, 5  ;;  %v15937_v34 = vld [vmem:[#allocation61_spill] sm:$0xff]  ;;  %v6408_v22 = vrot.slane %v6406_v53, 5  ;;  %v6412_v43 = vshll.u32 %v13476_v33, 16  ;;  %v13506_v9 = vsel %vm11383_vm7, %v5084_v27, %v5085_v6  ;;  %v9763_v0 = vld [vmem:[%s11019_s20 + $0x28] sm:$0xe] }
 0x19e   : > { %15934 = vst [vmem:[#allocation53_spill] sm:$0xff] %v13478_v30  ;;  %v13496_v2 = vadd.f32 %v2556_v38, %v1812_v12  ;;  %v1833_v48 = vadd.f32 %v10257_v42, %v12908_v60  ;;  %v2572_v50 = vpop.f32.mrf.mxu0  ;;  %v15938_v30 = vcombine.low %v12936_v16, %v15937_v34  ;;  %v5090_v41 = vrot.slane %v5088_v44, 4  ;;  %v13509_v38 = vld [vmem:[%s11019_s20 + $0x34] sm:$0xf]  ;;  %v15941_v34 = vld [vmem:[#allocation63_spill] sm:$0xff] }
 0x19f   : > { %v1824_v19 = vpop.f32.mrf.mxu1  ;;  %v6416_v60 = vshrl.u32 %v13476_v33, 16  ;;  %v6422_v36 = vshll.u32 %v13489_v3, 16  ;;  %v15940_v16 = vld [vmem:[#allocation60_spill] sm:$0xff]  ;;  %v13519_v42 = vsel %vm11383_vm7, %v5087_v59, %v5088_v44  ;;  %v6409_v27 = vor.u32 %v6408_v22, %v6405_v58 }
 0x1a0   : > { %15936 = vst [vmem:[#allocation55_spill] sm:$0xff] %v13496_v2  ;;  %10491 = vmatprep.mubr.msk.bf16.mxu1 %vm1029_vm3, %v15938_v30  ;;  %v13513_v12 = vadd.f32 %v10323_v57, %v1833_v48  ;;  %v1825_v30 = vadd.f32 %v1824_v19, %v15940_v16  ;;  %v10327_v53 = vpop.f32.mrf.mxu0  ;;  %10558 = vmatmul.mubr.msk.bf16.vlgmr.msra.gmra.mxu0 %vm1029_vm3, %v10839_v31  ;;  %v13524_v2 = vld [vmem:[%s11019_s20 + $0x38] sm:$0x1]  ;;  %v6414_v57 = vrot.slane %v6412_v43, 5  ;;  %v6426_v19 = vshrl.u32 %v13489_v3, 16  ;;  %v15943_v16 = vld [vmem:[#allocation64_spill] sm:$0xff] }
 0x1a1   : > { %v10258_v6 = vpop.f32.mrf.mxu1  ;;  %10688 = vmatpush3.bf16.msra.mxu0 %v15941_v34  ;;  %10561 = vmatprep.mubr.msk.bf16.mxu0 %vm1029_vm3, %v10840_v63  ;;  %v6418_v48 = vrot.slane %v6416_v60, 4  ;;  %v6410_v22 = vrot.slane %v6409_v27, 4  ;;  %v6432_v58 = vshll.u32 %v13509_v38, 16  ;;  %v13533_v63 = vsel %vm11383_vm7, %v5090_v41, %v5091_v11  ;;  %v10842_v41 = vld [vmem:[%s11019_s20 + $0x50] sm:$0xff]  }
 0x1a2   : > { %15939 = vst [vmem:[#allocation57_spill] sm:$0xff] %v13513_v12  ;;  %v6424_v12 = vrot.slane %v6422_v36, 5  ;;  %v13527_v31 = vadd.f32 %v2569_v7, %v1825_v30  ;;  %v1836_v44 = vadd.f32 %v10258_v6, %v15943_v16  ;;  %v2585_v59 = vpop.f32.mrf.mxu0  ;;  %v6428_v60 = vrot.slane %v6426_v19, 4  ;;  %v15945_v7 = vld [vmem:[#allocation67_spill] sm:$0xff] }
 0x1a3   : > { %v1827_v34 = vpop.f32.mrf.mxu1  ;;  %v6419_v43 = vor.u32 %v6418_v48, %v6414_v57  ;;  %v6436_v36 = vshrl.u32 %v13509_v38, 16  ;;  %v10841_v16 = vld [vmem:[%s11019_s20 + $0x44] sm:$0xff]   ;;  %v13541_v27 = vrot.slane %v6432_v58, 5  ;;  %v15948_v11 = vcombine.low %v15946_v13, %v15947_v55 }
 0x1a4   : > { %15942 = vst [vmem:[#allocation61_spill] sm:$0xff] %v13527_v31  ;;  %v13537_v62 = vadd.f32 %v10324_v20, %v1836_v44  ;;  %v1828_v30 = vadd.f32 %v1827_v34, %v15945_v7  ;;  %v10328_v6 = vpop.f32.mrf.mxu0  ;;  %v6442_v31 = vshll.u32 %v13524_v2, 16  ;;  %v6415_v19 = vsel %vm11033_vm4, %v6410_v22, %v6414_v57  ;;  %v15951_v7 = vld [vmem:[#allocation6_spill] sm:$0xff] }
 0x1a5   : > { %v10261_v28 = vpop.f32.mrf.mxu1  ;;  %10492 = vmatmul.mubr.msk.bf16.vlgmr.msra.gmra.mxu1 %vm1029_vm3, %v15948_v11  ;;  %v6420_v20 = vrot.slane %v6419_v43, 4  ;;  %v6429_v44 = vor.u32 %v6428_v60, %v6424_v12  ;;  %v15955_v55 = vcombine.low %v15953_v4, %v15954_v5  ;;  %v9779_v13 = vrot.slane %v9763_v0, 9  ;;  %v15957_v60 = vld [vmem:[#allocation8_spill] sm:$0xff] }
 0x1a6   : > { %15944 = vst [vmem:[#allocation60_spill] sm:$0xff] %v13537_v62  ;;  %v6438_v62 = vrot.slane %v6436_v36, 4  ;;  %v13551_v34 = vadd.f32 %v2572_v50, %v1828_v30  ;;  %v1849_v58 = vadd.f32 %v10261_v28, %v15951_v7  ;;  %10622 = vmatpush3.bf16.msra.mxu1 %v15952_v23  ;;  %v2588_v10 = vpop.f32.mrf.mxu0  ;;  %v7754_v11 = vrot.slane %v13476_v33, 5  ;;  %v9623_v33 = vld [vmem:[%s11019_s20 + $0x3c] sm:$0xf] }
 0x1a7   : > { %10495 = vmatprep.mubr.msk.bf16.mxu1 %vm1029_vm3, %v15955_v55  ;;  %v1840_v57 = vpop.f32.mrf.mxu1  ;;  %v6425_v22 = vsel %vm11033_vm4, %v6420_v20, %v6424_v12  ;;  %v6430_v50 = vrot.slane %v6429_v44, 4  ;;  %v7757_v28 = vrot.slane %v13489_v3, 5  ;;  %v6444_v4 = vrot.slane %v6442_v31, 5 }
 0x1a8   : > { %15950 = vst [vmem:[#allocation63_spill] sm:$0xff] %v13551_v34  ;;  %v6439_v43 = vor.u32 %v6438_v62, %v13541_v27  ;;  %v13564_v23 = vadd.f32 %v10327_v53, %v1849_v58  ;;  %v1841_v36 = vadd.f32 %v1840_v57, %v15957_v60  ;;  %v10331_v30 = vpop.f32.mrf.mxu0  ;;  %10562 = vmatmul.mubr.msk.bf16.gmra.mxu0 %vm1029_vm3, %v10841_v16  ;;  %v7756_v53 = vrot.slane %v7754_v11, 4  ;;  %v15959_v16 = vld [vmem:[#allocation10_spill] sm:$0xff]  ;;  %v15961_v60 = vld [vmem:[#allocation9_spill] sm:$0xff]  ;;  %v15989_v34 = vld [vmem:[#allocation75_spill] sm:$0xff] }
 0x1a9   : > { %v10262_v0 = vpop.f32.mrf.mxu1  ;;  %10565 = vmatprep.mubr.msk.bf16.mxu0 %vm1029_vm3, %v10842_v41  ;;  %v13574_v12 = vcombine.low %v6415_v19, %v6425_v22  ;;  %v13581_v31 = vsel %vm11383_vm7, %v9779_v13, %v7754_v11  ;;  %v7760_v41 = vrot.slane %v13509_v38, 5  ;;  %v6435_v19 = vsel %vm11033_vm4, %v6430_v50, %v13541_v27  ;;  %v13588_v57 = vld [vmem:[%s11019_s20 + $0x40] sm:$0xf]  ;;  %v10843_v13 = vld [vmem:[%s11019_s20 + $0x58] sm:$0xff]   ;;  %v15962_v27 = vld [vmem:[#allocation72_spill] sm:$0xff] }
 0x1aa   : > { %15956 = vst [vmem:[#allocation64_spill] sm:$0xff] %v13564_v23  ;;  %v6440_v3 = vrot.slane %v6439_v43, 4  ;;  %v13576_v20 = vadd.f32 %v2585_v59, %v1841_v36  ;;  %v1852_v44 = vadd.f32 %v10262_v0, %v15959_v16  ;;  %v2601_v7 = vpop.f32.mrf.mxu0  ;;  %v7759_v55 = vrot.slane %v7757_v28, 4  ;;  %v13598_v16 = vld [vmem:[%s11019_s20 + $0x44] sm:$0xf]  ;;  %v15963_v50 = vld [vmem:[#allocation73_spill] sm:$0xff] }
 0x1ab   : > { %v1843_v58 = vpop.f32.mrf.mxu1  ;;  %v6447_v59 = vshrl.u32 %v9623_v33, 16  ;;  %v6450_v22 = vshll.u32 %v9623_v33, 16  ;;  %v7763_v11 = vrot.slane %v13524_v2, 5  ;;  %v15964_v5 = vcombine.low %v15962_v27, %v15963_v50  ;;  %v10844_v33 = vld [vmem:[%s11019_s20 + $0x64] sm:$0xff]  }
 0x1ac   : > { %15958 = vst [vmem:[#allocation67_spill] sm:$0xff] %v13576_v20  ;;  %v13590_v43 = vadd.f32 %v10328_v6, %v1852_v44  ;;  %v1844_v36 = vadd.f32 %v1843_v58, %v15961_v60  ;;  %v10332_v0 = vpop.f32.mrf.mxu0  ;;  %v6445_v38 = vsel %vm11033_vm4, %v6440_v3, %v6444_v4  ;;  %v13607_v6 = vsel %vm11383_vm7, %v7756_v53, %v7757_v28  ;;  %v15966_v2 = vld [vmem:[#allocation11_spill] sm:$0xff] }
 0x1ad   : > { %v10265_v62 = vpop.f32.mrf.mxu1  ;;  %10496 = vmatmul.mubr.msk.bf16.gmra.mxu1 %vm1029_vm3, %v15964_v5  ;;  %v7762_v44 = vrot.slane %v7760_v41, 4  ;;  %v6449_v58 = vrot.slane %v6447_v59, 4  ;;  %v6452_v60 = vrot.slane %v6450_v22, 5  ;;  %v15967_v20 = vcombine.low %v13013_v29, %v13023_v52  ;;  %v9764_v22 = vld [vmem:[%s11019_s20 + $0x3c] sm:$0xe] }
 0x1ae   : > { %15960 = vst [vmem:[#allocation65_spill] sm:$0xff] %v13590_v43  ;;  %v13609_v4 = vadd.f32 %v2588_v10, %v1844_v36  ;;  %v1865_v3 = vadd.f32 %v10265_v62, %v15966_v2  ;;  %v2604_v43 = vpop.f32.mrf.mxu0  ;;  %v6456_v5 = vshll.u32 %v13588_v57, 16  ;;  %v6460_v27 = vshrl.u32 %v13588_v57, 16  ;;  %v15970_v36 = vld [vmem:[#allocation13_spill] sm:$0xff] }
 0x1af   : > { %10499 = vmatprep.mubr.msk.bf16.mxu1 %vm1029_vm3, %v15967_v20  ;;  %v1856_v50 = vpop.f32.mrf.mxu1  ;;  %v13618_v28 = vcombine.low %v6435_v19, %v6445_v38  ;;  %v6453_v53 = vor.u32 %v6452_v60, %v6449_v58  ;;  %v6466_v59 = vshll.u32 %v13598_v16, 16  ;;  %v6470_v10 = vshrl.u32 %v13598_v16, 16 }
 0x1b0   : > { %15965 = vst [vmem:[#allocation30_spill] sm:$0xff] %v13609_v4  ;;  %v13623_v62 = vadd.f32 %v10331_v30, %v1865_v3  ;;  %v1857_v2 = vadd.f32 %v1856_v50, %v15970_v36  ;;  %v10335_v29 = vpop.f32.mrf.mxu0  ;;  %10566 = vmatmul.mubr.msk.bf16.gmra.mxu0 %vm1029_vm3, %v10843_v13  ;;  %v13629_v52 = vsel %vm11383_vm7, %v7759_v55, %v7760_v41  ;;  %v13631_v20 = vrot.slane %v6456_v5, 5  ;;  %v15973_v13 = vld [vmem:[#allocation16_spill] sm:$0xff] }
 0x1b1   : > { %15968 = vst [vmem:[#allocation2_spill] sm:$0xff] %v13618_v28  ;;  %v10266_v19 = vpop.f32.mrf.mxu1  ;;  %10569 = vmatprep.mubr.msk.bf16.mxu0 %vm1029_vm3, %v10844_v33  ;;  %v13636_v38 = vsel %vm11383_vm7, %v7762_v44, %v7763_v11  ;;  %v6462_v30 = vrot.slane %v6460_v27, 4  ;;  %v13638_v58 = vrot.slane %v6466_v59, 5  ;;  %v6472_v60 = vrot.slane %v6470_v10, 4  ;;  %v13645_v33 = vld [vmem:[%s11019_s20 + $0x48] sm:$0xf] }
 0x1b2   : > { %15969 = vst [vmem:[#allocation6_spill] sm:$0xff] %v13623_v62  ;;  %15971 = vst [vmem:[#allocation62_spill] sm:$0xff] %v13636_v38  ;;  %v13640_v3 = vadd.f32 %v2601_v7, %v1857_v2  ;;  %v1868_v50 = vadd.f32 %v10266_v19, %v15973_v13  ;;  %v2617_v41 = vpop.f32.mrf.mxu0  ;;  %v9780_v55 = vrot.slane %v9764_v22, 9  ;;  %v7767_v5 = vrot.slane %v13588_v57, 5  ;;  %v15975_v10 = vld [vmem:[#allocation14_spill] sm:$0xff]  ;;  %v10845_v22 = vld [vmem:[%s11019_s20 + $0x6c] sm:$0xff]  }
 0x1b3   : > { %v1859_v36 = vpop.f32.mrf.mxu1  ;;  %v13647_v11 = vrot.slane %v6453_v53, 4  ;;  %v6463_v44 = vor.u32 %v6462_v30, %v13631_v20  ;;  %v6473_v27 = vor.u32 %v6472_v60, %v13638_v58  ;;  %v7770_v7 = vrot.slane %v13598_v16, 5  ;;  %v10846_v60 = vld [vmem:[%s11019_s20 + $0x78] sm:$0xff]   ;;  %v15979_v57 = vld [vmem:[#allocation15_spill] sm:$0xff]  ;;  %v13702_v4 = vld [vmem:[%s11019_s20 + $0x54] sm:$0xf] }
 0x1b4   : > { %15972 = vst [vmem:[#allocation69_spill] sm:$0xff] %v13640_v3  ;;  %v13652_v59 = vadd.f32 %v10332_v0, %v1868_v50  ;;  %v1860_v2 = vadd.f32 %v1859_v36, %v15975_v10  ;;  %v10336_v19 = vpop.f32.mrf.mxu0  ;;  %v7769_v13 = vrot.slane %v7767_v5, 4  ;;  %v13659_v3 = vld [vmem:[%s11019_s20 + $0x4c] sm:$0x1]  ;;  %v15976_v30 = vcombine.low %v13029_v56, %v13038_v25  ;;  %v15980_v25 = vld [vmem:[#allocation12_spill] sm:$0xff] }
 0x1b5   : > { %v10269_v53 = vpop.f32.mrf.mxu1  ;;  %v13668_v16 = vrot.slane %v6463_v44, 4  ;;  %v13672_v50 = vsel %vm11383_vm7, %v9780_v55, %v7767_v5  ;;  %v6476_v36 = vshll.u32 %v13645_v33, 16  ;;  %v6480_v55 = vshrl.u32 %v13645_v33, 16 }
 0x1b6   : > { %15974 = vst [vmem:[#allocation70_spill] sm:$0xff] %v13652_v59  ;;  %10500 = vmatmul.mubr.msk.bf16.gmra.mxu1 %vm1029_vm3, %v15976_v30  ;;  %15977 = vst [vmem:[#allocation8_spill] sm:$0xff] %v13672_v50  ;;  %v13675_v10 = vadd.f32 %v2604_v43, %v1860_v2  ;;  %v1881_v59 = vadd.f32 %v10269_v53, %v15979_v57  ;;  %v2620_v56 = vpop.f32.mrf.mxu0  ;;  %v15981_v30 = vcombine.low %v13050_v1, %v15980_v25  ;;  %v9628_v53 = vld [vmem:[%s11019_s20 + $0x50] sm:$0xf] }
 0x1b7   : > { %v13684_v44 = vsel %vm11383_vm7, %v7769_v13, %v7770_v7  ;;  %v1872_v5 = vpop.f32.mrf.mxu1  ;;  %v13691_v2 = vrot.slane %v6473_v27, 4  ;;  %v13693_v57 = vrot.slane %v6476_v36, 5  ;;  %v6486_v1 = vshll.u32 %v13659_v3, 16  ;;  %v15986_v36 = vld [vmem:[#allocation18_spill] sm:$0xff] }
 0x1b8   : > { %15978 = vst [vmem:[#allocation10_spill] sm:$0xff] %v13675_v10  ;;  %10503 = vmatprep.mubr.msk.bf16.mxu1 %vm1029_vm3, %v15981_v30  ;;  %15982 = vst [vmem:[#allocation9_spill] sm:$0xff] %v13684_v44  ;;  %v13697_v25 = vadd.f32 %v10335_v29, %v1881_v59  ;;  %v15984_v30 = vld [vmem:[#allocation17_spill] sm:$0xff]  ;;  %v10339_v0 = vpop.f32.mrf.mxu0  ;;  %10570 = vmatmul.mubr.msk.bf16.gmra.mxu0 %vm1029_vm3, %v10845_v22  ;;  %v7772_v10 = vrot.slane %v7770_v7, 4  ;;  %v6482_v62 = vrot.slane %v6480_v55, 4  ;;  %v7773_v59 = vrot.slane %v13645_v33, 5 }
 0x1b9   : > { %v1873_v13 = vadd.f32 %v1872_v5, %v15984_v30  ;;  %v10270_v23 = vpop.f32.mrf.mxu1  ;;  %10573 = vmatprep.mubr.msk.bf16.mxu0 %vm1029_vm3, %v10846_v60  ;;  %v6469_v27 = vsel %vm11033_vm4, %v13668_v16, %v13638_v58  ;;  %v7776_v22 = vrot.slane %v13659_v3, 5  ;;  %v6491_v30 = vshrl.u32 %v9628_v53, 16  ;;  %v15988_v3 = vld [vmem:[#allocation19_spill] sm:$0xff]  ;;  %v15990_v44 = vld [vmem:[#allocation76_spill] sm:$0xff] }
 0x1ba   : > { %15983 = vst [vmem:[#allocation72_spill] sm:$0xff] %v13697_v25  ;;  %v1884_v55 = vadd.f32 %v10270_v23, %v15986_v36  ;;  %v2633_v5 = vpop.f32.mrf.mxu0  ;;  %v6483_v60 = vor.u32 %v6482_v62, %v13693_v57  ;;  %v6488_v58 = vrot.slane %v6486_v1, 5  ;;  %v7775_v16 = vrot.slane %v7773_v59, 4  ;;  %v13723_v23 = vld [vmem:[%s11019_s20 + $0x58] sm:$0xf]  ;;  %v10848_v1 = vld [vmem:[%s11019_s20 + $0x8c] sm:$0xff]  }
 0x1bb   : > { %v13713_v7 = vadd.f32 %v2617_v41, %v1873_v13  ;;  %v1875_v43 = vpop.f32.mrf.mxu1  ;;  %v6494_v25 = vshll.u32 %v9628_v53, 16  ;;  %v6500_v29 = vshll.u32 %v13702_v4, 16  ;;  %v10847_v13 = vld [vmem:[%s11019_s20 + $0x80] sm:$0xff]   ;;  %v6493_v36 = vrot.slane %v6491_v30, 4  ;;  %v15993_v30 = vld [vmem:[#allocation20_spill] sm:$0xff] }
 0x1bc   : > { %v13718_v33 = vadd.f32 %v10336_v19, %v1884_v55  ;;  %v1876_v28 = vadd.f32 %v1875_v43, %v15988_v3  ;;  %v10340_v41 = vpop.f32.mrf.mxu0  ;;  %v15991_v50 = vcombine.low %v15989_v34, %v15990_v44  ;;  %v6479_v19 = vsel %vm11033_vm4, %v13691_v2, %v13693_v57 }
 0x1bd   : > { %15985 = vst [vmem:[#allocation73_spill] sm:$0xff] %v13713_v7  ;;  %v6484_v7 = vrot.slane %v6483_v60, 4  ;;  %v10273_v62 = vpop.f32.mrf.mxu1  ;;  %v6496_v53 = vrot.slane %v6494_v25, 5  ;;  %v13734_v43 = vrot.slane %v6500_v29, 5  ;;  %v6504_v55 = vshrl.u32 %v13702_v4, 16 }
 0x1be   : > { %15987 = vst [vmem:[#allocation11_spill] sm:$0xff] %v13718_v33  ;;  %10504 = vmatmul.mubr.msk.bf16.gmra.mxu1 %vm1029_vm3, %v15991_v50  ;;  %v9765_v60 = vld [vmem:[%s11019_s20 + $0x50] sm:$0xe]  ;;  %v13738_v3 = vadd.f32 %v2620_v56, %v1876_v28  ;;  %v1897_v33 = vadd.f32 %v10273_v62, %v15993_v30  ;;  %v2636_v38 = vpop.f32.mrf.mxu0  ;;  %v15994_v34 = vcombine.low %v13075_v49, %v13085_v15  ;;  %v6510_v25 = vshll.u32 %v13723_v23, 16  ;;  %v15996_v49 = vld [vmem:[#allocation21_spill] sm:$0xff] }
 0x1bf   : > { %v13747_v50 = vsel %vm11383_vm7, %v7772_v10, %v7773_v59  ;;  %v13751_v44 = vsel %vm11383_vm7, %v7775_v16, %v7776_v22  ;;  %v1888_v2 = vpop.f32.mrf.mxu1  ;;  %v6489_v28 = vsel %vm11033_vm4, %v6484_v7, %v6488_v58  ;;  %v6497_v56 = vor.u32 %v6496_v53, %v6493_v36  ;;  %v15998_v36 = vld [vmem:[#allocation22_spill] sm:$0xff] }
 0x1c0   : > { %15992 = vst [vmem:[#allocation13_spill] sm:$0xff] %v13738_v3  ;;  %10507 = vmatprep.mubr.msk.bf16.mxu1 %vm1029_vm3, %v15994_v34  ;;  %v6506_v57 = vrot.slane %v6504_v55, 4  ;;  %v13756_v29 = vadd.f32 %v10339_v0, %v1897_v33  ;;  %v1889_v15 = vadd.f32 %v1888_v2, %v15996_v49  ;;  %v10343_v62 = vpop.f32.mrf.mxu0  ;;  %10574 = vmatmul.mubr.msk.bf16.gmra.mxu0 %vm1029_vm3, %v10847_v13  ;;  %v6514_v10 = vshrl.u32 %v13723_v23, 16 }
 0x1c1   : > { %v9781_v59 = vrot.slane %v9765_v60, 9  ;;  %v10274_v22 = vpop.f32.mrf.mxu1  ;;  %10577 = vmatprep.mubr.msk.bf16.mxu0 %vm1029_vm3, %v10848_v1  ;;  %v6498_v16 = vrot.slane %v6497_v56, 4  ;;  %v6512_v58 = vrot.slane %v6510_v25, 5  ;;  %v7780_v0 = vrot.slane %v13702_v4, 5  ;;  %v13769_v60 = vld [vmem:[%s11019_s20 + $0x5c] sm:$0xf] }
 0x1c2   : > { %15995 = vst [vmem:[#allocation16_spill] sm:$0xff] %v13756_v29  ;;  %v6507_v7 = vor.u32 %v6506_v57, %v13734_v43  ;;  %v13764_v33 = vadd.f32 %v2633_v5, %v1889_v15  ;;  %v1900_v53 = vadd.f32 %v10274_v22, %v15998_v36  ;;  %v2649_v55 = vpop.f32.mrf.mxu0  ;;  %v6516_v30 = vrot.slane %v6514_v10, 4  ;;  %v16001_v25 = vld [vmem:[#allocation23_spill] sm:$0xff]  ;;  %v10849_v15 = vld [vmem:[%s11019_s20 + $0x94] sm:$0xff]  }
 0x1c3   : > { %v7783_v13 = vrot.slane %v13723_v23, 5  ;;  %v1891_v34 = vpop.f32.mrf.mxu1  ;;  %v15999_v1 = vsel %vm11033_vm4, %v13647_v11, %v13631_v20  ;;  %v7782_v56 = vrot.slane %v7780_v0, 4  ;;  %v13784_v10 = vcombine.low %v6479_v19, %v6489_v28  ;;  %v16002_v20 = vld [vmem:[#allocation78_spill] sm:$0xff]  ;;  %v16003_v11 = vld [vmem:[#allocation80_spill] sm:$0xff] }
 0x1c4   : > { %15997 = vst [vmem:[#allocation14_spill] sm:$0xff] %v13764_v33  ;;  %v13776_v2 = vcombine.low %v15999_v1, %v6469_v27  ;;  %v6508_v5 = vrot.slane %v6507_v7, 4  ;;  %v13780_v57 = vadd.f32 %v10340_v41, %v1900_v53  ;;  %v1892_v23 = vadd.f32 %v1891_v34, %v16001_v25  ;;  %v10344_v49 = vpop.f32.mrf.mxu0  ;;  %v10850_v1 = vld [vmem:[%s11019_s20 + $0xa0] sm:$0xff]   ;;  %v16006_v34 = vld [vmem:[#allocation24_spill] sm:$0xff] }
 0x1c5   : > { %v6517_v22 = vor.u32 %v6516_v30, %v6512_v58  ;;  %v10277_v36 = vpop.f32.mrf.mxu1  ;;  %v16004_v27 = vcombine.low %v16002_v20, %v16003_v11  ;;  %v6503_v41 = vsel %vm11033_vm4, %v6498_v16, %v13734_v43  ;;  %v13796_v7 = vsel %vm11383_vm7, %v9781_v59, %v7780_v0  ;;  %v9632_v53 = vld [vmem:[%s11019_s20 + $0x60] sm:$0x1]  ;;  %v9633_v16 = vld [vmem:[%s11019_s20 + $0x64] sm:$0xf] }
 0x1c6   : > { %16000 = vst [vmem:[#allocation15_spill] sm:$0xff] %v13780_v57  ;;  %v6520_v19 = vshll.u32 %v13769_v60, 16  ;;  %v6524_v28 = vshrl.u32 %v13769_v60, 16  ;;  %v13801_v30 = vadd.f32 %v2636_v38, %v1892_v23  ;;  %v1913_v25 = vadd.f32 %v10277_v36, %v16006_v34  ;;  %v2652_v20 = vpop.f32.mrf.mxu0  ;;  %v9766_v57 = vld [vmem:[%s11019_s20 + $0x64] sm:$0xe] }
 0x1c7   : > { %10508 = vmatmul.mubr.msk.bf16.gmra.mxu1 %vm1029_vm3, %v16004_v27  ;;  %v16007_v11 = vcombine.low %v13121_v47, %v13125_v46  ;;  %v6513_v43 = vsel %vm11033_vm4, %v6508_v5, %v6512_v58  ;;  %v13812_v59 = vsel %vm11383_vm7, %v7782_v56, %v7783_v13  ;;  %v1904_v0 = vpop.f32.mrf.mxu1  ;;  %v13815_v38 = vrot.slane %v6517_v22, 4  ;;  %v16009_v47 = vld [vmem:[#allocation28_spill] sm:$0xff]  ;;  %v13825_v56 = vld [vmem:[%s11019_s20 + $0x68] sm:$0xf] }
 0x1c8   : > { %16005 = vst [vmem:[#allocation12_spill] sm:$0xff] %v13801_v30  ;;  %v7785_v23 = vrot.slane %v7783_v13, 4  ;;  %v13817_v36 = vrot.slane %v6520_v19, 5  ;;  %v6526_v27 = vrot.slane %v6524_v28, 4  ;;  %v13819_v34 = vadd.f32 %v10343_v62, %v1913_v25  ;;  %10578 = vmatmul.mubr.msk.bf16.gmra.mxu0 %vm1029_vm3, %v10849_v15  ;;  %v16011_v15 = vld [vmem:[#allocation29_spill] sm:$0xff] }
 0x1c9   : > { %10511 = vmatprep.mubr.msk.bf16.mxu1 %vm1029_vm3, %v16007_v11  ;;  %v1905_v46 = vadd.f32 %v1904_v0, %v16009_v47  ;;  %v10347_v11 = vpop.f32.mrf.mxu0  ;;  %v6530_v58 = vshll.u32 %v9632_v53, 16  ;;  %v7786_v5 = vrot.slane %v13769_v60, 5  ;;  %v10278_v4 = vpop.f32.mrf.mxu1  ;;  %10581 = vmatprep.mubr.msk.bf16.mxu0 %vm1029_vm3, %v10850_v1  ;;  %v13828_v13 = vcombine.low %v6503_v41, %v6513_v43  ;;  %v10851_v1 = vld [vmem:[%s11019_s20 + $0xa8] sm:$0xff]  }
 0x1ca   : > { %16008 = vst [vmem:[#allocation17_spill] sm:$0xff] %v13819_v34  ;;  %v6527_v22 = vor.u32 %v6526_v27, %v13817_v36  ;;  %v6535_v19 = vshrl.u32 %v9633_v16, 16  ;;  %v1916_v25 = vadd.f32 %v10278_v4, %v16011_v15  ;;  %v7789_v47 = vrot.slane %v9632_v53, 5  ;;  %v13846_v30 = vld [vmem:[%s11019_s20 + $0x6c] sm:$0xf] }
 0x1cb   : > { %v13833_v28 = vadd.f32 %v2649_v55, %v1905_v46  ;;  %v2665_v60 = vpop.f32.mrf.mxu0  ;;  %v7788_v0 = vrot.slane %v7786_v5, 4  ;;  %v1907_v34 = vpop.f32.mrf.mxu1  ;;  %v6523_v41 = vsel %vm11033_vm4, %v13815_v38, %v13817_v36  ;;  %v6538_v27 = vshll.u32 %v9633_v16, 16  ;;  %v16013_v46 = vld [vmem:[#allocation31_spill] sm:$0xff]  ;;  %v10852_v16 = vld [vmem:[%s11019_s20 + $0xb4] sm:$0xff]  }
 0x1cc   : > { %v6537_v43 = vrot.slane %v6535_v19, 4  ;;  %v6544_v62 = vshll.u32 %v13825_v56, 16  ;;  %v13842_v55 = vadd.f32 %v10344_v49, %v1916_v25  ;;  %v1908_v4 = vadd.f32 %v1907_v34, %v16013_v46  ;;  %v16016_v19 = vld [vmem:[#allocation36_spill] sm:$0xff] }
 0x1cd   : > { %16010 = vst [vmem:[#allocation18_spill] sm:$0xff] %v13833_v28  ;;  %v10348_v15 = vpop.f32.mrf.mxu0  ;;  %v6532_v28 = vrot.slane %v6530_v58, 5  ;;  %v6548_v53 = vshrl.u32 %v13825_v56, 16  ;;  %v10281_v33 = vpop.f32.mrf.mxu1  ;;  %v16014_v29 = vcombine.low %v13136_v45, %v13140_v17  ;;  %v6528_v38 = vrot.slane %v6527_v22, 4  ;;  %v16019_v22 = vld [vmem:[#allocation40_spill] sm:$0xff] }
 0x1ce   : > { %16012 = vst [vmem:[#allocation19_spill] sm:$0xff] %v13842_v55  ;;  %v13857_v49 = vsel %vm11383_vm7, %v7785_v23, %v7786_v5  ;;  %v6540_v36 = vrot.slane %v6538_v27, 5  ;;  %v6546_v34 = vrot.slane %v6544_v62, 5  ;;  %v13859_v58 = vadd.f32 %v2652_v20, %v1908_v4 }
 0x1cf   : > { %10512 = vmatmul.mubr.msk.bf16.gmra.mxu1 %vm1029_vm3, %v16014_v29  ;;  %v1929_v25 = vadd.f32 %v10281_v33, %v16016_v19  ;;  %v2668_v46 = vpop.f32.mrf.mxu0  ;;  %v16017_v55 = vcombine.low %v13163_v24, %v13167_v8  ;;  %v13868_v45 = vsel %vm11383_vm7, %v7788_v0, %v7789_v47  ;;  %v6550_v17 = vrot.slane %v6548_v53, 4  ;;  %v1920_v29 = vpop.f32.mrf.mxu1 }
 0x1d0   : > { %16015 = vst [vmem:[#allocation75_spill] sm:$0xff] %v13859_v58  ;;  %v6541_v23 = vor.u32 %v6540_v36, %v6537_v43  ;;  %v6554_v5 = vshll.u32 %v13846_v30, 16  ;;  %v6558_v20 = vshrl.u32 %v13846_v30, 16  ;;  %v9782_v62 = vrot.slane %v9766_v57, 9  ;;  %10582 = vmatmul.mubr.msk.bf16.gmra.mxu0 %vm1029_vm3, %v10851_v1  ;;  %v13880_v57 = vld [vmem:[%s11019_s20 + $0x70] sm:$0xf] }
 0x1d1   : > { %10515 = vmatprep.mubr.msk.bf16.mxu1 %vm1029_vm3, %v16017_v55  ;;  %v13872_v33 = vadd.f32 %v10347_v11, %v1929_v25  ;;  %v1921_v27 = vadd.f32 %v1920_v29, %v16019_v22  ;;  %v10351_v24 = vpop.f32.mrf.mxu0  ;;  %v6551_v8 = vor.u32 %v6550_v17, %v6546_v34  ;;  %v7793_v0 = vrot.slane %v13825_v56, 5  ;;  %v10282_v47 = vpop.f32.mrf.mxu1  ;;  %10585 = vmatprep.mubr.msk.bf16.mxu0 %vm1029_vm3, %v10852_v16  ;;  %v16021_v36 = vld [vmem:[#allocation44_spill] sm:$0xff]  ;;  %v16061_v58 = vld [vmem:[#allocation94_spill] sm:$0xff] }
 0x1d2   : > { %v6542_v43 = vrot.slane %v6541_v23, 4  ;;  %v6556_v55 = vrot.slane %v6554_v5, 5  ;;  %v6560_v4 = vrot.slane %v6558_v20, 4  ;;  %v7796_v53 = vrot.slane %v13846_v30, 5  ;;  %v16023_v5 = vld [vmem:[#allocation48_spill] sm:$0xff] }
 0x1d3   : > { %16018 = vst [vmem:[#allocation76_spill] sm:$0xff] %v13872_v33  ;;  %v13882_v11 = vadd.f32 %v2665_v60, %v1921_v27  ;;  %v1932_v19 = vadd.f32 %v10282_v47, %v16021_v36  ;;  %v2681_v1 = vpop.f32.mrf.mxu0  ;;  %v6533_v56 = vsel %vm11033_vm4, %v6528_v38, %v6532_v28  ;;  %v6552_v25 = vrot.slane %v6551_v8, 4  ;;  %v1923_v16 = vpop.f32.mrf.mxu1  ;;  %v10853_v27 = vld [vmem:[%s11019_s20 + $0xbc] sm:$0xff]   ;;  %v9637_v38 = vld [vmem:[%s11019_s20 + $0x74] sm:$0x1] }
 0x1d4   : > { %v6547_v30 = vsel %vm11033_vm4, %v6542_v43, %v6546_v34  ;;  %v6561_v29 = vor.u32 %v6560_v4, %v6556_v55  ;;  %v7795_v23 = vrot.slane %v7793_v0, 4  ;;  %v1924_v20 = vadd.f32 %v1923_v16, %v16023_v5  ;;  %v10854_v34 = vld [vmem:[%s11019_s20 + $0xc8] sm:$0xff]   ;;  %v16026_v16 = vld [vmem:[#allocation52_spill] sm:$0xff] }
 0x1d5   : > { %16020 = vst [vmem:[#allocation20_spill] sm:$0xff] %v13882_v11  ;;  %v13891_v60 = vadd.f32 %v10348_v15, %v1932_v19  ;;  %v10352_v22 = vpop.f32.mrf.mxu0  ;;  %v6557_v28 = vsel %vm11033_vm4, %v6552_v25, %v6556_v55  ;;  %v6564_v8 = vshll.u32 %v13880_v57, 16  ;;  %v10285_v47 = vpop.f32.mrf.mxu1  ;;  %v16024_v36 = vcombine.low %v13172_v32, %v13176_v51  ;;  %v9638_v55 = vld [vmem:[%s11019_s20 + $0x78] sm:$0xf]  ;;  %v9768_v11 = vld [vmem:[%s11019_s20 + $0x8c] sm:$0xe] }
 0x1d6   : > { %v13904_v43 = vcombine.low %v6523_v41, %v6533_v56  ;;  %v13908_v15 = vsel %vm11383_vm7, %v9782_v62, %v7793_v0  ;;  %v7798_v4 = vrot.slane %v7796_v53, 4  ;;  %v6568_v19 = vshrl.u32 %v13880_v57, 16 }
 0x1d7   : > { %16022 = vst [vmem:[#allocation21_spill] sm:$0xff] %v13891_v60  ;;  %10516 = vmatmul.mubr.msk.bf16.gmra.mxu1 %vm1029_vm3, %v16024_v36  ;;  %v13912_v25 = vadd.f32 %v2668_v46, %v1924_v20  ;;  %v1945_v5 = vadd.f32 %v10285_v47, %v16026_v16  ;;  %v2684_v17 = vpop.f32.mrf.mxu0  ;;  %v16027_v32 = vcombine.low %v13180_v37, %v13190_v40  ;;  %v13919_v51 = vrot.slane %v6561_v29, 4  ;;  %v1936_v62 = vpop.f32.mrf.mxu1  ;;  %v16029_v47 = vld [vmem:[#allocation56_spill] sm:$0xff]  ;;  %v13935_v40 = vld [vmem:[%s11019_s20 + $0x7c] sm:$0xf] }
 0x1d8   : > { %v13921_v41 = vrot.slane %v6564_v8, 5  ;;  %v13923_v0 = vcombine.low %v6547_v30, %v6557_v28  ;;  %v6570_v56 = vrot.slane %v6568_v19, 4  ;;  %v6574_v36 = vshll.u32 %v9637_v38, 16  ;;  %10586 = vmatmul.mubr.msk.bf16.gmra.mxu0 %vm1029_vm3, %v10853_v27 }
 0x1d9   : > { %16025 = vst [vmem:[#allocation22_spill] sm:$0xff] %v13912_v25  ;;  %10519 = vmatprep.mubr.msk.bf16.mxu1 %vm1029_vm3, %v16027_v32  ;;  %v7799_v46 = vrot.slane %v13880_v57, 5  ;;  %v13926_v20 = vadd.f32 %v10351_v24, %v1945_v5  ;;  %v1937_v16 = vadd.f32 %v1936_v62, %v16029_v47  ;;  %v10355_v25 = vpop.f32.mrf.mxu0  ;;  %v13932_v37 = vsel %vm11383_vm7, %v7795_v23, %v7796_v53  ;;  %v10286_v29 = vpop.f32.mrf.mxu1  ;;  %v16031_v5 = vld [vmem:[#allocation58_spill] sm:$0xff] }
 0x1da   : > { %v6579_v30 = vshrl.u32 %v9638_v55, 16  ;;  %10589 = vmatprep.mubr.msk.bf16.mxu0 %vm1029_vm3, %v10854_v34  ;;  %v6571_v57 = vor.u32 %v6570_v56, %v13921_v41  ;;  %v6576_v24 = vrot.slane %v6574_v36, 5  ;;  %v7802_v8 = vrot.slane %v9637_v38, 5  ;;  %v13943_v53 = vld [vmem:[%s11019_s20 + $0x80] sm:$0xf] }
 0x1db   : > { %16028 = vst [vmem:[#allocation23_spill] sm:$0xff] %v13926_v20  ;;  %v7801_v28 = vrot.slane %v7799_v46, 4  ;;  %v13939_v19 = vadd.f32 %v2681_v1, %v1937_v16  ;;  %v1948_v27 = vadd.f32 %v10286_v29, %v16031_v5  ;;  %v2697_v32 = vpop.f32.mrf.mxu0  ;;  %v6582_v62 = vshll.u32 %v9638_v55, 16  ;;  %v1939_v47 = vpop.f32.mrf.mxu1  ;;  %v16033_v16 = vld [vmem:[#allocation59_spill] sm:$0xff]  ;;  %v9767_v20 = vld [vmem:[%s11019_s20 + $0x78] sm:$0xe] }
 0x1dc   : > { %v6581_v23 = vrot.slane %v6579_v30, 4  ;;  %v6567_v34 = vsel %vm11033_vm4, %v13919_v51, %v13921_v41  ;;  %v6572_v56 = vrot.slane %v6571_v57, 4  ;;  %v6588_v38 = vshll.u32 %v13935_v40, 16  ;;  %v10856_v41 = vld [vmem:[%s11019_s20 + $0xdc] sm:$0xff]  }
 0x1dd   : > { %16030 = vst [vmem:[#allocation78_spill] sm:$0xff] %v13939_v19  ;;  %v6592_v1 = vshrl.u32 %v13935_v40, 16  ;;  %v13951_v36 = vadd.f32 %v10352_v22, %v1948_v27  ;;  %v1940_v29 = vadd.f32 %v1939_v47, %v16033_v16  ;;  %v10356_v5 = vpop.f32.mrf.mxu0  ;;  %v10855_v19 = vld [vmem:[%s11019_s20 + $0xd0] sm:$0xff]   ;;  %v13957_v55 = vsel %vm11383_vm7, %v7798_v4, %v7799_v46  ;;  %v10289_v60 = vpop.f32.mrf.mxu1  ;;  %v16036_v46 = vld [vmem:[#allocation66_spill] sm:$0xff] }
 0x1de   : > { %v6584_v30 = vrot.slane %v6582_v62, 5  ;;  %v16034_v51 = vcombine.low %v13216_v39, %v13221_v26  ;;  %v13967_v22 = vsel %vm11383_vm7, %v7801_v28, %v7802_v8  ;;  %v6590_v57 = vrot.slane %v6588_v38, 5  ;;  %v13980_v28 = vld [vmem:[%s11019_s20 + $0x84] sm:$0xf] }
 0x1df   : > { %16032 = vst [vmem:[#allocation80_spill] sm:$0xff] %v13951_v36  ;;  %v6594_v27 = vrot.slane %v6592_v1, 4  ;;  %v6598_v47 = vshll.u32 %v13943_v53, 16  ;;  %v13970_v4 = vadd.f32 %v2684_v17, %v1940_v29  ;;  %v1961_v62 = vadd.f32 %v10289_v60, %v16036_v46  ;;  %v2700_v16 = vpop.f32.mrf.mxu0  ;;  %v1952_v8 = vpop.f32.mrf.mxu1  ;;  %v16039_v60 = vld [vmem:[#allocation68_spill] sm:$0xff] }
 0x1e0   : > { %10520 = vmatmul.mubr.msk.bf16.gmra.mxu1 %vm1029_vm3, %v16034_v51  ;;  %v16037_v36 = vcombine.low %v13230_v35, %v13237_v18  ;;  %v6577_v26 = vsel %vm11033_vm4, %v6572_v56, %v6576_v24  ;;  %v6585_v39 = vor.u32 %v6584_v30, %v6581_v23  ;;  %v6602_v17 = vshrl.u32 %v13943_v53, 16  ;;  %10590 = vmatmul.mubr.msk.bf16.gmra.mxu0 %vm1029_vm3, %v10855_v19  ;;  %v16041_v30 = vld [vmem:[#allocation71_spill] sm:$0xff] }
 0x1e1   : > { %16035 = vst [vmem:[#allocation24_spill] sm:$0xff] %v13970_v4  ;;  %v6595_v38 = vor.u32 %v6594_v27, %v6590_v57  ;;  %v6600_v1 = vrot.slane %v6598_v47, 5  ;;  %v9783_v29 = vrot.slane %v9767_v20, 9  ;;  %v13983_v51 = vadd.f32 %v10355_v25, %v1961_v62  ;;  %v10427_v4 = vpop.f32.mrf.mxu0  ;;  %v10290_v24 = vpop.f32.mrf.mxu1  ;;  %10593 = vmatprep.mubr.msk.bf16.mxu0 %vm1029_vm3, %v10856_v41 }
 0x1e2   : > { %10523 = vmatprep.mubr.msk.bf16.mxu1 %vm1029_vm3, %v16037_v36  ;;  %v1953_v46 = vadd.f32 %v1952_v8, %v16039_v60  ;;  %v6586_v35 = vrot.slane %v6585_v39, 4  ;;  %v7806_v18 = vrot.slane %v13935_v40, 5  ;;  %v6604_v56 = vrot.slane %v6602_v17, 4  ;;  %v16044_v17 = vld [vmem:[#allocation74_spill] sm:$0xff]  ;;  %v16050_v40 = vld [vmem:[#allocation92_spill] sm:$0xff] }
 0x1e3   : > { %16038 = vst [vmem:[#allocation28_spill] sm:$0xff] %v13983_v51  ;;  %v6596_v23 = vrot.slane %v6595_v38, 4  ;;  %v7809_v36 = vrot.slane %v13943_v53, 5  ;;  %v6608_v25 = vshll.u32 %v13980_v28, 16  ;;  %v1964_v27 = vadd.f32 %v10290_v24, %v16041_v30  ;;  %v4470_v47 = vpop.f32.mrf.mxu0  ;;  %v1955_v41 = vpop.f32.mrf.mxu1  ;;  %v10857_v24 = vld [vmem:[%s11019_s20 + $0xe4] sm:$0xff]  }
 0x1e4   : > { %v13991_v20 = vadd.f32 %v2697_v32, %v1953_v46  ;;  %v13998_v62 = vcombine.low %v6567_v34, %v6577_v26  ;;  %v6591_v53 = vsel %vm11033_vm4, %v6586_v35, %v6590_v57  ;;  %v6605_v39 = vor.u32 %v6604_v56, %v6600_v1  ;;  %v9642_v32 = vld [vmem:[%s11019_s20 + $0x88] sm:$0x1] }
 0x1e5   : > { %v7808_v8 = vrot.slane %v7806_v18, 4  ;;  %v14003_v38 = vadd.f32 %v10356_v5, %v1964_v27  ;;  %v1956_v60 = vadd.f32 %v1955_v41, %v16044_v17  ;;  %v10428_v46 = vpop.f32.mrf.mxu0  ;;  %v6601_v30 = vsel %vm11033_vm4, %v6596_v23, %v6600_v1  ;;  %v10361_v26 = vpop.f32.mrf.mxu1  ;;  %v10858_v5 = vld [vmem:[%s11019_s20 + $0xf0] sm:$0xff]   ;;  %v16048_v23 = vld [vmem:[#allocation77_spill] sm:$0xff] }
 0x1e6   : > { %16040 = vst [vmem:[#allocation29_spill] sm:$0xff] %v13991_v20  ;;  %16042 = vst [vmem:[#allocation31_spill] sm:$0xff] %v13998_v62  ;;  %v14011_v34 = vsel %vm11383_vm7, %v9783_v29, %v7806_v18  ;;  %v16046_v57 = vcombine.low %v13248_v54, %v13252_v21  ;;  %v14018_v35 = vrot.slane %v6605_v39, 4  ;;  %v7811_v56 = vrot.slane %v7809_v36, 4  ;;  %v16049_v18 = vld [vmem:[#allocation91_spill] sm:$0xff] }
 0x1e7   : > { %16043 = vst [vmem:[#allocation36_spill] sm:$0xff] %v14003_v38  ;;  %16045 = vst [vmem:[#allocation40_spill] sm:$0xff] %v14011_v34  ;;  %v14020_v27 = vrot.slane %v6608_v25, 5  ;;  %v6612_v41 = vshrl.u32 %v13980_v28, 16  ;;  %v14023_v1 = vadd.f32 %v2700_v16, %v1956_v60  ;;  %v3393_v17 = vadd.f32 %v10361_v26, %v16048_v23  ;;  %v4473_v29 = vpop.f32.mrf.mxu0  ;;  %v9643_v39 = vld [vmem:[%s11019_s20 + $0x8c] sm:$0xf]  ;;  %v3136_v25 = vpop.f32.mrf.mxu1 }
 0x1e8   : > { %10524 = vmatmul.mubr.msk.bf16.gmra.mxu1 %vm1029_vm3, %v16046_v57  ;;  %v16051_v19 = vcombine.low %v16049_v18, %v16050_v40  ;;  %v6618_v54 = vshll.u32 %v9642_v32, 16  ;;  %v7812_v21 = vrot.slane %v13980_v28, 5  ;;  %v14033_v57 = vld [vmem:[%s11019_s20 + $0x90] sm:$0xf]  ;;  %v14035_v38 = vcombine.low %v6591_v53, %v6601_v30  ;;  %v16055_v26 = vld [vmem:[#allocation7_spill] sm:$0xff]  ;;  %10594 = vmatmul.mubr.msk.bf16.gmra.mxu0 %vm1029_vm3, %v10857_v24 }
 0x1e9   : > { %16047 = vst [vmem:[#allocation44_spill] sm:$0xff] %v14023_v1  ;;  %v14039_v16 = vsel %vm11383_vm7, %v7808_v8, %v7809_v36  ;;  %v6614_v60 = vrot.slane %v6612_v41, 4  ;;  %v3391_v28 = vadd.f32 %v3136_v25, %v16055_v26  ;;  %v10431_v23 = vpop.f32.mrf.mxu0  ;;  %v7815_v30 = vrot.slane %v9642_v32, 5  ;;  %v10362_v18 = vpop.f32.mrf.mxu1  ;;  %10597 = vmatprep.mubr.msk.bf16.mxu0 %vm1029_vm3, %v10858_v5  ;;  %v14056_v24 = vld [vmem:[%s11019_s20 + $0x94] sm:$0xf] }
 0x1ea   : > { %10527 = vmatprep.mubr.msk.bf16.mxu1 %vm1029_vm3, %v16051_v19  ;;  %16052 = vst [vmem:[#allocation48_spill] sm:$0xff] %v14035_v38  ;;  %16053 = vst [vmem:[#allocation52_spill] sm:$0xff] %v14039_v16  ;;  %v14045_v19 = vadd.f32 %v10427_v4, %v3393_v17  ;;  %v7814_v53 = vrot.slane %v7812_v21, 4  ;;  %v6623_v8 = vshrl.u32 %v9643_v39, 16  ;;  %v6626_v1 = vshll.u32 %v9643_v39, 16  ;;  %v16057_v17 = vld [vmem:[#allocation79_spill] sm:$0xff] }
 0x1eb   : > { %v6615_v36 = vor.u32 %v6614_v60, %v14020_v27  ;;  %v6632_v41 = vshll.u32 %v14033_v57, 16  ;;  %v14052_v4 = vadd.f32 %v4470_v47, %v3391_v28  ;;  %v3394_v40 = vadd.f32 %v10362_v18, %v16057_v17  ;;  %v4486_v25 = vpop.f32.mrf.mxu0  ;;  %v3139_v5 = vpop.f32.mrf.mxu1  ;;  %v16060_v28 = vld [vmem:[#allocation81_spill] sm:$0xff]  ;;  %v16062_v38 = vld [vmem:[#allocation95_spill] sm:$0xff] }
 0x1ec   : > { %16054 = vst [vmem:[#allocation56_spill] sm:$0xff] %v14045_v19  ;;  %v6620_v26 = vrot.slane %v6618_v54, 5  ;;  %v6636_v32 = vshrl.u32 %v14033_v57, 16  ;;  %v14061_v39 = vsel %vm11383_vm7, %v7811_v56, %v7812_v21  ;;  %v6625_v60 = vrot.slane %v6623_v8, 4  ;;  %v10860_v56 = vld [vmem:[%s11019_s20 + $0x104] sm:$0xff]  }
 0x1ed   : > { %16056 = vst [vmem:[#allocation58_spill] sm:$0xff] %v14052_v4  ;;  %v6616_v19 = vrot.slane %v6615_v36, 4  ;;  %16058 = vst [vmem:[#allocation59_spill] sm:$0xff] %v14061_v39  ;;  %v6628_v20 = vrot.slane %v6626_v1, 5  ;;  %v14063_v47 = vadd.f32 %v10428_v46, %v3394_v40  ;;  %v3392_v18 = vadd.f32 %v3139_v5, %v16060_v28  ;;  %v10432_v17 = vpop.f32.mrf.mxu0  ;;  %v10859_v4 = vld [vmem:[%s11019_s20 + $0xf8] sm:$0xff]   ;;  %v10365_v33 = vpop.f32.mrf.mxu1 }
 0x1ee   : > { %v6634_v54 = vrot.slane %v6632_v41, 5  ;;  %v6638_v51 = vrot.slane %v6636_v32, 4  ;;  %v16063_v36 = vcombine.low %v16061_v58, %v16062_v38  ;;  %v14075_v1 = vsel %vm11383_vm7, %v7814_v53, %v7815_v30  ;;  %v16066_v41 = vld [vmem:[#allocation82_spill] sm:$0xff]  ;;  %v16067_v28 = vld [vmem:[#allocation97_spill] sm:$0xff] }
 0x1ef   : > { %16059 = vst [vmem:[#allocation66_spill] sm:$0xff] %v14063_v47  ;;  %16064 = vst [vmem:[#allocation68_spill] sm:$0xff] %v14075_v1  ;;  %v6629_v46 = vor.u32 %v6628_v20, %v6625_v60  ;;  %v6642_v21 = vshll.u32 %v14056_v24, 16  ;;  %v6646_v40 = vshrl.u32 %v14056_v24, 16  ;;  %v14079_v8 = vadd.f32 %v4473_v29, %v3392_v18  ;;  %v4489_v5 = vpop.f32.mrf.mxu0  ;;  %v16068_v47 = vld [vmem:[#allocation25_spill] sm:$0xff]  ;;  %v3152_v20 = vpop.f32.mrf.mxu1 }
 0x1f0   : > { %10528 = vmatmul.mubr.msk.bf16.gmra.mxu1 %vm1029_vm3, %v16063_v36  ;;  %v3397_v32 = vadd.f32 %v10365_v33, %v16066_v41  ;;  %v16069_v58 = vcombine.low %v16067_v28, %v16068_v47  ;;  %v6621_v38 = vsel %vm11033_vm4, %v6616_v19, %v6620_v26  ;;  %v6639_v53 = vor.u32 %v6638_v51, %v6634_v54  ;;  %v14089_v30 = vld [vmem:[%s11019_s20 + $0x98] sm:$0xf]  ;;  %v16071_v33 = vld [vmem:[#allocation83_spill] sm:$0xff] }
 0x1f1   : > { %16065 = vst [vmem:[#allocation71_spill] sm:$0xff] %v14079_v8  ;;  %v6630_v60 = vrot.slane %v6629_v46, 4  ;;  %v6644_v36 = vrot.slane %v6642_v21, 5  ;;  %v6648_v62 = vrot.slane %v6646_v40, 4  ;;  %v9784_v29 = vrot.slane %v9768_v11, 9  ;;  %v10435_v8 = vpop.f32.mrf.mxu0  ;;  %10598 = vmatmul.mubr.msk.bf16.gmra.mxu0 %vm1029_vm3, %v10859_v4  ;;  %v16073_v46 = vld [vmem:[#allocation84_spill] sm:$0xff] }
 0x1f2   : > { %10531 = vmatprep.mubr.msk.bf16.mxu1 %vm1029_vm3, %v16069_v58  ;;  %v14091_v18 = vadd.f32 %v10431_v23, %v3397_v32  ;;  %v3395_v41 = vadd.f32 %v3152_v20, %v16071_v33  ;;  %v6640_v47 = vrot.slane %v6639_v53, 4  ;;  %v7819_v28 = vrot.slane %v14033_v57, 5  ;;  %v10366_v58 = vpop.f32.mrf.mxu1  ;;  %10601 = vmatprep.mubr.msk.bf16.mxu0 %vm1029_vm3, %v10860_v56 }
 0x1f3   : > { %v6649_v19 = vor.u32 %v6648_v62, %v6644_v36  ;;  %v7822_v11 = vrot.slane %v14056_v24, 5  ;;  %v6652_v23 = vshll.u32 %v14089_v30, 16  ;;  %v3398_v4 = vadd.f32 %v10366_v58, %v16073_v46  ;;  %v4502_v21 = vpop.f32.mrf.mxu0  ;;  %v16080_v58 = vld [vmem:[#allocation26_spill] sm:$0xff]  ;;  %v10862_v46 = vld [vmem:[%s11019_s20 + $0x118] sm:$0xff]  }
 0x1f4   : > { %16070 = vst [vmem:[#allocation74_spill] sm:$0xff] %v14091_v18  ;;  %v14101_v26 = vadd.f32 %v4486_v25, %v3395_v41  ;;  %v6635_v57 = vsel %vm11033_vm4, %v6630_v60, %v6634_v54  ;;  %v6645_v56 = vsel %vm11033_vm4, %v6640_v47, %v6644_v36  ;;  %v3155_v40 = vpop.f32.mrf.mxu1  ;;  %v16074_v62 = vsel %vm11033_vm4, %v14018_v35, %v14020_v27  ;;  %v14120_v54 = vld [vmem:[%s11019_s20 + $0x9c] sm:$0x1]  ;;  %v10861_v41 = vld [vmem:[%s11019_s20 + $0x10c] sm:$0xff]  }
 0x1f5   : > { %v14113_v24 = vcombine.low %v16074_v62, %v6621_v38  ;;  %v14117_v32 = vrot.slane %v6649_v19, 4  ;;  %v7821_v53 = vrot.slane %v7819_v28, 4  ;;  %v14122_v20 = vadd.f32 %v10432_v17, %v3398_v4  ;;  %v16077_v60 = vld [vmem:[#allocation85_spill] sm:$0xff]  ;;  %v10436_v33 = vpop.f32.mrf.mxu0  ;;  %v16079_v47 = vld [vmem:[#allocation99_spill] sm:$0xff] }
 0x1f6   : > { %16072 = vst [vmem:[#allocation77_spill] sm:$0xff] %v14101_v26  ;;  %v3396_v36 = vadd.f32 %v3155_v40, %v16077_v60  ;;  %v14128_v35 = vsel %vm11383_vm7, %v9784_v29, %v7819_v28  ;;  %v6656_v27 = vshrl.u32 %v14089_v30, 16  ;;  %v10369_v38 = vpop.f32.mrf.mxu1  ;;  %v16081_v19 = vcombine.low %v16079_v47, %v16080_v58  ;;  %v9648_v28 = vld [vmem:[%s11019_s20 + $0xa0] sm:$0xf]  ;;  %v16086_v47 = vld [vmem:[#allocation27_spill] sm:$0xff]  ;;  %v16087_v58 = vld [vmem:[#allocation5_spill] sm:$0xff] }
 0x1f7   : > { %16075 = vst [vmem:[#allocation91_spill] sm:$0xff] %v14113_v24  ;;  %16076 = vst [vmem:[#allocation92_spill] sm:$0xff] %v14122_v20  ;;  %v14136_v17 = vcombine.low %v6635_v57, %v6645_v56  ;;  %v14140_v4 = vsel %vm11383_vm7, %v7821_v53, %v7822_v11  ;;  %v14142_v40 = vrot.slane %v6652_v23, 5  ;;  %v7825_v29 = vrot.slane %v14089_v30, 5  ;;  %v16085_v60 = vld [vmem:[#allocation86_spill] sm:$0xff]  ;;  %v4505_v51 = vpop.f32.mrf.mxu0 }
 0x1f8   : > { %16078 = vst [vmem:[#allocation7_spill] sm:$0xff] %v14128_v35  ;;  %10532 = vmatmul.mubr.msk.bf16.gmra.mxu1 %vm1029_vm3, %v16081_v19  ;;  %16083 = vst [vmem:[#allocation81_spill] sm:$0xff] %v14140_v4  ;;  %v14146_v62 = vadd.f32 %v4489_v5, %v3396_v36  ;;  %v3401_v25 = vadd.f32 %v10369_v38, %v16085_v60  ;;  %v16088_v19 = vcombine.low %v16086_v47, %v16087_v58  ;;  %v14155_v53 = vld [vmem:[%s11019_s20 + $0xa4] sm:$0xf]  ;;  %v3168_v23 = vpop.f32.mrf.mxu1  ;;  %v14171_v5 = vld [vmem:[%s11019_s20 + $0xa8] sm:$0xf] }
 0x1f9   : > { %16082 = vst [vmem:[#allocation79_spill] sm:$0xff] %v14136_v17  ;;  %v7824_v57 = vrot.slane %v7822_v11, 4  ;;  %v6662_v56 = vshll.u32 %v14120_v54, 16  ;;  %v6658_v36 = vrot.slane %v6656_v27, 4  ;;  %v7828_v38 = vrot.slane %v14120_v54, 5  ;;  %v16090_v11 = vld [vmem:[#allocation87_spill] sm:$0xff]  ;;  %v10439_v58 = vpop.f32.mrf.mxu0  ;;  %10602 = vmatmul.mubr.msk.bf16.gmra.mxu0 %vm1029_vm3, %v10861_v41 }
 0x1fa   : > { %16084 = vst [vmem:[#allocation94_spill] sm:$0xff] %v14146_v62  ;;  %10535 = vmatprep.mubr.msk.bf16.mxu1 %vm1029_vm3, %v16088_v19  ;;  %v14164_v60 = vadd.f32 %v10435_v8, %v3401_v25  ;;  %v3399_v47 = vadd.f32 %v3168_v23, %v16090_v11  ;;  %v6667_v19 = vshrl.u32 %v9648_v28, 16  ;;  %v6670_v62 = vshll.u32 %v9648_v28, 16  ;;  %v10370_v20 = vpop.f32.mrf.mxu1  ;;  %10605 = vmatprep.mubr.msk.bf16.mxu0 %vm1029_vm3, %v10862_v46  ;;  %v16092_v27 = vld [vmem:[#allocation88_spill] sm:$0xff]  ;;  %v9769_v24 = vld [vmem:[%s11019_s20 + $0xa0] sm:$0xe] }
 0x1fb   : > { %v6659_v30 = vor.u32 %v6658_v36, %v14142_v40  ;;  %v7827_v26 = vrot.slane %v7825_v29, 4  ;;  %v6676_v54 = vshll.u32 %v14155_v53, 16  ;;  %v6680_v8 = vshrl.u32 %v14155_v53, 16  ;;  %v4518_v23 = vpop.f32.mrf.mxu0  ;;  %v16094_v35 = vld [vmem:[#allocation89_spill] sm:$0xff] }
 0x1fc   : > { %16089 = vst [vmem:[#allocation95_spill] sm:$0xff] %v14164_v60  ;;  %v14175_v25 = vadd.f32 %v4502_v21, %v3399_v47  ;;  %v3402_v41 = vadd.f32 %v10370_v20, %v16092_v27  ;;  %v6664_v28 = vrot.slane %v6662_v56, 5  ;;  %v6669_v11 = vrot.slane %v6667_v19, 4  ;;  %v3171_v46 = vpop.f32.mrf.mxu1  ;;  %v10863_v21 = vld [vmem:[%s11019_s20 + $0x120] sm:$0xff]   ;;  %v16095_v27 = vld [vmem:[#allocation3_spill] sm:$0xff] }
 0x1fd   : > { %v6660_v60 = vrot.slane %v6659_v30, 4  ;;  %v6672_v18 = vrot.slane %v6670_v62, 5  ;;  %v6678_v36 = vrot.slane %v6676_v54, 5  ;;  %v6682_v17 = vrot.slane %v6680_v8, 4  ;;  %v10440_v39 = vpop.f32.mrf.mxu0  ;;  %v16096_v19 = vld [vmem:[#allocation102_spill] sm:$0xff]  ;;  %v10864_v62 = vld [vmem:[%s11019_s20 + $0x12c] sm:$0xff]  }
 0x1fe   : > { %16091 = vst [vmem:[#allocation82_spill] sm:$0xff] %v14175_v25  ;;  %v14179_v4 = vadd.f32 %v10436_v33, %v3402_v41  ;;  %v3400_v1 = vadd.f32 %v3171_v46, %v16094_v35  ;;  %v6686_v47 = vshll.u32 %v14171_v5, 16  ;;  %v6690_v20 = vshrl.u32 %v14171_v5, 16  ;;  %v10373_v56 = vpop.f32.mrf.mxu1  ;;  %v14199_v8 = vld [vmem:[%s11019_s20 + $0xac] sm:$0xf]  ;;  %v16099_v46 = vld [vmem:[#allocation90_spill] sm:$0xff] }
 0x1ff   : > { %v16097_v25 = vcombine.low %v16095_v27, %v16096_v19  ;;  %v14192_v30 = vsel %vm11383_vm7, %v7824_v57, %v7825_v29  ;;  %v14196_v33 = vsel %vm11383_vm7, %v7827_v26, %v7828_v38  ;;  %v6673_v35 = vor.u32 %v6672_v18, %v6669_v11  ;;  %v4521_v27 = vpop.f32.mrf.mxu0  ;;  %v16100_v19 = vld [vmem:[#allocation32_spill] sm:$0xff] }
 0x200   : > { %16093 = vst [vmem:[#allocation97_spill] sm:$0xff] %v14179_v4  ;;  %v6683_v54 = vor.u32 %v6682_v17, %v6678_v36  ;;  %v14201_v41 = vadd.f32 %v4505_v51, %v3400_v1  ;;  %v3405_v4 = vadd.f32 %v10373_v56, %v16099_v46  ;;  %v6688_v29 = vrot.slane %v6686_v47, 5  ;;  %v3184_v16 = vpop.f32.mrf.mxu1  ;;  %v16104_v1 = vld [vmem:[#allocation93_spill] sm:$0xff] }
 0x201   : > { %10536 = vmatmul.mubr.msk.bf16.gmra.mxu1 %vm1029_vm3, %v16097_v25  ;;  %v16101_v25 = vld [vmem:[#allocation33_spill] sm:$0xff]  ;;  %v9785_v57 = vrot.slane %v9769_v24, 9  ;;  %v6674_v34 = vrot.slane %v6673_v35, 4  ;;  %v6692_v18 = vrot.slane %v6690_v20, 4  ;;  %v7832_v17 = vrot.slane %v14155_v53, 5  ;;  %v10443_v11 = vpop.f32.mrf.mxu0  ;;  %10606 = vmatmul.mubr.msk.bf16.gmra.mxu0 %vm1029_vm3, %v10863_v21 }
 0x202   : > { %16098 = vst [vmem:[#allocation25_spill] sm:$0xff] %v14201_v41  ;;  %v16102_v3 = vcombine.low %v16100_v19, %v16101_v25  ;;  %v6684_v26 = vrot.slane %v6683_v54, 4  ;;  %v14209_v38 = vadd.f32 %v10439_v58, %v3405_v4  ;;  %v3403_v51 = vadd.f32 %v3184_v16, %v16104_v1  ;;  %v10374_v24 = vpop.f32.mrf.mxu1  ;;  %10609 = vmatprep.mubr.msk.bf16.mxu0 %vm1029_vm3, %v10864_v62  ;;  %v9652_v58 = vld [vmem:[%s11019_s20 + $0xb0] sm:$0x1]  ;;  %v16110_v25 = vld [vmem:[#allocation98_spill] sm:$0xff]  ;;  %v16130_v41 = vld [vmem:[#allocation35_spill] sm:$0xff] }
 0x203   : > { %v6665_v56 = vsel %vm11033_vm4, %v6660_v60, %v6664_v28  ;;  %v6679_v47 = vsel %vm11033_vm4, %v6674_v34, %v6678_v36  ;;  %v6693_v53 = vor.u32 %v6692_v18, %v6688_v29  ;;  %v7835_v16 = vrot.slane %v14171_v5, 5  ;;  %v16106_v60 = vld [vmem:[#allocation96_spill] sm:$0xff]  ;;  %v4534_v20 = vpop.f32.mrf.mxu0  ;;  %v10866_v1 = vld [vmem:[%s11019_s20 + $0x140] sm:$0xff]  }
 0x204   : > { %10539 = vmatprep.mubr.msk.bf16.mxu1 %vm1029_vm3, %v16102_v3  ;;  %16103 = vst [vmem:[#allocation83_spill] sm:$0xff] %v14209_v38  ;;  %v6696_v3 = vshll.u32 %v14199_v8, 16  ;;  %v6689_v4 = vsel %vm11033_vm4, %v6684_v26, %v6688_v29  ;;  %v14223_v21 = vadd.f32 %v4518_v23, %v3403_v51  ;;  %v3406_v28 = vadd.f32 %v10374_v24, %v16106_v60  ;;  %v3187_v34 = vpop.f32.mrf.mxu1  ;;  %v10865_v18 = vld [vmem:[%s11019_s20 + $0x134] sm:$0xff]   ;;  %v16117_v62 = vld [vmem:[#allocation38_spill] sm:$0xff] }
 0x205   : > { %v7834_v35 = vrot.slane %v7832_v17, 4  ;;  %v16107_v36 = vsel %vm11033_vm4, %v14117_v32, %v14142_v40  ;;  %v14237_v5 = vsel %vm11383_vm7, %v9785_v57, %v7832_v17  ;;  %v6700_v46 = vshrl.u32 %v14199_v8, 16  ;;  %v10444_v26 = vpop.f32.mrf.mxu0  ;;  %v9653_v40 = vld [vmem:[%s11019_s20 + $0xb4] sm:$0xf]  ;;  %v16112_v24 = vld [vmem:[#allocation37_spill] sm:$0xff]  ;;  %v16113_v57 = vld [vmem:[#allocation34_spill] sm:$0xff] }
 0x206   : > { %16105 = vst [vmem:[#allocation84_spill] sm:$0xff] %v14223_v21  ;;  %v14233_v54 = vcombine.low %v16107_v36, %v6665_v56  ;;  %v14239_v23 = vrot.slane %v6696_v3, 5  ;;  %v14242_v19 = vadd.f32 %v10440_v39, %v3406_v28  ;;  %v3404_v29 = vadd.f32 %v3187_v34, %v16110_v25  ;;  %v10377_v56 = vpop.f32.mrf.mxu1  ;;  %v14258_v34 = vld [vmem:[%s11019_s20 + $0xb8] sm:$0xf] }
 0x207   : > { %v14247_v51 = vcombine.low %v6679_v47, %v6689_v4  ;;  %v6706_v32 = vshll.u32 %v9652_v58, 16  ;;  %v16114_v17 = vcombine.low %v16112_v24, %v16113_v57  ;;  %v14254_v3 = vrot.slane %v6693_v53, 4  ;;  %v16116_v47 = vld [vmem:[#allocation100_spill] sm:$0xff]  ;;  %v4537_v25 = vpop.f32.mrf.mxu0 }
 0x208   : > { %16108 = vst [vmem:[#allocation85_spill] sm:$0xff] %v14233_v54  ;;  %16109 = vst [vmem:[#allocation99_spill] sm:$0xff] %v14242_v19  ;;  %v7837_v60 = vrot.slane %v7835_v16, 4  ;;  %v6702_v39 = vrot.slane %v6700_v46, 4  ;;  %v7838_v28 = vrot.slane %v14199_v8, 5  ;;  %v14260_v36 = vadd.f32 %v4521_v27, %v3404_v29  ;;  %v16118_v19 = vld [vmem:[#allocation41_spill] sm:$0xff]  ;;  %v3200_v8 = vpop.f32.mrf.mxu1 }
 0x209   : > { %16111 = vst [vmem:[#allocation26_spill] sm:$0xff] %v14247_v51  ;;  %10540 = vmatmul.mubr.msk.bf16.gmra.mxu1 %vm1029_vm3, %v16114_v17  ;;  %v3409_v4 = vadd.f32 %v10377_v56, %v16116_v47  ;;  %v16119_v21 = vcombine.low %v16117_v62, %v16118_v19  ;;  %v14269_v53 = vsel %vm11383_vm7, %v7834_v35, %v7835_v16  ;;  %v14271_v46 = vrot.slane %v6706_v32, 5  ;;  %v16121_v56 = vld [vmem:[#allocation101_spill] sm:$0xff] }
 0x20a   : > { %16115 = vst [vmem:[#allocation86_spill] sm:$0xff] %v14260_v36  ;;  %v6703_v24 = vor.u32 %v6702_v39, %v14239_v23  ;;  %v7840_v57 = vrot.slane %v7838_v28, 4  ;;  %v7841_v27 = vrot.slane %v9652_v58, 5  ;;  %v6711_v29 = vshrl.u32 %v9653_v40, 16  ;;  %v10447_v36 = vpop.f32.mrf.mxu0  ;;  %10610 = vmatmul.mubr.msk.bf16.gmra.mxu0 %vm1029_vm3, %v10865_v18  ;;  %v10378_v35 = vpop.f32.mrf.mxu1  ;;  %v16123_v18 = vld [vmem:[#allocation4_spill] sm:$0xff] }
 0x20b   : > { %10543 = vmatprep.mubr.msk.bf16.mxu1 %vm1029_vm3, %v16119_v21  ;;  %v14274_v17 = vadd.f32 %v10443_v11, %v3409_v4  ;;  %v3407_v47 = vadd.f32 %v3200_v8, %v16121_v56  ;;  %v14279_v21 = vld [vmem:[%s11019_s20 + $0xbc] sm:$0xf]  ;;  %v6714_v16 = vshll.u32 %v9653_v40, 16  ;;  %v6720_v62 = vshll.u32 %v14258_v34, 16  ;;  %10613 = vmatprep.mubr.msk.bf16.mxu0 %vm1029_vm3, %v10866_v1  ;;  %v9770_v56 = vld [vmem:[%s11019_s20 + $0xb4] sm:$0xe] }
 0x20c   : > { %v6699_v11 = vsel %vm11033_vm4, %v14254_v3, %v14239_v23  ;;  %v6704_v58 = vrot.slane %v6703_v24, 4  ;;  %v6713_v19 = vrot.slane %v6711_v29, 4  ;;  %v6724_v32 = vshrl.u32 %v14258_v34, 16  ;;  %v4550_v40 = vpop.f32.mrf.mxu0 }
 0x20d   : > { %16120 = vst [vmem:[#allocation27_spill] sm:$0xff] %v14274_v17  ;;  %v14288_v39 = vadd.f32 %v4534_v20, %v3407_v47  ;;  %v3410_v4 = vadd.f32 %v10378_v35, %v16123_v18  ;;  %v14293_v8 = vsel %vm11383_vm7, %v7837_v60, %v7838_v28  ;;  %v6716_v1 = vrot.slane %v6714_v16, 5  ;;  %v3203_v17 = vpop.f32.mrf.mxu1  ;;  %v16125_v47 = vld [vmem:[#allocation103_spill] sm:$0xff]  ;;  %v14309_v16 = vld [vmem:[%s11019_s20 + $0xc0] sm:$0xf] }
 0x20e   : > { %v14298_v23 = vsel %vm11383_vm7, %v7840_v57, %v7841_v27  ;;  %v6722_v3 = vrot.slane %v6720_v62, 5  ;;  %v6726_v24 = vrot.slane %v6724_v32, 4  ;;  %v6730_v20 = vshll.u32 %v14279_v21, 16  ;;  %v10448_v18 = vpop.f32.mrf.mxu0  ;;  %v16126_v57 = vld [vmem:[#allocation45_spill] sm:$0xff]  ;;  %v16127_v27 = vld [vmem:[#allocation42_spill] sm:$0xff] }
 0x20f   : > { %16122 = vst [vmem:[#allocation5_spill] sm:$0xff] %v14288_v39  ;;  %v14301_v29 = vadd.f32 %v10444_v26, %v3410_v4  ;;  %v3408_v35 = vadd.f32 %v3203_v17, %v16125_v47  ;;  %v10867_v39 = vld [vmem:[%s11019_s20 + $0x148] sm:$0xff]   ;;  %v6709_v60 = vsel %vm11033_vm4, %v6704_v58, %v14271_v46  ;;  %v6717_v28 = vor.u32 %v6716_v1, %v6713_v19  ;;  %v10381_v38 = vpop.f32.mrf.mxu1  ;;  %v10868_v32 = vld [vmem:[%s11019_s20 + $0x154] sm:$0xff]  }
 0x210   : > { %v16128_v62 = vcombine.low %v16126_v57, %v16127_v27  ;;  %v6727_v26 = vor.u32 %v6726_v24, %v6722_v3  ;;  %v6732_v4 = vrot.slane %v6730_v20, 5  ;;  %v6734_v17 = vshrl.u32 %v14279_v21, 16  ;;  %v4553_v46 = vpop.f32.mrf.mxu0  ;;  %v16131_v58 = vld [vmem:[#allocation47_spill] sm:$0xff]  ;;  %v16132_v19 = vld [vmem:[#allocation49_spill] sm:$0xff] }
 0x211   : > { %16124 = vst [vmem:[#allocation87_spill] sm:$0xff] %v14301_v29  ;;  %v9786_v47 = vrot.slane %v9770_v56, 9  ;;  %v14317_v29 = vadd.f32 %v4537_v25, %v3408_v35  ;;  %v3413_v51 = vadd.f32 %v10381_v38, %v16130_v41  ;;  %v16133_v1 = vcombine.low %v16131_v58, %v16132_v19  ;;  %v3216_v27 = vpop.f32.mrf.mxu1  ;;  %v16135_v41 = vld [vmem:[#allocation104_spill] sm:$0xff]  ;;  %v9657_v58 = vld [vmem:[%s11019_s20 + $0xc4] sm:$0x1] }
 0x212   : > { %10544 = vmatmul.mubr.msk.bf16.gmra.mxu1 %vm1029_vm3, %v16128_v62  ;;  %v6718_v54 = vrot.slane %v6717_v28, 4  ;;  %v7845_v57 = vrot.slane %v14258_v34, 5  ;;  %v6728_v62 = vrot.slane %v6727_v26, 4  ;;  %v6736_v24 = vrot.slane %v6734_v17, 4  ;;  %v10451_v35 = vpop.f32.mrf.mxu0  ;;  %10614 = vmatmul.mubr.msk.bf16.gmra.mxu0 %vm1029_vm3, %v10867_v39  ;;  %v16138_v39 = vld [vmem:[#allocation39_spill] sm:$0xff] }
 0x213   : > { %16129 = vst [vmem:[#allocation88_spill] sm:$0xff] %v14317_v29  ;;  %10547 = vmatprep.mubr.msk.bf16.mxu1 %vm1029_vm3, %v16133_v1  ;;  %v7848_v20 = vrot.slane %v14279_v21, 5  ;;  %v6740_v25 = vshll.u32 %v14309_v16, 16  ;;  %v14327_v56 = vadd.f32 %v10447_v36, %v3413_v51  ;;  %v3411_v38 = vadd.f32 %v3216_v27, %v16135_v41  ;;  %v10382_v26 = vpop.f32.mrf.mxu1  ;;  %10617 = vmatprep.mubr.msk.bf16.mxu0 %vm1029_vm3, %v10868_v32  ;;  %v10869_v32 = vld [vmem:[%s11019_s20 + $0x15c] sm:$0xff]  }
 0x214   : > { %v14336_v21 = vcombine.low %v6699_v11, %v6709_v60  ;;  %v6723_v51 = vsel %vm11033_vm4, %v6718_v54, %v6722_v3  ;;  %v6737_v36 = vor.u32 %v6736_v24, %v6732_v4  ;;  %v7847_v17 = vrot.slane %v7845_v57, 4  ;;  %v4566_v27 = vpop.f32.mrf.mxu0 }
 0x215   : > { %16134 = vst [vmem:[#allocation89_spill] sm:$0xff] %v14327_v56  ;;  %v14341_v19 = vadd.f32 %v4550_v40, %v3411_v38  ;;  %v3414_v1 = vadd.f32 %v10382_v26, %v16138_v39  ;;  %v6733_v41 = vsel %vm11033_vm4, %v6728_v62, %v6732_v4  ;;  %v14348_v11 = vsel %vm11383_vm7, %v9786_v47, %v7845_v57  ;;  %v3219_v60 = vpop.f32.mrf.mxu1  ;;  %v16140_v26 = vld [vmem:[#allocation43_spill] sm:$0xff] }
 0x216   : > { %16136 = vst [vmem:[#allocation3_spill] sm:$0xff] %v14336_v21  ;;  %v14351_v54 = vrot.slane %v6737_v36, 4  ;;  %v7850_v3 = vrot.slane %v7848_v20, 4  ;;  %v14353_v24 = vrot.slane %v6740_v25, 5  ;;  %v6744_v40 = vshrl.u32 %v14309_v16, 16  ;;  %v10452_v34 = vpop.f32.mrf.mxu0  ;;  %v16142_v36 = vld [vmem:[#allocation54_spill] sm:$0xff] }
 0x217   : > { %16137 = vst [vmem:[#allocation102_spill] sm:$0xff] %v14341_v19  ;;  %v14356_v38 = vadd.f32 %v10448_v18, %v3414_v1  ;;  %v3412_v39 = vadd.f32 %v3219_v60, %v16140_v26  ;;  %v6750_v28 = vshll.u32 %v9657_v58, 16  ;;  %v7851_v4 = vrot.slane %v14309_v16, 5  ;;  %v9658_v62 = vld [vmem:[%s11019_s20 + $0xc8] sm:$0xf]  ;;  %v10385_v57 = vpop.f32.mrf.mxu1  ;;  %v16146_v26 = vld [vmem:[#allocation46_spill] sm:$0xff] }
 0x218   : > { %v14362_v47 = vld [vmem:[%s11019_s20 + $0xcc] sm:$0xf]  ;;  %v14368_v25 = vcombine.low %v6723_v51, %v6733_v41  ;;  %v14372_v18 = vsel %vm11383_vm7, %v7847_v17, %v7848_v20  ;;  %v6746_v1 = vrot.slane %v6744_v40, 4  ;;  %v7854_v20 = vrot.slane %v9657_v58, 5 }
 0x219   : > { %16139 = vst [vmem:[#allocation90_spill] sm:$0xff] %v14356_v38  ;;  %v16141_v19 = vld [vmem:[#allocation51_spill] sm:$0xff]  ;;  %v14378_v60 = vadd.f32 %v4553_v46, %v3412_v39  ;;  %v3417_v38 = vadd.f32 %v10385_v57, %v16146_v26  ;;  %v7853_v51 = vrot.slane %v7851_v4, 4  ;;  %v3232_v17 = vpop.f32.mrf.mxu1  ;;  %v6758_v29 = vshll.u32 %v9658_v62, 16  ;;  %v16149_v39 = vld [vmem:[#allocation50_spill] sm:$0xff] }
 0x21a   : > { %v16143_v56 = vcombine.low %v16141_v19, %v16142_v36  ;;  %16144 = vst [vmem:[#allocation32_spill] sm:$0xff] %v14368_v25  ;;  %v4569_v19 = vpop.f32.mrf.mxu0  ;;  %v6747_v41 = vor.u32 %v6746_v1, %v14353_v24  ;;  %v6755_v36 = vshrl.u32 %v9658_v62, 16  ;;  %v6764_v40 = vshll.u32 %v14362_v47, 16  ;;  %10618 = vmatmul.mubr.msk.bf16.gmra.mxu0 %vm1029_vm3, %v10869_v32  ;;  %v9771_v25 = vld [vmem:[%s11019_s20 + $0xc8] sm:$0xe] }
 0x21b   : > { %16145 = vst [vmem:[#allocation33_spill] sm:$0xff] %v14378_v60  ;;  %v14387_v46 = vadd.f32 %v10451_v35, %v3417_v38  ;;  %v3415_v16 = vadd.f32 %v3232_v17, %v16149_v39  ;;  %v6768_v58 = vshrl.u32 %v14362_v47, 16  ;;  %v10386_v26 = vpop.f32.mrf.mxu1  ;;  %v16150_v1 = vcombine.low %v13581_v31, %v13607_v6 }
 0x21c   : > { %10548 = vmatmul.mubr.msk.bf16.gmra.mxu1 %vm1029_vm3, %v16143_v56  ;;  %v16147_v56 = vcombine.low %v13486_v14, %v13506_v9  ;;  %v10455_v57 = vpop.f32.mrf.mxu0  ;;  %v6752_v14 = vrot.slane %v6750_v28, 5  ;;  %v14392_v9 = vld [vmem:[%s11019_s20 + $0xd0] sm:$0xf]  ;;  %v6748_v62 = vrot.slane %v6747_v41, 4  ;;  %v14401_v35 = vsel %vm11383_vm7, %v7850_v3, %v7851_v4  ;;  %v16151_v28 = vld [vmem:[#allocation53_spill] sm:$0xff] }
 0x21d   : > { %16148 = vst [vmem:[#allocation93_spill] sm:$0xff] %v14387_v46  ;;  %10689 = vmatprep.mubr.msk.bf16.mxu0 %vm1029_vm3, %v16150_v1  ;;  %v6757_v38 = vrot.slane %v6755_v36, 4  ;;  %v14403_v17 = vadd.f32 %v4566_v27, %v3415_v16  ;;  %v3418_v32 = vadd.f32 %v10386_v26, %v16151_v28  ;;  %v6766_v46 = vrot.slane %v6764_v40, 5  ;;  %v3235_v21 = vpop.f32.mrf.mxu1  ;;  %v16152_v27 = vld [vmem:[#allocation55_spill] sm:$0xff] }
 0x21e   : > { %10551 = vmatprep.mubr.msk.bf16.mxu1 %vm1029_vm3, %v16147_v56  ;;  %v6760_v56 = vrot.slane %v6758_v29, 5  ;;  %v4582_v39 = vpop.f32.mrf.mxu0  ;;  %v6770_v60 = vrot.slane %v6768_v58, 4  ;;  %v14409_v31 = vsel %vm11383_vm7, %v7853_v51, %v7854_v20  ;;  %v6774_v3 = vshll.u32 %v14392_v9, 16  ;;  %v14419_v58 = vld [vmem:[%s11019_s20 + $0xd4] sm:$0xf] }
 0x21f   : > { %v6778_v4 = vshrl.u32 %v14392_v9, 16  ;;  %v14413_v29 = vadd.f32 %v10452_v34, %v3418_v32  ;;  %v3416_v16 = vadd.f32 %v3235_v21, %v16152_v27  ;;  %v6753_v36 = vsel %vm11033_vm4, %v6748_v62, %v6752_v14  ;;  %v10389_v26 = vpop.f32.mrf.mxu1  ;;  %v16154_v21 = vld [vmem:[#allocation57_spill] sm:$0xff] }
 0x220   : > { %v6761_v6 = vor.u32 %v6760_v56, %v6757_v38  ;;  %v10456_v41 = vpop.f32.mrf.mxu0  ;;  %v6771_v40 = vor.u32 %v6770_v60, %v6766_v46  ;;  %v16153_v51 = vcombine.low %v13519_v42, %v13533_v63  ;;  %v6776_v1 = vrot.slane %v6774_v3, 5  ;;  %v16156_v3 = vld [vmem:[#allocation61_spill] sm:$0xff] }
 0x221   : > { %v6780_v38 = vrot.slane %v6778_v4, 4  ;;  %v9787_v34 = vrot.slane %v9771_v25, 9  ;;  %v14425_v56 = vadd.f32 %v4569_v19, %v3416_v16  ;;  %v3421_v28 = vadd.f32 %v10389_v26, %v16154_v21  ;;  %v3248_v62 = vpop.f32.mrf.mxu1  ;;  %v9662_v21 = vld [vmem:[%s11019_s20 + $0xd8] sm:$0x1] }
 0x222   : > { %v6762_v20 = vrot.slane %v6761_v6, 4  ;;  %v4585_v32 = vpop.f32.mrf.mxu0  ;;  %v6772_v60 = vrot.slane %v6771_v40, 4  ;;  %v7858_v14 = vrot.slane %v14362_v47, 5  ;;  %v7861_v6 = vrot.slane %v14392_v9, 5  ;;  %v16159_v9 = vld [vmem:[#allocation8_spill] sm:$0xff] }
 0x223   : > { %v6781_v63 = vor.u32 %v6780_v38, %v6776_v1  ;;  %v6784_v25 = vshll.u32 %v14419_v58, 16  ;;  %v14435_v19 = vadd.f32 %v10455_v57, %v3421_v28  ;;  %v3419_v4 = vadd.f32 %v3248_v62, %v16156_v3  ;;  %v10390_v26 = vpop.f32.mrf.mxu1 }
 0x224   : > { %10552 = vmatmul.mubr.msk.bf16.gmra.mxu1 %vm1029_vm3, %v16153_v51  ;;  %v10459_v27 = vpop.f32.mrf.mxu0  ;;  %v6767_v47 = vsel %vm11033_vm4, %v6762_v20, %v6766_v46  ;;  %v6777_v40 = vsel %vm11033_vm4, %v6772_v60, %v6776_v1  ;;  %v16160_v51 = vld [vmem:[#allocation9_spill] sm:$0xff]  ;;  %v16162_v57 = vsel %vm11033_vm4, %v14351_v54, %v14353_v24  ;;  %v7860_v1 = vrot.slane %v7858_v14, 4  ;;  %v16164_v60 = vld [vmem:[#allocation60_spill] sm:$0xff] }
 0x225   : > { %10623 = vmatprep.mubr.msk.bf16.mxu1 %vm1029_vm3, %v13574_v12  ;;  %16155 = vst [vmem:[#allocation96_spill] sm:$0xff] %v14435_v19  ;;  %v16157_v12 = vld [vmem:[#allocation62_spill] sm:$0xff]  ;;  %v16161_v38 = vcombine.low %v16159_v9, %v16160_v51  ;;  %v14459_v20 = vrot.slane %v6781_v63, 4  ;;  %v14462_v28 = vadd.f32 %v4582_v39, %v3419_v4  ;;  %v3422_v62 = vadd.f32 %v10390_v26, %v16164_v60  ;;  %v3251_v24 = vpop.f32.mrf.mxu1  ;;  %v9663_v4 = vld [vmem:[%s11019_s20 + $0xdc] sm:$0xf]  ;;  %v16166_v9 = vld [vmem:[#allocation63_spill] sm:$0xff] }
 0x226   : > { %v16158_v16 = vcombine.low %v13629_v52, %v16157_v12  ;;  %v14455_v52 = vcombine.low %v16162_v57, %v6753_v36  ;;  %v4598_v3 = vpop.f32.mrf.mxu0  ;;  %v14467_v12 = vsel %vm11383_vm7, %v9787_v34, %v7858_v14  ;;  %v6788_v54 = vshrl.u32 %v14419_v58, 16  ;;  %v14484_v57 = vld [vmem:[%s11019_s20 + $0xe0] sm:$0xf]  ;;  %v16175_v19 = vld [vmem:[#allocation65_spill] sm:$0xff] }
 0x227   : > { %16163 = vst [vmem:[#allocation98_spill] sm:$0xff] %v14462_v28  ;;  %v14470_v36 = vcombine.low %v6767_v47, %v6777_v40  ;;  %v14474_v63 = vsel %vm11383_vm7, %v7860_v1, %v7861_v6  ;;  %v7864_v39 = vrot.slane %v14419_v58, 5  ;;  %v14480_v26 = vadd.f32 %v10456_v41, %v3422_v62  ;;  %v10393_v47 = vpop.f32.mrf.mxu1  ;;  %v16167_v40 = vld [vmem:[#allocation2_spill] sm:$0xff] }
 0x228   : > { %10690 = vmatmul.mubr.msk.bf16.vlgmr.msra.gmra.mxu0 %vm1029_vm3, %v16158_v16  ;;  %v14476_v16 = vrot.slane %v6784_v25, 5  ;;  %v3420_v51 = vadd.f32 %v3251_v24, %v16166_v9  ;;  %v10460_v34 = vpop.f32.mrf.mxu0  ;;  %v7863_v14 = vrot.slane %v7861_v6, 4  ;;  %v6790_v58 = vrot.slane %v6788_v54, 4  ;;  %v16169_v6 = vld [vmem:[#allocation64_spill] sm:$0xff] }
 0x229   : > { %10693 = vmatprep.mubr.msk.bf16.mxu0 %vm1029_vm3, %v16161_v38  ;;  %16165 = vst [vmem:[#allocation37_spill] sm:$0xff] %v14480_v26  ;;  %v6794_v38 = vshll.u32 %v9662_v21, 16  ;;  %v7867_v1 = vrot.slane %v9662_v21, 5  ;;  %v3425_v62 = vadd.f32 %v10393_v47, %v16169_v6  ;;  %v6799_v9 = vshrl.u32 %v9663_v4, 16  ;;  %v3264_v46 = vpop.f32.mrf.mxu1  ;;  %v14501_v26 = vld [vmem:[%s11019_s20 + $0xe4] sm:$0xf] }
 0x22a   : > { %v14494_v60 = vadd.f32 %v4585_v32, %v3420_v51  ;;  %v4601_v24 = vpop.f32.mrf.mxu0  ;;  %v6791_v25 = vor.u32 %v6790_v58, %v14476_v16  ;;  %v7866_v42 = vrot.slane %v7864_v39, 4  ;;  %v6808_v54 = vshll.u32 %v14484_v57, 16  ;;  %v16171_v51 = vld [vmem:[#allocation67_spill] sm:$0xff] }
 0x22b   : > { %v6812_v32 = vshrl.u32 %v14484_v57, 16  ;;  %v14505_v21 = vadd.f32 %v10459_v27, %v3425_v62  ;;  %v3423_v47 = vadd.f32 %v3264_v46, %v16171_v51  ;;  %v6801_v58 = vrot.slane %v6799_v9, 4  ;;  %v10394_v41 = vpop.f32.mrf.mxu1  ;;  %v9772_v46 = vld [vmem:[%s11019_s20 + $0xdc] sm:$0xe] }
 0x22c   : > { %10624 = vmatmul.mubr.msk.bf16.vlgmr.msra.gmra.mxu1 %vm1029_vm3, %v16167_v40  ;;  %16168 = vst [vmem:[#allocation34_spill] sm:$0xff] %v14494_v60  ;;  %v6802_v40 = vshll.u32 %v9663_v4, 16  ;;  %v10463_v6 = vpop.f32.mrf.mxu0  ;;  %v6796_v4 = vrot.slane %v6794_v38, 5  ;;  %v16173_v60 = vcombine.low %v13796_v7, %v13812_v59  ;;  %v6792_v28 = vrot.slane %v6791_v25, 4 }
 0x22d   : > { %10627 = vmatprep.mubr.msk.bf16.mxu1 %vm1029_vm3, %v13776_v2  ;;  %16170 = vst [vmem:[#allocation100_spill] sm:$0xff] %v14505_v21  ;;  %v16172_v2 = vcombine.low %v13747_v50, %v13751_v44  ;;  %v6810_v62 = vrot.slane %v6808_v54, 5  ;;  %v6814_v21 = vrot.slane %v6812_v32, 4  ;;  %v14517_v51 = vadd.f32 %v4598_v3, %v3423_v47  ;;  %v14531_v3 = vld [vmem:[%s11019_s20 + $0xe8] sm:$0xf] }
 0x22e   : > { %v6804_v27 = vrot.slane %v6802_v40, 5  ;;  %v3426_v50 = vadd.f32 %v10394_v41, %v16175_v19  ;;  %v4614_v44 = vpop.f32.mrf.mxu0  ;;  %v6818_v38 = vshll.u32 %v14501_v26, 16  ;;  %v6822_v9 = vshrl.u32 %v14501_v26, 16  ;;  %v16177_v19 = vld [vmem:[#allocation30_spill] sm:$0xff] }
 0x22f   : > { %16174 = vst [vmem:[#allocation38_spill] sm:$0xff] %v14517_v51  ;;  %v14524_v7 = vsel %vm11383_vm7, %v7863_v14, %v7864_v39  ;;  %v14528_v59 = vsel %vm11383_vm7, %v7866_v42, %v7867_v1  ;;  %v9788_v47 = vrot.slane %v9772_v46, 9  ;;  %v7871_v1 = vrot.slane %v14484_v57, 5 }
 0x230   : > { %10694 = vmatmul.mubr.msk.bf16.gmra.mxu0 %vm1029_vm3, %v16172_v2  ;;  %v3267_v2 = vpop.f32.mrf.mxu1  ;;  %v6805_v25 = vor.u32 %v6804_v27, %v6801_v58  ;;  %v14533_v40 = vadd.f32 %v10460_v34, %v3426_v50  ;;  %v10464_v54 = vpop.f32.mrf.mxu0  ;;  %v6820_v32 = vrot.slane %v6818_v38, 5  ;;  %v6824_v42 = vrot.slane %v6822_v9, 4  ;;  %v16179_v58 = vld [vmem:[#allocation6_spill] sm:$0xff] }
 0x231   : > { %10697 = vmatprep.mubr.msk.bf16.mxu0 %vm1029_vm3, %v16173_v60  ;;  %v6815_v60 = vor.u32 %v6814_v21, %v6810_v62  ;;  %v3424_v41 = vadd.f32 %v3267_v2, %v16177_v19  ;;  %v6797_v46 = vsel %vm11033_vm4, %v6792_v28, %v6796_v4  ;;  %v6828_v50 = vshll.u32 %v14531_v3, 16 }
 0x232   : > { %16176 = vst [vmem:[#allocation41_spill] sm:$0xff] %v14533_v40  ;;  %v10397_v51 = vpop.f32.mrf.mxu1  ;;  %v6806_v39 = vrot.slane %v6805_v25, 4  ;;  %v4617_v27 = vpop.f32.mrf.mxu0  ;;  %v7874_v9 = vrot.slane %v14501_v26, 5  ;;  %v16181_v25 = vld [vmem:[#allocation69_spill] sm:$0xff]  ;;  %v16182_v28 = vcombine.low %v13857_v49, %v13868_v45  ;;  %v16183_v26 = vcombine.low %v13908_v15, %v13932_v37  ;;  %v16186_v15 = vld [vmem:[#allocation70_spill] sm:$0xff] }
 0x233   : > { %v6816_v14 = vrot.slane %v6815_v60, 4  ;;  %v14539_v21 = vadd.f32 %v4601_v24, %v3424_v41  ;;  %v3429_v34 = vadd.f32 %v10397_v51, %v16179_v58  ;;  %v6825_v24 = vor.u32 %v6824_v42, %v6820_v32  ;;  %v9667_v51 = vld [vmem:[%s11019_s20 + $0xec] sm:$0x1]  ;;  %v16245_v40 = vld [vmem:[#allocation78_spill] sm:$0xff] }
 0x234   : > { %10628 = vmatmul.mubr.msk.bf16.gmra.mxu1 %vm1029_vm3, %v13784_v10  ;;  %v3280_v10 = vpop.f32.mrf.mxu1  ;;  %v6811_v38 = vsel %vm11033_vm4, %v6806_v39, %v6810_v62  ;;  %v10467_v60 = vpop.f32.mrf.mxu0  ;;  %v7873_v62 = vrot.slane %v7871_v1, 4  ;;  %v14575_v49 = vsel %vm11383_vm7, %v9788_v47, %v7871_v1  ;;  %v14577_v45 = vrot.slane %v6828_v50, 5  ;;  %v14590_v1 = vld [vmem:[%s11019_s20 + $0xf4] sm:$0xf] }
 0x235   : > { %16178 = vst [vmem:[#allocation101_spill] sm:$0xff] %v14539_v21  ;;  %10631 = vmatprep.mubr.msk.bf16.mxu1 %vm1029_vm3, %v13828_v13  ;;  %v6821_v57 = vsel %vm11033_vm4, %v6816_v14, %v6820_v32  ;;  %v14553_v2 = vadd.f32 %v10463_v6, %v3429_v34  ;;  %v3427_v13 = vadd.f32 %v3280_v10, %v16181_v25  ;;  %v6832_v32 = vshrl.u32 %v14531_v3, 16 }
 0x236   : > { %v10398_v19 = vpop.f32.mrf.mxu1  ;;  %v16184_v6 = vsel %vm11033_vm4, %v14459_v20, %v14476_v16  ;;  %v4630_v14 = vpop.f32.mrf.mxu0  ;;  %v14583_v42 = vcombine.low %v6811_v38, %v6821_v57  ;;  %v6838_v58 = vshll.u32 %v9667_v51, 16  ;;  %v9668_v20 = vld [vmem:[%s11019_s20 + $0xf0] sm:$0xf]  ;;  %v14586_v34 = vrot.slane %v6825_v24, 4 }
 0x237   : > { %16180 = vst [vmem:[#allocation4_spill] sm:$0xff] %v14553_v2  ;;  %v14571_v41 = vcombine.low %v16184_v6, %v6797_v46  ;;  %v14580_v39 = vadd.f32 %v4614_v44, %v3427_v13  ;;  %v3430_v37 = vadd.f32 %v10398_v19, %v16186_v15  ;;  %v7876_v46 = vrot.slane %v7874_v9, 4  ;;  %v16188_v44 = vld [vmem:[#allocation10_spill] sm:$0xff] }
 0x238   : > { %10698 = vmatmul.mubr.msk.bf16.gmra.mxu0 %vm1029_vm3, %v16182_v28  ;;  %v3283_v16 = vpop.f32.mrf.mxu1  ;;  %v6834_v10 = vrot.slane %v6832_v32, 4  ;;  %v7877_v47 = vrot.slane %v14531_v3, 5  ;;  %v10468_v13 = vpop.f32.mrf.mxu0  ;;  %v14597_v38 = vsel %vm11383_vm7, %v7873_v62, %v7874_v9  ;;  %v6840_v57 = vrot.slane %v6838_v58, 5  ;;  %v14608_v9 = vld [vmem:[%s11019_s20 + $0xf8] sm:$0xf] }
 0x239   : > { %10701 = vmatprep.mubr.msk.bf16.mxu0 %vm1029_vm3, %v16183_v26  ;;  %16185 = vst [vmem:[#allocation103_spill] sm:$0xff] %v14580_v39  ;;  %v14592_v50 = vadd.f32 %v10464_v54, %v3430_v37  ;;  %v3428_v25 = vadd.f32 %v3283_v16, %v16188_v44  ;;  %v7880_v19 = vrot.slane %v9667_v51, 5  ;;  %v6843_v26 = vshrl.u32 %v9668_v20, 16  ;;  %v16190_v54 = vld [vmem:[#allocation72_spill] sm:$0xff]  ;;  %v16192_v44 = vld [vmem:[#allocation73_spill] sm:$0xff] }
 0x23a   : > { %v10401_v28 = vpop.f32.mrf.mxu1  ;;  %v6835_v24 = vor.u32 %v6834_v10, %v14577_v45  ;;  %v7879_v3 = vrot.slane %v7877_v47, 4  ;;  %v4633_v15 = vpop.f32.mrf.mxu0  ;;  %v6846_v62 = vshll.u32 %v9668_v20, 16  ;;  %v6852_v37 = vshll.u32 %v14590_v1, 16 }
 0x23b   : > { %16187 = vst [vmem:[#allocation45_spill] sm:$0xff] %v14592_v50  ;;  %v14602_v6 = vadd.f32 %v4617_v27, %v3428_v25  ;;  %v3433_v32 = vadd.f32 %v10401_v28, %v16190_v54  ;;  %v6831_v51 = vsel %vm11033_vm4, %v14586_v34, %v14577_v45  ;;  %v6845_v58 = vrot.slane %v6843_v26, 4  ;;  %v9773_v34 = vld [vmem:[%s11019_s20 + $0xf0] sm:$0xe] }
 0x23c   : > { %10632 = vmatmul.mubr.msk.bf16.gmra.mxu1 %vm1029_vm3, %v13904_v43  ;;  %v3296_v43 = vpop.f32.mrf.mxu1  ;;  %v6836_v27 = vrot.slane %v6835_v24, 4  ;;  %v6856_v16 = vshrl.u32 %v14590_v1, 16  ;;  %v16193_v20 = vcombine.low %v13957_v55, %v13967_v22  ;;  %v14625_v28 = vsel %vm11383_vm7, %v7876_v46, %v7877_v47  ;;  %v16194_v26 = vld [vmem:[#allocation40_spill] sm:$0xff]  ;;  %v16198_v46 = vld [vmem:[#allocation11_spill] sm:$0xff] }
 0x23d   : > { %16189 = vst [vmem:[#allocation42_spill] sm:$0xff] %v14602_v6  ;;  %10635 = vmatprep.mubr.msk.bf16.mxu1 %vm1029_vm3, %v13923_v0  ;;  %v14616_v10 = vadd.f32 %v10467_v60, %v3433_v32  ;;  %v3431_v25 = vadd.f32 %v3296_v43, %v16192_v44  ;;  %v10471_v0 = vpop.f32.mrf.mxu0  ;;  %v6848_v45 = vrot.slane %v6846_v62, 5  ;;  %v16195_v54 = vld [vmem:[#allocation52_spill] sm:$0xff]  ;;  %v14634_v32 = vsel %vm11383_vm7, %v7879_v3, %v7880_v19  ;;  %v16201_v6 = vld [vmem:[#allocation31_spill] sm:$0xff] }
 0x23e   : > { %v10402_v24 = vpop.f32.mrf.mxu1  ;;  %v16196_v60 = vcombine.low %v16194_v26, %v16195_v54  ;;  %v6854_v55 = vrot.slane %v6852_v37, 5  ;;  %v6858_v22 = vrot.slane %v6856_v16, 4  ;;  %v6862_v43 = vshll.u32 %v14608_v9, 16  ;;  %v14643_v26 = vld [vmem:[%s11019_s20 + $0xfc] sm:$0xf] }
 0x23f   : > { %16191 = vst [vmem:[#allocation35_spill] sm:$0xff] %v14616_v10  ;;  %v14637_v44 = vadd.f32 %v4630_v14, %v3431_v25  ;;  %v3434_v47 = vadd.f32 %v10402_v24, %v16198_v46  ;;  %v4646_v62 = vpop.f32.mrf.mxu0  ;;  %v6849_v4 = vor.u32 %v6848_v45, %v6845_v58  ;;  %v6866_v3 = vshrl.u32 %v14608_v9, 16  ;;  %v16200_v16 = vld [vmem:[#allocation13_spill] sm:$0xff] }
 0x240   : > { %10702 = vmatmul.mubr.msk.bf16.gmra.mxu0 %vm1029_vm3, %v16193_v20  ;;  %v6841_v20 = vsel %vm11033_vm4, %v6836_v27, %v6840_v57  ;;  %v3299_v54 = vpop.f32.mrf.mxu1  ;;  %v6864_v10 = vrot.slane %v6862_v43, 5  ;;  %v9789_v19 = vrot.slane %v9773_v34, 9  ;;  %v7884_v24 = vrot.slane %v14590_v1, 5  ;;  %v9673_v1 = vld [vmem:[%s11019_s20 + $0x104] sm:$0xf] }
 0x241   : > { %10705 = vmatprep.mubr.msk.bf16.mxu0 %vm1029_vm3, %v16196_v60  ;;  %16197 = vst [vmem:[#allocation47_spill] sm:$0xff] %v14637_v44  ;;  %v6859_v60 = vor.u32 %v6858_v22, %v6854_v55  ;;  %v14646_v37 = vadd.f32 %v10468_v13, %v3434_v47  ;;  %v3432_v14 = vadd.f32 %v3299_v54, %v16200_v16  ;;  %v10472_v25 = vpop.f32.mrf.mxu0  ;;  %v6850_v44 = vrot.slane %v6849_v4, 4  ;;  %v16203_v13 = vld [vmem:[#allocation16_spill] sm:$0xff] }
 0x242   : > { %v10405_v46 = vpop.f32.mrf.mxu1  ;;  %v6868_v27 = vrot.slane %v6866_v3, 4  ;;  %v7887_v58 = vrot.slane %v14608_v9, 5  ;;  %v6872_v45 = vshll.u32 %v14643_v26, 16  ;;  %v16204_v47 = vld [vmem:[#allocation48_spill] sm:$0xff]  ;;  %v14663_v54 = vcombine.low %v6831_v51, %v6841_v20  ;;  %v9672_v3 = vld [vmem:[%s11019_s20 + $0x100] sm:$0x1] }
 0x243   : > { %16199 = vst [vmem:[#allocation49_spill] sm:$0xff] %v14646_v37  ;;  %v6860_v57 = vrot.slane %v6859_v60, 4  ;;  %v14654_v34 = vadd.f32 %v4633_v15, %v3432_v14  ;;  %v3437_v22 = vadd.f32 %v10405_v46, %v16203_v13  ;;  %v4649_v43 = vpop.f32.mrf.mxu0  ;;  %v6855_v9 = vsel %vm11033_vm4, %v6850_v44, %v6854_v55  ;;  %v16206_v14 = vld [vmem:[#allocation14_spill] sm:$0xff]  ;;  %v16208_v4 = vld [vmem:[#allocation68_spill] sm:$0xff]  ;;  %v16211_v20 = vld [vmem:[#allocation81_spill] sm:$0xff] }
 0x244   : > { %10636 = vmatmul.mubr.msk.bf16.gmra.mxu1 %vm1029_vm3, %v16201_v6  ;;  %v3312_v6 = vpop.f32.mrf.mxu1  ;;  %v6869_v15 = vor.u32 %v6868_v27, %v6864_v10  ;;  %v7886_v60 = vrot.slane %v7884_v24, 4  ;;  %v14679_v55 = vsel %vm11383_vm7, %v9789_v19, %v7884_v24  ;;  %v6882_v19 = vshll.u32 %v9672_v3, 16 }
 0x245   : > { %16202 = vst [vmem:[#allocation104_spill] sm:$0xff] %v14654_v34  ;;  %10639 = vmatprep.mubr.msk.bf16.mxu1 %vm1029_vm3, %v16204_v47  ;;  %v14668_v16 = vadd.f32 %v10471_v0, %v3437_v22  ;;  %v3435_v46 = vadd.f32 %v3312_v6, %v16206_v14  ;;  %v10475_v13 = vpop.f32.mrf.mxu0  ;;  %v16207_v47 = vld [vmem:[#allocation59_spill] sm:$0xff]  ;;  %v6865_v51 = vsel %vm11033_vm4, %v6860_v57, %v6864_v10  ;;  %v7889_v6 = vrot.slane %v7887_v58, 4 }
 0x246   : > { %v16209_v34 = vcombine.low %v16207_v47, %v16208_v4  ;;  %v10406_v44 = vpop.f32.mrf.mxu1  ;;  %v16210_v0 = vld [vmem:[#allocation7_spill] sm:$0xff]  ;;  %v14685_v22 = vrot.slane %v6869_v15, 4  ;;  %v14687_v4 = vrot.slane %v6872_v45, 5  ;;  %v7890_v24 = vrot.slane %v14643_v26, 5 }
 0x247   : > { %16205 = vst [vmem:[#allocation39_spill] sm:$0xff] %v14668_v16  ;;  %v16212_v27 = vcombine.low %v16210_v0, %v16211_v20  ;;  %v14690_v14 = vadd.f32 %v4646_v62, %v3435_v46  ;;  %v16214_v10 = vld [vmem:[#allocation15_spill] sm:$0xff]  ;;  %v4662_v47 = vpop.f32.mrf.mxu0  ;;  %v14698_v20 = vcombine.low %v6855_v9, %v6865_v51  ;;  %v14702_v45 = vsel %vm11383_vm7, %v7886_v60, %v7887_v58 }
 0x248   : > { %10706 = vmatmul.mubr.msk.bf16.gmra.mxu0 %vm1029_vm3, %v16209_v34  ;;  %v6876_v34 = vshrl.u32 %v14643_v26, 16  ;;  %v3438_v57 = vadd.f32 %v10406_v44, %v16214_v10  ;;  %v14696_v16 = vld [vmem:[%s11019_s20 + $0x108] sm:$0xf]  ;;  %v3315_v0 = vpop.f32.mrf.mxu1  ;;  %v16216_v44 = vld [vmem:[#allocation12_spill] sm:$0xff]  ;;  %v7892_v10 = vrot.slane %v7890_v24, 4  ;;  %v6887_v60 = vshrl.u32 %v9673_v1, 16 }
 0x249   : > { %10709 = vmatprep.mubr.msk.bf16.mxu0 %vm1029_vm3, %v16212_v27  ;;  %16213 = vst [vmem:[#allocation43_spill] sm:$0xff] %v14690_v14  ;;  %v3436_v26 = vadd.f32 %v3315_v0, %v16216_v44  ;;  %v10476_v27 = vpop.f32.mrf.mxu0  ;;  %v7893_v14 = vrot.slane %v9672_v3, 5  ;;  %v16217_v51 = vld [vmem:[#allocation91_spill] sm:$0xff]  ;;  %v6890_v37 = vshll.u32 %v9673_v1, 16  ;;  %v6896_v50 = vshll.u32 %v14696_v16, 16 }
 0x24a   : > { %v6878_v15 = vrot.slane %v6876_v34, 4  ;;  %v14708_v46 = vadd.f32 %v10472_v25, %v3438_v57  ;;  %v10409_v9 = vpop.f32.mrf.mxu1  ;;  %v16219_v25 = vld [vmem:[#allocation17_spill] sm:$0xff]  ;;  %v6884_v3 = vrot.slane %v6882_v19, 5  ;;  %v14721_v0 = vld [vmem:[%s11019_s20 + $0x10c] sm:$0xf]  ;;  %v6900_v44 = vshrl.u32 %v14696_v16, 16 }
 0x24b   : > { %v14715_v62 = vadd.f32 %v4649_v43, %v3436_v26  ;;  %v3441_v34 = vadd.f32 %v10409_v9, %v16219_v25  ;;  %v4665_v57 = vpop.f32.mrf.mxu0  ;;  %v14726_v1 = vsel %vm11383_vm7, %v7889_v6, %v7890_v24  ;;  %v6889_v43 = vrot.slane %v6887_v60, 4  ;;  %v16222_v9 = vld [vmem:[#allocation18_spill] sm:$0xff] }
 0x24c   : > { %16215 = vst [vmem:[#allocation51_spill] sm:$0xff] %v14708_v46  ;;  %10640 = vmatmul.mubr.msk.bf16.gmra.mxu1 %vm1029_vm3, %v16217_v51  ;;  %v6879_v58 = vor.u32 %v6878_v15, %v14687_v4  ;;  %v16220_v46 = vld [vmem:[#allocation79_spill] sm:$0xff]  ;;  %v3328_v51 = vpop.f32.mrf.mxu1  ;;  %v6892_v26 = vrot.slane %v6890_v37, 5  ;;  %v16223_v19 = vcombine.low %v14192_v30, %v14196_v33  ;;  %v6902_v2 = vrot.slane %v6900_v44, 4 }
 0x24d   : > { %16218 = vst [vmem:[#allocation54_spill] sm:$0xff] %v14715_v62  ;;  %10643 = vmatprep.mubr.msk.bf16.mxu1 %vm1029_vm3, %v16220_v46  ;;  %v14728_v62 = vadd.f32 %v10475_v13, %v3441_v34  ;;  %v3439_v25 = vadd.f32 %v3328_v51, %v16222_v9  ;;  %v10479_v39 = vpop.f32.mrf.mxu0  ;;  %v6898_v46 = vrot.slane %v6896_v50, 5  ;;  %v16224_v6 = vcombine.low %v14237_v5, %v14269_v53  ;;  %v16226_v50 = vld [vmem:[#allocation19_spill] sm:$0xff]  ;;  %v14752_v53 = vld [vmem:[%s11019_s20 + $0x110] sm:$0xf] }
 0x24e   : > { %v6880_v15 = vrot.slane %v6879_v58, 4  ;;  %v9774_v58 = vld [vmem:[%s11019_s20 + $0x104] sm:$0xe]  ;;  %v10410_v21 = vpop.f32.mrf.mxu1  ;;  %v14742_v37 = vsel %vm11383_vm7, %v7892_v10, %v7893_v14  ;;  %v6893_v13 = vor.u32 %v6892_v26, %v6889_v43  ;;  %v6906_v24 = vshll.u32 %v14721_v0, 16 }
 0x24f   : > { %16221 = vst [vmem:[#allocation46_spill] sm:$0xff] %v14728_v62  ;;  %v6910_v30 = vshrl.u32 %v14721_v0, 16  ;;  %v14746_v33 = vadd.f32 %v4662_v47, %v3439_v25  ;;  %v3442_v60 = vadd.f32 %v10410_v21, %v16226_v50  ;;  %v4678_v34 = vpop.f32.mrf.mxu0  ;;  %v6903_v5 = vor.u32 %v6902_v2, %v6898_v46  ;;  %v14830_v2 = vld [vmem:[%s11019_s20 + $0x120] sm:$0xf] }
 0x250   : > { %10710 = vmatmul.mubr.msk.bf16.gmra.mxu0 %vm1029_vm3, %v16223_v19  ;;  %v6885_v44 = vsel %vm11033_vm4, %v6880_v15, %v6884_v3  ;;  %v3331_v51 = vpop.f32.mrf.mxu1  ;;  %v6894_v9 = vrot.slane %v6893_v13, 4  ;;  %v6908_v14 = vrot.slane %v6906_v24, 5  ;;  %v9790_v43 = vrot.slane %v9774_v58, 9  ;;  %v16228_v19 = vld [vmem:[#allocation75_spill] sm:$0xff]  ;;  %v16231_v13 = vld [vmem:[#allocation76_spill] sm:$0xff] }
 0x251   : > { %10713 = vmatprep.mubr.msk.bf16.mxu0 %vm1029_vm3, %v16224_v6  ;;  %16225 = vst [vmem:[#allocation50_spill] sm:$0xff] %v14746_v33  ;;  %v6912_v10 = vrot.slane %v6910_v30, 4  ;;  %v14754_v26 = vadd.f32 %v10476_v27, %v3442_v60  ;;  %v3440_v6 = vadd.f32 %v3331_v51, %v16228_v19  ;;  %v10480_v47 = vpop.f32.mrf.mxu0  ;;  %v6904_v25 = vrot.slane %v6903_v5, 4  ;;  %v16229_v33 = vld [vmem:[#allocation85_spill] sm:$0xff]  ;;  %v16232_v60 = vld [vmem:[#allocation26_spill] sm:$0xff] }
 0x252   : > { %v7897_v21 = vrot.slane %v14696_v16, 5  ;;  %v10413_v50 = vpop.f32.mrf.mxu1  ;;  %v7900_v15 = vrot.slane %v14721_v0, 5  ;;  %v6916_v27 = vshll.u32 %v14752_v53, 16  ;;  %v6899_v16 = vsel %vm11033_vm4, %v6894_v9, %v6898_v46  ;;  %v16235_v9 = vld [vmem:[#allocation20_spill] sm:$0xff] }
 0x253   : > { %16227 = vst [vmem:[#allocation53_spill] sm:$0xff] %v14754_v26  ;;  %v6913_v3 = vor.u32 %v6912_v10, %v6908_v14  ;;  %v14764_v58 = vadd.f32 %v4665_v57, %v3440_v6  ;;  %v3445_v24 = vadd.f32 %v10413_v50, %v16231_v13  ;;  %v4681_v30 = vpop.f32.mrf.mxu0  ;;  %v16233_v0 = vsel %vm11033_vm4, %v14685_v22, %v14687_v4  ;;  %v9677_v6 = vld [vmem:[%s11019_s20 + $0x114] sm:$0x1]  ;;  %v9775_v26 = vld [vmem:[%s11019_s20 + $0x118] sm:$0xe] }
 0x254   : > { %10644 = vmatmul.mubr.msk.bf16.gmra.mxu1 %vm1029_vm3, %v16229_v33  ;;  %v6909_v33 = vsel %vm11033_vm4, %v6904_v25, %v6908_v14  ;;  %v3344_v5 = vpop.f32.mrf.mxu1  ;;  %v14778_v57 = vcombine.low %v16233_v0, %v6885_v44  ;;  %v7899_v19 = vrot.slane %v7897_v21, 4  ;;  %v16236_v50 = vcombine.low %v14293_v8, %v14298_v23 }
 0x255   : > { %16230 = vst [vmem:[#allocation55_spill] sm:$0xff] %v14764_v58  ;;  %10647 = vmatprep.mubr.msk.bf16.mxu1 %vm1029_vm3, %v16232_v60  ;;  %v14782_v10 = vrot.slane %v6913_v3, 4  ;;  %v14785_v46 = vadd.f32 %v10479_v39, %v3445_v24  ;;  %v3443_v14 = vadd.f32 %v3344_v5, %v16235_v9  ;;  %v10483_v25 = vpop.f32.mrf.mxu0  ;;  %v14794_v22 = vsel %vm11383_vm7, %v9790_v43, %v7897_v21  ;;  %v9678_v43 = vld [vmem:[%s11019_s20 + $0x118] sm:$0xf]  ;;  %v16241_v9 = vld [vmem:[#allocation22_spill] sm:$0xff] }
 0x256   : > { %v6920_v4 = vshrl.u32 %v14752_v53, 16  ;;  %v10414_v44 = vpop.f32.mrf.mxu1  ;;  %v16237_v39 = vcombine.low %v14348_v11, %v14372_v18  ;;  %v14801_v3 = vcombine.low %v6899_v16, %v6909_v33  ;;  %v14805_v8 = vsel %vm11383_vm7, %v7899_v19, %v7900_v15  ;;  %v16239_v24 = vld [vmem:[#allocation21_spill] sm:$0xff] }
 0x257   : > { %16234 = vst [vmem:[#allocation57_spill] sm:$0xff] %v14785_v46  ;;  %v14807_v23 = vrot.slane %v6916_v27, 5  ;;  %v7903_v13 = vrot.slane %v14752_v53, 5  ;;  %v14811_v21 = vadd.f32 %v4678_v34, %v3443_v14  ;;  %v3446_v60 = vadd.f32 %v10414_v44, %v16239_v24  ;;  %v4694_v5 = vpop.f32.mrf.mxu0  ;;  %v14815_v18 = vld [vmem:[%s11019_s20 + $0x11c] sm:$0xf]  ;;  %v16242_v24 = vld [vmem:[#allocation3_spill] sm:$0xff] }
 0x258   : > { %10714 = vmatmul.mubr.msk.bf16.gmra.mxu0 %vm1029_vm3, %v16236_v50  ;;  %v7902_v0 = vrot.slane %v7900_v15, 4  ;;  %v6926_v11 = vshll.u32 %v9677_v6, 16  ;;  %v3347_v16 = vpop.f32.mrf.mxu1  ;;  %v6922_v27 = vrot.slane %v6920_v4, 4  ;;  %v7906_v34 = vrot.slane %v9677_v6, 5 }
 0x259   : > { %10717 = vmatprep.mubr.msk.bf16.mxu0 %vm1029_vm3, %v16237_v39  ;;  %16238 = vst [vmem:[#allocation61_spill] sm:$0xff] %v14811_v21  ;;  %v14823_v19 = vadd.f32 %v10480_v47, %v3446_v60  ;;  %v3444_v14 = vadd.f32 %v3347_v16, %v16241_v9  ;;  %v10484_v15 = vpop.f32.mrf.mxu0  ;;  %v6931_v50 = vshrl.u32 %v9678_v43, 16  ;;  %v6934_v44 = vshll.u32 %v9678_v43, 16  ;;  %v16243_v60 = vld [vmem:[#allocation23_spill] sm:$0xff]  ;;  %v16244_v43 = vld [vmem:[#allocation32_spill] sm:$0xff] }
 0x25a   : > { %v10417_v39 = vpop.f32.mrf.mxu1  ;;  %v6923_v33 = vor.u32 %v6922_v27, %v14807_v23  ;;  %v7905_v51 = vrot.slane %v7903_v13, 4  ;;  %v6940_v4 = vshll.u32 %v14815_v18, 16  ;;  %v6944_v47 = vshrl.u32 %v14815_v18, 16 }
 0x25b   : > { %16240 = vst [vmem:[#allocation62_spill] sm:$0xff] %v14823_v19  ;;  %v14834_v6 = vadd.f32 %v4681_v30, %v3444_v14  ;;  %v3449_v16 = vadd.f32 %v10417_v39, %v16243_v60  ;;  %v4697_v9 = vpop.f32.mrf.mxu0  ;;  %v6928_v53 = vrot.slane %v6926_v11, 5  ;;  %v6936_v21 = vrot.slane %v6934_v44, 5 }
 0x25c   : > { %10648 = vmatmul.mubr.msk.bf16.gmra.mxu1 %vm1029_vm3, %v16242_v24  ;;  %v6933_v24 = vrot.slane %v6931_v50, 4  ;;  %v3360_v19 = vpop.f32.mrf.mxu1  ;;  %v6924_v27 = vrot.slane %v6923_v33, 4  ;;  %v6942_v46 = vrot.slane %v6940_v4, 5  ;;  %v6946_v58 = vrot.slane %v6944_v47, 4  ;;  %v16248_v47 = vld [vmem:[#allocation80_spill] sm:$0xff] }
 0x25d   : > { %10651 = vmatprep.mubr.msk.bf16.mxu1 %vm1029_vm3, %v16244_v43  ;;  %v14840_v62 = vadd.f32 %v10483_v25, %v3449_v16  ;;  %v3447_v30 = vadd.f32 %v3360_v19, %v16245_v40  ;;  %v10487_v14 = vpop.f32.mrf.mxu0  ;;  %v16246_v39 = vcombine.low %v14401_v35, %v14409_v31  ;;  %v6950_v11 = vshll.u32 %v14830_v2, 16  ;;  %v14862_v19 = vld [vmem:[%s11019_s20 + $0x124] sm:$0xf] }
 0x25e   : > { %v6954_v50 = vshrl.u32 %v14830_v2, 16  ;;  %v10418_v33 = vpop.f32.mrf.mxu1  ;;  %v16247_v44 = vcombine.low %v14467_v12, %v14474_v63  ;;  %v14855_v25 = vsel %vm11383_vm7, %v7902_v0, %v7903_v13  ;;  %v14859_v40 = vsel %vm11383_vm7, %v7905_v51, %v7906_v34 }
 0x25f   : > { %v6937_v35 = vor.u32 %v6936_v21, %v6933_v24  ;;  %v6947_v31 = vor.u32 %v6946_v58, %v6942_v46  ;;  %v14864_v4 = vadd.f32 %v4694_v5, %v3447_v30  ;;  %v3450_v60 = vadd.f32 %v10418_v33, %v16248_v47  ;;  %v4710_v16 = vpop.f32.mrf.mxu0  ;;  %v16249_v21 = vld [vmem:[#allocation24_spill] sm:$0xff] }
 0x260   : > { %10718 = vmatmul.mubr.msk.bf16.gmra.mxu0 %vm1029_vm3, %v16246_v39  ;;  %v6952_v12 = vrot.slane %v6950_v11, 5  ;;  %v9791_v63 = vrot.slane %v9775_v26, 9  ;;  %v3363_v43 = vpop.f32.mrf.mxu1  ;;  %v6956_v0 = vrot.slane %v6954_v50, 4  ;;  %v6929_v5 = vsel %vm11033_vm4, %v6924_v27, %v6928_v53  ;;  %v9682_v50 = vld [vmem:[%s11019_s20 + $0x128] sm:$0x1] }
 0x261   : > { %10721 = vmatprep.mubr.msk.bf16.mxu0 %vm1029_vm3, %v16247_v44  ;;  %v6938_v39 = vrot.slane %v6937_v35, 4  ;;  %v6948_v13 = vrot.slane %v6947_v31, 4  ;;  %v7910_v44 = vrot.slane %v14815_v18, 5  ;;  %v14868_v51 = vadd.f32 %v10484_v15, %v3450_v60  ;;  %v10488_v34 = vpop.f32.mrf.mxu0  ;;  %v16250_v35 = vld [vmem:[#allocation28_spill] sm:$0xff] }
 0x262   : > { %v3448_v58 = vadd.f32 %v3363_v43, %v16249_v21  ;;  %v6960_v24 = vshll.u32 %v14862_v19, 16  ;;  %v10421_v30 = vpop.f32.mrf.mxu1  ;;  %v6957_v15 = vor.u32 %v6956_v0, %v6952_v12  ;;  %v7913_v11 = vrot.slane %v14830_v2, 5  ;;  %v16252_v43 = vld [vmem:[#allocation29_spill] sm:$0xff] }
 0x263   : > { %v6943_v26 = vsel %vm11033_vm4, %v6938_v39, %v6942_v46  ;;  %v6953_v18 = vsel %vm11033_vm4, %v6948_v13, %v6952_v12  ;;  %v3453_v53 = vadd.f32 %v10421_v30, %v16250_v35  ;;  %v4713_v27 = vpop.f32.mrf.mxu0  ;;  %v7912_v46 = vrot.slane %v7910_v44, 4  ;;  %v16255_v30 = vld [vmem:[#allocation36_spill] sm:$0xff] }
 0x264   : > { %10652 = vmatmul.mubr.msk.bf16.gmra.mxu1 %vm1029_vm3, %v14455_v52  ;;  %v14882_v33 = vadd.f32 %v4697_v9, %v3448_v58  ;;  %v3376_v31 = vpop.f32.mrf.mxu1  ;;  %v16251_v2 = vsel %vm11033_vm4, %v14782_v10, %v14807_v23  ;;  %v14898_v9 = vsel %vm11383_vm7, %v9791_v63, %v7910_v44  ;;  %v14900_v60 = vrot.slane %v6960_v24, 5  ;;  %v9683_v63 = vld [vmem:[%s11019_s20 + $0x12c] sm:$0xf] }
 0x265   : > { %10655 = vmatprep.mubr.msk.bf16.mxu1 %vm1029_vm3, %v14470_v36  ;;  %v14894_v47 = vcombine.low %v16251_v2, %v6929_v5  ;;  %v6964_v36 = vshrl.u32 %v14862_v19, 16  ;;  %v14903_v12 = vadd.f32 %v10487_v14, %v3453_v53  ;;  %v3451_v39 = vadd.f32 %v3376_v31, %v16252_v43  ;;  %v10559_v13 = vpop.f32.mrf.mxu0 }
 0x266   : > { %v16253_v0 = vcombine.low %v14524_v7, %v14528_v59  ;;  %v14910_v10 = vcombine.low %v6943_v26, %v6953_v18  ;;  %v6970_v23 = vshll.u32 %v9682_v50, 16  ;;  %v10422_v44 = vpop.f32.mrf.mxu1  ;;  %v16254_v21 = vcombine.low %v14575_v49, %v14597_v38  ;;  %v14921_v7 = vld [vmem:[%s11019_s20 + $0x130] sm:$0xf] }
 0x267   : > { %v14917_v14 = vrot.slane %v6957_v15, 4  ;;  %v7915_v58 = vrot.slane %v7913_v11, 4  ;;  %v6966_v5 = vrot.slane %v6964_v36, 4  ;;  %v7916_v24 = vrot.slane %v14862_v19, 5  ;;  %v6003_v18 = vpop.f32.mrf.mxu0  ;;  %v16256_v19 = vld [vmem:[#allocation44_spill] sm:$0xff] }
 0x268   : > { %10722 = vmatmul.mubr.msk.bf16.gmra.mxu0 %vm1029_vm3, %v16253_v0  ;;  %v14923_v59 = vadd.f32 %v4710_v16, %v3451_v39  ;;  %v3454_v26 = vadd.f32 %v10422_v44, %v16255_v30  ;;  %v14928_v35 = vsel %vm11383_vm7, %v7912_v46, %v7913_v11  ;;  %v6972_v49 = vrot.slane %v6970_v23, 5  ;;  %v3379_v38 = vpop.f32.mrf.mxu1  ;;  %v14935_v39 = vld [vmem:[%s11019_s20 + $0x134] sm:$0xf] }
 0x269   : > { %10725 = vmatprep.mubr.msk.bf16.mxu0 %vm1029_vm3, %v16254_v21  ;;  %v6967_v15 = vor.u32 %v6966_v5, %v14900_v60  ;;  %v7918_v53 = vrot.slane %v7916_v24, 4  ;;  %v7919_v31 = vrot.slane %v9682_v50, 5  ;;  %v6975_v2 = vshrl.u32 %v9683_v63, 16  ;;  %v10560_v16 = vpop.f32.mrf.mxu0  ;;  %v16257_v5 = vld [vmem:[#allocation56_spill] sm:$0xff] }
 0x26a   : > { %v14931_v36 = vadd.f32 %v10488_v34, %v3454_v26  ;;  %v3452_v43 = vadd.f32 %v3379_v38, %v16256_v19  ;;  %v6978_v0 = vshll.u32 %v9683_v63, 16  ;;  %v6984_v44 = vshll.u32 %v14921_v7, 16  ;;  %v10493_v11 = vpop.f32.mrf.mxu1  ;;  %v9776_v38 = vld [vmem:[%s11019_s20 + $0x12c] sm:$0xe] }
 0x26b   : > { %v6963_v50 = vsel %vm11033_vm4, %v14917_v14, %v14900_v60  ;;  %v6968_v34 = vrot.slane %v6967_v15, 4  ;;  %v6977_v46 = vrot.slane %v6975_v2, 4  ;;  %v6988_v23 = vshrl.u32 %v14921_v7, 16  ;;  %v6006_v63 = vpop.f32.mrf.mxu0 }
 0x26c   : > { %10656 = vmatmul.mubr.msk.bf16.gmra.mxu1 %vm1029_vm3, %v14571_v41  ;;  %v14945_v21 = vadd.f32 %v4713_v27, %v3452_v43  ;;  %v5581_v30 = vadd.f32 %v10493_v11, %v16257_v5  ;;  %v14952_v41 = vsel %vm11383_vm7, %v7915_v58, %v7916_v24  ;;  %v6980_v26 = vrot.slane %v6978_v0, 5  ;;  %v5324_v60 = vpop.f32.mrf.mxu1  ;;  %v16258_v43 = vld [vmem:[#allocation58_spill] sm:$0xff] }
 0x26d   : > { %10659 = vmatprep.mubr.msk.bf16.mxu1 %vm1029_vm3, %v14583_v42  ;;  %v14957_v14 = vsel %vm11383_vm7, %v7918_v53, %v7919_v31  ;;  %v6986_v27 = vrot.slane %v6984_v44, 5  ;;  %v6990_v15 = vrot.slane %v6988_v23, 4  ;;  %v6994_v2 = vshll.u32 %v14935_v39, 16  ;;  %v10563_v42 = vpop.f32.mrf.mxu0  ;;  %v14970_v53 = vld [vmem:[%s11019_s20 + $0x138] sm:$0xf] }
 0x26e   : > { %v14960_v19 = vadd.f32 %v10559_v13, %v5581_v30  ;;  %v5579_v11 = vadd.f32 %v5324_v60, %v16258_v43  ;;  %v16259_v58 = vcombine.low %v14625_v28, %v14634_v32  ;;  %v6973_v24 = vsel %vm11033_vm4, %v6968_v34, %v6972_v49  ;;  %v10494_v31 = vpop.f32.mrf.mxu1  ;;  %v16261_v32 = vld [vmem:[#allocation66_spill] sm:$0xff] }
 0x26f   : > { %v6981_v0 = vor.u32 %v6980_v26, %v6977_v46  ;;  %v16260_v44 = vcombine.low %v14679_v55, %v14702_v45  ;;  %v6991_v13 = vor.u32 %v6990_v15, %v6986_v27  ;;  %v6996_v23 = vrot.slane %v6994_v2, 5  ;;  %v6019_v43 = vpop.f32.mrf.mxu0  ;;  %v16262_v2 = vld [vmem:[#allocation71_spill] sm:$0xff] }
 0x270   : > { %10726 = vmatmul.mubr.msk.bf16.gmra.mxu0 %vm1029_vm3, %v16259_v58  ;;  %v6998_v5 = vshrl.u32 %v14935_v39, 16  ;;  %v9792_v30 = vrot.slane %v9776_v38, 9  ;;  %v14977_v28 = vadd.f32 %v6003_v18, %v5579_v11  ;;  %v5582_v60 = vadd.f32 %v10494_v31, %v16261_v32  ;;  %v5327_v46 = vpop.f32.mrf.mxu1  ;;  %v16263_v32 = vld [vmem:[#allocation74_spill] sm:$0xff] }
 0x271   : > { %10729 = vmatprep.mubr.msk.bf16.mxu0 %vm1029_vm3, %v16260_v44  ;;  %v6982_v49 = vrot.slane %v6981_v0, 4  ;;  %v7923_v34 = vrot.slane %v14921_v7, 5  ;;  %v6992_v26 = vrot.slane %v6991_v13, 4  ;;  %v7926_v55 = vrot.slane %v14935_v39, 5  ;;  %v10564_v18 = vpop.f32.mrf.mxu0  ;;  %v9687_v13 = vld [vmem:[%s11019_s20 + $0x13c] sm:$0x1] }
 0x272   : > { %v7000_v58 = vrot.slane %v6998_v5, 4  ;;  %v7004_v45 = vshll.u32 %v14970_v53, 16  ;;  %v14983_v15 = vadd.f32 %v10560_v16, %v5582_v60  ;;  %v5580_v38 = vadd.f32 %v5327_v46, %v16262_v2  ;;  %v10497_v7 = vpop.f32.mrf.mxu1  ;;  %v16270_v11 = vld [vmem:[#allocation94_spill] sm:$0xff] }
 0x273   : > { %v14992_v31 = vcombine.low %v6963_v50, %v6973_v24  ;;  %v6987_v39 = vsel %vm11033_vm4, %v6982_v49, %v6986_v27  ;;  %v7925_v44 = vrot.slane %v7923_v34, 4  ;;  %v5585_v60 = vadd.f32 %v10497_v7, %v16263_v32  ;;  %v6022_v46 = vpop.f32.mrf.mxu0 }
 0x274   : > { %10660 = vmatmul.mubr.msk.bf16.gmra.mxu1 %vm1029_vm3, %v14663_v54  ;;  %v7001_v16 = vor.u32 %v7000_v58, %v6996_v23  ;;  %v14997_v5 = vadd.f32 %v6006_v63, %v5580_v38  ;;  %v6997_v54 = vsel %vm11033_vm4, %v6992_v26, %v6996_v23  ;;  %v15006_v50 = vsel %vm11383_vm7, %v9792_v30, %v7923_v34  ;;  %v5340_v27 = vpop.f32.mrf.mxu1  ;;  %v16264_v38 = vld [vmem:[#allocation77_spill] sm:$0xff]  ;;  %v9688_v26 = vld [vmem:[%s11019_s20 + $0x140] sm:$0xf] }
 0x275   : > { %10663 = vmatprep.mubr.msk.bf16.mxu1 %vm1029_vm3, %v14698_v20  ;;  %v7928_v63 = vrot.slane %v7926_v55, 4  ;;  %v15010_v49 = vrot.slane %v7004_v45, 5  ;;  %v7008_v58 = vshrl.u32 %v14970_v53, 16  ;;  %v15013_v2 = vadd.f32 %v10563_v42, %v5585_v60  ;;  %v10567_v20 = vpop.f32.mrf.mxu0 }
 0x276   : > { %v15008_v24 = vrot.slane %v7001_v16, 4  ;;  %v5583_v7 = vadd.f32 %v5340_v27, %v16264_v38  ;;  %v16265_v23 = vcombine.low %v14726_v1, %v14742_v37  ;;  %v7014_v30 = vshll.u32 %v9687_v13, 16  ;;  %v15023_v16 = vld [vmem:[%s11019_s20 + $0x144] sm:$0xf]  ;;  %v10498_v45 = vpop.f32.mrf.mxu1  ;;  %v16268_v27 = vld [vmem:[#allocation92_spill] sm:$0xff] }
 0x277   : > { %v7929_v34 = vrot.slane %v14970_v53, 5  ;;  %v16266_v32 = vcombine.low %v14794_v22, %v14805_v8  ;;  %v15029_v42 = vcombine.low %v6987_v39, %v6997_v54  ;;  %v15033_v60 = vsel %vm11383_vm7, %v7925_v44, %v7926_v55  ;;  %v6035_v22 = vpop.f32.mrf.mxu0 }
 0x278   : > { %10730 = vmatmul.mubr.msk.bf16.gmra.mxu0 %vm1029_vm3, %v16265_v23  ;;  %v7010_v37 = vrot.slane %v7008_v58, 4  ;;  %v15039_v53 = vadd.f32 %v6019_v43, %v5583_v7  ;;  %v5586_v38 = vadd.f32 %v10498_v45, %v16268_v27  ;;  %v7932_v23 = vrot.slane %v9687_v13, 5  ;;  %v5343_v39 = vpop.f32.mrf.mxu1  ;;  %v15048_v58 = vld [vmem:[%s11019_s20 + $0x148] sm:$0xf] }
 0x279   : > { %10733 = vmatprep.mubr.msk.bf16.mxu0 %vm1029_vm3, %v16266_v32  ;;  %v7931_v8 = vrot.slane %v7929_v34, 4  ;;  %v7019_v32 = vshrl.u32 %v9688_v26, 16  ;;  %v7022_v55 = vshll.u32 %v9688_v26, 16  ;;  %v7028_v44 = vshll.u32 %v15023_v16, 16  ;;  %v10568_v52 = vpop.f32.mrf.mxu0 }
 0x27a   : > { %16267 = vst [vmem:[#allocation8_spill] sm:$0xff] %v15039_v53  ;;  %v7011_v54 = vor.u32 %v7010_v37, %v15010_v49  ;;  %v15044_v0 = vadd.f32 %v10564_v18, %v5586_v38  ;;  %v5584_v1 = vadd.f32 %v5343_v39, %v16270_v11  ;;  %v7016_v43 = vrot.slane %v7014_v30, 5  ;;  %v10501_v45 = vpop.f32.mrf.mxu1  ;;  %v16271_v11 = vld [vmem:[#allocation95_spill] sm:$0xff]  ;;  %v9777_v53 = vld [vmem:[%s11019_s20 + $0x140] sm:$0xe] }
 0x27b   : > { %v7032_v7 = vshrl.u32 %v15023_v16, 16  ;;  %v15055_v26 = vsel %vm11383_vm7, %v7928_v63, %v7929_v34  ;;  %v7021_v18 = vrot.slane %v7019_v32, 4  ;;  %v7024_v37 = vrot.slane %v7022_v55, 5  ;;  %v6038_v30 = vpop.f32.mrf.mxu0  ;;  %v16272_v32 = vld [vmem:[#allocation82_spill] sm:$0xff] }
 0x27c   : > { %16269 = vst [vmem:[#allocation9_spill] sm:$0xff] %v15044_v0  ;;  %10664 = vmatmul.mubr.msk.bf16.gmra.mxu1 %vm1029_vm3, %v14778_v57  ;;  %v7012_v13 = vrot.slane %v7011_v54, 4  ;;  %v15057_v27 = vadd.f32 %v6022_v46, %v5584_v1  ;;  %v5589_v38 = vadd.f32 %v10501_v45, %v16271_v11  ;;  %v7030_v39 = vrot.slane %v7028_v44, 5  ;;  %v5356_v57 = vpop.f32.mrf.mxu1 }
 0x27d   : > { %10667 = vmatprep.mubr.msk.bf16.mxu1 %vm1029_vm3, %v14801_v3  ;;  %v7034_v0 = vrot.slane %v7032_v7, 4  ;;  %v15065_v54 = vsel %vm11383_vm7, %v7931_v8, %v7932_v23  ;;  %v7025_v63 = vor.u32 %v7024_v37, %v7021_v18  ;;  %v7038_v34 = vshll.u32 %v15048_v58, 16  ;;  %v10571_v45 = vpop.f32.mrf.mxu0  ;;  %v15079_v23 = vld [vmem:[%s11019_s20 + $0x14c] sm:$0xf] }
 0x27e   : > { %v7042_v46 = vshrl.u32 %v15048_v58, 16  ;;  %v15069_v1 = vadd.f32 %v10567_v20, %v5589_v38  ;;  %v5587_v55 = vadd.f32 %v5356_v57, %v16272_v32  ;;  %v16273_v3 = vcombine.low %v14855_v25, %v14859_v40  ;;  %v10502_v7 = vpop.f32.mrf.mxu1  ;;  %v16275_v25 = vld [vmem:[#allocation97_spill] sm:$0xff] }
 0x27f   : > { %v7017_v44 = vsel %vm11033_vm4, %v7012_v13, %v7016_v43  ;;  %v7035_v8 = vor.u32 %v7034_v0, %v7030_v39  ;;  %v16274_v18 = vcombine.low %v14898_v9, %v14928_v35  ;;  %v7026_v20 = vrot.slane %v7025_v63, 4  ;;  %v6051_v32 = vpop.f32.mrf.mxu0 }
 0x280   : > { %10734 = vmatmul.mubr.msk.bf16.gmra.mxu0 %vm1029_vm3, %v16273_v3  ;;  %v7040_v37 = vrot.slane %v7038_v34, 5  ;;  %v7044_v11 = vrot.slane %v7042_v46, 4  ;;  %v9793_v38 = vrot.slane %v9777_v53, 9  ;;  %v15085_v57 = vadd.f32 %v6035_v22, %v5587_v55  ;;  %v5359_v43 = vpop.f32.mrf.mxu1  ;;  %v16276_v53 = vld [vmem:[#allocation25_spill] sm:$0xff] }
 0x281   : > { %10737 = vmatprep.mubr.msk.bf16.mxu0 %vm1029_vm3, %v16274_v18  ;;  %v5590_v40 = vadd.f32 %v10502_v7, %v16275_v25  ;;  %v7036_v3 = vrot.slane %v7035_v8, 4  ;;  %v7936_v0 = vrot.slane %v15023_v16, 5  ;;  %v9822_v13 = vcombine.low %v15006_v50, %v15033_v60  ;;  %v10572_v46 = vpop.f32.mrf.mxu0  ;;  %v9692_v7 = vld [vmem:[%s11019_s20 + $0x150] sm:$0x1] }
 0x282   : > { %v7045_v9 = vor.u32 %v7044_v11, %v7040_v37  ;;  %v7939_v35 = vrot.slane %v15048_v58, 5  ;;  %v7048_v63 = vshll.u32 %v15079_v23, 16  ;;  %v5588_v22 = vadd.f32 %v5359_v43, %v16276_v53  ;;  %v10505_v8 = vpop.f32.mrf.mxu1 }
 0x283   : > { %v15093_v34 = vadd.f32 %v10568_v52, %v5590_v40  ;;  %v7031_v55 = vsel %vm11033_vm4, %v7026_v20, %v7030_v39  ;;  %v7041_v16 = vsel %vm11033_vm4, %v7036_v3, %v7040_v37  ;;  %v16277_v50 = vsel %vm11033_vm4, %v15008_v24, %v15010_v49  ;;  %v16278_v20 = vld [vmem:[#allocation83_spill] sm:$0xff]  ;;  %v9693_v3 = vld [vmem:[%s11019_s20 + $0x154] sm:$0xf] }
 0x284   : > { %10668 = vmatmul.mubr.msk.bf16.gmra.mxu1 %vm1029_vm3, %v14894_v47  ;;  %v15107_v52 = vcombine.low %v16277_v50, %v7017_v44  ;;  %v15111_v58 = vrot.slane %v7045_v9, 4  ;;  %v7938_v39 = vrot.slane %v7936_v0, 4  ;;  %v15114_v18 = vadd.f32 %v6038_v30, %v5588_v22  ;;  %v6054_v47 = vpop.f32.mrf.mxu0  ;;  %v5372_v44 = vpop.f32.mrf.mxu1 }
 0x285   : > { %v5593_v37 = vadd.f32 %v10505_v8, %v16278_v20  ;;  %10671 = vmatprep.mubr.msk.bf16.mxu1 %vm1029_vm3, %v14910_v10  ;;  %v15121_v24 = vsel %vm11383_vm7, %v9793_v38, %v7936_v0  ;;  %v7052_v49 = vshrl.u32 %v15079_v23, 16  ;;  %v15124_v11 = vcombine.low %v7031_v55, %v7041_v16  ;;  %v16279_v10 = vld [vmem:[#allocation84_spill] sm:$0xff]  ;;  %v15140_v55 = vld [vmem:[%s11019_s20 + $0x158] sm:$0xf] }
 0x286   : > { %v7940_v30 = vsel %vm11383_vm7, %v7938_v39, %v7939_v35  ;;  %v15128_v25 = vrot.slane %v7048_v63, 5  ;;  %v7942_v40 = vrot.slane %v15079_v23, 5  ;;  %v5591_v9 = vadd.f32 %v5372_v44, %v16279_v10  ;;  %v10575_v53 = vpop.f32.mrf.mxu0  ;;  %v10506_v63 = vpop.f32.mrf.mxu1 }
 0x287   : > { %v15132_v43 = vadd.f32 %v10571_v45, %v5593_v37  ;;  %v16280_v38 = vcombine.low %v14952_v41, %v14957_v14  ;;  %v7941_v0 = vrot.slane %v7939_v35, 4  ;;  %v7058_v22 = vshll.u32 %v9692_v7, 16  ;;  %v16282_v14 = vld [vmem:[#allocation99_spill] sm:$0xff] }
 0x288   : > { %v9824_v23 = vcombine.low %v15121_v24, %v7940_v30  ;;  %v7054_v16 = vrot.slane %v7052_v49, 4  ;;  %v7945_v8 = vrot.slane %v9692_v7, 5  ;;  %v15148_v41 = vadd.f32 %v6051_v32, %v5591_v9  ;;  %v6067_v50 = vpop.f32.mrf.mxu0  ;;  %v5375_v37 = vpop.f32.mrf.mxu1  ;;  %v15153_v24 = vld [vmem:[%s11019_s20 + $0x15c] sm:$0xf]  ;;  %v16284_v32 = vld [vmem:[#allocation86_spill] sm:$0xff] }
 0x289   : > { %10738 = vmatmul.mubr.msk.bf16.gmra.mxu0 %vm1029_vm3, %v16280_v38  ;;  %v5594_v35 = vadd.f32 %v10506_v63, %v16282_v14  ;;  %v7063_v39 = vshrl.u32 %v9693_v3, 16  ;;  %v7066_v20 = vshll.u32 %v9693_v3, 16  ;;  %v7072_v30 = vshll.u32 %v15140_v55, 16 }
 0x28a   : > { %10741 = vmatprep.mubr.msk.bf16.mxu0 %vm1029_vm3, %v9822_v13  ;;  %16281 = vst [vmem:[#allocation60_spill] sm:$0xff] %v15148_v41  ;;  %v7055_v44 = vor.u32 %v7054_v16, %v15128_v25  ;;  %v7944_v13 = vrot.slane %v7942_v40, 4  ;;  %v7076_v10 = vshrl.u32 %v15140_v55, 16  ;;  %v5592_v7 = vadd.f32 %v5375_v37, %v16284_v32  ;;  %v10576_v9 = vpop.f32.mrf.mxu0  ;;  %v10509_v3 = vpop.f32.mrf.mxu1  ;;  %v16286_v37 = vld [vmem:[#allocation27_spill] sm:$0xff] }
 0x28b   : > { %v15157_v49 = vadd.f32 %v10572_v46, %v5594_v35  ;;  %v15160_v38 = vrot.slane %v7058_v22, 5  ;;  %v7065_v63 = vrot.slane %v7063_v39, 4  ;;  %v15166_v16 = vsel %vm11383_vm7, %v7941_v0, %v7942_v40  ;;  %v9778_v35 = vld [vmem:[%s11019_s20 + $0x154] sm:$0xe] }
 0x28c   : > { %10672 = vmatmul.mubr.msk.bf16.gmra.mxu1 %vm1029_vm3, %v14992_v31  ;;  %v7068_v14 = vrot.slane %v7066_v20, 5  ;;  %v15168_v45 = vrot.slane %v7072_v30, 5  ;;  %v7078_v46 = vrot.slane %v7076_v10, 4  ;;  %v15171_v60 = vadd.f32 %v6054_v47, %v5592_v7  ;;  %v6070_v32 = vpop.f32.mrf.mxu0  ;;  %v5388_v40 = vpop.f32.mrf.mxu1  ;;  %v9696_v47 = vld [vmem:[%s11019_s20 + $0x160] sm:$0xf] }
 0x28d   : > { %16283 = vst [vmem:[#allocation63_spill] sm:$0xff] %v15157_v49  ;;  %v5597_v22 = vadd.f32 %v10509_v3, %v16286_v37  ;;  %10675 = vmatprep.mubr.msk.bf16.mxu1 %vm1029_vm3, %v15029_v42  ;;  %v7082_v31 = vshll.u32 %v15153_v24, 16  ;;  %v7086_v39 = vshrl.u32 %v15153_v24, 16  ;;  %v7056_v0 = vrot.slane %v7055_v44, 4  ;;  %v16287_v3 = vld [vmem:[#allocation5_spill] sm:$0xff] }
 0x28e   : > { %16285 = vst [vmem:[#allocation2_spill] sm:$0xff] %v15171_v60  ;;  %v7946_v20 = vsel %vm11383_vm7, %v7944_v13, %v7945_v8  ;;  %v7069_v30 = vor.u32 %v7068_v14, %v7065_v63  ;;  %v7079_v10 = vor.u32 %v7078_v46, %v15168_v45  ;;  %v5595_v37 = vadd.f32 %v5388_v40, %v16287_v3  ;;  %v10579_v60 = vpop.f32.mrf.mxu0  ;;  %v10510_v44 = vpop.f32.mrf.mxu1  ;;  %v16289_v46 = vld [vmem:[#allocation87_spill] sm:$0xff] }
 0x28f   : > { %v15182_v7 = vadd.f32 %v10575_v53, %v5597_v22  ;;  %v16288_v42 = vcombine.low %v15055_v26, %v15065_v54  ;;  %v7084_v49 = vrot.slane %v7082_v31, 5  ;;  %v9794_v41 = vrot.slane %v9778_v35, 9 }
 0x290   : > { %v7070_v8 = vrot.slane %v7069_v30, 4  ;;  %v7080_v13 = vrot.slane %v7079_v10, 4  ;;  %v7088_v63 = vrot.slane %v7086_v39, 4  ;;  %v7949_v53 = vrot.slane %v15140_v55, 5  ;;  %v6083_v40 = vpop.f32.mrf.mxu0  ;;  %v5391_v3 = vpop.f32.mrf.mxu1  ;;  %v16290_v30 = vld [vmem:[#allocation88_spill] sm:$0xff] }
 0x291   : > { %10742 = vmatmul.mubr.msk.bf16.gmra.mxu0 %vm1029_vm3, %v16288_v42  ;;  %v15191_v14 = vadd.f32 %v6067_v50, %v5595_v37  ;;  %v5598_v22 = vadd.f32 %v10510_v44, %v16289_v46  ;;  %v7952_v26 = vrot.slane %v15153_v24, 5  ;;  %v7092_v54 = vshll.u32 %v9696_v47, 16  ;;  %v9697_v50 = vld [vmem:[%s11019_s20 + $0x164] sm:$0x1] }
 0x292   : > { %10745 = vmatprep.mubr.msk.bf16.mxu0 %vm1029_vm3, %v9824_v23  ;;  %v7061_v35 = vsel %vm11033_vm4, %v7056_v0, %v15160_v38  ;;  %v9825_v23 = vcombine.low %v15166_v16, %v7946_v20  ;;  %v7075_v31 = vsel %vm11033_vm4, %v7070_v8, %v15168_v45  ;;  %v7085_v55 = vsel %vm11033_vm4, %v7080_v13, %v7084_v49  ;;  %v10580_v10 = vpop.f32.mrf.mxu0  ;;  %v10513_v38 = vpop.f32.mrf.mxu1  ;;  %v16291_v8 = vld [vmem:[#allocation89_spill] sm:$0xff] }
 0x293   : > { %v15205_v39 = vadd.f32 %v10576_v9, %v5598_v22  ;;  %v5596_v24 = vadd.f32 %v5391_v3, %v16290_v30  ;;  %v7950_v37 = vsel %vm11383_vm7, %v9794_v41, %v7949_v53  ;;  %v7951_v42 = vrot.slane %v7949_v53, 4 }
 0x294   : > { %10676 = vmatmul.mubr.msk.bf16.gmra.mxu1 %vm1029_vm3, %v15107_v52  ;;  %v7089_v16 = vor.u32 %v7088_v63, %v7084_v49  ;;  %v7954_v0 = vrot.slane %v7952_v26, 4  ;;  %v7094_v45 = vrot.slane %v7092_v54, 5  ;;  %v7096_v20 = vshrl.u32 %v9696_v47, 16  ;;  %v6086_v13 = vpop.f32.mrf.mxu0  ;;  %v5404_v46 = vpop.f32.mrf.mxu1  ;;  %v16292_v63 = vld [vmem:[#allocation102_spill] sm:$0xff] }
 0x295   : > { %v15212_v44 = vadd.f32 %v6070_v32, %v5596_v24  ;;  %v5601_v9 = vadd.f32 %v10513_v38, %v16291_v8  ;;  %10679 = vmatprep.mubr.msk.bf16.mxu1 %vm1029_vm3, %v15124_v11  ;;  %v7953_v41 = vsel %vm11383_vm7, %v7951_v42, %v7952_v26  ;;  %v7102_v53 = vshll.u32 %v9697_v50, 16 }
 0x296   : > { %v9826_v22 = vcombine.low %v7950_v37, %v7953_v41  ;;  %v7098_v3 = vrot.slane %v7096_v20, 4  ;;  %v7955_v52 = vrot.slane %v9696_v47, 5  ;;  %v5599_v54 = vadd.f32 %v5404_v46, %v16292_v63  ;;  %v10583_v32 = vpop.f32.mrf.mxu0  ;;  %v10514_v26 = vpop.f32.mrf.mxu1  ;;  %v16294_v20 = vld [vmem:[#allocation90_spill] sm:$0xff] }
 0x297   : > { %v15219_v49 = vadd.f32 %v10579_v60, %v5601_v9  ;;  %v16293_v30 = vsel %vm11033_vm4, %v15111_v58, %v15128_v25  ;;  %v7958_v11 = vrot.slane %v9697_v50, 5  ;;  %v9729_v42 = vcombine.low %v7075_v31, %v7085_v55  ;;  %v16295_v55 = vld [vmem:[#allocation33_spill] sm:$0xff] }
 0x298   : > { %v9728_v24 = vcombine.low %v16293_v30, %v7061_v35  ;;  %v7099_v37 = vor.u32 %v7098_v3, %v7094_v45  ;;  %v7956_v60 = vsel %vm11383_vm7, %v7954_v0, %v7955_v52  ;;  %v7957_v47 = vrot.slane %v7955_v52, 4  ;;  %v6099_v9 = vpop.f32.mrf.mxu0  ;;  %v5407_v25 = vpop.f32.mrf.mxu1  ;;  %v16296_v3 = vld [vmem:[#allocation93_spill] sm:$0xff] }
 0x299   : > { %10746 = vmatmul.mubr.msk.bf16.gmra.mxu0 %vm1029_vm3, %v9825_v23  ;;  %v15231_v38 = vadd.f32 %v6083_v40, %v5599_v54  ;;  %v5602_v8 = vadd.f32 %v10514_v26, %v16294_v20  ;;  %v7090_v41 = vrot.slane %v7089_v16, 4  ;;  %v7104_v58 = vrot.slane %v7102_v53, 5 }
 0x29a   : > { %10749 = vmatprep.mubr.msk.bf16.mxu0 %vm1029_vm3, %v9826_v22  ;;  %v7100_v35 = vrot.slane %v7099_v37, 4  ;;  %v7959_v23 = vsel %vm11383_vm7, %v7957_v47, %v7958_v11  ;;  %v5600_v50 = vadd.f32 %v5407_v25, %v16295_v55  ;;  %v10584_v46 = vpop.f32.mrf.mxu0  ;;  %v10517_v0 = vpop.f32.mrf.mxu1  ;;  %v16297_v47 = vld [vmem:[#allocation96_spill] sm:$0xff]  ;;  %v16299_v55 = vld [vmem:[#allocation37_spill] sm:$0xff] }
 0x29b   : > { %v15236_v31 = vadd.f32 %v10580_v10, %v5602_v8  ;;  %v9827_v22 = vcombine.low %v7956_v60, %v7959_v23  ;;  %v5605_v52 = vadd.f32 %v10517_v0, %v16296_v3  ;;  %v7095_v61 = vsel %vm11033_vm4, %v7090_v41, %v7094_v45  ;;  %v16300_v0 = vld [vmem:[#allocation34_spill] sm:$0xff] }
 0x29c   : > { %10680 = vmatmul.mubr.msk.bf16.gmra.mxu1 %vm1029_vm3, %v9728_v24  ;;  %v15240_v40 = vadd.f32 %v6086_v13, %v5600_v50  ;;  %v6102_v16 = vpop.f32.mrf.mxu0  ;;  %v7105_v10 = vsel %vm11033_vm4, %v7100_v35, %v7104_v58  ;;  %v5420_v53 = vpop.f32.mrf.mxu1  ;;  %v16298_v58 = vld [vmem:[#allocation98_spill] sm:$0xff] }
 0x29d   : > { %10683 = vmatprep.mubr.msk.bf16.mxu1 %vm1029_vm3, %v9729_v42  ;;  %v15248_v63 = vadd.f32 %v10583_v32, %v5605_v52  ;;  %v5603_v54 = vadd.f32 %v5420_v53, %v14403_v17  ;;  %v9730_v24 = vcombine.low %v7095_v61, %v7105_v10  ;;  %v16301_v10 = vld [vmem:[#allocation100_spill] sm:$0xff] }
 0x29e   : > { %v10587_v30 = vpop.f32.mrf.mxu0  ;;  %v10518_v13 = vpop.f32.mrf.mxu1 }
 0x29f   : > { %v15252_v11 = vadd.f32 %v6099_v9, %v5603_v54  ;;  %v5606_v26 = vadd.f32 %v10518_v13, %v14413_v29 }
 0x2a0   : > { %v6115_v42 = vpop.f32.mrf.mxu0  ;;  %v5423_v37 = vpop.f32.mrf.mxu1 }
 0x2a1   : > { %10750 = vmatmul.mubr.msk.bf16.gmra.mxu0 %vm1029_vm3, %v9827_v22  ;;  %v15255_v45 = vadd.f32 %v10584_v46, %v5606_v26  ;;  %v5604_v48 = vadd.f32 %v5423_v37, %v14425_v56 }
 0x2a2   : > { %v10588_v60 = vpop.f32.mrf.mxu0  ;;  %v10521_v32 = vpop.f32.mrf.mxu1 }
 0x2a3   : > { %v15259_v17 = vadd.f32 %v6102_v16, %v5604_v48  ;;  %v5609_v20 = vadd.f32 %v10521_v32, %v16297_v47 }
 0x2a4   : > { %10684 = vmatmul.mubr.msk.bf16.gmra.mxu1 %vm1029_vm3, %v9730_v24  ;;  %v6118_v8 = vpop.f32.mrf.mxu0  ;;  %v5436_v41 = vpop.f32.mrf.mxu1  ;;  %v16302_v24 = vld [vmem:[#allocation38_spill] sm:$0xff] }
 0x2a5   : > { %v15262_v9 = vadd.f32 %v10587_v30, %v5609_v20  ;;  %v5607_v29 = vadd.f32 %v5436_v41, %v16298_v58 }
 0x2a6   : > { %v10591_v25 = vpop.f32.mrf.mxu0  ;;  %v10522_v35 = vpop.f32.mrf.mxu1 }
 0x2a7   : > { %v15265_v23 = vadd.f32 %v6115_v42, %v5607_v29  ;;  %v5610_v56 = vadd.f32 %v10522_v35, %v16299_v55 }
 0x2a8   : > { %v6131_v50 = vpop.f32.mrf.mxu0  ;;  %v5439_v46 = vpop.f32.mrf.mxu1 }
 0x2a9   : > { %v15268_v22 = vadd.f32 %v10588_v60, %v5610_v56  ;;  %v5608_v3 = vadd.f32 %v5439_v46, %v16300_v0  ;;  %v16303_v60 = vld [vmem:[#allocation41_spill] sm:$0xff] }
 0x2aa   : > { %v10592_v52 = vpop.f32.mrf.mxu0  ;;  %v10525_v16 = vpop.f32.mrf.mxu1 }
 0x2ab   : > { %v15271_v61 = vadd.f32 %v6118_v8, %v5608_v3  ;;  %v5613_v53 = vadd.f32 %v10525_v16, %v16301_v10  ;;  %v16304_v8 = vld [vmem:[#allocation101_spill] sm:$0xff] }
 0x2ac   : > { %v6134_v54 = vpop.f32.mrf.mxu0  ;;  %v5452_v30 = vpop.f32.mrf.mxu1 }
 0x2ad   : > { %v15274_v13 = vadd.f32 %v10591_v25, %v5613_v53  ;;  %v5611_v26 = vadd.f32 %v5452_v30, %v16302_v24  ;;  %v16305_v25 = vld [vmem:[#allocation4_spill] sm:$0xff] }
 0x2ae   : > { %v10595_v42 = vpop.f32.mrf.mxu0  ;;  %v10526_v37 = vpop.f32.mrf.mxu1 }
 0x2af   : > { %v15277_v48 = vadd.f32 %v6131_v50, %v5611_v26  ;;  %v5614_v32 = vadd.f32 %v10526_v37, %v16303_v60  ;;  %v16306_v50 = vld [vmem:[#allocation103_spill] sm:$0xff] }
 0x2b0   : > { %v6147_v47 = vpop.f32.mrf.mxu0  ;;  %v5455_v20 = vpop.f32.mrf.mxu1 }
 0x2b1   : > { %v15280_v41 = vadd.f32 %v10592_v52, %v5614_v32  ;;  %v5612_v58 = vadd.f32 %v5455_v20, %v16304_v8  ;;  %v16307_v52 = vld [vmem:[#allocation45_spill] sm:$0xff] }
 0x2b2   : > { %v10596_v29 = vpop.f32.mrf.mxu0  ;;  %v10529_v35 = vpop.f32.mrf.mxu1 }
 0x2b3   : > { %v15283_v55 = vadd.f32 %v6134_v54, %v5612_v58  ;;  %v5617_v56 = vadd.f32 %v10529_v35, %v16305_v25  ;;  %v16309_v54 = vld [vmem:[#allocation42_spill] sm:$0xff] }
 0x2b4   : > { %v6150_v46 = vpop.f32.mrf.mxu0  ;;  %v5468_v0 = vpop.f32.mrf.mxu1 }
 0x2b5   : > { %v15286_v3 = vadd.f32 %v10595_v42, %v5617_v56  ;;  %v5615_v16 = vadd.f32 %v5468_v0, %v16306_v50  ;;  %v16311_v42 = vld [vmem:[#allocation35_spill] sm:$0xff] }
 0x2b6   : > { %v10599_v10 = vpop.f32.mrf.mxu0  ;;  %v10530_v53 = vpop.f32.mrf.mxu1 }
 0x2b7   : > { %v15289_v30 = vadd.f32 %v6147_v47, %v5615_v16  ;;  %v5618_v24 = vadd.f32 %v10530_v53, %v16307_v52  ;;  %v16313_v47 = vld [vmem:[#allocation47_spill] sm:$0xff] }
 0x2b8   : > { %v6163_v26 = vpop.f32.mrf.mxu0  ;;  %v5471_v37 = vpop.f32.mrf.mxu1 }
 0x2b9   : > { %v15292_v60 = vadd.f32 %v10596_v29, %v5618_v24  ;;  %v5616_v32 = vadd.f32 %v5471_v37, %v16309_v54  ;;  %v16315_v29 = vld [vmem:[#allocation49_spill] sm:$0xff] }
 0x2ba   : > { %v10600_v20 = vpop.f32.mrf.mxu0  ;;  %v10533_v8 = vpop.f32.mrf.mxu1 }
 0x2bb   : > { %16308 = vst [vmem:[#allocation64_spill] sm:$0xff] %v15292_v60  ;;  %v15295_v58 = vadd.f32 %v6150_v46, %v5616_v32  ;;  %v5621_v35 = vadd.f32 %v10533_v8, %v16311_v42  ;;  %v16317_v46 = vld [vmem:[#allocation104_spill] sm:$0xff] }
 0x2bc   : > { %v6166_v25 = vpop.f32.mrf.mxu0  ;;  %v5484_v56 = vpop.f32.mrf.mxu1 }
 0x2bd   : > { %16310 = vst [vmem:[#allocation67_spill] sm:$0xff] %v15295_v58  ;;  %v15298_v0 = vadd.f32 %v10599_v10, %v5621_v35  ;;  %v5619_v50 = vadd.f32 %v5484_v56, %v16313_v47  ;;  %v16319_v10 = vld [vmem:[#allocation39_spill] sm:$0xff] }
 0x2be   : > { %v10603_v16 = vpop.f32.mrf.mxu0  ;;  %v10534_v53 = vpop.f32.mrf.mxu1 }
 0x2bf   : > { %16312 = vst [vmem:[#allocation65_spill] sm:$0xff] %v15298_v0  ;;  %v15301_v52 = vadd.f32 %v6163_v26, %v5619_v50  ;;  %v5622_v24 = vadd.f32 %v10534_v53, %v16315_v29  ;;  %v16321_v26 = vld [vmem:[#allocation43_spill] sm:$0xff] }
 0x2c0   : > { %v6179_v60 = vpop.f32.mrf.mxu0  ;;  %v5487_v37 = vpop.f32.mrf.mxu1 }
 0x2c1   : > { %16314 = vst [vmem:[#allocation30_spill] sm:$0xff] %v15301_v52  ;;  %v15304_v54 = vadd.f32 %v10600_v20, %v5622_v24  ;;  %v5620_v32 = vadd.f32 %v5487_v37, %v16317_v46  ;;  %v16323_v20 = vld [vmem:[#allocation51_spill] sm:$0xff] }
 0x2c2   : > { %v10604_v58 = vpop.f32.mrf.mxu0  ;;  %v10537_v8 = vpop.f32.mrf.mxu1 }
 0x2c3   : > { %16316 = vst [vmem:[#allocation6_spill] sm:$0xff] %v15304_v54  ;;  %v15307_v42 = vadd.f32 %v6166_v25, %v5620_v32  ;;  %v5625_v35 = vadd.f32 %v10537_v8, %v16319_v10  ;;  %v16325_v25 = vld [vmem:[#allocation54_spill] sm:$0xff] }
 0x2c4   : > { %v6182_v0 = vpop.f32.mrf.mxu0  ;;  %v5500_v56 = vpop.f32.mrf.mxu1 }
 0x2c5   : > { %16318 = vst [vmem:[#allocation69_spill] sm:$0xff] %v15307_v42  ;;  %v15310_v47 = vadd.f32 %v10603_v16, %v5625_v35  ;;  %v5623_v50 = vadd.f32 %v5500_v56, %v16321_v26  ;;  %v16327_v16 = vld [vmem:[#allocation46_spill] sm:$0xff] }
 0x2c6   : > { %v10607_v52 = vpop.f32.mrf.mxu0  ;;  %v10538_v53 = vpop.f32.mrf.mxu1 }
 0x2c7   : > { %16320 = vst [vmem:[#allocation70_spill] sm:$0xff] %v15310_v47  ;;  %v15313_v29 = vadd.f32 %v6179_v60, %v5623_v50  ;;  %v5626_v24 = vadd.f32 %v10538_v53, %v16323_v20  ;;  %v16329_v60 = vld [vmem:[#allocation50_spill] sm:$0xff] }
 0x2c8   : > { %v6195_v54 = vpop.f32.mrf.mxu0  ;;  %v5503_v37 = vpop.f32.mrf.mxu1 }
 0x2c9   : > { %16322 = vst [vmem:[#allocation10_spill] sm:$0xff] %v15313_v29  ;;  %v15316_v46 = vadd.f32 %v10604_v58, %v5626_v24  ;;  %v5624_v32 = vadd.f32 %v5503_v37, %v16325_v25  ;;  %v16331_v58 = vld [vmem:[#allocation53_spill] sm:$0xff] }
 0x2ca   : > { %v10608_v42 = vpop.f32.mrf.mxu0  ;;  %v10541_v8 = vpop.f32.mrf.mxu1 }
 0x2cb   : > { %16324 = vst [vmem:[#allocation72_spill] sm:$0xff] %v15316_v46  ;;  %v15319_v10 = vadd.f32 %v6182_v0, %v5624_v32  ;;  %v5629_v35 = vadd.f32 %v10541_v8, %v16327_v16  ;;  %v16333_v0 = vld [vmem:[#allocation55_spill] sm:$0xff] }
 0x2cc   : > { %v6198_v47 = vpop.f32.mrf.mxu0  ;;  %v5516_v56 = vpop.f32.mrf.mxu1 }
 0x2cd   : > { %16326 = vst [vmem:[#allocation73_spill] sm:$0xff] %v15319_v10  ;;  %v15322_v26 = vadd.f32 %v10607_v52, %v5629_v35  ;;  %v5627_v50 = vadd.f32 %v5516_v56, %v16329_v60  ;;  %v16334_v52 = vld [vmem:[#allocation57_spill] sm:$0xff] }
 0x2ce   : > { %v10611_v29 = vpop.f32.mrf.mxu0  ;;  %v10542_v53 = vpop.f32.mrf.mxu1 }
 0x2cf   : > { %16328 = vst [vmem:[#allocation40_spill] sm:$0xff] %v15322_v26  ;;  %v15325_v20 = vadd.f32 %v6195_v54, %v5627_v50  ;;  %v5630_v24 = vadd.f32 %v10542_v53, %v16331_v58  ;;  %v16335_v54 = vld [vmem:[#allocation61_spill] sm:$0xff] }
 0x2d0   : > { %v6211_v46 = vpop.f32.mrf.mxu0  ;;  %v5519_v37 = vpop.f32.mrf.mxu1 }
 0x2d1   : > { %16330 = vst [vmem:[#allocation52_spill] sm:$0xff] %v15325_v20  ;;  %v15328_v25 = vadd.f32 %v10608_v42, %v5630_v24  ;;  %v5628_v32 = vadd.f32 %v5519_v37, %v16333_v0  ;;  %v16336_v42 = vld [vmem:[#allocation62_spill] sm:$0xff] }
 0x2d2   : > { %v10612_v10 = vpop.f32.mrf.mxu0  ;;  %v10545_v8 = vpop.f32.mrf.mxu1 }
 0x2d3   : > { %16332 = vst [vmem:[#allocation11_spill] sm:$0xff] %v15328_v25  ;;  %v15331_v16 = vadd.f32 %v6198_v47, %v5628_v32  ;;  %v5633_v35 = vadd.f32 %v10545_v8, %v16334_v52 }
 0x2d4   : > { %v6214_v26 = vpop.f32.mrf.mxu0  ;;  %v5532_v56 = vpop.f32.mrf.mxu1 }
 0x2d5   : > { %v15334_v60 = vadd.f32 %v10611_v29, %v5633_v35  ;;  %v5631_v50 = vadd.f32 %v5532_v56, %v16335_v54 }
 0x2d6   : > { %v10615_v20 = vpop.f32.mrf.mxu0  ;;  %v10546_v53 = vpop.f32.mrf.mxu1 }
 0x2d7   : > { %v15337_v58 = vadd.f32 %v6211_v46, %v5631_v50  ;;  %v5634_v24 = vadd.f32 %v10546_v53, %v16336_v42 }
 0x2d8   : > { %v6227_v25 = vpop.f32.mrf.mxu0  ;;  %v5535_v37 = vpop.f32.mrf.mxu1 }
 0x2d9   : > { %v15340_v0 = vadd.f32 %v10612_v10, %v5634_v24  ;;  %v5632_v47 = vadd.f32 %v5535_v37, %v14834_v6 }
 0x2da   : > { %v10616_v32 = vpop.f32.mrf.mxu0 }
 0x2db   : > { %v15343_v52 = vadd.f32 %v6214_v26, %v5632_v47 }
 0x2dc   : > { %v10549_v8 = vpop.f32.mrf.mxu1  ;;  %v6230_v35 = vpop.f32.mrf.mxu0 }
 0x2dd   : > { %v5637_v29 = vadd.f32 %v10549_v8, %v14840_v62 }
 0x2de   : > { %v5548_v56 = vpop.f32.mrf.mxu1  ;;  %v10619_v50 = vpop.f32.mrf.mxu0 }
 0x2df   : > { %v15346_v54 = vadd.f32 %v10615_v20, %v5637_v29  ;;  %v5635_v46 = vadd.f32 %v5548_v56, %v14864_v4 }
 0x2e0   : > { %v10550_v53 = vpop.f32.mrf.mxu1  ;;  %v6243_v24 = vpop.f32.mrf.mxu0 }
 0x2e1   : > { %16337 = vst [vmem:[#allocation13_spill] sm:$0xff] %v15346_v54  ;;  %v15349_v42 = vadd.f32 %v6227_v25, %v5635_v46  ;;  %v5638_v10 = vadd.f32 %v10550_v53, %v14868_v51 }
 0x2e2   : > { %v5551_v6 = vpop.f32.mrf.mxu1  ;;  %v10620_v47 = vpop.f32.mrf.mxu0 }
 0x2e3   : > { %16338 = vst [vmem:[#allocation31_spill] sm:$0xff] %v15349_v42  ;;  %v15352_v37 = vadd.f32 %v10616_v32, %v5638_v10  ;;  %v5636_v26 = vadd.f32 %v5551_v6, %v14882_v33 }
 0x2e4   : > { %v10553_v62 = vpop.f32.mrf.mxu1  ;;  %v6246_v29 = vpop.f32.mrf.mxu0 }
 0x2e5   : > { %16339 = vst [vmem:[#allocation16_spill] sm:$0xff] %v15352_v37  ;;  %v15355_v8 = vadd.f32 %v6230_v35, %v5636_v26  ;;  %v5641_v20 = vadd.f32 %v10553_v62, %v14903_v12 }
 0x2e6   : > { %v5564_v4 = vpop.f32.mrf.mxu1 }
 0x2e7   : > { %16340 = vst [vmem:[#allocation48_spill] sm:$0xff] %v15355_v8  ;;  %v15358_v56 = vadd.f32 %v10619_v50, %v5641_v20  ;;  %v5639_v25 = vadd.f32 %v5564_v4, %v14923_v59 }
 0x2e8   : > { %v10691_v46 = vpop.f32.mrf.mxu0  ;;  %v10554_v51 = vpop.f32.mrf.mxu1 }
 0x2e9   : > { %16341 = vst [vmem:[#allocation14_spill] sm:$0xff] %v15358_v56  ;;  %v15361_v53 = vadd.f32 %v6243_v24, %v5639_v25  ;;  %v5642_v32 = vadd.f32 %v10554_v51, %v14931_v36 }
 0x2ea   : > { %v8191_v10 = vpop.f32.mrf.mxu0  ;;  %v5567_v33 = vpop.f32.mrf.mxu1 }
 0x2eb   : > { %16342 = vst [vmem:[#allocation59_spill] sm:$0xff] %v15361_v53  ;;  %v15364_v6 = vadd.f32 %v10620_v47, %v5642_v32  ;;  %v5640_v35 = vadd.f32 %v5567_v33, %v14945_v21 }
 0x2ec   : > { %v10692_v26 = vpop.f32.mrf.mxu0  ;;  %v10625_v12 = vpop.f32.mrf.mxu1 }
 0x2ed   : > { %16343 = vst [vmem:[#allocation68_spill] sm:$0xff] %v15364_v6  ;;  %v15367_v62 = vadd.f32 %v6246_v29, %v5640_v35  ;;  %v7594_v24 = vadd.f32 %v10625_v12, %v14960_v19  ;;  %v16345_v19 = vld [vmem:[#allocation8_spill] sm:$0xff] }
 0x2ee   : > { %v8194_v50 = vpop.f32.mrf.mxu0  ;;  %v7337_v20 = vpop.f32.mrf.mxu1 }
 0x2ef   : > { %16344 = vst [vmem:[#allocation7_spill] sm:$0xff] %v15367_v62  ;;  %v7592_v59 = vadd.f32 %v7337_v20, %v14977_v28  ;;  %v8448_v6 = vadd.f32 %v10691_v46, %v7594_v24 }
 0x2f0   : > { %v10695_v4 = vpop.f32.mrf.mxu0  ;;  %v10626_v25 = vpop.f32.mrf.mxu1 }
 0x2f1   : > { %v8446_v36 = vadd.f32 %v8191_v10, %v7592_v59  ;;  %v7595_v51 = vadd.f32 %v10626_v25, %v14983_v15  ;;  %v8646_v10 = vmul.f32 %v8448_v6, %v8448_v6 }
 0x2f2   : > { %v8207_v53 = vpop.f32.mrf.mxu0  ;;  %v7340_v47 = vpop.f32.mrf.mxu1 }
 0x2f3   : > { %v7593_v21 = vadd.f32 %v7340_v47, %v14997_v5  ;;  %v8644_v35 = vmul.f32 %v8446_v36, %v8446_v36  ;;  %v8449_v62 = vadd.f32 %v10692_v26, %v7595_v51  ;;  %v8511_v15 = vsel %vm8510_vm8, %v8446_v36, 0.0  ;;  %v16346_v51 = vld [vmem:[#allocation9_spill] sm:$0xff] }
 0x2f4   : > { %v10696_v32 = vpop.f32.mrf.mxu0  ;;  %v10629_v33 = vpop.f32.mrf.mxu1  ;;  %v8514_v5 = vsel %vm8510_vm8, %v8448_v6, 0.0 }
 0x2f5   : > { %v8447_v56 = vadd.f32 %v8194_v50, %v7593_v21  ;;  %v7598_v20 = vadd.f32 %v10629_v33, %v15013_v2  ;;  %v8708_v26 = vsel %vm8510_vm8, %v8644_v35, 0.0  ;;  %v8647_v50 = vmul.f32 %v8449_v62, %v8449_v62 }
 0x2f6   : > { %v8210_v29 = vpop.f32.mrf.mxu0  ;;  %v7353_v28 = vpop.f32.mrf.mxu1  ;;  %v8516_v42 = vsel %vm8510_vm8, %v8449_v62, 0.0 }
 0x2f7   : > { %v7596_v12 = vadd.f32 %v7353_v28, %v16345_v19  ;;  %v8512_v59 = vsel %vm8510_vm8, %v8447_v56, 0.0  ;;  %v8645_v46 = vmul.f32 %v8447_v56, %v8447_v56  ;;  %v8452_v36 = vadd.f32 %v10695_v4, %v7598_v20 }
 0x2f8   : > { %v10699_v8 = vpop.f32.mrf.mxu0  ;;  %v10630_v24 = vpop.f32.mrf.mxu1  ;;  %v8513_v25 = vadd.f32 %v8512_v59, %v8511_v15  ;;  %v8711_v56 = vsel %vm8510_vm8, %v8646_v10, 0.0 }
 0x2f9   : > { %v8450_v47 = vadd.f32 %v8207_v53, %v7596_v12  ;;  %v8709_v2 = vsel %vm8510_vm8, %v8645_v46, 0.0  ;;  %v7599_v21 = vadd.f32 %v10630_v24, %v16346_v51  ;;  %v8713_v46 = vsel %vm8510_vm8, %v8647_v50, 0.0 }
 0x2fa   : > { %v8223_v37 = vpop.f32.mrf.mxu0  ;;  %v7356_v33 = vpop.f32.mrf.mxu1  ;;  %v8515_v28 = vadd.f32 %v8514_v5, %v8513_v25  ;;  %v8710_v19 = vadd.f32 %v8709_v2, %v8708_v26  ;;  %v8650_v4 = vmul.f32 %v8452_v36, %v8452_v36  ;;  %v8522_v50 = vsel %vm8510_vm8, %v8452_v36, 0.0 }
 0x2fb   : > { %v8648_v6 = vmul.f32 %v8450_v47, %v8450_v47  ;;  %v7597_v53 = vadd.f32 %v7356_v33, %v15057_v27  ;;  %v8518_v24 = vsel %vm8510_vm8, %v8450_v47, 0.0  ;;  %v8453_v51 = vadd.f32 %v10696_v32, %v7599_v21 }
 0x2fc   : > { %v10700_v54 = vpop.f32.mrf.mxu0  ;;  %v10633_v12 = vpop.f32.mrf.mxu1  ;;  %v8712_v15 = vadd.f32 %v8711_v56, %v8710_v19  ;;  %v8517_v35 = vadd.f32 %v8516_v42, %v8515_v28 }
 0x2fd   : > { %v8451_v5 = vadd.f32 %v8210_v29, %v7597_v53  ;;  %v8715_v2 = vsel %vm8510_vm8, %v8648_v6, 0.0  ;;  %v7602_v42 = vadd.f32 %v10633_v12, %v15069_v1  ;;  %v8651_v21 = vmul.f32 %v8453_v51, %v8453_v51 }
 0x2fe   : > { %v8226_v59 = vpop.f32.mrf.mxu0  ;;  %v7369_v25 = vpop.f32.mrf.mxu1  ;;  %v8519_v20 = vadd.f32 %v8518_v24, %v8517_v35  ;;  %v8714_v26 = vadd.f32 %v8713_v46, %v8712_v15  ;;  %v8719_v1 = vsel %vm8510_vm8, %v8650_v4, 0.0  ;;  %v8524_v12 = vsel %vm8510_vm8, %v8453_v51, 0.0 }
 0x2ff   : > { %v7600_v10 = vadd.f32 %v7369_v25, %v15085_v57  ;;  %v8520_v27 = vsel %vm8510_vm8, %v8451_v5, 0.0  ;;  %v8649_v33 = vmul.f32 %v8451_v5, %v8451_v5  ;;  %v8456_v36 = vadd.f32 %v10699_v8, %v7602_v42 }
 0x300   : > { %v10703_v62 = vpop.f32.mrf.mxu0  ;;  %v10634_v28 = vpop.f32.mrf.mxu1  ;;  %v8716_v47 = vadd.f32 %v8715_v2, %v8714_v26  ;;  %v8521_v32 = vadd.f32 %v8520_v27, %v8519_v20 }
 0x301   : > { %v8717_v19 = vsel %vm8510_vm8, %v8649_v33, 0.0  ;;  %v8454_v56 = vadd.f32 %v8223_v37, %v7600_v10  ;;  %v7603_v57 = vadd.f32 %v10634_v28, %v15093_v34  ;;  %v8721_v37 = vsel %vm8510_vm8, %v8651_v21, 0.0 }
 0x302   : > { %v8239_v29 = vpop.f32.mrf.mxu0  ;;  %v7372_v53 = vpop.f32.mrf.mxu1  ;;  %v8523_v15 = vadd.f32 %v8522_v50, %v8521_v32  ;;  %v8718_v6 = vadd.f32 %v8717_v19, %v8716_v47  ;;  %v8654_v51 = vmul.f32 %v8456_v36, %v8456_v36  ;;  %v16347_v47 = vld [vmem:[#allocation60_spill] sm:$0xff] }
 0x303   : > { %v7601_v35 = vadd.f32 %v7372_v53, %v15114_v18  ;;  %v8652_v24 = vmul.f32 %v8454_v56, %v8454_v56  ;;  %v8526_v34 = vsel %vm8510_vm8, %v8454_v56, 0.0  ;;  %v8457_v10 = vadd.f32 %v10700_v54, %v7603_v57 }
 0x304   : > { %v10704_v46 = vpop.f32.mrf.mxu0  ;;  %v10637_v5 = vpop.f32.mrf.mxu1  ;;  %v8720_v25 = vadd.f32 %v8719_v1, %v8718_v6  ;;  %v8525_v20 = vadd.f32 %v8524_v12, %v8523_v15  ;;  %v8530_v57 = vsel %vm8510_vm8, %v8456_v36, 0.0  ;;  %v16348_v6 = vld [vmem:[#allocation63_spill] sm:$0xff] }
 0x305   : > { %v8455_v26 = vadd.f32 %v8226_v59, %v7601_v35  ;;  %v8723_v8 = vsel %vm8510_vm8, %v8652_v24, 0.0  ;;  %v7606_v42 = vadd.f32 %v10637_v5, %v15132_v43  ;;  %v8655_v53 = vmul.f32 %v8457_v10, %v8457_v10  ;;  %v16349_v24 = vld [vmem:[#allocation2_spill] sm:$0xff] }
 0x306   : > { %v8242_v2 = vpop.f32.mrf.mxu0  ;;  %v7385_v27 = vpop.f32.mrf.mxu1  ;;  %v8527_v33 = vadd.f32 %v8526_v34, %v8525_v20  ;;  %v8722_v18 = vadd.f32 %v8721_v37, %v8720_v25  ;;  %v8727_v5 = vsel %vm8510_vm8, %v8654_v51, 0.0 }
 0x307   : > { %v8528_v28 = vsel %vm8510_vm8, %v8455_v26, 0.0  ;;  %v8653_v4 = vmul.f32 %v8455_v26, %v8455_v26  ;;  %v7604_v59 = vadd.f32 %v7385_v27, %v16347_v47  ;;  %v8532_v26 = vsel %vm8510_vm8, %v8457_v10, 0.0 }
 0x308   : > { %v10707_v50 = vpop.f32.mrf.mxu0  ;;  %v10638_v32 = vpop.f32.mrf.mxu1  ;;  %v8724_v19 = vadd.f32 %v8723_v8, %v8722_v18  ;;  %v8529_v21 = vadd.f32 %v8528_v28, %v8527_v33  ;;  %v8460_v37 = vadd.f32 %v10703_v62, %v7606_v42 }
 0x309   : > { %v8725_v56 = vsel %vm8510_vm8, %v8653_v4, 0.0  ;;  %v8458_v15 = vadd.f32 %v8239_v29, %v7604_v59  ;;  %v7607_v35 = vadd.f32 %v10638_v32, %v16348_v6  ;;  %v8729_v29 = vsel %vm8510_vm8, %v8655_v53, 0.0 }
 0x30a   : > { %v8255_v54 = vpop.f32.mrf.mxu0  ;;  %v7388_v1 = vpop.f32.mrf.mxu1  ;;  %v8531_v12 = vadd.f32 %v8530_v57, %v8529_v21  ;;  %v8726_v25 = vadd.f32 %v8725_v56, %v8724_v19  ;;  %v8658_v62 = vmul.f32 %v8460_v37, %v8460_v37 }
 0x30b   : > { %v7605_v20 = vadd.f32 %v7388_v1, %v16349_v24  ;;  %v8656_v34 = vmul.f32 %v8458_v15, %v8458_v15  ;;  %v8534_v28 = vsel %vm8510_vm8, %v8458_v15, 0.0  ;;  %v8461_v4 = vadd.f32 %v10704_v46, %v7607_v35 }
 0x30c   : > { %v10708_v43 = vpop.f32.mrf.mxu0  ;;  %v10641_v27 = vpop.f32.mrf.mxu1  ;;  %v8728_v33 = vadd.f32 %v8727_v5, %v8726_v25  ;;  %v8533_v18 = vadd.f32 %v8532_v26, %v8531_v12  ;;  %v8735_v5 = vsel %vm8510_vm8, %v8658_v62, 0.0 }
 0x30d   : > { %v8459_v8 = vadd.f32 %v8242_v2, %v7605_v20  ;;  %v7610_v19 = vadd.f32 %v10641_v27, %v15182_v7  ;;  %v8731_v42 = vsel %vm8510_vm8, %v8656_v34, 0.0  ;;  %v8538_v2 = vsel %vm8510_vm8, %v8460_v37, 0.0 }
 0x30e   : > { %v8258_v36 = vpop.f32.mrf.mxu0  ;;  %v7401_v47 = vpop.f32.mrf.mxu1  ;;  %v8535_v59 = vadd.f32 %v8534_v28, %v8533_v18  ;;  %v8730_v32 = vadd.f32 %v8729_v29, %v8728_v33  ;;  %v8659_v35 = vmul.f32 %v8461_v4, %v8461_v4  ;;  %v8540_v26 = vsel %vm8510_vm8, %v8461_v4, 0.0 }
 0x30f   : > { %v7608_v51 = vadd.f32 %v7401_v47, %v15191_v14  ;;  %v8536_v21 = vsel %vm8510_vm8, %v8459_v8, 0.0  ;;  %v8657_v56 = vmul.f32 %v8459_v8, %v8459_v8  ;;  %v8464_v24 = vadd.f32 %v10707_v50, %v7610_v19 }
 0x310   : > { %v10711_v10 = vpop.f32.mrf.mxu0  ;;  %v10642_v57 = vpop.f32.mrf.mxu1  ;;  %v8732_v53 = vadd.f32 %v8731_v42, %v8730_v32  ;;  %v8537_v6 = vadd.f32 %v8536_v21, %v8535_v59  ;;  %v8737_v29 = vsel %vm8510_vm8, %v8659_v35, 0.0 }
 0x311   : > { %v8462_v15 = vadd.f32 %v8255_v54, %v7608_v51  ;;  %v8733_v1 = vsel %vm8510_vm8, %v8657_v56, 0.0  ;;  %v7611_v7 = vadd.f32 %v10642_v57, %v15205_v39  ;;  %v8662_v50 = vmul.f32 %v8464_v24, %v8464_v24 }
 0x312   : > { %v8271_v46 = vpop.f32.mrf.mxu0  ;;  %v7404_v14 = vpop.f32.mrf.mxu1  ;;  %v8539_v12 = vadd.f32 %v8538_v2, %v8537_v6  ;;  %v8734_v25 = vadd.f32 %v8733_v1, %v8732_v53  ;;  %v8546_v56 = vsel %vm8510_vm8, %v8464_v24, 0.0 }
 0x313   : > { %v8660_v34 = vmul.f32 %v8462_v15, %v8462_v15  ;;  %v7609_v54 = vadd.f32 %v7404_v14, %v15212_v44  ;;  %v8542_v39 = vsel %vm8510_vm8, %v8462_v15, 0.0  ;;  %v8465_v28 = vadd.f32 %v10708_v43, %v7611_v7 }
 0x314   : > { %v10712_v20 = vpop.f32.mrf.mxu0  ;;  %v10645_v27 = vpop.f32.mrf.mxu1  ;;  %v8736_v33 = vadd.f32 %v8735_v5, %v8734_v25  ;;  %v8541_v37 = vadd.f32 %v8540_v26, %v8539_v12 }
 0x315   : > { %v8463_v8 = vadd.f32 %v8258_v36, %v7609_v54  ;;  %v8739_v51 = vsel %vm8510_vm8, %v8660_v34, 0.0  ;;  %v7614_v42 = vadd.f32 %v10645_v27, %v15219_v49  ;;  %v8663_v53 = vmul.f32 %v8465_v28, %v8465_v28 }
 0x316   : > { %v8274_v18 = vpop.f32.mrf.mxu0  ;;  %v7417_v47 = vpop.f32.mrf.mxu1  ;;  %v8543_v59 = vadd.f32 %v8542_v39, %v8541_v37  ;;  %v8738_v32 = vadd.f32 %v8737_v29, %v8736_v33  ;;  %v8743_v49 = vsel %vm8510_vm8, %v8662_v50, 0.0  ;;  %v8548_v12 = vsel %vm8510_vm8, %v8465_v28, 0.0 }
 0x317   : > { %v7612_v19 = vadd.f32 %v7417_v47, %v15231_v38  ;;  %v8544_v44 = vsel %vm8510_vm8, %v8463_v8, 0.0  ;;  %v8661_v62 = vmul.f32 %v8463_v8, %v8463_v8  ;;  %v8468_v25 = vadd.f32 %v10711_v10, %v7614_v42 }
 0x318   : > { %v10715_v4 = vpop.f32.mrf.mxu0  ;;  %v10646_v21 = vpop.f32.mrf.mxu1  ;;  %v8740_v57 = vadd.f32 %v8739_v51, %v8738_v32  ;;  %v8545_v43 = vadd.f32 %v8544_v44, %v8543_v59 }
 0x319   : > { %v8741_v6 = vsel %vm8510_vm8, %v8661_v62, 0.0  ;;  %v8466_v15 = vadd.f32 %v8271_v46, %v7612_v19  ;;  %v7615_v38 = vadd.f32 %v10646_v21, %v15236_v31  ;;  %v8745_v46 = vsel %vm8510_vm8, %v8663_v53, 0.0 }
 0x31a   : > { %v8287_v36 = vpop.f32.mrf.mxu0  ;;  %v7420_v2 = vpop.f32.mrf.mxu1  ;;  %v8547_v35 = vadd.f32 %v8546_v56, %v8545_v43  ;;  %v8742_v1 = vadd.f32 %v8741_v6, %v8740_v57  ;;  %v8666_v28 = vmul.f32 %v8468_v25, %v8468_v25  ;;  %v8554_v44 = vsel %vm8510_vm8, %v8468_v25, 0.0 }
 0x31b   : > { %v7613_v7 = vadd.f32 %v7420_v2, %v15240_v40  ;;  %v8664_v24 = vmul.f32 %v8466_v15, %v8466_v15  ;;  %v8550_v31 = vsel %vm8510_vm8, %v8466_v15, 0.0  ;;  %v8469_v33 = vadd.f32 %v10712_v20, %v7615_v38 }
 0x31c   : > { %v10716_v14 = vpop.f32.mrf.mxu0  ;;  %v10649_v5 = vpop.f32.mrf.mxu1  ;;  %v8744_v26 = vadd.f32 %v8743_v49, %v8742_v1  ;;  %v8549_v34 = vadd.f32 %v8548_v12, %v8547_v35 }
 0x31d   : > { %v8467_v54 = vadd.f32 %v8274_v18, %v7613_v7  ;;  %v8747_v10 = vsel %vm8510_vm8, %v8664_v24, 0.0  ;;  %v7618_v50 = vadd.f32 %v10649_v5, %v15248_v63  ;;  %v8667_v62 = vmul.f32 %v8469_v33, %v8469_v33 }
 0x31e   : > { %v8290_v27 = vpop.f32.mrf.mxu0  ;;  %v7433_v37 = vpop.f32.mrf.mxu1  ;;  %v8551_v29 = vadd.f32 %v8550_v31, %v8549_v34  ;;  %v8746_v40 = vadd.f32 %v8745_v46, %v8744_v26  ;;  %v8556_v6 = vsel %vm8510_vm8, %v8469_v33, 0.0 }
 0x31f   : > { %v8552_v39 = vsel %vm8510_vm8, %v8467_v54, 0.0  ;;  %v8665_v8 = vmul.f32 %v8467_v54, %v8467_v54  ;;  %v7616_v18 = vadd.f32 %v7433_v37, %v15252_v11  ;;  %v8751_v11 = vsel %vm8510_vm8, %v8666_v28, 0.0 }
 0x320   : > { %v10719_v47 = vpop.f32.mrf.mxu0  ;;  %v10650_v59 = vpop.f32.mrf.mxu1  ;;  %v8748_v32 = vadd.f32 %v8747_v10, %v8746_v40  ;;  %v8553_v19 = vadd.f32 %v8552_v39, %v8551_v29  ;;  %v8472_v15 = vadd.f32 %v10715_v4, %v7618_v50 }
 0x321   : > { %v8749_v51 = vsel %vm8510_vm8, %v8665_v8, 0.0  ;;  %v8470_v42 = vadd.f32 %v8287_v36, %v7616_v18  ;;  %v7619_v21 = vadd.f32 %v10650_v59, %v15255_v45  ;;  %v8753_v36 = vsel %vm8510_vm8, %v8667_v62, 0.0 }
 0x322   : > { %v8303_v20 = vpop.f32.mrf.mxu0  ;;  %v7436_v56 = vpop.f32.mrf.mxu1  ;;  %v8555_v57 = vadd.f32 %v8554_v44, %v8553_v19  ;;  %v8750_v43 = vadd.f32 %v8749_v51, %v8748_v32  ;;  %v8670_v4 = vmul.f32 %v8472_v15, %v8472_v15 }
 0x323   : > { %v7617_v53 = vadd.f32 %v7436_v56, %v15259_v17  ;;  %v8668_v38 = vmul.f32 %v8470_v42, %v8470_v42  ;;  %v8558_v45 = vsel %vm8510_vm8, %v8470_v42, 0.0  ;;  %v8473_v49 = vadd.f32 %v10716_v14, %v7619_v21 }
 0x324   : > { %v10720_v63 = vpop.f32.mrf.mxu0  ;;  %v10653_v2 = vpop.f32.mrf.mxu1  ;;  %v8752_v35 = vadd.f32 %v8751_v11, %v8750_v43  ;;  %v8557_v1 = vadd.f32 %v8556_v6, %v8555_v57  ;;  %v8759_v59 = vsel %vm8510_vm8, %v8670_v4, 0.0 }
 0x325   : > { %v8471_v12 = vadd.f32 %v8290_v27, %v7617_v53  ;;  %v7622_v5 = vadd.f32 %v10653_v2, %v15262_v9  ;;  %v8755_v54 = vsel %vm8510_vm8, %v8668_v38, 0.0  ;;  %v8562_v27 = vsel %vm8510_vm8, %v8472_v15, 0.0 }
 0x326   : > { %v8306_v7 = vpop.f32.mrf.mxu0  ;;  %v7449_v25 = vpop.f32.mrf.mxu1  ;;  %v8559_v24 = vadd.f32 %v8558_v45, %v8557_v1  ;;  %v8754_v17 = vadd.f32 %v8753_v36, %v8752_v35  ;;  %v8671_v39 = vmul.f32 %v8473_v49, %v8473_v49  ;;  %v8564_v32 = vsel %vm8510_vm8, %v8473_v49, 0.0 }
 0x327   : > { %v7620_v26 = vadd.f32 %v7449_v25, %v15265_v23  ;;  %v8560_v46 = vsel %vm8510_vm8, %v8471_v12, 0.0  ;;  %v8669_v31 = vmul.f32 %v8471_v12, %v8471_v12  ;;  %v8476_v50 = vadd.f32 %v10719_v47, %v7622_v5 }
 0x328   : > { %v10723_v34 = vpop.f32.mrf.mxu0  ;;  %v10654_v33 = vpop.f32.mrf.mxu1  ;;  %v8756_v37 = vadd.f32 %v8755_v54, %v8754_v17  ;;  %v8561_v29 = vadd.f32 %v8560_v46, %v8559_v24  ;;  %v8761_v21 = vsel %vm8510_vm8, %v8671_v39, 0.0 }
 0x329   : > { %v8474_v40 = vadd.f32 %v8303_v20, %v7620_v26  ;;  %v8757_v8 = vsel %vm8510_vm8, %v8669_v31, 0.0  ;;  %v7623_v9 = vadd.f32 %v10654_v33, %v15268_v22  ;;  %v8674_v47 = vmul.f32 %v8476_v50, %v8476_v50 }
 0x32a   : > { %v8319_v14 = vpop.f32.mrf.mxu0  ;;  %v7452_v23 = vpop.f32.mrf.mxu1  ;;  %v8563_v28 = vadd.f32 %v8562_v27, %v8561_v29  ;;  %v8758_v10 = vadd.f32 %v8757_v8, %v8756_v37  ;;  %v8570_v36 = vsel %vm8510_vm8, %v8476_v50, 0.0 }
 0x32b   : > { %v8672_v19 = vmul.f32 %v8474_v40, %v8474_v40  ;;  %v7621_v51 = vadd.f32 %v7452_v23, %v15271_v61  ;;  %v8566_v22 = vsel %vm8510_vm8, %v8474_v40, 0.0  ;;  %v8477_v56 = vadd.f32 %v10720_v63, %v7623_v9 }
 0x32c   : > { %v10724_v18 = vpop.f32.mrf.mxu0  ;;  %v10657_v20 = vpop.f32.mrf.mxu1  ;;  %v8760_v44 = vadd.f32 %v8759_v59, %v8758_v10  ;;  %v8565_v62 = vadd.f32 %v8564_v32, %v8563_v28 }
 0x32d   : > { %v8475_v57 = vadd.f32 %v8306_v7, %v7621_v51  ;;  %v8763_v38 = vsel %vm8510_vm8, %v8672_v19, 0.0  ;;  %v7626_v35 = vadd.f32 %v10657_v20, %v15274_v13  ;;  %v8675_v49 = vmul.f32 %v8477_v56, %v8477_v56 }
 0x32e   : > { %v8322_v42 = vpop.f32.mrf.mxu0  ;;  %v7465_v43 = vpop.f32.mrf.mxu1  ;;  %v8567_v53 = vadd.f32 %v8566_v22, %v8565_v62  ;;  %v8762_v11 = vadd.f32 %v8761_v21, %v8760_v44  ;;  %v8767_v13 = vsel %vm8510_vm8, %v8674_v47, 0.0  ;;  %v8572_v54 = vsel %vm8510_vm8, %v8477_v56, 0.0  ;;  %v16350_v22 = vld [vmem:[#allocation64_spill] sm:$0xff] }
 0x32f   : > { %v7624_v6 = vadd.f32 %v7465_v43, %v15277_v48  ;;  %v8568_v61 = vsel %vm8510_vm8, %v8475_v57, 0.0  ;;  %v8673_v2 = vmul.f32 %v8475_v57, %v8475_v57  ;;  %v8480_v46 = vadd.f32 %v10723_v34, %v7626_v35 }
 0x330   : > { %v10727_v15 = vpop.f32.mrf.mxu0  ;;  %v10658_v1 = vpop.f32.mrf.mxu1  ;;  %v8764_v45 = vadd.f32 %v8763_v38, %v8762_v11  ;;  %v8569_v63 = vadd.f32 %v8568_v61, %v8567_v53  ;;  %v16351_v53 = vld [vmem:[#allocation67_spill] sm:$0xff] }
 0x331   : > { %v8765_v12 = vsel %vm8510_vm8, %v8673_v2, 0.0  ;;  %v8478_v25 = vadd.f32 %v8319_v14, %v7624_v6  ;;  %v7627_v48 = vadd.f32 %v10658_v1, %v15280_v41  ;;  %v8769_v14 = vsel %vm8510_vm8, %v8675_v49, 0.0 }
 0x332   : > { %v8335_v7 = vpop.f32.mrf.mxu0  ;;  %v7468_v24 = vpop.f32.mrf.mxu1  ;;  %v8571_v17 = vadd.f32 %v8570_v36, %v8569_v63  ;;  %v8766_v5 = vadd.f32 %v8765_v12, %v8764_v45  ;;  %v8678_v50 = vmul.f32 %v8480_v46, %v8480_v46  ;;  %v8578_v62 = vsel %vm8510_vm8, %v8480_v46, 0.0 }
 0x333   : > { %v7625_v26 = vadd.f32 %v7468_v24, %v15283_v55  ;;  %v8676_v31 = vmul.f32 %v8478_v25, %v8478_v25  ;;  %v8574_v41 = vsel %vm8510_vm8, %v8478_v25, 0.0  ;;  %v8481_v39 = vadd.f32 %v10724_v18, %v7627_v48  ;;  %v16352_v24 = vld [vmem:[#allocation65_spill] sm:$0xff] }
 0x334   : > { %v10728_v4 = vpop.f32.mrf.mxu0  ;;  %v10661_v33 = vpop.f32.mrf.mxu1  ;;  %v8768_v37 = vadd.f32 %v8767_v13, %v8766_v5  ;;  %v8573_v29 = vadd.f32 %v8572_v54, %v8571_v17  ;;  %v16353_v5 = vld [vmem:[#allocation30_spill] sm:$0xff] }
 0x335   : > { %v8479_v40 = vadd.f32 %v8322_v42, %v7625_v26  ;;  %v8771_v34 = vsel %vm8510_vm8, %v8676_v31, 0.0  ;;  %v7630_v59 = vadd.f32 %v10661_v33, %v15286_v3  ;;  %v8679_v42 = vmul.f32 %v8481_v39, %v8481_v39 }
 0x336   : > { %v8338_v27 = vpop.f32.mrf.mxu0  ;;  %v7481_v8 = vpop.f32.mrf.mxu1  ;;  %v8575_v9 = vadd.f32 %v8574_v41, %v8573_v29  ;;  %v8770_v55 = vadd.f32 %v8769_v14, %v8768_v37  ;;  %v8580_v6 = vsel %vm8510_vm8, %v8481_v39, 0.0  ;;  %v16354_v39 = vld [vmem:[#allocation6_spill] sm:$0xff] }
 0x337   : > { %v8576_v23 = vsel %vm8510_vm8, %v8479_v40, 0.0  ;;  %v8677_v28 = vmul.f32 %v8479_v40, %v8479_v40  ;;  %v7628_v32 = vadd.f32 %v7481_v8, %v15289_v30  ;;  %v8775_v30 = vsel %vm8510_vm8, %v8678_v50, 0.0 }
 0x338   : > { %v10731_v10 = vpop.f32.mrf.mxu0  ;;  %v10662_v19 = vpop.f32.mrf.mxu1  ;;  %v8772_v51 = vadd.f32 %v8771_v34, %v8770_v55  ;;  %v8577_v20 = vadd.f32 %v8576_v23, %v8575_v9  ;;  %v8484_v38 = vadd.f32 %v10727_v15, %v7630_v59  ;;  %v8777_v45 = vsel %vm8510_vm8, %v8679_v42, 0.0 }
 0x339   : > { %v8773_v44 = vsel %vm8510_vm8, %v8677_v28, 0.0  ;;  %v8482_v21 = vadd.f32 %v8335_v7, %v7628_v32  ;;  %v7631_v56 = vadd.f32 %v10662_v19, %v16350_v22  ;;  %v16355_v19 = vld [vmem:[#allocation69_spill] sm:$0xff] }
 0x33a   : > { %v8351_v18 = vpop.f32.mrf.mxu0  ;;  %v7484_v57 = vpop.f32.mrf.mxu1  ;;  %v8579_v43 = vadd.f32 %v8578_v62, %v8577_v20  ;;  %v8774_v47 = vadd.f32 %v8773_v44, %v8772_v51  ;;  %v8682_v15 = vmul.f32 %v8484_v38, %v8484_v38 }
 0x33b   : > { %v7629_v11 = vadd.f32 %v7484_v57, %v16351_v53  ;;  %v8680_v61 = vmul.f32 %v8482_v21, %v8482_v21  ;;  %v8582_v63 = vsel %vm8510_vm8, %v8482_v21, 0.0  ;;  %v8485_v7 = vadd.f32 %v10728_v4, %v7631_v56  ;;  %v16356_v53 = vld [vmem:[#allocation10_spill] sm:$0xff] }
 0x33c   : > { %v10732_v3 = vpop.f32.mrf.mxu0  ;;  %v10665_v2 = vpop.f32.mrf.mxu1  ;;  %v8776_v35 = vadd.f32 %v8775_v30, %v8774_v47  ;;  %v8581_v1 = vadd.f32 %v8580_v6, %v8579_v43  ;;  %v8783_v34 = vsel %vm8510_vm8, %v8682_v15, 0.0 }
 0x33d   : > { %v8483_v49 = vadd.f32 %v8338_v27, %v7629_v11  ;;  %v7634_v17 = vadd.f32 %v10665_v2, %v16352_v24  ;;  %v8779_v54 = vsel %vm8510_vm8, %v8680_v61, 0.0  ;;  %v8586_v27 = vsel %vm8510_vm8, %v8484_v38, 0.0  ;;  %v16357_v2 = vld [vmem:[#allocation70_spill] sm:$0xff] }
 0x33e   : > { %v8354_v36 = vpop.f32.mrf.mxu0  ;;  %v7497_v12 = vpop.f32.mrf.mxu1  ;;  %v8583_v25 = vadd.f32 %v8582_v63, %v8581_v1  ;;  %v8778_v48 = vadd.f32 %v8777_v45, %v8776_v35  ;;  %v8683_v14 = vmul.f32 %v8485_v7, %v8485_v7  ;;  %v8588_v59 = vsel %vm8510_vm8, %v8485_v7, 0.0 }
 0x33f   : > { %v7632_v26 = vadd.f32 %v7497_v12, %v16353_v5  ;;  %v8584_v46 = vsel %vm8510_vm8, %v8483_v49, 0.0  ;;  %v8681_v31 = vmul.f32 %v8483_v49, %v8483_v49  ;;  %v8488_v28 = vadd.f32 %v10731_v10, %v7634_v17 }
 0x340   : > { %v10735_v13 = vpop.f32.mrf.mxu0  ;;  %v10666_v33 = vpop.f32.mrf.mxu1  ;;  %v8780_v37 = vadd.f32 %v8779_v54, %v8778_v48  ;;  %v8585_v29 = vadd.f32 %v8584_v46, %v8583_v25  ;;  %v8785_v42 = vsel %vm8510_vm8, %v8683_v14, 0.0  ;;  %v16358_v25 = vld [vmem:[#allocation72_spill] sm:$0xff] }
 0x341   : > { %v8486_v40 = vadd.f32 %v8351_v18, %v7632_v26  ;;  %v8781_v41 = vsel %vm8510_vm8, %v8681_v31, 0.0  ;;  %v7635_v8 = vadd.f32 %v10666_v33, %v16354_v39  ;;  %v8686_v10 = vmul.f32 %v8488_v28, %v8488_v28  ;;  %v16359_v26 = vld [vmem:[#allocation73_spill] sm:$0xff] }
 0x342   : > { %v8367_v4 = vpop.f32.mrf.mxu0  ;;  %v7500_v9 = vpop.f32.mrf.mxu1  ;;  %v8587_v55 = vadd.f32 %v8586_v27, %v8585_v29  ;;  %v8782_v23 = vadd.f32 %v8781_v41, %v8780_v37  ;;  %v8594_v45 = vsel %vm8510_vm8, %v8488_v28, 0.0 }
 0x343   : > { %v8684_v32 = vmul.f32 %v8486_v40, %v8486_v40  ;;  %v7633_v51 = vadd.f32 %v7500_v9, %v16355_v19  ;;  %v8590_v21 = vsel %vm8510_vm8, %v8486_v40, 0.0  ;;  %v8489_v22 = vadd.f32 %v10732_v3, %v7635_v8  ;;  %v16360_v19 = vld [vmem:[#allocation40_spill] sm:$0xff] }
 0x344   : > { %v10736_v50 = vpop.f32.mrf.mxu0  ;;  %v10669_v20 = vpop.f32.mrf.mxu1  ;;  %v8784_v44 = vadd.f32 %v8783_v34, %v8782_v23  ;;  %v8589_v18 = vadd.f32 %v8588_v59, %v8587_v55  ;;  %v8791_v46 = vsel %vm8510_vm8, %v8686_v10, 0.0  ;;  %v16362_v10 = vld [vmem:[#allocation11_spill] sm:$0xff] }
 0x345   : > { %v8487_v56 = vadd.f32 %v8354_v36, %v7633_v51  ;;  %v8787_v6 = vsel %vm8510_vm8, %v8684_v32, 0.0  ;;  %v7638_v35 = vadd.f32 %v10669_v20, %v16357_v2  ;;  %v8687_v7 = vmul.f32 %v8489_v22, %v8489_v22  ;;  %v16361_v20 = vld [vmem:[#allocation52_spill] sm:$0xff] }
 0x346   : > { %v8370_v62 = vpop.f32.mrf.mxu0  ;;  %v7513_v57 = vpop.f32.mrf.mxu1  ;;  %v8591_v43 = vadd.f32 %v8590_v21, %v8589_v18  ;;  %v8786_v47 = vadd.f32 %v8785_v42, %v8784_v44  ;;  %v8596_v31 = vsel %vm8510_vm8, %v8489_v22, 0.0 }
 0x347   : > { %v7636_v11 = vadd.f32 %v7513_v57, %v16356_v53  ;;  %v8592_v38 = vsel %vm8510_vm8, %v8487_v56, 0.0  ;;  %v8685_v61 = vmul.f32 %v8487_v56, %v8487_v56  ;;  %v8492_v33 = vadd.f32 %v10735_v13, %v7638_v35 }
 0x348   : > { %v10670_v1 = vpop.f32.mrf.mxu1  ;;  %v8788_v63 = vadd.f32 %v8787_v6, %v8786_v47  ;;  %v8593_v3 = vadd.f32 %v8592_v38, %v8591_v43 }
 0x349   : > { %v10739_v30 = vpop.f32.mrf.mxu0  ;;  %v8789_v49 = vsel %vm8510_vm8, %v8685_v61, 0.0  ;;  %v8490_v12 = vadd.f32 %v8367_v4, %v7636_v11  ;;  %v7639_v48 = vadd.f32 %v10670_v1, %v16358_v25  ;;  %v8793_v4 = vsel %vm8510_vm8, %v8687_v7, 0.0 }
 0x34a   : > { %v7516_v24 = vpop.f32.mrf.mxu1  ;;  %v8595_v17 = vadd.f32 %v8594_v45, %v8593_v3  ;;  %v8790_v5 = vadd.f32 %v8789_v49, %v8788_v63  ;;  %v8690_v32 = vmul.f32 %v8492_v33, %v8492_v33  ;;  %v8602_v22 = vsel %vm8510_vm8, %v8492_v33, 0.0 }
 0x34b   : > { %v8383_v36 = vpop.f32.mrf.mxu0  ;;  %v7637_v15 = vadd.f32 %v7516_v24, %v16359_v26  ;;  %v8688_v37 = vmul.f32 %v8490_v12, %v8490_v12  ;;  %v8598_v39 = vsel %vm8510_vm8, %v8490_v12, 0.0  ;;  %v8493_v8 = vadd.f32 %v10736_v50, %v7639_v48 }
 0x34c   : > { %v10673_v29 = vpop.f32.mrf.mxu1  ;;  %v8792_v40 = vadd.f32 %v8791_v46, %v8790_v5  ;;  %v8597_v27 = vadd.f32 %v8596_v31, %v8595_v17  ;;  %v8799_v61 = vsel %vm8510_vm8, %v8690_v32, 0.0 }
 0x34d   : > { %v10740_v54 = vpop.f32.mrf.mxu0  ;;  %v8491_v14 = vadd.f32 %v8370_v62, %v7637_v15  ;;  %v8795_v13 = vsel %vm8510_vm8, %v8688_v37, 0.0  ;;  %v7642_v51 = vadd.f32 %v10673_v29, %v16360_v19  ;;  %v8691_v56 = vmul.f32 %v8493_v8, %v8493_v8 }
 0x34e   : > { %v7529_v9 = vpop.f32.mrf.mxu1  ;;  %v8599_v55 = vadd.f32 %v8598_v39, %v8597_v27  ;;  %v8794_v23 = vadd.f32 %v8793_v4, %v8792_v40  ;;  %v8604_v2 = vsel %vm8510_vm8, %v8493_v8, 0.0 }
 0x34f   : > { %v8386_v41 = vpop.f32.mrf.mxu0  ;;  %v8600_v28 = vsel %vm8510_vm8, %v8491_v14, 0.0  ;;  %v8689_v34 = vmul.f32 %v8491_v14, %v8491_v14  ;;  %v7640_v44 = vadd.f32 %v7529_v9, %v16361_v20  ;;  %v8496_v35 = vadd.f32 %v10739_v30, %v7642_v51 }
 0x350   : > { %v10674_v18 = vpop.f32.mrf.mxu1  ;;  %v8796_v62 = vadd.f32 %v8795_v13, %v8794_v23  ;;  %v8601_v42 = vadd.f32 %v8600_v28, %v8599_v55 }
 0x351   : > { %v10743_v59 = vpop.f32.mrf.mxu0  ;;  %v8797_v21 = vsel %vm8510_vm8, %v8689_v34, 0.0  ;;  %v8494_v57 = vadd.f32 %v8383_v36, %v7640_v44  ;;  %v7643_v43 = vadd.f32 %v10674_v18, %v16362_v10  ;;  %v8801_v36 = vsel %vm8510_vm8, %v8691_v56, 0.0  ;;  %v16364_v10 = vld [vmem:[#allocation13_spill] sm:$0xff] }
 0x352   : > { %v7532_v47 = vpop.f32.mrf.mxu1  ;;  %v8603_v53 = vadd.f32 %v8602_v22, %v8601_v42  ;;  %v8798_v11 = vadd.f32 %v8797_v21, %v8796_v62  ;;  %v8694_v30 = vmul.f32 %v8496_v35, %v8496_v35  ;;  %v8610_v27 = vsel %vm8510_vm8, %v8496_v35, 0.0 }
 0x353   : > { %v8399_v50 = vpop.f32.mrf.mxu0  ;;  %v7641_v6 = vadd.f32 %v7532_v47, %v15331_v16  ;;  %v8692_v1 = vmul.f32 %v8494_v57, %v8494_v57  ;;  %v8606_v49 = vsel %vm8510_vm8, %v8494_v57, 0.0  ;;  %v8497_v12 = vadd.f32 %v10740_v54, %v7643_v43 }
 0x354   : > { %v10677_v45 = vpop.f32.mrf.mxu1  ;;  %v8800_v63 = vadd.f32 %v8799_v61, %v8798_v11  ;;  %v8605_v3 = vadd.f32 %v8604_v2, %v8603_v53  ;;  %v8807_v55 = vsel %vm8510_vm8, %v8694_v30, 0.0 }
 0x355   : > { %v10744_v38 = vpop.f32.mrf.mxu0  ;;  %v8495_v25 = vadd.f32 %v8386_v41, %v7641_v6  ;;  %v7646_v17 = vadd.f32 %v10677_v45, %v15334_v60  ;;  %v8803_v15 = vsel %vm8510_vm8, %v8692_v1, 0.0  ;;  %v8695_v14 = vmul.f32 %v8497_v12, %v8497_v12  ;;  %v16365_v1 = vld [vmem:[#allocation16_spill] sm:$0xff] }
 0x356   : > { %v7545_v48 = vpop.f32.mrf.mxu1  ;;  %v8607_v24 = vadd.f32 %v8606_v49, %v8605_v3  ;;  %v8802_v16 = vadd.f32 %v8801_v36, %v8800_v63  ;;  %v8612_v23 = vsel %vm8510_vm8, %v8497_v12, 0.0  ;;  %v16366_v36 = vld [vmem:[#allocation48_spill] sm:$0xff] }
 0x357   : > { %v8402_v7 = vpop.f32.mrf.mxu0  ;;  %v7644_v5 = vadd.f32 %v7545_v48, %v15337_v58  ;;  %v8608_v46 = vsel %vm8510_vm8, %v8495_v25, 0.0  ;;  %v8693_v31 = vmul.f32 %v8495_v25, %v8495_v25  ;;  %v8500_v8 = vadd.f32 %v10743_v59, %v7646_v17 }
 0x358   : > { %v10678_v33 = vpop.f32.mrf.mxu1  ;;  %v8804_v37 = vadd.f32 %v8803_v15, %v8802_v16  ;;  %v8609_v29 = vadd.f32 %v8608_v46, %v8607_v24  ;;  %v8809_v20 = vsel %vm8510_vm8, %v8695_v14, 0.0 }
 0x359   : > { %v10747_v26 = vpop.f32.mrf.mxu0  ;;  %v8498_v40 = vadd.f32 %v8399_v50, %v7644_v5  ;;  %v8805_v41 = vsel %vm8510_vm8, %v8693_v31, 0.0  ;;  %v7647_v60 = vadd.f32 %v10678_v33, %v15340_v0  ;;  %v8698_v59 = vmul.f32 %v8500_v8, %v8500_v8  ;;  %v16363_v50 = vld [vmem:[#allocation31_spill] sm:$0xff] }
 0x35a   : > { %v7548_v58 = vpop.f32.mrf.mxu1  ;;  %v8611_v4 = vadd.f32 %v8610_v27, %v8609_v29  ;;  %v8806_v39 = vadd.f32 %v8805_v41, %v8804_v37  ;;  %v8618_v53 = vsel %vm8510_vm8, %v8500_v8, 0.0  ;;  %v16367_v41 = vld [vmem:[#allocation14_spill] sm:$0xff] }
 0x35b   : > { %v8415_v54 = vpop.f32.mrf.mxu0  ;;  %v8696_v28 = vmul.f32 %v8498_v40, %v8498_v40  ;;  %v7645_v34 = vadd.f32 %v7548_v58, %v15343_v52  ;;  %v8614_v0 = vsel %vm8510_vm8, %v8498_v40, 0.0  ;;  %v8501_v44 = vadd.f32 %v10744_v38, %v7647_v60  ;;  %v16368_v58 = vld [vmem:[#allocation59_spill] sm:$0xff] }
 0x35c   : > { %v10681_v32 = vpop.f32.mrf.mxu1  ;;  %v8808_v13 = vadd.f32 %v8807_v55, %v8806_v39  ;;  %v8613_v19 = vadd.f32 %v8612_v23, %v8611_v4  ;;  %v8815_v12 = vsel %vm8510_vm8, %v8698_v59, 0.0 }
 0x35d   : > { %v10748_v9 = vpop.f32.mrf.mxu0  ;;  %v8499_v18 = vadd.f32 %v8402_v7, %v7645_v34  ;;  %v8811_v56 = vsel %vm8510_vm8, %v8696_v28, 0.0  ;;  %v7650_v43 = vadd.f32 %v10681_v32, %v16364_v10  ;;  %v8699_v61 = vmul.f32 %v8501_v44, %v8501_v44 }
 0x35e   : > { %v7561_v62 = vpop.f32.mrf.mxu1  ;;  %v8615_v42 = vadd.f32 %v8614_v0, %v8613_v19  ;;  %v8810_v21 = vadd.f32 %v8809_v20, %v8808_v13  ;;  %v8620_v25 = vsel %vm8510_vm8, %v8501_v44, 0.0  ;;  %v16369_v13 = vld [vmem:[#allocation68_spill] sm:$0xff]  ;;  %v16370_v44 = vld [vmem:[#allocation7_spill] sm:$0xff] }
 0x35f   : > { %v8418_v51 = vpop.f32.mrf.mxu0  ;;  %v7648_v22 = vadd.f32 %v7561_v62, %v16363_v50  ;;  %v8616_v52 = vsel %vm8510_vm8, %v8499_v18, 0.0  ;;  %v8697_v57 = vmul.f32 %v8499_v18, %v8499_v18  ;;  %v8504_v48 = vadd.f32 %v10747_v26, %v7650_v43 }
 0x360   : > { %v10682_v47 = vpop.f32.mrf.mxu1  ;;  %v8812_v11 = vadd.f32 %v8811_v56, %v8810_v21  ;;  %v8617_v6 = vadd.f32 %v8616_v52, %v8615_v42  ;;  %v8817_v46 = vsel %vm8510_vm8, %v8699_v61, 0.0 }
 0x361   : > { %v10751_v38 = vpop.f32.mrf.mxu0  ;;  %v8813_v2 = vsel %vm8510_vm8, %v8697_v57, 0.0  ;;  %v8502_v35 = vadd.f32 %v8415_v54, %v7648_v22  ;;  %v7651_v45 = vadd.f32 %v10682_v47, %v16365_v1  ;;  %v8702_v14 = vmul.f32 %v8504_v48, %v8504_v48 }
 0x362   : > { %v7564_v63 = vpop.f32.mrf.mxu1  ;;  %v8619_v3 = vadd.f32 %v8618_v53, %v8617_v6  ;;  %v8814_v7 = vadd.f32 %v8813_v2, %v8812_v11 }
 0x363   : > { %v7649_v49 = vadd.f32 %v7564_v63, %v16366_v36  ;;  %v8700_v24 = vmul.f32 %v8502_v35, %v8502_v35  ;;  %v8431_v15 = vpop.f32.mrf.mxu0  ;;  %v8622_v31 = vsel %vm8510_vm8, %v8502_v35, 0.0  ;;  %v8505_v33 = vadd.f32 %v10748_v9, %v7651_v45 }
 0x364   : > { %v10685_v16 = vpop.f32.mrf.mxu1  ;;  %v8816_v17 = vadd.f32 %v8815_v12, %v8814_v7  ;;  %v8621_v5 = vadd.f32 %v8620_v25, %v8619_v3  ;;  %v8626_v9 = vsel %vm8510_vm8, %v8504_v48, 0.0  ;;  %v8823_v62 = vsel %vm8510_vm8, %v8702_v14, 0.0 }
 0x365   : > { %v8503_v30 = vadd.f32 %v8418_v51, %v7649_v49  ;;  %v8819_v26 = vsel %vm8510_vm8, %v8700_v24, 0.0  ;;  %v7654_v60 = vadd.f32 %v10685_v16, %v16367_v41  ;;  %v10752_v28 = vpop.f32.mrf.mxu0  ;;  %v8703_v34 = vmul.f32 %v8505_v33, %v8505_v33 }
 0x366   : > { %v7577_v37 = vpop.f32.mrf.mxu1  ;;  %v8623_v29 = vadd.f32 %v8622_v31, %v8621_v5  ;;  %v8818_v40 = vadd.f32 %v8817_v46, %v8816_v17  ;;  %v8628_v59 = vsel %vm8510_vm8, %v8505_v33, 0.0 }
 0x367   : > { %v8624_v54 = vsel %vm8510_vm8, %v8503_v30, 0.0  ;;  %v8701_v27 = vmul.f32 %v8503_v30, %v8503_v30  ;;  %v7652_v4 = vadd.f32 %v7577_v37, %v16368_v58  ;;  %v8508_v42 = vadd.f32 %v10751_v38, %v7654_v60  ;;  %v8434_v56 = vpop.f32.mrf.mxu0 }
 0x368   : > { %v10686_v39 = vpop.f32.mrf.mxu1  ;;  %v8820_v8 = vadd.f32 %v8819_v26, %v8818_v40  ;;  %v8625_v55 = vadd.f32 %v8624_v54, %v8623_v29  ;;  %v8825_v52 = vsel %vm8510_vm8, %v8703_v34, 0.0  ;;  %v8841_v30 = vlaneseq }
 0x369   : > { %v8821_v23 = vsel %vm8510_vm8, %v8701_v27, 0.0  ;;  %v8506_v32 = vadd.f32 %v8431_v15, %v7652_v4  ;;  %v7655_v19 = vadd.f32 %v10686_v39, %v16369_v13  ;;  %v8706_v11 = vmul.f32 %v8508_v42, %v8508_v42 }
 0x36a   : > { %v7580_v51 = vpop.f32.mrf.mxu1  ;;  %v8627_v20 = vadd.f32 %v8626_v9, %v8625_v55  ;;  %v8822_v0 = vadd.f32 %v8821_v23, %v8820_v8  ;;  %v8634_v1 = vsel %vm8510_vm8, %v8508_v42, 0.0  ;;  %v8842_v37 = vshrl.u32 %v8841_v30, 7 }
 0x36b   : > { %v7653_v18 = vadd.f32 %v7580_v51, %v16370_v44  ;;  %v8704_v21 = vmul.f32 %v8506_v32, %v8506_v32  ;;  %v8630_v57 = vsel %vm8510_vm8, %v8506_v32, 0.0  ;;  %v8509_v10 = vadd.f32 %v10752_v28, %v7655_v19 }
 0x36c   : > { %v8824_v50 = vadd.f32 %v8823_v62, %v8822_v0  ;;  %v8629_v22 = vadd.f32 %v8628_v59, %v8627_v20  ;;  %v8831_v36 = vsel %vm8510_vm8, %v8706_v11, 0.0  ;;  %vm8844_vm9 = vcmp.eq.s32.totalorder %v8842_v37, 1 }
 0x36d   : > { %v8507_v43 = vadd.f32 %v8434_v56, %v7653_v18  ;;  %v8827_v6 = vsel %vm8510_vm8, %v8704_v21, 0.0  ;;  %v8707_v45 = vmul.f32 %v8509_v10, %v8509_v10  ;;  %v8636_v49 = vsel %vm8510_vm8, %v8509_v10, 0.0 }
 0x36e   : > { %v8631_v47 = vadd.f32 %v8630_v57, %v8629_v22  ;;  %v8826_v53 = vadd.f32 %v8825_v52, %v8824_v50  ;;  %vm8843_vm10 = vcmp.eq.s32.totalorder %v8842_v37, 0 }
 0x36f   : > { %v8632_v61 = vsel %vm8510_vm8, %v8507_v43, 0.0  ;;  %v8705_v2 = vmul.f32 %v8507_v43, %v8507_v43  ;;  %v8833_v48 = vsel %vm8510_vm8, %v8707_v45, 0.0 }
 0x370   : > { %v8828_v35 = vadd.f32 %v8827_v6, %v8826_v53  ;;  %v8633_v38 = vadd.f32 %v8632_v61, %v8631_v47 }
 0x371   : > { %v8829_v63 = vsel %vm8510_vm8, %v8705_v2, 0.0 }
 0x372   : > { %v8635_v3 = vadd.f32 %v8634_v1, %v8633_v38  ;;  %v8830_v7 = vadd.f32 %v8829_v63, %v8828_v35 }
 0x374   : > { %v8637_v12 = vadd.f32 %v8636_v49, %v8635_v3  ;;  %v8832_v25 = vadd.f32 %v8831_v36, %v8830_v7 }
 0x376   : > { %v8638_v24 = vrot.slane %v8637_v12, 4  ;;  %v8834_v16 = vadd.f32 %v8833_v48, %v8832_v25 }
 0x378   : > { %v8639_v17 = vadd.f32 %v8638_v24, %v8637_v12  ;;  %v8835_v5 = vrot.slane %v8834_v16, 4 }
 0x37a   : > { %v8640_v15 = vrot.slane %v8639_v17, 2  ;;  %v8836_v46 = vadd.f32 %v8835_v5, %v8834_v16 }
 0x37c   : > { %v8641_v31 = vadd.f32 %v8640_v15, %v8639_v17  ;;  %v8837_v33 = vrot.slane %v8836_v46, 2 }
 0x37e   : > { %v8838_v29 = vadd.f32 %v8837_v33, %v8836_v46  ;;  %v8642_v40 = vrot.slane %v8641_v31, 1 }
 0x380   : > { %v8839_v54 = vrot.slane %v8838_v29, 1  ;;  %v8643_v14 = vadd.f32 %v8642_v40, %v8641_v31 }
 0x382   : > { %v8840_v27 = vadd.f32 %v8839_v54, %v8838_v29 }
 0x384   : > { %v8845_v26 = vsel %vm8844_vm9, %v8840_v27, 0.0 }
 0x385   : > { %v8846_v41 = vsel %vm8843_vm10, %v8643_v14, %v8845_v26 }
 0x386   : > { %8847 = vst.msk [vmem:[%s141_s8] sm:$0xff] %vm8510_vm8, %v8846_v41 }
 0x387 PF: > { %s12_s9 = sadd.s32 1, %s10974_s9  }
 0x388   : > { %p9_p4 = scmp.ge.s32.totalorder %s12_s9, 6  }
 0x38a   :  { %11 = sbr.rel (!%p9_p4) target bundleno = 1 (0x1), region = 68 }

</bundles_post_ra>
